<compile_context>
chip_gen: v5e
topology: v5e:2x2
jax: 0.10.0
libtpu: 0.0.40
codegen_flags: <defaults>
</compile_context>

<pallas_src>
import functools

import jax
import jax.numpy as jnp
import numpy as np
from jax.experimental import pallas as pl
from jax.experimental.pallas import tpu as pltpu

EPS = 1e-5  # torch.nn.GroupNorm default


# ----------------------------- fused Pallas kernel --------------------------

def _fused_block_kernel(x_ref, t_ref, w1_ref, b1_ref, g1_ref, be1_ref,
                        wt_ref, bt_ref, w2_ref, b2_ref, g2_ref, be2_ref,
                        gproj_ref, out_ref, h1p_ref,
                        *, H, W, cin, cpad, mm_dtype):
    """Per-sample fused Block forward.

    x_ref:    (H+2, W+2, Cin)   zero-halo NHWC input tile (f32)
    t_ref:    (1, Tdim)         time embedding projection
    w1_ref:   (9, Cin, cpad)    conv1 per-tap weights (mm_dtype)
    w2_ref:   (9, cpad, cpad)   conv2 per-tap weights (mm_dtype)
    b*/g*/be*/bt_ref: (1, cpad) biases / GN affine / time bias (f32)
    wt_ref:   (Tdim, cpad)      time MLP weight (f32)
    gproj_ref:(cpad, cpad)      group-average projection (folds 1/(HW*cg))
    out_ref:  (HW, cpad)        lane-dense output
    h1p_ref:  (H+2, W+2, cpad)  VMEM scratch: h1 with zero halo
    """
    HW = H * W
    ones_hw = jnp.ones((1, HW), jnp.float32)

    def group_norm(h, gamma, beta):
        # Per-channel sums via a ones-row MXU matmul (keeps the reduction off
        # the XLU); group reduce + broadcast-back via one precomputed
        # projection matrix (zero rows/cols for padded channels).
        col_sum = jnp.dot(ones_hw, h, preferred_element_type=jnp.float32)
        col_sq = jnp.dot(ones_hw, h * h, preferred_element_type=jnp.float32)
        mean_c = jnp.dot(col_sum, gproj_ref[...],
                         preferred_element_type=jnp.float32)
        msq_c = jnp.dot(col_sq, gproj_ref[...],
                        preferred_element_type=jnp.float32)
        var_c = jnp.maximum(msq_c - mean_c * mean_c, 0.0)   # clamp cancellation
        return (h - mean_c) * jax.lax.rsqrt(var_c + EPS) * gamma + beta

    # ---------------- stage 1: conv1 as 9 shifted-tap matmuls ----------------
    h = jnp.zeros((HW, cpad), jnp.float32)
    for k in range(9):
        dy, dx = divmod(k, 3)
        tap = x_ref[dy:dy + H, dx:dx + W, :].reshape(HW, cin).astype(mm_dtype)
        h = h + jnp.dot(tap, w1_ref[k], preferred_element_type=jnp.float32)
    h = h + b1_ref[...]
    h = group_norm(h, g1_ref[...], be1_ref[...])

    # time conditioning: Linear(SiLU(t_emb_proj)), folded into this kernel
    t = t_ref[...]
    t_act = t * jax.nn.sigmoid(t)
    tcond = jnp.dot(t_act, wt_ref[...],
                    preferred_element_type=jnp.float32) + bt_ref[...]
    h = h + tcond
    h = h * jax.nn.sigmoid(h)                                # SiLU

    # Stash h1 (with zero halo) in VMEM — it never goes back to HBM.
    h1p_ref[...] = jnp.zeros_like(h1p_ref)
    h1p_ref[1:H + 1, 1:W + 1, :] = h.reshape(H, W, cpad)

    # ---------------- stage 2: conv2 -> GN2 -> SiLU (no time bias) ----------
    h2 = jnp.zeros((HW, cpad), jnp.float32)
    for k in range(9):
        dy, dx = divmod(k, 3)
        tap = h1p_ref[dy:dy + H, dx:dx + W, :].reshape(HW, cpad).astype(mm_dtype)
        h2 = h2 + jnp.dot(tap, w2_ref[k], preferred_element_type=jnp.float32)
    h2 = h2 + b2_ref[...]
    h2 = group_norm(h2, g2_ref[...], be2_ref[...])
    out_ref[...] = h2 * jax.nn.sigmoid(h2)


# ------------------------------ JAX wrapper ---------------------------------

def _round_up(x, m):
    return (x + m - 1) // m * m


def _pad_lanes(a, cpad):
    return jnp.pad(a, [(0, 0)] * (a.ndim - 1) + [(0, cpad - a.shape[-1])])


def _group_projection(cout, cpad, groups, hw):
    """(cpad, cpad) matrix: col_sum @ P == per-channel broadcast of group mean."""
    cg = cout // groups
    gid = np.arange(cout) // cg
    proj = np.zeros((cpad, cpad), np.float32)
    proj[:cout, :cout] = (gid[:, None] == gid[None, :]).astype(np.float32) / float(hw * cg)
    return jnp.asarray(proj)


def block_forward(x_nchw, t_emb, params, num_groups=8,
                  matmul_dtype=jnp.bfloat16):
    """Pallas implementation of Block.forward (use_groupnorm=True)."""
    B, Cin, H, W = x_nchw.shape
    Cout = params["conv1_w"].shape[0]
    Tdim = t_emb.shape[1]
    HW = H * W
    cpad = _round_up(Cout, 128)          # lane-dense channel padding

    # NCHW -> NHWC + 1-pixel zero halo (single cheap pad; no 9x im2col in HBM).
    # Production models should keep activations NHWC end-to-end.
    x_halo = jnp.pad(jnp.transpose(x_nchw, (0, 2, 3, 1)),
                     ((0, 0), (1, 1), (1, 1), (0, 0)))

    # torch conv weights (O, I, 3, 3) -> per-tap matmul operands (9, I, cpad).
    w1 = jnp.transpose(params["conv1_w"], (2, 3, 1, 0)).reshape(9, Cin, Cout)
    w1 = _pad_lanes(w1, cpad).astype(matmul_dtype)
    w2 = jnp.transpose(params["conv2_w"], (2, 3, 1, 0)).reshape(9, Cout, Cout)
    w2 = jnp.pad(w2, ((0, 0), (0, cpad - Cout), (0, cpad - Cout))).astype(matmul_dtype)

    b1 = _pad_lanes(params["conv1_b"].reshape(1, Cout), cpad)
    b2 = _pad_lanes(params["conv2_b"].reshape(1, Cout), cpad)
    g1 = _pad_lanes(params["gn1_w"].reshape(1, Cout), cpad)
    be1 = _pad_lanes(params["gn1_b"].reshape(1, Cout), cpad)
    g2 = _pad_lanes(params["gn2_w"].reshape(1, Cout), cpad)
    be2 = _pad_lanes(params["gn2_b"].reshape(1, Cout), cpad)
    wt = _pad_lanes(params["time_w"], cpad)                       # (Tdim, cpad)
    bt = _pad_lanes(params["time_b"].reshape(1, Cout), cpad)
    gproj = _group_projection(Cout, cpad, num_groups, HW)
    t3 = t_emb.reshape(B, 1, Tdim)

    kernel = functools.partial(_fused_block_kernel, H=H, W=W, cin=Cin,
                               cpad=cpad, mm_dtype=matmul_dtype)
    vec = pl.BlockSpec((1, cpad), lambda i: (0, 0))

    out = pl.pallas_call(
        kernel,
        out_shape=jax.ShapeDtypeStruct((B, HW, cpad), jnp.float32),
        grid=(B,),
        in_specs=[
            pl.BlockSpec((None, H + 2, W + 2, Cin), lambda i: (i, 0, 0, 0)),  # x halo
            pl.BlockSpec((None, 1, Tdim), lambda i: (i, 0, 0)),               # t_emb
            pl.BlockSpec((9, Cin, cpad), lambda i: (0, 0, 0)),                # conv1 w
            vec, vec, vec,                                                    # b1, gn1_w, gn1_b
            pl.BlockSpec((Tdim, cpad), lambda i: (0, 0)),                     # time w
            vec,                                                              # time b
            pl.BlockSpec((9, cpad, cpad), lambda i: (0, 0, 0)),               # conv2 w
            vec, vec, vec,                                                    # b2, gn2_w, gn2_b
            pl.BlockSpec((cpad, cpad), lambda i: (0, 0)),                     # group proj
        ],
        out_specs=pl.BlockSpec((None, HW, cpad), lambda i: (i, 0, 0)),
        scratch_shapes=[pltpu.VMEM((H + 2, W + 2, cpad), jnp.float32)],
        compiler_params=pltpu.CompilerParams(
            dimension_semantics=("parallel",),       # batch shards across TCs
            vmem_limit_bytes=48 * 1024 * 1024),      # > default scoped 32 MiB
    )(x_halo, t3, w1, b1, g1, be1, wt, bt, w2, b2, g2, be2, gproj)

    y = out[..., :Cout].reshape(B, H, W, Cout)
    return jnp.transpose(y, (0, 3, 1, 2))            # back to NCHW


# ------------------------------ pure-JAX reference ---------------------------

def _group_norm_ref(h, gamma, beta, G, eps=EPS):
    B, C, H, W = h.shape
    hg = h.reshape(B, G, C // G, H, W)
    mean = hg.mean(axis=(2, 3, 4), keepdims=True)
    var = hg.var(axis=(2, 3, 4), keepdims=True)
    hn = ((hg - mean) / jnp.sqrt(var + eps)).reshape(B, C, H, W)
    return hn * gamma[None, :, None, None] + beta[None, :, None, None]


def block_ref(x, t_emb, params, G=8):
    def conv(h, w, b):
        y = jax.lax.conv_general_dilated(
            h, w, (1, 1), "SAME", dimension_numbers=("NCHW", "OIHW", "NCHW"))
        return y + b[None, :, None, None]

    silu = lambda v: v * jax.nn.sigmoid(v)
    h = conv(x, params["conv1_w"], params["conv1_b"])
    h = _group_norm_ref(h, params["gn1_w"], params["gn1_b"], G)
    tcond = silu(t_emb) @ params["time_w"] + params["time_b"]
    h = h + tcond[:, :, None, None]
    h = silu(h)
    h = conv(h, params["conv2_w"], params["conv2_b"])
    h = _group_norm_ref(h, params["gn2_w"], params["gn2_b"], G)
    return silu(h)


# ----------------------------------- main ------------------------------------

if __name__ == "__main__":
    B, in_ch, out_ch, time_emb_dim, H, W = 2, 4, 16, 32, 16, 16

    key = jax.random.PRNGKey(0)
    ks = jax.random.split(key, 12)
    params = {
        "conv1_w": jax.random.normal(ks[0], (out_ch, in_ch, 3, 3), jnp.float32) * 0.1,
        "conv1_b": jax.random.normal(ks[1], (out_ch,), jnp.float32) * 0.1,
        "conv2_w": jax.random.normal(ks[2], (out_ch, out_ch, 3, 3), jnp.float32) * 0.1,
        "conv2_b": jax.random.normal(ks[3], (out_ch,), jnp.float32) * 0.1,
        "time_w": jax.random.normal(ks[4], (time_emb_dim, out_ch), jnp.float32) * 0.1,
        "time_b": jax.random.normal(ks[5], (out_ch,), jnp.float32) * 0.1,
        "gn1_w": 1.0 + 0.1 * jax.random.normal(ks[6], (out_ch,), jnp.float32),
        "gn1_b": 0.1 * jax.random.normal(ks[7], (out_ch,), jnp.float32),
        "gn2_w": 1.0 + 0.1 * jax.random.normal(ks[8], (out_ch,), jnp.float32),
        "gn2_b": 0.1 * jax.random.normal(ks[9], (out_ch,), jnp.float32),
    }
    x = jax.random.normal(ks[10], (B, in_ch, H, W), jnp.float32)
    t_emb = jax.random.normal(ks[11], (B, time_emb_dim), jnp.float32)

    ref = jax.block_until_ready(block_ref(x, t_emb, params))

    # 1) numerics check: f32 MXU operands — tight match against the reference.
    out_f32 = jax.block_until_ready(
        block_forward(x, t_emb, params, matmul_dtype=jnp.float32))
    np.testing.assert_allclose(np.asarray(out_f32), np.asarray(ref),
                               rtol=5e-3, atol=5e-3)

    # 2) production path: bf16 MXU operands, f32 accumulate / epilogue
    #    (looser tolerance accounts for bf16 operand rounding).
    out_bf16 = jax.block_until_ready(
        block_forward(x, t_emb, params, matmul_dtype=jnp.bfloat16))
    np.testing.assert_allclose(np.asarray(out_bf16), np.asarray(ref),
                               rtol=4e-2, atol=4e-2)

    print("KERNEL_OK")
</pallas_src>

<mosaic_0001>
module attributes {stable_mosaic.version = 11 : i64} {
  func.func @_fused_block_kernel(%arg0: i32, %arg1: memref<1x18x18x4xf32, #tpu.memory_space<vmem>>, %arg2: memref<1x1x32xf32, #tpu.memory_space<vmem>>, %arg3: memref<9x4x128xf32, #tpu.memory_space<vmem>>, %arg4: memref<1x128xf32, #tpu.memory_space<vmem>>, %arg5: memref<1x128xf32, #tpu.memory_space<vmem>>, %arg6: memref<1x128xf32, #tpu.memory_space<vmem>>, %arg7: memref<32x128xf32, #tpu.memory_space<vmem>>, %arg8: memref<1x128xf32, #tpu.memory_space<vmem>>, %arg9: memref<9x128x128xf32, #tpu.memory_space<vmem>>, %arg10: memref<1x128xf32, #tpu.memory_space<vmem>>, %arg11: memref<1x128xf32, #tpu.memory_space<vmem>>, %arg12: memref<1x128xf32, #tpu.memory_space<vmem>>, %arg13: memref<128x128xf32, #tpu.memory_space<vmem>>, %arg14: memref<1x256x128xf32, #tpu.memory_space<vmem>>, %arg15: memref<18x18x128xf32, #tpu.memory_space<vmem>>) attributes {dimension_semantics = [#tpu.dimension_semantics<parallel>], iteration_bounds = array<i64: 2>, scalar_prefetch = 0 : i64, scratch_operands = 1 : i64, tpu.core_type = #tpu.core_type<tc>, window_params = [{transform_indices = @transform_0, window_bounds = array<i64: 1, 18, 18, 4>}, {transform_indices = @transform_1, window_bounds = array<i64: 1, 1, 32>}, {pipeline_mode = #tpu.pipeline_mode<synchronous>, transform_indices = @transform_2, window_bounds = array<i64: 9, 4, 128>}, {pipeline_mode = #tpu.pipeline_mode<synchronous>, transform_indices = @transform_3, window_bounds = array<i64: 1, 128>}, {pipeline_mode = #tpu.pipeline_mode<synchronous>, transform_indices = @transform_4, window_bounds = array<i64: 1, 128>}, {pipeline_mode = #tpu.pipeline_mode<synchronous>, transform_indices = @transform_5, window_bounds = array<i64: 1, 128>}, {pipeline_mode = #tpu.pipeline_mode<synchronous>, transform_indices = @transform_6, window_bounds = array<i64: 32, 128>}, {pipeline_mode = #tpu.pipeline_mode<synchronous>, transform_indices = @transform_7, window_bounds = array<i64: 1, 128>}, {pipeline_mode = #tpu.pipeline_mode<synchronous>, transform_indices = @transform_8, window_bounds = array<i64: 9, 128, 128>}, {pipeline_mode = #tpu.pipeline_mode<synchronous>, transform_indices = @transform_9, window_bounds = array<i64: 1, 128>}, {pipeline_mode = #tpu.pipeline_mode<synchronous>, transform_indices = @transform_10, window_bounds = array<i64: 1, 128>}, {pipeline_mode = #tpu.pipeline_mode<synchronous>, transform_indices = @transform_11, window_bounds = array<i64: 1, 128>}, {pipeline_mode = #tpu.pipeline_mode<synchronous>, transform_indices = @transform_12, window_bounds = array<i64: 128, 128>}, {transform_indices = @transform_13, window_bounds = array<i64: 1, 256, 128>}]} {
    %cst = arith.constant 1.000000e+00 : f32
    %0 = vector.broadcast %cst : f32 to vector<1x256xf32>
    %cst_0 = arith.constant 0.000000e+00 : f32
    %1 = vector.broadcast %cst_0 : f32 to vector<256x128xf32>
    %c0 = arith.constant 0 : index
    %c0_1 = arith.constant 0 : index
    %c0_2 = arith.constant 0 : index
    %c0_3 = arith.constant 0 : index
    %2 = vector.load %arg1[%c0, %c0_1, %c0_2, %c0_3] : memref<1x18x18x4xf32, #tpu.memory_space<vmem>>, vector<1x16x16x4xf32>
    %3 = vector.shape_cast %2 : vector<1x16x16x4xf32> to vector<16x16x4xf32>
    %4 = vector.shape_cast %3 : vector<16x16x4xf32> to vector<256x4xf32>
    %c0_4 = arith.constant 0 : index
    %c0_5 = arith.constant 0 : index
    %c0_6 = arith.constant 0 : index
    %5 = vector.load %arg3[%c0_4, %c0_5, %c0_6] : memref<9x4x128xf32, #tpu.memory_space<vmem>>, vector<1x4x128xf32>
    %6 = vector.shape_cast %5 : vector<1x4x128xf32> to vector<4x128xf32>
    %cst_7 = arith.constant dense<0.000000e+00> : vector<256x128xf32>
    %7 = tpu.matmul %4, %6, %cst_7 {dimension_numbers = #tpu.dot_dimension_numbers<[1], [0], [0], [1], [0, 0, 1, 1], [], []>} : vector<256x4xf32>, vector<4x128xf32>, vector<256x128xf32> -> vector<256x128xf32>
    %8 = arith.addf %1, %7 : vector<256x128xf32>
    %c0_8 = arith.constant 0 : index
    %c0_9 = arith.constant 0 : index
    %c1 = arith.constant 1 : index
    %c0_10 = arith.constant 0 : index
    %9 = vector.load %arg1[%c0_8, %c0_9, %c1, %c0_10] : memref<1x18x18x4xf32, #tpu.memory_space<vmem>>, vector<1x16x16x4xf32>
    %10 = vector.shape_cast %9 : vector<1x16x16x4xf32> to vector<16x16x4xf32>
    %11 = vector.shape_cast %10 : vector<16x16x4xf32> to vector<256x4xf32>
    %c1_11 = arith.constant 1 : index
    %c0_12 = arith.constant 0 : index
    %c0_13 = arith.constant 0 : index
    %12 = vector.load %arg3[%c1_11, %c0_12, %c0_13] : memref<9x4x128xf32, #tpu.memory_space<vmem>>, vector<1x4x128xf32>
    %13 = vector.shape_cast %12 : vector<1x4x128xf32> to vector<4x128xf32>
    %cst_14 = arith.constant dense<0.000000e+00> : vector<256x128xf32>
    %14 = tpu.matmul %11, %13, %cst_14 {dimension_numbers = #tpu.dot_dimension_numbers<[1], [0], [0], [1], [0, 0, 1, 1], [], []>} : vector<256x4xf32>, vector<4x128xf32>, vector<256x128xf32> -> vector<256x128xf32>
    %15 = arith.addf %8, %14 : vector<256x128xf32>
    %c0_15 = arith.constant 0 : index
    %c0_16 = arith.constant 0 : index
    %c2 = arith.constant 2 : index
    %c0_17 = arith.constant 0 : index
    %16 = vector.load %arg1[%c0_15, %c0_16, %c2, %c0_17] : memref<1x18x18x4xf32, #tpu.memory_space<vmem>>, vector<1x16x16x4xf32>
    %17 = vector.shape_cast %16 : vector<1x16x16x4xf32> to vector<16x16x4xf32>
    %18 = vector.shape_cast %17 : vector<16x16x4xf32> to vector<256x4xf32>
    %c2_18 = arith.constant 2 : index
    %c0_19 = arith.constant 0 : index
    %c0_20 = arith.constant 0 : index
    %19 = vector.load %arg3[%c2_18, %c0_19, %c0_20] : memref<9x4x128xf32, #tpu.memory_space<vmem>>, vector<1x4x128xf32>
    %20 = vector.shape_cast %19 : vector<1x4x128xf32> to vector<4x128xf32>
    %cst_21 = arith.constant dense<0.000000e+00> : vector<256x128xf32>
    %21 = tpu.matmul %18, %20, %cst_21 {dimension_numbers = #tpu.dot_dimension_numbers<[1], [0], [0], [1], [0, 0, 1, 1], [], []>} : vector<256x4xf32>, vector<4x128xf32>, vector<256x128xf32> -> vector<256x128xf32>
    %22 = arith.addf %15, %21 : vector<256x128xf32>
    %c0_22 = arith.constant 0 : index
    %c1_23 = arith.constant 1 : index
    %c0_24 = arith.constant 0 : index
    %c0_25 = arith.constant 0 : index
    %23 = vector.load %arg1[%c0_22, %c1_23, %c0_24, %c0_25] : memref<1x18x18x4xf32, #tpu.memory_space<vmem>>, vector<1x16x16x4xf32>
    %24 = vector.shape_cast %23 : vector<1x16x16x4xf32> to vector<16x16x4xf32>
    %25 = vector.shape_cast %24 : vector<16x16x4xf32> to vector<256x4xf32>
    %c3 = arith.constant 3 : index
    %c0_26 = arith.constant 0 : index
    %c0_27 = arith.constant 0 : index
    %26 = vector.load %arg3[%c3, %c0_26, %c0_27] : memref<9x4x128xf32, #tpu.memory_space<vmem>>, vector<1x4x128xf32>
    %27 = vector.shape_cast %26 : vector<1x4x128xf32> to vector<4x128xf32>
    %cst_28 = arith.constant dense<0.000000e+00> : vector<256x128xf32>
    %28 = tpu.matmul %25, %27, %cst_28 {dimension_numbers = #tpu.dot_dimension_numbers<[1], [0], [0], [1], [0, 0, 1, 1], [], []>} : vector<256x4xf32>, vector<4x128xf32>, vector<256x128xf32> -> vector<256x128xf32>
    %29 = arith.addf %22, %28 : vector<256x128xf32>
    %c0_29 = arith.constant 0 : index
    %c1_30 = arith.constant 1 : index
    %c1_31 = arith.constant 1 : index
    %c0_32 = arith.constant 0 : index
    %30 = vector.load %arg1[%c0_29, %c1_30, %c1_31, %c0_32] : memref<1x18x18x4xf32, #tpu.memory_space<vmem>>, vector<1x16x16x4xf32>
    %31 = vector.shape_cast %30 : vector<1x16x16x4xf32> to vector<16x16x4xf32>
    %32 = vector.shape_cast %31 : vector<16x16x4xf32> to vector<256x4xf32>
    %c4 = arith.constant 4 : index
    %c0_33 = arith.constant 0 : index
    %c0_34 = arith.constant 0 : index
    %33 = vector.load %arg3[%c4, %c0_33, %c0_34] : memref<9x4x128xf32, #tpu.memory_space<vmem>>, vector<1x4x128xf32>
    %34 = vector.shape_cast %33 : vector<1x4x128xf32> to vector<4x128xf32>
    %cst_35 = arith.constant dense<0.000000e+00> : vector<256x128xf32>
    %35 = tpu.matmul %32, %34, %cst_35 {dimension_numbers = #tpu.dot_dimension_numbers<[1], [0], [0], [1], [0, 0, 1, 1], [], []>} : vector<256x4xf32>, vector<4x128xf32>, vector<256x128xf32> -> vector<256x128xf32>
    %36 = arith.addf %29, %35 : vector<256x128xf32>
    %c0_36 = arith.constant 0 : index
    %c1_37 = arith.constant 1 : index
    %c2_38 = arith.constant 2 : index
    %c0_39 = arith.constant 0 : index
    %37 = vector.load %arg1[%c0_36, %c1_37, %c2_38, %c0_39] : memref<1x18x18x4xf32, #tpu.memory_space<vmem>>, vector<1x16x16x4xf32>
    %38 = vector.shape_cast %37 : vector<1x16x16x4xf32> to vector<16x16x4xf32>
    %39 = vector.shape_cast %38 : vector<16x16x4xf32> to vector<256x4xf32>
    %c5 = arith.constant 5 : index
    %c0_40 = arith.constant 0 : index
    %c0_41 = arith.constant 0 : index
    %40 = vector.load %arg3[%c5, %c0_40, %c0_41] : memref<9x4x128xf32, #tpu.memory_space<vmem>>, vector<1x4x128xf32>
    %41 = vector.shape_cast %40 : vector<1x4x128xf32> to vector<4x128xf32>
    %cst_42 = arith.constant dense<0.000000e+00> : vector<256x128xf32>
    %42 = tpu.matmul %39, %41, %cst_42 {dimension_numbers = #tpu.dot_dimension_numbers<[1], [0], [0], [1], [0, 0, 1, 1], [], []>} : vector<256x4xf32>, vector<4x128xf32>, vector<256x128xf32> -> vector<256x128xf32>
    %43 = arith.addf %36, %42 : vector<256x128xf32>
    %c0_43 = arith.constant 0 : index
    %c2_44 = arith.constant 2 : index
    %c0_45 = arith.constant 0 : index
    %c0_46 = arith.constant 0 : index
    %44 = vector.load %arg1[%c0_43, %c2_44, %c0_45, %c0_46] : memref<1x18x18x4xf32, #tpu.memory_space<vmem>>, vector<1x16x16x4xf32>
    %45 = vector.shape_cast %44 : vector<1x16x16x4xf32> to vector<16x16x4xf32>
    %46 = vector.shape_cast %45 : vector<16x16x4xf32> to vector<256x4xf32>
    %c6 = arith.constant 6 : index
    %c0_47 = arith.constant 0 : index
    %c0_48 = arith.constant 0 : index
    %47 = vector.load %arg3[%c6, %c0_47, %c0_48] : memref<9x4x128xf32, #tpu.memory_space<vmem>>, vector<1x4x128xf32>
    %48 = vector.shape_cast %47 : vector<1x4x128xf32> to vector<4x128xf32>
    %cst_49 = arith.constant dense<0.000000e+00> : vector<256x128xf32>
    %49 = tpu.matmul %46, %48, %cst_49 {dimension_numbers = #tpu.dot_dimension_numbers<[1], [0], [0], [1], [0, 0, 1, 1], [], []>} : vector<256x4xf32>, vector<4x128xf32>, vector<256x128xf32> -> vector<256x128xf32>
    %50 = arith.addf %43, %49 : vector<256x128xf32>
    %c0_50 = arith.constant 0 : index
    %c2_51 = arith.constant 2 : index
    %c1_52 = arith.constant 1 : index
    %c0_53 = arith.constant 0 : index
    %51 = vector.load %arg1[%c0_50, %c2_51, %c1_52, %c0_53] : memref<1x18x18x4xf32, #tpu.memory_space<vmem>>, vector<1x16x16x4xf32>
    %52 = vector.shape_cast %51 : vector<1x16x16x4xf32> to vector<16x16x4xf32>
    %53 = vector.shape_cast %52 : vector<16x16x4xf32> to vector<256x4xf32>
    %c7 = arith.constant 7 : index
    %c0_54 = arith.constant 0 : index
    %c0_55 = arith.constant 0 : index
    %54 = vector.load %arg3[%c7, %c0_54, %c0_55] : memref<9x4x128xf32, #tpu.memory_space<vmem>>, vector<1x4x128xf32>
    %55 = vector.shape_cast %54 : vector<1x4x128xf32> to vector<4x128xf32>
    %cst_56 = arith.constant dense<0.000000e+00> : vector<256x128xf32>
    %56 = tpu.matmul %53, %55, %cst_56 {dimension_numbers = #tpu.dot_dimension_numbers<[1], [0], [0], [1], [0, 0, 1, 1], [], []>} : vector<256x4xf32>, vector<4x128xf32>, vector<256x128xf32> -> vector<256x128xf32>
    %57 = arith.addf %50, %56 : vector<256x128xf32>
    %c0_57 = arith.constant 0 : index
    %c2_58 = arith.constant 2 : index
    %c2_59 = arith.constant 2 : index
    %c0_60 = arith.constant 0 : index
    %58 = vector.load %arg1[%c0_57, %c2_58, %c2_59, %c0_60] : memref<1x18x18x4xf32, #tpu.memory_space<vmem>>, vector<1x16x16x4xf32>
    %59 = vector.shape_cast %58 : vector<1x16x16x4xf32> to vector<16x16x4xf32>
    %60 = vector.shape_cast %59 : vector<16x16x4xf32> to vector<256x4xf32>
    %c8 = arith.constant 8 : index
    %c0_61 = arith.constant 0 : index
    %c0_62 = arith.constant 0 : index
    %61 = vector.load %arg3[%c8, %c0_61, %c0_62] : memref<9x4x128xf32, #tpu.memory_space<vmem>>, vector<1x4x128xf32>
    %62 = vector.shape_cast %61 : vector<1x4x128xf32> to vector<4x128xf32>
    %cst_63 = arith.constant dense<0.000000e+00> : vector<256x128xf32>
    %63 = tpu.matmul %60, %62, %cst_63 {dimension_numbers = #tpu.dot_dimension_numbers<[1], [0], [0], [1], [0, 0, 1, 1], [], []>} : vector<256x4xf32>, vector<4x128xf32>, vector<256x128xf32> -> vector<256x128xf32>
    %64 = arith.addf %57, %63 : vector<256x128xf32>
    %c0_64 = arith.constant 0 : index
    %c0_65 = arith.constant 0 : index
    %65 = vector.load %arg4[%c0_64, %c0_65] : memref<1x128xf32, #tpu.memory_space<vmem>>, vector<1x128xf32>
    %66 = vector.broadcast %65 : vector<1x128xf32> to vector<256x128xf32>
    %67 = arith.addf %64, %66 : vector<256x128xf32>
    %c0_66 = arith.constant 0 : index
    %c0_67 = arith.constant 0 : index
    %68 = vector.load %arg5[%c0_66, %c0_67] : memref<1x128xf32, #tpu.memory_space<vmem>>, vector<1x128xf32>
    %c0_68 = arith.constant 0 : index
    %c0_69 = arith.constant 0 : index
    %69 = vector.load %arg6[%c0_68, %c0_69] : memref<1x128xf32, #tpu.memory_space<vmem>>, vector<1x128xf32>
    %cst_70 = arith.constant dense<0.000000e+00> : vector<1x128xf32>
    %70 = tpu.matmul %0, %67, %cst_70 {dimension_numbers = #tpu.dot_dimension_numbers<[1], [0], [0], [1], [0, 0, 1, 1], [], []>} : vector<1x256xf32>, vector<256x128xf32>, vector<1x128xf32> -> vector<1x128xf32>
    %71 = arith.mulf %67, %67 : vector<256x128xf32>
    %cst_71 = arith.constant dense<0.000000e+00> : vector<1x128xf32>
    %72 = tpu.matmul %0, %71, %cst_71 {dimension_numbers = #tpu.dot_dimension_numbers<[1], [0], [0], [1], [0, 0, 1, 1], [], []>} : vector<1x256xf32>, vector<256x128xf32>, vector<1x128xf32> -> vector<1x128xf32>
    %c0_72 = arith.constant 0 : index
    %c0_73 = arith.constant 0 : index
    %73 = vector.load %arg13[%c0_72, %c0_73] : memref<128x128xf32, #tpu.memory_space<vmem>>, vector<128x128xf32>
    %cst_74 = arith.constant dense<0.000000e+00> : vector<1x128xf32>
    %74 = tpu.matmul %70, %73, %cst_74 {dimension_numbers = #tpu.dot_dimension_numbers<[1], [0], [0], [1], [0, 0, 1, 1], [], []>} : vector<1x128xf32>, vector<128x128xf32>, vector<1x128xf32> -> vector<1x128xf32>
    %c0_75 = arith.constant 0 : index
    %c0_76 = arith.constant 0 : index
    %75 = vector.load %arg13[%c0_75, %c0_76] : memref<128x128xf32, #tpu.memory_space<vmem>>, vector<128x128xf32>
    %cst_77 = arith.constant dense<0.000000e+00> : vector<1x128xf32>
    %76 = tpu.matmul %72, %75, %cst_77 {dimension_numbers = #tpu.dot_dimension_numbers<[1], [0], [0], [1], [0, 0, 1, 1], [], []>} : vector<1x128xf32>, vector<128x128xf32>, vector<1x128xf32> -> vector<1x128xf32>
    %77 = arith.mulf %74, %74 : vector<1x128xf32>
    %78 = arith.subf %76, %77 : vector<1x128xf32>
    %cst_78 = arith.constant 0.000000e+00 : f32
    %79 = vector.broadcast %cst_78 : f32 to vector<1x128xf32>
    %80 = arith.maximumf %78, %79 : vector<1x128xf32>
    %81 = vector.broadcast %74 : vector<1x128xf32> to vector<256x128xf32>
    %82 = arith.subf %67, %81 : vector<256x128xf32>
    %cst_79 = arith.constant 9.99999974E-6 : f32
    %83 = vector.broadcast %cst_79 : f32 to vector<1x128xf32>
    %84 = arith.addf %80, %83 : vector<1x128xf32>
    %85 = math.rsqrt %84 : vector<1x128xf32>
    %86 = vector.broadcast %85 : vector<1x128xf32> to vector<256x128xf32>
    %87 = arith.mulf %82, %86 : vector<256x128xf32>
    %88 = vector.broadcast %68 : vector<1x128xf32> to vector<256x128xf32>
    %89 = arith.mulf %87, %88 : vector<256x128xf32>
    %90 = vector.broadcast %69 : vector<1x128xf32> to vector<256x128xf32>
    %91 = arith.addf %89, %90 : vector<256x128xf32>
    %c0_80 = arith.constant 0 : index
    %c0_81 = arith.constant 0 : index
    %c0_82 = arith.constant 0 : index
    %92 = vector.load %arg2[%c0_80, %c0_81, %c0_82] : memref<1x1x32xf32, #tpu.memory_space<vmem>>, vector<1x1x32xf32>
    %93 = vector.shape_cast %92 : vector<1x1x32xf32> to vector<1x32xf32>
    %94 = arith.negf %93 : vector<1x32xf32>
    %95 = math.exp %94 : vector<1x32xf32>
    %cst_83 = arith.constant 1.000000e+00 : f32
    %96 = vector.broadcast %cst_83 : f32 to vector<1x32xf32>
    %97 = arith.addf %96, %95 : vector<1x32xf32>
    %98 = arith.divf %96, %97 : vector<1x32xf32>
    %99 = arith.mulf %93, %98 : vector<1x32xf32>
    %c0_84 = arith.constant 0 : index
    %c0_85 = arith.constant 0 : index
    %100 = vector.load %arg7[%c0_84, %c0_85] : memref<32x128xf32, #tpu.memory_space<vmem>>, vector<32x128xf32>
    %cst_86 = arith.constant dense<0.000000e+00> : vector<1x128xf32>
    %101 = tpu.matmul %99, %100, %cst_86 {dimension_numbers = #tpu.dot_dimension_numbers<[1], [0], [0], [1], [0, 0, 1, 1], [], []>} : vector<1x32xf32>, vector<32x128xf32>, vector<1x128xf32> -> vector<1x128xf32>
    %c0_87 = arith.constant 0 : index
    %c0_88 = arith.constant 0 : index
    %102 = vector.load %arg8[%c0_87, %c0_88] : memref<1x128xf32, #tpu.memory_space<vmem>>, vector<1x128xf32>
    %103 = arith.addf %101, %102 : vector<1x128xf32>
    %104 = vector.broadcast %103 : vector<1x128xf32> to vector<256x128xf32>
    %105 = arith.addf %91, %104 : vector<256x128xf32>
    %106 = arith.negf %105 : vector<256x128xf32>
    %107 = math.exp %106 : vector<256x128xf32>
    %cst_89 = arith.constant 1.000000e+00 : f32
    %108 = vector.broadcast %cst_89 : f32 to vector<256x128xf32>
    %109 = arith.addf %108, %107 : vector<256x128xf32>
    %110 = arith.divf %108, %109 : vector<256x128xf32>
    %111 = arith.mulf %105, %110 : vector<256x128xf32>
    %cst_90 = arith.constant 0.000000e+00 : f32
    %112 = vector.broadcast %cst_90 : f32 to vector<18x18x128xf32>
    %c0_91 = arith.constant 0 : index
    %c0_92 = arith.constant 0 : index
    %c0_93 = arith.constant 0 : index
    %113 = vector.load %arg15[%c0_91, %c0_92, %c0_93] : memref<18x18x128xf32, #tpu.memory_space<vmem>>, vector<18x18x128xf32>
    tpu.vector_store %arg15[%c0_91, %c0_92, %c0_93], %112 {strides = array<i32>} : memref<18x18x128xf32, #tpu.memory_space<vmem>>, vector<18x18x128xf32>,
    %114 = vector.shape_cast %111 : vector<256x128xf32> to vector<16x16x128xf32>
    %c1_94 = arith.constant 1 : index
    %c1_95 = arith.constant 1 : index
    %c0_96 = arith.constant 0 : index
    %115 = vector.load %arg15[%c1_94, %c1_95, %c0_96] : memref<18x18x128xf32, #tpu.memory_space<vmem>>, vector<16x16x128xf32>
    tpu.vector_store %arg15[%c1_94, %c1_95, %c0_96], %114 {strides = array<i32>} : memref<18x18x128xf32, #tpu.memory_space<vmem>>, vector<16x16x128xf32>,
    %cst_97 = arith.constant 0.000000e+00 : f32
    %116 = vector.broadcast %cst_97 : f32 to vector<256x128xf32>
    %c0_98 = arith.constant 0 : index
    %c0_99 = arith.constant 0 : index
    %c0_100 = arith.constant 0 : index
    %117 = vector.load %arg15[%c0_98, %c0_99, %c0_100] : memref<18x18x128xf32, #tpu.memory_space<vmem>>, vector<16x16x128xf32>
    %118 = vector.shape_cast %117 : vector<16x16x128xf32> to vector<256x128xf32>
    %c0_101 = arith.constant 0 : index
    %c0_102 = arith.constant 0 : index
    %c0_103 = arith.constant 0 : index
    %119 = vector.load %arg9[%c0_101, %c0_102, %c0_103] : memref<9x128x128xf32, #tpu.memory_space<vmem>>, vector<1x128x128xf32>
    %120 = vector.shape_cast %119 : vector<1x128x128xf32> to vector<128x128xf32>
    %cst_104 = arith.constant dense<0.000000e+00> : vector<256x128xf32>
    %121 = tpu.matmul %118, %120, %cst_104 {dimension_numbers = #tpu.dot_dimension_numbers<[1], [0], [0], [1], [0, 0, 1, 1], [], []>} : vector<256x128xf32>, vector<128x128xf32>, vector<256x128xf32> -> vector<256x128xf32>
    %122 = arith.addf %116, %121 : vector<256x128xf32>
    %c0_105 = arith.constant 0 : index
    %c1_106 = arith.constant 1 : index
    %c0_107 = arith.constant 0 : index
    %123 = vector.load %arg15[%c0_105, %c1_106, %c0_107] : memref<18x18x128xf32, #tpu.memory_space<vmem>>, vector<16x16x128xf32>
    %124 = vector.shape_cast %123 : vector<16x16x128xf32> to vector<256x128xf32>
    %c1_108 = arith.constant 1 : index
    %c0_109 = arith.constant 0 : index
    %c0_110 = arith.constant 0 : index
    %125 = vector.load %arg9[%c1_108, %c0_109, %c0_110] : memref<9x128x128xf32, #tpu.memory_space<vmem>>, vector<1x128x128xf32>
    %126 = vector.shape_cast %125 : vector<1x128x128xf32> to vector<128x128xf32>
    %cst_111 = arith.constant dense<0.000000e+00> : vector<256x128xf32>
    %127 = tpu.matmul %124, %126, %cst_111 {dimension_numbers = #tpu.dot_dimension_numbers<[1], [0], [0], [1], [0, 0, 1, 1], [], []>} : vector<256x128xf32>, vector<128x128xf32>, vector<256x128xf32> -> vector<256x128xf32>
    %128 = arith.addf %122, %127 : vector<256x128xf32>
    %c0_112 = arith.constant 0 : index
    %c2_113 = arith.constant 2 : index
    %c0_114 = arith.constant 0 : index
    %129 = vector.load %arg15[%c0_112, %c2_113, %c0_114] : memref<18x18x128xf32, #tpu.memory_space<vmem>>, vector<16x16x128xf32>
    %130 = vector.shape_cast %129 : vector<16x16x128xf32> to vector<256x128xf32>
    %c2_115 = arith.constant 2 : index
    %c0_116 = arith.constant 0 : index
    %c0_117 = arith.constant 0 : index
    %131 = vector.load %arg9[%c2_115, %c0_116, %c0_117] : memref<9x128x128xf32, #tpu.memory_space<vmem>>, vector<1x128x128xf32>
    %132 = vector.shape_cast %131 : vector<1x128x128xf32> to vector<128x128xf32>
    %cst_118 = arith.constant dense<0.000000e+00> : vector<256x128xf32>
    %133 = tpu.matmul %130, %132, %cst_118 {dimension_numbers = #tpu.dot_dimension_numbers<[1], [0], [0], [1], [0, 0, 1, 1], [], []>} : vector<256x128xf32>, vector<128x128xf32>, vector<256x128xf32> -> vector<256x128xf32>
    %134 = arith.addf %128, %133 : vector<256x128xf32>
    %c1_119 = arith.constant 1 : index
    %c0_120 = arith.constant 0 : index
    %c0_121 = arith.constant 0 : index
    %135 = vector.load %arg15[%c1_119, %c0_120, %c0_121] : memref<18x18x128xf32, #tpu.memory_space<vmem>>, vector<16x16x128xf32>
    %136 = vector.shape_cast %135 : vector<16x16x128xf32> to vector<256x128xf32>
    %c3_122 = arith.constant 3 : index
    %c0_123 = arith.constant 0 : index
    %c0_124 = arith.constant 0 : index
    %137 = vector.load %arg9[%c3_122, %c0_123, %c0_124] : memref<9x128x128xf32, #tpu.memory_space<vmem>>, vector<1x128x128xf32>
    %138 = vector.shape_cast %137 : vector<1x128x128xf32> to vector<128x128xf32>
    %cst_125 = arith.constant dense<0.000000e+00> : vector<256x128xf32>
    %139 = tpu.matmul %136, %138, %cst_125 {dimension_numbers = #tpu.dot_dimension_numbers<[1], [0], [0], [1], [0, 0, 1, 1], [], []>} : vector<256x128xf32>, vector<128x128xf32>, vector<256x128xf32> -> vector<256x128xf32>
    %140 = arith.addf %134, %139 : vector<256x128xf32>
    %c1_126 = arith.constant 1 : index
    %c1_127 = arith.constant 1 : index
    %c0_128 = arith.constant 0 : index
    %141 = vector.load %arg15[%c1_126, %c1_127, %c0_128] : memref<18x18x128xf32, #tpu.memory_space<vmem>>, vector<16x16x128xf32>
    %142 = vector.shape_cast %141 : vector<16x16x128xf32> to vector<256x128xf32>
    %c4_129 = arith.constant 4 : index
    %c0_130 = arith.constant 0 : index
    %c0_131 = arith.constant 0 : index
    %143 = vector.load %arg9[%c4_129, %c0_130, %c0_131] : memref<9x128x128xf32, #tpu.memory_space<vmem>>, vector<1x128x128xf32>
    %144 = vector.shape_cast %143 : vector<1x128x128xf32> to vector<128x128xf32>
    %cst_132 = arith.constant dense<0.000000e+00> : vector<256x128xf32>
    %145 = tpu.matmul %142, %144, %cst_132 {dimension_numbers = #tpu.dot_dimension_numbers<[1], [0], [0], [1], [0, 0, 1, 1], [], []>} : vector<256x128xf32>, vector<128x128xf32>, vector<256x128xf32> -> vector<256x128xf32>
    %146 = arith.addf %140, %145 : vector<256x128xf32>
    %c1_133 = arith.constant 1 : index
    %c2_134 = arith.constant 2 : index
    %c0_135 = arith.constant 0 : index
    %147 = vector.load %arg15[%c1_133, %c2_134, %c0_135] : memref<18x18x128xf32, #tpu.memory_space<vmem>>, vector<16x16x128xf32>
    %148 = vector.shape_cast %147 : vector<16x16x128xf32> to vector<256x128xf32>
    %c5_136 = arith.constant 5 : index
    %c0_137 = arith.constant 0 : index
    %c0_138 = arith.constant 0 : index
    %149 = vector.load %arg9[%c5_136, %c0_137, %c0_138] : memref<9x128x128xf32, #tpu.memory_space<vmem>>, vector<1x128x128xf32>
    %150 = vector.shape_cast %149 : vector<1x128x128xf32> to vector<128x128xf32>
    %cst_139 = arith.constant dense<0.000000e+00> : vector<256x128xf32>
    %151 = tpu.matmul %148, %150, %cst_139 {dimension_numbers = #tpu.dot_dimension_numbers<[1], [0], [0], [1], [0, 0, 1, 1], [], []>} : vector<256x128xf32>, vector<128x128xf32>, vector<256x128xf32> -> vector<256x128xf32>
    %152 = arith.addf %146, %151 : vector<256x128xf32>
    %c2_140 = arith.constant 2 : index
    %c0_141 = arith.constant 0 : index
    %c0_142 = arith.constant 0 : index
    %153 = vector.load %arg15[%c2_140, %c0_141, %c0_142] : memref<18x18x128xf32, #tpu.memory_space<vmem>>, vector<16x16x128xf32>
    %154 = vector.shape_cast %153 : vector<16x16x128xf32> to vector<256x128xf32>
    %c6_143 = arith.constant 6 : index
    %c0_144 = arith.constant 0 : index
    %c0_145 = arith.constant 0 : index
    %155 = vector.load %arg9[%c6_143, %c0_144, %c0_145] : memref<9x128x128xf32, #tpu.memory_space<vmem>>, vector<1x128x128xf32>
    %156 = vector.shape_cast %155 : vector<1x128x128xf32> to vector<128x128xf32>
    %cst_146 = arith.constant dense<0.000000e+00> : vector<256x128xf32>
    %157 = tpu.matmul %154, %156, %cst_146 {dimension_numbers = #tpu.dot_dimension_numbers<[1], [0], [0], [1], [0, 0, 1, 1], [], []>} : vector<256x128xf32>, vector<128x128xf32>, vector<256x128xf32> -> vector<256x128xf32>
    %158 = arith.addf %152, %157 : vector<256x128xf32>
    %c2_147 = arith.constant 2 : index
    %c1_148 = arith.constant 1 : index
    %c0_149 = arith.constant 0 : index
    %159 = vector.load %arg15[%c2_147, %c1_148, %c0_149] : memref<18x18x128xf32, #tpu.memory_space<vmem>>, vector<16x16x128xf32>
    %160 = vector.shape_cast %159 : vector<16x16x128xf32> to vector<256x128xf32>
    %c7_150 = arith.constant 7 : index
    %c0_151 = arith.constant 0 : index
    %c0_152 = arith.constant 0 : index
    %161 = vector.load %arg9[%c7_150, %c0_151, %c0_152] : memref<9x128x128xf32, #tpu.memory_space<vmem>>, vector<1x128x128xf32>
    %162 = vector.shape_cast %161 : vector<1x128x128xf32> to vector<128x128xf32>
    %cst_153 = arith.constant dense<0.000000e+00> : vector<256x128xf32>
    %163 = tpu.matmul %160, %162, %cst_153 {dimension_numbers = #tpu.dot_dimension_numbers<[1], [0], [0], [1], [0, 0, 1, 1], [], []>} : vector<256x128xf32>, vector<128x128xf32>, vector<256x128xf32> -> vector<256x128xf32>
    %164 = arith.addf %158, %163 : vector<256x128xf32>
    %c2_154 = arith.constant 2 : index
    %c2_155 = arith.constant 2 : index
    %c0_156 = arith.constant 0 : index
    %165 = vector.load %arg15[%c2_154, %c2_155, %c0_156] : memref<18x18x128xf32, #tpu.memory_space<vmem>>, vector<16x16x128xf32>
    %166 = vector.shape_cast %165 : vector<16x16x128xf32> to vector<256x128xf32>
    %c8_157 = arith.constant 8 : index
    %c0_158 = arith.constant 0 : index
    %c0_159 = arith.constant 0 : index
    %167 = vector.load %arg9[%c8_157, %c0_158, %c0_159] : memref<9x128x128xf32, #tpu.memory_space<vmem>>, vector<1x128x128xf32>
    %168 = vector.shape_cast %167 : vector<1x128x128xf32> to vector<128x128xf32>
    %cst_160 = arith.constant dense<0.000000e+00> : vector<256x128xf32>
    %169 = tpu.matmul %166, %168, %cst_160 {dimension_numbers = #tpu.dot_dimension_numbers<[1], [0], [0], [1], [0, 0, 1, 1], [], []>} : vector<256x128xf32>, vector<128x128xf32>, vector<256x128xf32> -> vector<256x128xf32>
    %170 = arith.addf %164, %169 : vector<256x128xf32>
    %c0_161 = arith.constant 0 : index
    %c0_162 = arith.constant 0 : index
    %171 = vector.load %arg10[%c0_161, %c0_162] : memref<1x128xf32, #tpu.memory_space<vmem>>, vector<1x128xf32>
    %172 = vector.broadcast %171 : vector<1x128xf32> to vector<256x128xf32>
    %173 = arith.addf %170, %172 : vector<256x128xf32>
    %c0_163 = arith.constant 0 : index
    %c0_164 = arith.constant 0 : index
    %174 = vector.load %arg11[%c0_163, %c0_164] : memref<1x128xf32, #tpu.memory_space<vmem>>, vector<1x128xf32>
    %c0_165 = arith.constant 0 : index
    %c0_166 = arith.constant 0 : index
    %175 = vector.load %arg12[%c0_165, %c0_166] : memref<1x128xf32, #tpu.memory_space<vmem>>, vector<1x128xf32>
    %cst_167 = arith.constant dense<0.000000e+00> : vector<1x128xf32>
    %176 = tpu.matmul %0, %173, %cst_167 {dimension_numbers = #tpu.dot_dimension_numbers<[1], [0], [0], [1], [0, 0, 1, 1], [], []>} : vector<1x256xf32>, vector<256x128xf32>, vector<1x128xf32> -> vector<1x128xf32>
    %177 = arith.mulf %173, %173 : vector<256x128xf32>
    %cst_168 = arith.constant dense<0.000000e+00> : vector<1x128xf32>
    %178 = tpu.matmul %0, %177, %cst_168 {dimension_numbers = #tpu.dot_dimension_numbers<[1], [0], [0], [1], [0, 0, 1, 1], [], []>} : vector<1x256xf32>, vector<256x128xf32>, vector<1x128xf32> -> vector<1x128xf32>
    %c0_169 = arith.constant 0 : index
    %c0_170 = arith.constant 0 : index
    %179 = vector.load %arg13[%c0_169, %c0_170] : memref<128x128xf32, #tpu.memory_space<vmem>>, vector<128x128xf32>
    %cst_171 = arith.constant dense<0.000000e+00> : vector<1x128xf32>
    %180 = tpu.matmul %176, %179, %cst_171 {dimension_numbers = #tpu.dot_dimension_numbers<[1], [0], [0], [1], [0, 0, 1, 1], [], []>} : vector<1x128xf32>, vector<128x128xf32>, vector<1x128xf32> -> vector<1x128xf32>
    %c0_172 = arith.constant 0 : index
    %c0_173 = arith.constant 0 : index
    %181 = vector.load %arg13[%c0_172, %c0_173] : memref<128x128xf32, #tpu.memory_space<vmem>>, vector<128x128xf32>
    %cst_174 = arith.constant dense<0.000000e+00> : vector<1x128xf32>
    %182 = tpu.matmul %178, %181, %cst_174 {dimension_numbers = #tpu.dot_dimension_numbers<[1], [0], [0], [1], [0, 0, 1, 1], [], []>} : vector<1x128xf32>, vector<128x128xf32>, vector<1x128xf32> -> vector<1x128xf32>
    %183 = arith.mulf %180, %180 : vector<1x128xf32>
    %184 = arith.subf %182, %183 : vector<1x128xf32>
    %cst_175 = arith.constant 0.000000e+00 : f32
    %185 = vector.broadcast %cst_175 : f32 to vector<1x128xf32>
    %186 = arith.maximumf %184, %185 : vector<1x128xf32>
    %187 = vector.broadcast %180 : vector<1x128xf32> to vector<256x128xf32>
    %188 = arith.subf %173, %187 : vector<256x128xf32>
    %cst_176 = arith.constant 9.99999974E-6 : f32
    %189 = vector.broadcast %cst_176 : f32 to vector<1x128xf32>
    %190 = arith.addf %186, %189 : vector<1x128xf32>
    %191 = math.rsqrt %190 : vector<1x128xf32>
    %192 = vector.broadcast %191 : vector<1x128xf32> to vector<256x128xf32>
    %193 = arith.mulf %188, %192 : vector<256x128xf32>
    %194 = vector.broadcast %174 : vector<1x128xf32> to vector<256x128xf32>
    %195 = arith.mulf %193, %194 : vector<256x128xf32>
    %196 = vector.broadcast %175 : vector<1x128xf32> to vector<256x128xf32>
    %197 = arith.addf %195, %196 : vector<256x128xf32>
    %198 = arith.negf %197 : vector<256x128xf32>
    %199 = math.exp %198 : vector<256x128xf32>
    %cst_177 = arith.constant 1.000000e+00 : f32
    %200 = vector.broadcast %cst_177 : f32 to vector<256x128xf32>
    %201 = arith.addf %200, %199 : vector<256x128xf32>
    %202 = arith.divf %200, %201 : vector<256x128xf32>
    %203 = arith.mulf %197, %202 : vector<256x128xf32>
    %c0_178 = arith.constant 0 : index
    %c0_179 = arith.constant 0 : index
    %c0_180 = arith.constant 0 : index
    %204 = vector.load %arg14[%c0_178, %c0_179, %c0_180] : memref<1x256x128xf32, #tpu.memory_space<vmem>>, vector<1x256x128xf32>
    %205 = vector.shape_cast %204 : vector<1x256x128xf32> to vector<256x128xf32>
    %206 = vector.shape_cast %203 : vector<256x128xf32> to vector<1x256x128xf32>
    tpu.vector_store %arg14[%c0_178, %c0_179, %c0_180], %206 {strides = array<i32>} : memref<1x256x128xf32, #tpu.memory_space<vmem>>, vector<1x256x128xf32>,
    return
  }
  func.func @transform_0(%arg0: i32) -> (i32, i32, i32, i32) {
    %c0_i32 = arith.constant 0 : i32
    %c0_i32_0 = arith.constant 0 : i32
    %c0_i32_1 = arith.constant 0 : i32
    %c0_i32_2 = arith.constant 0 : i32
    return %arg0, %c0_i32, %c0_i32_0, %c0_i32_1 : i32, i32, i32, i32
  }
  func.func @transform_1(%arg0: i32) -> (i32, i32, i32) {
    %c0_i32 = arith.constant 0 : i32
    %c0_i32_0 = arith.constant 0 : i32
    %c0_i32_1 = arith.constant 0 : i32
    return %arg0, %c0_i32, %c0_i32_0 : i32, i32, i32
  }
  func.func @transform_2(%arg0: i32) -> (i32, i32, i32) {
    %c0_i32 = arith.constant 0 : i32
    %c0_i32_0 = arith.constant 0 : i32
    %c0_i32_1 = arith.constant 0 : i32
    %c0_i32_2 = arith.constant 0 : i32
    return %c0_i32, %c0_i32_0, %c0_i32_1 : i32, i32, i32
  }
  func.func @transform_3(%arg0: i32) -> (i32, i32) {
    %c0_i32 = arith.constant 0 : i32
    %c0_i32_0 = arith.constant 0 : i32
    %c0_i32_1 = arith.constant 0 : i32
    return %c0_i32, %c0_i32_0 : i32, i32
  }
  func.func @transform_4(%arg0: i32) -> (i32, i32) {
    %c0_i32 = arith.constant 0 : i32
    %c0_i32_0 = arith.constant 0 : i32
    %c0_i32_1 = arith.constant 0 : i32
    return %c0_i32, %c0_i32_0 : i32, i32
  }
  func.func @transform_5(%arg0: i32) -> (i32, i32) {
    %c0_i32 = arith.constant 0 : i32
    %c0_i32_0 = arith.constant 0 : i32
    %c0_i32_1 = arith.constant 0 : i32
    return %c0_i32, %c0_i32_0 : i32, i32
  }
  func.func @transform_6(%arg0: i32) -> (i32, i32) {
    %c0_i32 = arith.constant 0 : i32
    %c0_i32_0 = arith.constant 0 : i32
    %c0_i32_1 = arith.constant 0 : i32
    return %c0_i32, %c0_i32_0 : i32, i32
  }
  func.func @transform_7(%arg0: i32) -> (i32, i32) {
    %c0_i32 = arith.constant 0 : i32
    %c0_i32_0 = arith.constant 0 : i32
    %c0_i32_1 = arith.constant 0 : i32
    return %c0_i32, %c0_i32_0 : i32, i32
  }
  func.func @transform_8(%arg0: i32) -> (i32, i32, i32) {
    %c0_i32 = arith.constant 0 : i32
    %c0_i32_0 = arith.constant 0 : i32
    %c0_i32_1 = arith.constant 0 : i32
    %c0_i32_2 = arith.constant 0 : i32
    return %c0_i32, %c0_i32_0, %c0_i32_1 : i32, i32, i32
  }
  func.func @transform_9(%arg0: i32) -> (i32, i32) {
    %c0_i32 = arith.constant 0 : i32
    %c0_i32_0 = arith.constant 0 : i32
    %c0_i32_1 = arith.constant 0 : i32
    return %c0_i32, %c0_i32_0 : i32, i32
  }
  func.func @transform_10(%arg0: i32) -> (i32, i32) {
    %c0_i32 = arith.constant 0 : i32
    %c0_i32_0 = arith.constant 0 : i32
    %c0_i32_1 = arith.constant 0 : i32
    return %c0_i32, %c0_i32_0 : i32, i32
  }
  func.func @transform_11(%arg0: i32) -> (i32, i32) {
    %c0_i32 = arith.constant 0 : i32
    %c0_i32_0 = arith.constant 0 : i32
    %c0_i32_1 = arith.constant 0 : i32
    return %c0_i32, %c0_i32_0 : i32, i32
  }
  func.func @transform_12(%arg0: i32) -> (i32, i32) {
    %c0_i32 = arith.constant 0 : i32
    %c0_i32_0 = arith.constant 0 : i32
    %c0_i32_1 = arith.constant 0 : i32
    return %c0_i32, %c0_i32_0 : i32, i32
  }
  func.func @transform_13(%arg0: i32) -> (i32, i32, i32) {
    %c0_i32 = arith.constant 0 : i32
    %c0_i32_0 = arith.constant 0 : i32
    %c0_i32_1 = arith.constant 0 : i32
    return %arg0, %c0_i32, %c0_i32_0 : i32, i32, i32
  }
}

</mosaic_0001>

<bundles_post_ra>
// kernel: tpu_custom_call.1
= control target key start
LH: loop header
LB: loop body
LE: loop exit
PB: predicated region body
PF: predicated region fallthrough
CT: control target
= control target key end

     0   :  { %s13950_s0 = inlined_call_operand.vmem [shape: f32[2,18,18,4], index: 0, kind: input, shape index: {}]   ;;  %s13951_s1 = inlined_call_operand.vmem [shape: f32[2,1,32], index: 1, kind: input, shape index: {}]   ;;  %s13952_s2 = inlined_call_operand.vmem [shape: f32[9,4,128], index: 2, kind: input, shape index: {}]   ;;  %s13953_s3 = inlined_call_operand.vmem [shape: f32[1,128], index: 3, kind: input, shape index: {}]   ;;  %s13954_s4 = inlined_call_operand.vmem [shape: f32[1,128], index: 4, kind: input, shape index: {}]   ;;  %s13955_s5 = inlined_call_operand.vmem [shape: f32[1,128], index: 5, kind: input, shape index: {}]   ;;  %s13956_s6 = inlined_call_operand.vmem [shape: f32[32,128], index: 6, kind: input, shape index: {}]   ;;  %s13957_s7 = inlined_call_operand.vmem [shape: f32[1,128], index: 7, kind: input, shape index: {}]   ;;  %s13958_s8 = inlined_call_operand.hbm [shape: f32[9,128,128], index: 8, kind: input, shape index: {}]   ;;  %s13959_s9 = inlined_call_operand.vmem [shape: f32[1,128], index: 9, kind: input, shape index: {}]   ;;  %s13960_s10 = inlined_call_operand.vmem [shape: f32[1,128], index: 10, kind: input, shape index: {}]   ;;  %s13961_s11 = inlined_call_operand.vmem [shape: f32[1,128], index: 11, kind: input, shape index: {}]   ;;  %s13962_s12 = inlined_call_operand.vmem [shape: f32[128,128], index: 12, kind: input, shape index: {}]   ;;  %s13963_s13 = inlined_call_operand.hbm [shape: f32[2,256,128], index: 13, kind: output, shape index: {}]  }
   0x1   :  { %14120 = sst [smem:[#allocation95_spill]] %s13950_s0 }
   0x2   :  { %14121 = sst [smem:[#allocation96_spill]] %s13952_s2 }
   0x3   :  { %14122 = sst [smem:[#allocation97_spill]] %s13953_s3 }
   0x4   :  { %14123 = sst [smem:[#allocation98_spill]] %s13958_s8 }
   0x5   :  { %18 = vsyncpa [#allocation4], 0 }
   0x6   :  { %19 = vsyncpa [#allocation5], 0 }
   0x7   :  { %21 = vsyncpa [#allocation5 + $0x1], 0  ;;  %s7970_s25 = smov 0   ;;  %s7972_s26 = smov 0  }
   0x8   :  { %s7974_s27 = smov 0   ;;  %s7976_s28 = smov 0  }
   0x9 LB: > { %s7991_s29 = sadd.s32 4294967295, %s7891_s28   ;;  %s6886_s30 = sadd.s32 4294967294, %s7891_s28   ;;  %s7891_s28 = sphi %s7976_s28, %s15022_s28   ;;  %s7887_s27 = sphi %s7974_s27, %s15021_s27   ;;  %s7883_s26 = sphi %s7972_s26, %s15020_s26   ;;  %s7879_s25 = sphi %s7970_s25, %s15019_s25  }
   0xa   : > { %s7995_s14 = sadd.s32 1, %s7891_s28   ;;  %s317_s15 = sadd.s32 1, %s7887_s27 }
   0xb   : > { %s314_s16 = ssub.s32 %s7891_s28, %s7995_s14  ;;  %p327_p0 = scmp.ne.s32.totalorder %s7887_s27, %s7883_s26 }
   0xc   : > { %p315_p1 = scmp.eq.s32.totalorder %s314_s16, 0  ;;  %p328_p2 = scmp.eq.s32.totalorder %s7991_s29, 1 }
   0xd   : > { %p333_p3 = scmp.ne.s32.totalorder %s7883_s26, %s7879_s25  ;;  %p334_p4 = scmp.eq.s32.totalorder %s6886_s30, 1 }
   0xe   : > { %s8006_s17 = scalar_select %p315_p1, %s7887_s27, %s317_s15  }
   0xf   : > { %p8008_p5 = por %p328_p2, %p327_p0  ;;  %p8012_p6 = por %p334_p4, %p333_p3 }
  0x10   : > { %p6887_p7 = scmp.ge.s32.totalorder %s7891_s28, 1  ;;  %p341_p8 = scmp.lt.s32.totalorder %s7891_s28, 3 }
  0x11   : > { %p7481_p9 = scmp.eq.s32.totalorder %s7991_s29, 0  ;;  %s14126_s8 = sld [smem:[#allocation98_spill]] }
  0x12   : > { %p342_p10 = pnand %p6887_p7, %p341_p8  ;;  %s7893_s23 = smov [#allocation3]  }
  0x13   : > { %s372_s24 = sshll.u32 %s7893_s23, 4  ;;  %s7894_s30 = smov 128   ;;  %s373_s24 = int_to_ptr.vmem [resolvable:$true] %s372_s24 }
  0x14   : > { %p7473_p11 = pneg %p342_p10  ;;  %s7895_s15 = smov 8  }
  0x15   : > { %414 = sbr.rel (%p342_p10) target bundleno = 2745 (0xab9), region = 72 }
  0x16   : > { %p7474_p12 = pnand %p7481_p9, %p7473_p11 }
  0x17   : > { %s370_s22 = sshll.u32 %s14126_s8, 4  ;;  %s371_s22 = int_to_ptr.hbm [resolvable:$true] %s370_s22 }
  0x18   : > { %7476 = dma.hbm_to_vmem [thread:$0]  (!%p7474_p12), %s371_s22, 18432, %s373_s24, [#allocation4], %s7894_s30, %s7894_s30, %s7895_s15  }
  0x1a   : > { %7870 = dma.done.wait (%p7481_p9), [#allocation4], 18432  }
  0x1b   : > { %7872 = vsyncadd (%p7481_p9), [#allocation4], 4294948864  ;;  %p462_p13 = scmp.lt.s32.totalorder %s7991_s29, 1  ;;  %vm634_vm0 = vcmask 1043456   ;;  %s14127_s0 = sld [smem:[#allocation95_spill]]  ;;  %vm537_vm1 = vcmask 31744  }
  0x1c   : > { %s14128_s2 = sld [smem:[#allocation96_spill]]  ;;  %vm3293_vm6 = vcmask 261120   ;;  %s459_s30 = sand.u32 1, %s7883_s26  }
  0x1d   : > { %s8030_s16 = scalar_select %p462_p13, %s7991_s29, 1 }
  0x1e   : > { %s14299_s3 = sld [smem:[#allocation97_spill]]  ;;  %s13566_s15 = sshll.u32 %s459_s30, 8 }
  0x1f   : > { %s7466_s20 = smul.u32 432, %s8030_s16 }
  0x21   : > { %s8036_s8 = scalar_lea.vmem %s14127_s0, %s7466_s20  ;;  %s469_s0 = scalar_lea.vmem %s13951_s1, %s8030_s16 }
  0x22   : > { %v6894_v0 = vld [vmem:[%s14128_s2 + $0x4] sm:$0xf]  ;;  %v6961_v1 = vld [vmem:[%s14128_s2 + $0x8] sm:$0xf]  ;;  %v502_v5 = vld [vmem:[%s14128_s2] sm:$0xf] }
  0x23   : > { %v503_v2 = vld [vmem:[%s8036_s8 + $0x1] sm:$0xff]  ;;  %6895 = vmatpush.msk.msra.mxu0 %vm634_vm0, %v6894_v0  ;;  %7463 = vmatpush.msk.msra.mxu1 %vm634_vm0, %v6894_v0  ;;  %v985_v4 = vld [vmem:[%s8036_s8 + $0x10a] sm:$0xff]  ;;  %v986_v8 = vld [vmem:[%s8036_s8 + $0x112] sm:$0xff]  ;;  %s13636_s20 = scalar_lea.vmem [#allocation6], %s13566_s15  ;;  %s7462_s16 = sshll.u32 %s7991_s29, 8 }
  0x24   : > { %v530_v3 = vld [vmem:[%s8036_s8 + $0x141] sm:$0xff]  ;;  %7465 = vmatpush.msk.msra.mxu3 %vm634_vm0, %v6961_v1  ;;  %6896 = vmatmul.msk.f32.vlgmr.msra.gmra.mxu0 %vm537_vm1, %v503_v2  ;;  %v504_v6 = vld [vmem:[%s8036_s8 + $0x9] sm:$0xff]  ;;  %v531_v7 = vld [vmem:[%s8036_s8 + $0x151] sm:$0xff] }
  0x25   : > { %6923 = vmatmul.msk.f32.vlgmr.msra.gmra.mxu1 %vm537_vm1, %v530_v3  ;;  %6985 = vmatmul.msk.f32.vlgmr.msra.gmra.mxu3 %vm537_vm1, %v985_v4  ;;  %v8066_v9 = vld [vmem:[%s8036_s8 + $0x19] sm:$0xff]  ;;  %v987_v11 = vld [vmem:[%s8036_s8 + $0x122] sm:$0xff]  ;;  %v988_v14 = vld [vmem:[%s8036_s8 + $0x12a] sm:$0xff] }
  0x26   : > { %7464 = vmatpush.msk.msra.mxu2 %vm634_vm0, %v6961_v1  ;;  %6928 = vmatpush.msk.msrb.mxu1 %vm634_vm0, %v502_v5  ;;  %v532_v10 = vld [vmem:[%s8036_s8 + $0x159] sm:$0xff]  ;;  %v8075_v12 = vld [vmem:[%s8036_s8 + $0x21] sm:$0xff]  ;;  %v533_v13 = vld [vmem:[%s8036_s8 + $0x169] sm:$0xff] }
  0x27   : > { %v8084_v15 = vld [vmem:[%s8036_s8 + $0x22] sm:$0xff]  ;;  %v8089_v16 = vld [vmem:[%s8036_s8 + $0x31] sm:$0xff]  ;;  %v989_v18 = vld [vmem:[%s8036_s8 + $0x13a] sm:$0xff] }
  0x28   : > { %6962 = vmatpush.msk.msra.mxu1 %vm634_vm0, %v6961_v1  ;;  %6966 = vmatmul.msk.f32.vlgmr.msra.gmra.mxu2 %vm537_vm1, %v8084_v15  ;;  %v534_v17 = vld [vmem:[%s8036_s8 + $0x171] sm:$0xff]  ;;  %v8103_v20 = vld [vmem:[%s8036_s8 + $0x39] sm:$0xff]  ;;  %v990_v22 = vld [vmem:[%s8036_s8 + $0x142] sm:$0xff] }
  0x29   : > { %v8098_v19 = vld [vmem:[%s8036_s8 + $0x32] sm:$0xff]  ;;  %v470_v21 = vld [vmem:[%s8036_s8] sm:$0xff]  ;;  %v7027_v24 = vld [vmem:[%s14128_s2 + $0xc] sm:$0xf] }
  0x2a   : > { %v8112_v23 = vld [vmem:[%s8036_s8 + $0x3a] sm:$0xff]  ;;  %7028 = vmatpush.msk.msrb.mxu3 %vm634_vm0, %v7027_v24  ;;  %v8121_v25 = vld [vmem:[%s8036_s8 + $0x49] sm:$0xff]  ;;  %v991_v27 = vld [vmem:[%s8036_s8 + $0x152] sm:$0xff] }
  0x2b   : > { %v471_v26 = vld [vmem:[%s8036_s8 + $0x8] sm:$0xff]  ;;  %v8135_v29 = vld [vmem:[%s8036_s8 + $0x51] sm:$0xff]  ;;  %v992_v31 = vld [vmem:[%s8036_s8 + $0x15a] sm:$0xff] }
  0x2c   : > { %6897 = vmatmul.msk.f32.gmra.mxu0 %vm537_vm1, %v504_v6  ;;  %v8130_v28 = vld [vmem:[%s8036_s8 + $0x4a] sm:$0xff]  ;;  %v472_v30 = vld [vmem:[%s8036_s8 + $0x18] sm:$0xff]  ;;  %v8149_v33 = vld [vmem:[%s8036_s8 + $0x61] sm:$0xff] }
  0x2d   : > { %6924 = vmatmul.msk.f32.gmra.mxu1 %vm537_vm1, %v531_v7  ;;  %6986 = vmatmul.msk.f32.gmra.mxu3 %vm537_vm1, %v986_v8  ;;  %v8144_v32 = vld [vmem:[%s8036_s8 + $0x52] sm:$0xff]  ;;  %v473_v34 = vld [vmem:[%s8036_s8 + $0x20] sm:$0xff]  ;;  %v993_v35 = vld [vmem:[%s8036_s8 + $0x16a] sm:$0xff] }
  0x2e   : > { %14129 = vst [vmem:[#allocation9_spill] sm:$0xff] %v8144_v32  ;;  %v8158_v36 = vld [vmem:[%s8036_s8 + $0x62] sm:$0xff]  ;;  %v8166_v38 = vld [vmem:[%s8036_s8 + $0x30] sm:$0xff]  ;;  %v8180_v41 = vld [vmem:[%s8036_s8 + $0x79] sm:$0xff] }
  0x2f   : > { %14130 = vst [vmem:[#allocation10_spill] sm:$0xff] %v8158_v36  ;;  %v8163_v37 = vld [vmem:[%s8036_s8 + $0x69] sm:$0xff]  ;;  %v994_v39 = vld [vmem:[%s8036_s8 + $0x172] sm:$0xff]  ;;  %v8191_v43 = vld [vmem:[%s8036_s8 + $0x7a] sm:$0xff] }
  0x30   : > { %6967 = vmatmul.msk.f32.gmra.mxu2 %vm537_vm1, %v8098_v19  ;;  %v8175_v40 = vld [vmem:[%s8036_s8 + $0x6a] sm:$0xff]  ;;  %v8183_v42 = vld [vmem:[%s8036_s8 + $0x38] sm:$0xff]  ;;  %14132 = vst [vmem:[#allocation12_spill] sm:$0xff] %v8191_v43  ;;  %v8196_v44 = vld [vmem:[%s8036_s8 + $0x81] sm:$0xff] }
  0x31   : > { %14131 = vst [vmem:[#allocation11_spill] sm:$0xff] %v8175_v40  ;;  %v8199_v45 = vld [vmem:[%s8036_s8 + $0x48] sm:$0xff]  ;;  %v8212_v47 = vld [vmem:[%s8036_s8 + $0x91] sm:$0xff]  ;;  %v8227_v50 = vld [vmem:[%s8036_s8 + $0x99] sm:$0xff] }
  0x32   : > { %v8207_v46 = vld [vmem:[%s8036_s8 + $0x82] sm:$0xff]  ;;  %v8215_v48 = vld [vmem:[%s8036_s8 + $0x50] sm:$0xff]  ;;  %v8241_v52 = vld [vmem:[%s8036_s8 + $0x9a] sm:$0xff] }
  0x33   : > { %14133 = vst [vmem:[#allocation13_spill] sm:$0xff] %v8207_v46  ;;  %v8224_v49 = vld [vmem:[%s8036_s8 + $0x92] sm:$0xff]  ;;  %v8232_v51 = vld [vmem:[%s8036_s8 + $0x60] sm:$0xff]  ;;  %v8244_v53 = vld [vmem:[%s8036_s8 + $0xa9] sm:$0xff] }
  0x34   : > { %6898 = vmatmul.msk.f32.gmra.mxu0 %vm537_vm1, %v8066_v9  ;;  %14134 = vst [vmem:[#allocation14_spill] sm:$0xff] %v8224_v49  ;;  %v8249_v54 = vld [vmem:[%s8036_s8 + $0x68] sm:$0xff]  ;;  %v8261_v56 = vld [vmem:[%s8036_s8 + $0xb1] sm:$0xff]  ;;  %v8287_v62 = vld [vmem:[%s8036_s8 + $0x80] sm:$0xff] }
  0x35   : > { %6925 = vmatmul.msk.f32.gmra.mxu1 %vm537_vm1, %v532_v10  ;;  %6987 = vmatmul.msk.f32.gmra.mxu3 %vm537_vm1, %v987_v11  ;;  %14135 = vst [vmem:[#allocation15_spill] sm:$0xff] %v8241_v52  ;;  %v8258_v55 = vld [vmem:[%s8036_s8 + $0xaa] sm:$0xff]  ;;  %v8266_v57 = vld [vmem:[%s8036_s8 + $0x78] sm:$0xff]  ;;  %v8280_v60 = vld [vmem:[%s8036_s8 + $0xc1] sm:$0xff] }
  0x36   : > { %14136 = vst [vmem:[#allocation16_spill] sm:$0xff] %v8258_v55  ;;  %v8275_v58 = vld [vmem:[%s8036_s8 + $0xb2] sm:$0xff]  ;;  %v8298_v0 = vld [vmem:[%s8036_s8 + $0xc2] sm:$0xff]  ;;  %v8321_v6 = vld [vmem:[%s8036_s8 + $0xca] sm:$0xff] }
  0x37   : > { %14137 = vst [vmem:[#allocation17_spill] sm:$0xff] %v8275_v58  ;;  %v8303_v2 = vld [vmem:[%s8036_s8 + $0xc9] sm:$0xff]  ;;  %v8326_v8 = vld [vmem:[%s8036_s8 + $0xd9] sm:$0xff] }
  0x38   : > { %6968 = vmatmul.msk.f32.gmra.mxu2 %vm537_vm1, %v8112_v23  ;;  %14141 = vst [vmem:[#allocation21_spill] sm:$0xff] %v8298_v0  ;;  %v8310_v4 = vld [vmem:[%s8036_s8 + $0x90] sm:$0xff]  ;;  %v8333_v11 = vld [vmem:[%s8036_s8 + $0x98] sm:$0xff] }
  0x39   : > { %14145 = vst [vmem:[#allocation25_spill] sm:$0xff] %v8321_v6 }
  0x3c   : > { %6899 = vmatmul.msk.f32.gmra.mxu0 %vm537_vm1, %v8075_v12 }
  0x3d   : > { %6926 = vmatmul.msk.f32.gmra.mxu1 %vm537_vm1, %v533_v13  ;;  %6988 = vmatmul.msk.f32.gmra.mxu3 %vm537_vm1, %v988_v14  ;;  %v8344_v14 = vld [vmem:[%s8036_s8 + $0xda] sm:$0xff] }
  0x3e   : > { %14149 = vst [vmem:[#allocation29_spill] sm:$0xff] %v8344_v14 }
  0x40   : > { %6969 = vmatmul.msk.f32.gmra.mxu2 %vm537_vm1, %v8130_v28 }
  0x44   : > { %6900 = vmatmul.msk.f32.gmra.mxu0 %vm537_vm1, %v8089_v16 }
  0x45   : > { %6927 = vmatmul.msk.f32.gmra.mxu1 %vm537_vm1, %v534_v17  ;;  %6989 = vmatmul.msk.f32.gmra.mxu3 %vm537_vm1, %v989_v18  ;;  %v8349_v18 = vld [vmem:[%s8036_s8 + $0xe1] sm:$0xff] }
  0x48   : > { %6970 = vmatmul.msk.f32.gmra.mxu2 %vm537_vm1, %v8144_v32  ;;  %v8548_v32 = vld [vmem:[%s8036_s8 + $0x128] sm:$0xff] }
  0x49   : > { %14184 = vst [vmem:[#allocation64_spill] sm:$0xff] %v8548_v32 }
  0x4c   : > { %6901 = vmatmul.msk.f32.gmra.mxu0 %vm537_vm1, %v8103_v20 }
  0x4d   : > { %6929 = vmatmul.msk.f32.vlgmr.msrb.gmra.mxu1 %vm537_vm1, %v470_v21  ;;  %6990 = vmatmul.msk.f32.gmra.mxu3 %vm537_vm1, %v990_v22  ;;  %v8356_v22 = vld [vmem:[%s8036_s8 + $0xa8] sm:$0xff] }
  0x4e   : > { %14151 = vst [vmem:[#allocation31_spill] sm:$0xff] %v8356_v22 }
  0x50   : > { %6971 = vmatmul.msk.f32.gmra.mxu2 %vm537_vm1, %v8158_v36 }
  0x54   : > { %6902 = vmatmul.msk.f32.gmra.mxu0 %vm537_vm1, %v8121_v25 }
  0x55   : > { %6930 = vmatmul.msk.f32.gmra.mxu1 %vm537_vm1, %v471_v26  ;;  %6991 = vmatmul.msk.f32.gmra.mxu3 %vm537_vm1, %v991_v27  ;;  %v8367_v26 = vld [vmem:[%s8036_s8 + $0xe2] sm:$0xff] }
  0x56   : > { %14153 = vst [vmem:[#allocation33_spill] sm:$0xff] %v8367_v26 }
  0x58   : > { %6972 = vmatmul.msk.f32.gmra.mxu2 %vm537_vm1, %v8175_v40 }
  0x5c   : > { %6903 = vmatmul.msk.f32.gmra.mxu0 %vm537_vm1, %v8135_v29 }
  0x5d   : > { %6931 = vmatmul.msk.f32.gmra.mxu1 %vm537_vm1, %v472_v30  ;;  %6992 = vmatmul.msk.f32.gmra.mxu3 %vm537_vm1, %v992_v31 }
  0x60   : > { %6973 = vmatmul.msk.f32.gmra.mxu2 %vm537_vm1, %v8191_v43  ;;  %v8508_v43 = vld [vmem:[%s8036_s8 + $0x108] sm:$0xff] }
  0x64   : > { %6904 = vmatmul.msk.f32.gmra.mxu0 %vm537_vm1, %v8149_v33 }
  0x65   : > { %6932 = vmatmul.msk.f32.gmra.mxu1 %vm537_vm1, %v473_v34  ;;  %6993 = vmatmul.msk.f32.gmra.mxu3 %vm537_vm1, %v993_v35 }
  0x68   : > { %6974 = vmatmul.msk.f32.gmra.mxu2 %vm537_vm1, %v8207_v46 }
  0x6c   : > { %6905 = vmatmul.msk.f32.gmra.mxu0 %vm537_vm1, %v8163_v37 }
  0x6d   : > { %6933 = vmatmul.msk.f32.gmra.mxu1 %vm537_vm1, %v8166_v38  ;;  %6994 = vmatmul.msk.f32.gmra.mxu3 %vm537_vm1, %v994_v39  ;;  %v8390_v39 = vld [vmem:[%s8036_s8 + $0xf2] sm:$0xff] }
  0x6e   : > { %14157 = vst [vmem:[#allocation37_spill] sm:$0xff] %v8390_v39 }
  0x70   : > { %6975 = vmatmul.msk.f32.gmra.mxu2 %vm537_vm1, %v8224_v49 }
  0x74   : > { %6906 = vmatmul.msk.f32.gmra.mxu0 %vm537_vm1, %v8180_v41 }
  0x75   : > { %6934 = vmatmul.msk.f32.gmra.mxu1 %vm537_vm1, %v8183_v42  ;;  %7029 = vmatmul.msk.f32.vlgmr.msrb.gmra.mxu3 %vm537_vm1, %v472_v30  ;;  %v8372_v30 = vld [vmem:[%s8036_s8 + $0xf1] sm:$0xff] }
  0x78   : > { %6976 = vmatmul.msk.f32.gmra.mxu2 %vm537_vm1, %v8241_v52 }
  0x7c   : > { %6907 = vmatmul.msk.f32.gmra.mxu0 %vm537_vm1, %v8196_v44 }
  0x7d   : > { %6935 = vmatmul.msk.f32.gmra.mxu1 %vm537_vm1, %v8199_v45  ;;  %7030 = vmatmul.msk.f32.gmra.mxu3 %vm537_vm1, %v473_v34  ;;  %v8379_v34 = vld [vmem:[%s8036_s8 + $0xb0] sm:$0xff] }
  0x7e   : > { %14155 = vst [vmem:[#allocation35_spill] sm:$0xff] %v8379_v34 }
  0x80   : > { %6977 = vmatmul.msk.f32.gmra.mxu2 %vm537_vm1, %v8258_v55 }
  0x84   : > { %6908 = vmatmul.msk.f32.gmra.mxu0 %vm537_vm1, %v8212_v47 }
  0x85   : > { %6936 = vmatmul.msk.f32.gmra.mxu1 %vm537_vm1, %v8215_v48  ;;  %7031 = vmatmul.msk.f32.gmra.mxu3 %vm537_vm1, %v8166_v38 }
  0x88   : > { %6978 = vmatmul.msk.f32.gmra.mxu2 %vm537_vm1, %v8275_v58 }
  0x8c   : > { %6909 = vmatmul.msk.f32.gmra.mxu0 %vm537_vm1, %v8227_v50 }
  0x8d   : > { %6937 = vmatmul.msk.f32.gmra.mxu1 %vm537_vm1, %v8232_v51  ;;  %7032 = vmatmul.msk.f32.gmra.mxu3 %vm537_vm1, %v8183_v42 }
  0x90   : > { %6979 = vmatmul.msk.f32.gmra.mxu2 %vm537_vm1, %v8298_v0  ;;  %v8460_v0 = vld [vmem:[%s8036_s8 + $0x121] sm:$0xff] }
  0x91   : > { %14171 = vst [vmem:[#allocation51_spill] sm:$0xff] %v8460_v0 }
  0x94   : > { %6910 = vmatmul.msk.f32.gmra.mxu0 %vm537_vm1, %v8244_v53 }
  0x95   : > { %6938 = vmatmul.msk.f32.gmra.mxu1 %vm537_vm1, %v8249_v54  ;;  %7033 = vmatmul.msk.f32.gmra.mxu3 %vm537_vm1, %v8199_v45 }
  0x98   : > { %6980 = vmatmul.msk.f32.gmra.mxu2 %vm537_vm1, %v8321_v6 }
  0x9c   : > { %6911 = vmatmul.msk.f32.gmra.mxu0 %vm537_vm1, %v8261_v56 }
  0x9d   : > { %6939 = vmatmul.msk.f32.gmra.mxu1 %vm537_vm1, %v8266_v57  ;;  %7034 = vmatmul.msk.f32.gmra.mxu3 %vm537_vm1, %v8215_v48 }
  0xa0   : > { %6981 = vmatmul.msk.f32.gmra.mxu2 %vm537_vm1, %v8344_v14 }
  0xa1   : > { %v8277_v59 = vpop.f32.mrf.mxu0 }
  0xa2   : > { %14138 = vst [vmem:[#allocation18_spill] sm:$0xff] %v8277_v59  ;;  %v8284_v61 = vpop.f32.mrf.mxu1  ;;  %v7093_v59 = vld [vmem:[%s14128_s2 + $0x10] sm:$0xf] }
  0xa3   : > { %14139 = vst [vmem:[#allocation19_spill] sm:$0xff] %v8284_v61  ;;  %7094 = vmatpush.msk.msrb.mxu0 %vm634_vm0, %v7093_v59 }
  0xa4   : > { %6912 = vmatmul.msk.f32.gmra.mxu0 %vm537_vm1, %v8280_v60 }
  0xa5   : > { %6940 = vmatmul.msk.f32.gmra.mxu1 %vm537_vm1, %v8287_v62  ;;  %7035 = vmatmul.msk.f32.gmra.mxu3 %vm537_vm1, %v8232_v51 }
  0xa8   : > { %v8295_v63 = vpop.f32.mrf.mxu3  ;;  %6982 = vmatmul.msk.f32.gmra.mxu2 %vm537_vm1, %v8367_v26  ;;  %v8413_v26 = vld [vmem:[%s8036_s8 + $0xfa] sm:$0xff] }
  0xa9   : > { %14140 = vst [vmem:[#allocation20_spill] sm:$0xff] %v8295_v63  ;;  %v8300_v1 = vpop.f32.mrf.mxu0  ;;  %v8495_v63 = vld [vmem:[%s8036_s8 + $0xf8] sm:$0xff] }
  0xaa   : > { %14142 = vst [vmem:[#allocation22_spill] sm:$0xff] %v8300_v1  ;;  %v8307_v3 = vpop.f32.mrf.mxu1  ;;  %v8425_v1 = vld [vmem:[%s8036_s8 + $0xc8] sm:$0xff] }
  0xab   : > { %14143 = vst [vmem:[#allocation23_spill] sm:$0xff] %v8307_v3  ;;  %v8395_v3 = vld [vmem:[%s8036_s8 + $0xf9] sm:$0xff]  ;;  %v1122_v59 = vpop.f32.mrf.mxu2 }
  0xac   : > { %6913 = vmatmul.msk.f32.gmra.mxu0 %vm537_vm1, %v8303_v2  ;;  %14158 = vst [vmem:[#allocation38_spill] sm:$0xff] %v8395_v3 }
  0xad   : > { %6941 = vmatmul.msk.f32.gmra.mxu1 %vm537_vm1, %v8310_v4  ;;  %7036 = vmatmul.msk.f32.gmra.mxu3 %vm537_vm1, %v8249_v54  ;;  %14162 = vst [vmem:[#allocation42_spill] sm:$0xff] %v8413_v26 }
  0xae   : > { %14165 = vst [vmem:[#allocation45_spill] sm:$0xff] %v8425_v1 }
  0xaf   : > { %14178 = vst [vmem:[#allocation58_spill] sm:$0xff] %v8495_v63 }
  0xb0   : > { %v8318_v5 = vpop.f32.mrf.mxu3  ;;  %6983 = vmatmul.msk.f32.gmra.mxu2 %vm537_vm1, %v8390_v39 }
  0xb1   : > { %14144 = vst [vmem:[#allocation24_spill] sm:$0xff] %v8318_v5  ;;  %v8323_v7 = vpop.f32.mrf.mxu0  ;;  %v8492_v5 = vld [vmem:[%s8036_s8 + $0x139] sm:$0xff] }
  0xb2   : > { %14146 = vst [vmem:[#allocation26_spill] sm:$0xff] %v8323_v7  ;;  %v8330_v10 = vpop.f32.mrf.mxu1  ;;  %v8418_v7 = vld [vmem:[%s8036_s8 + $0x109] sm:$0xff] }
  0xb3   : > { %14147 = vst [vmem:[#allocation27_spill] sm:$0xff] %v8330_v10  ;;  %v8402_v10 = vld [vmem:[%s8036_s8 + $0xc0] sm:$0xff]  ;;  %v1125_v46 = vpop.f32.mrf.mxu2 }
  0xb4   : > { %6914 = vmatmul.msk.f32.gmra.mxu0 %vm537_vm1, %v8326_v8  ;;  %14160 = vst [vmem:[#allocation40_spill] sm:$0xff] %v8402_v10 }
  0xb5   : > { %6942 = vmatmul.msk.f32.gmra.mxu1 %vm537_vm1, %v8333_v11  ;;  %7037 = vmatmul.msk.f32.gmra.mxu3 %vm537_vm1, %v8266_v57  ;;  %14163 = vst [vmem:[#allocation43_spill] sm:$0xff] %v8418_v7 }
  0xb6   : > { %14177 = vst [vmem:[#allocation57_spill] sm:$0xff] %v8492_v5 }
  0xb8   : > { %v8341_v13 = vpop.f32.mrf.mxu3  ;;  %6984 = vmatmul.msk.f32.gmra.mxu2 %vm537_vm1, %v8413_v26  ;;  %v8438_v26 = vld [vmem:[%s8036_s8 + $0x111] sm:$0xff] }
  0xb9   : > { %14148 = vst [vmem:[#allocation28_spill] sm:$0xff] %v8341_v13  ;;  %v8346_v17 = vpop.f32.mrf.mxu0  ;;  %v8479_v13 = vld [vmem:[%s8036_s8 + $0xf0] sm:$0xff] }
  0xba   : > { %v8353_v21 = vpop.f32.mrf.mxu1  ;;  %14167 = vst [vmem:[#allocation47_spill] sm:$0xff] %v8438_v26 }
  0xbb   : > { %14150 = vst [vmem:[#allocation30_spill] sm:$0xff] %v8353_v21 }
  0xbc   : > { %6915 = vmatmul.msk.f32.gmra.mxu0 %vm537_vm1, %v8349_v18  ;;  %14175 = vst [vmem:[#allocation55_spill] sm:$0xff] %v8479_v13 }
  0xbd   : > { %6943 = vmatmul.msk.f32.gmra.mxu1 %vm537_vm1, %v8356_v22  ;;  %7038 = vmatmul.msk.f32.gmra.mxu3 %vm537_vm1, %v8287_v62 }
  0xc0   : > { %v8364_v24 = vpop.f32.mrf.mxu3 }
  0xc1   : > { %14152 = vst [vmem:[#allocation32_spill] sm:$0xff] %v8364_v24  ;;  %v8369_v27 = vpop.f32.mrf.mxu0  ;;  %v8476_v24 = vld [vmem:[%s8036_s8 + $0x129] sm:$0xff] }
  0xc2   : > { %v8376_v31 = vpop.f32.mrf.mxu1  ;;  %14174 = vst [vmem:[#allocation54_spill] sm:$0xff] %v8476_v24 }
  0xc3   : > { %14154 = vst [vmem:[#allocation34_spill] sm:$0xff] %v8376_v31 }
  0xc4   : > { %6916 = vmatmul.msk.f32.gmra.mxu0 %vm537_vm1, %v8372_v30 }
  0xc5   : > { %6944 = vmatmul.msk.f32.gmra.mxu1 %vm537_vm1, %v8379_v34  ;;  %7039 = vmatmul.msk.f32.gmra.mxu3 %vm537_vm1, %v8310_v4 }
  0xc8   : > { %v8387_v35 = vpop.f32.mrf.mxu3 }
  0xc9   : > { %14156 = vst [vmem:[#allocation36_spill] sm:$0xff] %v8387_v35  ;;  %v8392_v61 = vpop.f32.mrf.mxu0  ;;  %v8463_v35 = vld [vmem:[%s8036_s8 + $0xe0] sm:$0xff] }
  0xca   : > { %v8399_v31 = vpop.f32.mrf.mxu1  ;;  %14172 = vst [vmem:[#allocation52_spill] sm:$0xff] %v8463_v35 }
  0xcb   : > { %14159 = vst [vmem:[#allocation39_spill] sm:$0xff] %v8399_v31  ;;  %v8443_v31 = vld [vmem:[%s8036_s8 + $0xd8] sm:$0xff] }
  0xcc   : > { %6917 = vmatmul.msk.f32.gmra.mxu0 %vm537_vm1, %v8395_v3  ;;  %14169 = vst [vmem:[#allocation49_spill] sm:$0xff] %v8443_v31 }
  0xcd   : > { %6945 = vmatmul.msk.f32.gmra.mxu1 %vm537_vm1, %v8402_v10  ;;  %7040 = vmatmul.msk.f32.gmra.mxu3 %vm537_vm1, %v8333_v11 }
  0xd0   : > { %v8410_v21 = vpop.f32.mrf.mxu3 }
  0xd1   : > { %14161 = vst [vmem:[#allocation41_spill] sm:$0xff] %v8410_v21  ;;  %v8415_v39 = vpop.f32.mrf.mxu0 }
  0xd2   : > { %v8422_v14 = vpop.f32.mrf.mxu1 }
  0xd3   : > { %14164 = vst [vmem:[#allocation44_spill] sm:$0xff] %v8422_v14 }
  0xd4   : > { %6918 = vmatmul.msk.f32.gmra.mxu0 %vm537_vm1, %v8418_v7  ;;  %v8534_v7 = vld [vmem:[%s8036_s8 + $0x120] sm:$0xff] }
  0xd5   : > { %6946 = vmatmul.msk.f32.gmra.mxu1 %vm537_vm1, %v8425_v1  ;;  %7041 = vmatmul.msk.f32.gmra.mxu3 %vm537_vm1, %v8356_v22  ;;  %14182 = vst [vmem:[#allocation62_spill] sm:$0xff] %v8534_v7 }
  0xd8   : > { %v8433_v21 = vpop.f32.mrf.mxu3 }
  0xd9   : > { %14166 = vst [vmem:[#allocation46_spill] sm:$0xff] %v8433_v21  ;;  %v8435_v6 = vpop.f32.mrf.mxu0 }
  0xda   : > { %v8440_v14 = vpop.f32.mrf.mxu1 }
  0xdb   : > { %14168 = vst [vmem:[#allocation48_spill] sm:$0xff] %v8440_v14 }
  0xdc   : > { %6919 = vmatmul.msk.f32.gmra.mxu0 %vm537_vm1, %v8438_v26  ;;  %v1128_v26 = vpop.f32.mrf.mxu2 }
  0xdd   : > { %6947 = vmatmul.msk.f32.gmra.mxu1 %vm537_vm1, %v8443_v31  ;;  %7042 = vmatmul.msk.f32.gmra.mxu3 %vm537_vm1, %v8379_v34 }
  0xe0   : > { %v8455_v21 = vpop.f32.mrf.mxu3 }
  0xe1   : > { %14170 = vst [vmem:[#allocation50_spill] sm:$0xff] %v8455_v21  ;;  %v8457_v14 = vpop.f32.mrf.mxu0 }
  0xe2   : > { %v876_v58 = vpop.f32.mrf.mxu1 }
  0xe3   : > { %v877_v34 = vadd.f32 %v876_v58, %v8346_v17 }
  0xe4   : > { %6920 = vmatmul.msk.f32.gmra.mxu0 %vm537_vm1, %v8460_v0 }
  0xe5   : > { %6948 = vmatmul.msk.f32.gmra.mxu1 %vm537_vm1, %v8463_v35  ;;  %7043 = vmatmul.msk.f32.gmra.mxu3 %vm537_vm1, %v8402_v10  ;;  %v8521_v10 = vld [vmem:[%s8036_s8 + $0x110] sm:$0xff] }
  0xe8   : > { %v8471_v21 = vpop.f32.mrf.mxu3 }
  0xe9   : > { %14173 = vst [vmem:[#allocation53_spill] sm:$0xff] %v8471_v21  ;;  %v8473_v55 = vpop.f32.mrf.mxu0 }
  0xea   : > { %v879_v52 = vpop.f32.mrf.mxu1 }
  0xeb   : > { %v880_v58 = vadd.f32 %v879_v52, %v8369_v27 }
  0xec   : > { %6921 = vmatmul.msk.f32.gmra.mxu0 %vm537_vm1, %v8476_v24 }
  0xed   : > { %6949 = vmatmul.msk.f32.gmra.mxu1 %vm537_vm1, %v8479_v13  ;;  %7044 = vmatmul.msk.f32.gmra.mxu3 %vm537_vm1, %v8425_v1  ;;  %v1213_v17 = vadd.f32 %v1125_v46, %v880_v58 }
  0xf0   : > { %v8487_v49 = vpop.f32.mrf.mxu3 }
  0xf1   : > { %14176 = vst [vmem:[#allocation56_spill] sm:$0xff] %v8487_v49  ;;  %v8489_v21 = vpop.f32.mrf.mxu0 }
  0xf2   : > { %v882_v0 = vpop.f32.mrf.mxu1 }
  0xf3   : > { %v883_v52 = vadd.f32 %v882_v0, %v8392_v61 }
  0xf4   : > { %6922 = vmatmul.msk.f32.gmra.mxu0 %vm537_vm1, %v8492_v5 }
  0xf5   : > { %6950 = vmatmul.msk.f32.gmra.mxu1 %vm537_vm1, %v8495_v63  ;;  %7045 = vmatmul.msk.f32.gmra.mxu3 %vm537_vm1, %v8443_v31  ;;  %v1214_v46 = vadd.f32 %v1128_v26, %v883_v52 }
  0xf8   : > { %v8503_v24 = vpop.f32.mrf.mxu3 }
  0xf9   : > { %14179 = vst [vmem:[#allocation59_spill] sm:$0xff] %v8503_v24  ;;  %v8505_v49 = vpop.f32.mrf.mxu0 }
  0xfa   : > { %v885_v1 = vpop.f32.mrf.mxu1 }
  0xfb   : > { %v886_v61 = vadd.f32 %v885_v1, %v8415_v39  ;;  %v8592_v1 = vld [vmem:[%s8036_s8 + $0x150] sm:$0xff] }
  0xfc   : > { %7095 = vmatmul.msk.f32.vlgmr.msrb.gmra.mxu0 %vm537_vm1, %v8066_v9  ;;  %v1131_v9 = vpop.f32.mrf.mxu2 }
  0xfd   : > { %6951 = vmatmul.msk.f32.gmra.mxu1 %vm537_vm1, %v8508_v43  ;;  %7046 = vmatmul.msk.f32.gmra.mxu3 %vm537_vm1, %v8463_v35  ;;  %v1215_v26 = vadd.f32 %v1131_v9, %v886_v61 }
 0x100   : > { %v8516_v5 = vpop.f32.mrf.mxu3 }
 0x101   : > { %14180 = vst [vmem:[#allocation60_spill] sm:$0xff] %v8516_v5  ;;  %v8518_v31 = vpop.f32.mrf.mxu0 }
 0x102   : > { %v888_v24 = vpop.f32.mrf.mxu1 }
 0x103   : > { %v889_v39 = vadd.f32 %v888_v24, %v8435_v6  ;;  %v8608_v6 = vld [vmem:[%s8036_s8 + $0x158] sm:$0xff] }
 0x104   : > { %7096 = vmatmul.msk.f32.gmra.mxu0 %vm537_vm1, %v8075_v12  ;;  %v1212_v12 = vadd.f32 %v1122_v59, %v877_v34 }
 0x105   : > { %6952 = vmatmul.msk.f32.gmra.mxu1 %vm537_vm1, %v8521_v10  ;;  %7047 = vmatmul.msk.f32.gmra.mxu3 %vm537_vm1, %v8479_v13  ;;  %v1134_v13 = vpop.f32.mrf.mxu2 }
 0x106   : > { %v1216_v61 = vadd.f32 %v1134_v13, %v889_v39 }
 0x108   : > { %v8529_v40 = vpop.f32.mrf.mxu3 }
 0x109   : > { %14181 = vst [vmem:[#allocation61_spill] sm:$0xff] %v8529_v40  ;;  %v8531_v35 = vpop.f32.mrf.mxu0 }
 0x10a   : > { %v891_v5 = vpop.f32.mrf.mxu1 }
 0x10b   : > { %v892_v24 = vadd.f32 %v891_v5, %v8457_v14  ;;  %v8624_v5 = vld [vmem:[%s8036_s8 + $0x168] sm:$0xff] }
 0x10c   : > { %7097 = vmatmul.msk.f32.gmra.mxu0 %vm537_vm1, %v8089_v16 }
 0x10d   : > { %6953 = vmatmul.msk.f32.gmra.mxu1 %vm537_vm1, %v8534_v7  ;;  %7048 = vmatmul.msk.f32.gmra.mxu3 %vm537_vm1, %v8495_v63  ;;  %v8562_v63 = vld [vmem:[%s8036_s8 + $0x138] sm:$0xff] }
 0x110   : > { %v1401_v40 = vpop.f32.mrf.mxu3 }
 0x111   : > { %v8543_v36 = vadd.f32 %v1401_v40, %v1212_v12  ;;  %v8545_v3 = vpop.f32.mrf.mxu0  ;;  %v1137_v12 = vpop.f32.mrf.mxu2 }
 0x112   : > { %v894_v22 = vpop.f32.mrf.mxu1  ;;  %v1217_v13 = vadd.f32 %v1137_v12, %v892_v24  ;;  %v7225_v24 = vld [vmem:[%s14128_s2 + $0x18] sm:$0xf] }
 0x113   : > { %14183 = vst [vmem:[#allocation63_spill] sm:$0xff] %v8543_v36  ;;  %v895_v14 = vadd.f32 %v894_v22, %v8473_v55  ;;  %7226 = vmatpush.msk.msrb.mxu2 %vm634_vm0, %v7225_v24 }
 0x114   : > { %7098 = vmatmul.msk.f32.gmra.mxu0 %vm537_vm1, %v8103_v20  ;;  %7227 = vmatmul.msk.f32.vlgmr.msrb.gmra.mxu2 %vm537_vm1, %v8166_v38 }
 0x115   : > { %6954 = vmatmul.msk.f32.gmra.mxu1 %vm537_vm1, %v8548_v32  ;;  %7049 = vmatmul.msk.f32.gmra.mxu3 %vm537_vm1, %v8508_v43 }
 0x118   : > { %v1404_v40 = vpop.f32.mrf.mxu3 }
 0x119   : > { %v8557_v34 = vadd.f32 %v1404_v40, %v1213_v17  ;;  %v8559_v59 = vpop.f32.mrf.mxu0  ;;  %v1140_v0 = vpop.f32.mrf.mxu2 }
 0x11a   : > { %v897_v36 = vpop.f32.mrf.mxu1  ;;  %v1218_v12 = vadd.f32 %v1140_v0, %v895_v14  ;;  %v7159_v14 = vld [vmem:[%s14128_s2 + $0x14] sm:$0xf] }
 0x11b   : > { %14185 = vst [vmem:[#allocation65_spill] sm:$0xff] %v8557_v34  ;;  %v8576_v34 = vld [vmem:[%s8036_s8 + $0x140] sm:$0xff]  ;;  %v898_v0 = vadd.f32 %v897_v36, %v8489_v21  ;;  %7160 = vmatpush.msk.msrb.mxu1 %vm634_vm0, %v7159_v14 }
 0x11c   : > { %7099 = vmatmul.msk.f32.gmra.mxu0 %vm537_vm1, %v8121_v25  ;;  %14187 = vst [vmem:[#allocation67_spill] sm:$0xff] %v8576_v34  ;;  %7228 = vmatmul.msk.f32.gmra.mxu2 %vm537_vm1, %v8183_v42 }
 0x11d   : > { %6955 = vmatmul.msk.f32.gmra.mxu1 %vm537_vm1, %v8562_v63  ;;  %7050 = vmatmul.msk.f32.gmra.mxu3 %vm537_vm1, %v8521_v10 }
 0x120   : > { %v1407_v27 = vpop.f32.mrf.mxu3 }
 0x121   : > { %v8571_v58 = vadd.f32 %v1407_v27, %v1214_v46  ;;  %v8573_v17 = vpop.f32.mrf.mxu0  ;;  %v1143_v9 = vpop.f32.mrf.mxu2 }
 0x122   : > { %v900_v40 = vpop.f32.mrf.mxu1  ;;  %v1219_v38 = vadd.f32 %v1143_v9, %v898_v0 }
 0x123   : > { %14186 = vst [vmem:[#allocation66_spill] sm:$0xff] %v8571_v58  ;;  %v901_v14 = vadd.f32 %v900_v40, %v8505_v49  ;;  %v964_v49 = vld [vmem:[%s8036_s8 + $0xa] sm:$0xff] }
 0x124   : > { %7100 = vmatmul.msk.f32.gmra.mxu0 %vm537_vm1, %v8135_v29  ;;  %7229 = vmatmul.msk.f32.gmra.mxu2 %vm537_vm1, %v8199_v45 }
 0x125   : > { %6956 = vmatmul.msk.f32.gmra.mxu1 %vm537_vm1, %v8576_v34  ;;  %7051 = vmatmul.msk.f32.gmra.mxu3 %vm537_vm1, %v8534_v7 }
 0x128   : > { %v1410_v52 = vpop.f32.mrf.mxu3 }
 0x129   : > { %v8585_v46 = vadd.f32 %v1410_v52, %v1215_v26  ;;  %v8587_v27 = vpop.f32.mrf.mxu0  ;;  %v1146_v39 = vpop.f32.mrf.mxu2 }
 0x12a   : > { %v8589_v58 = vpop.f32.mrf.mxu1  ;;  %v1220_v9 = vadd.f32 %v1146_v39, %v901_v14 }
 0x12b   : > { %14188 = vst [vmem:[#allocation68_spill] sm:$0xff] %v8585_v46  ;;  %v904_v40 = vadd.f32 %v8589_v58, %v8518_v31 }
 0x12c   : > { %7101 = vmatmul.msk.f32.gmra.mxu0 %vm537_vm1, %v8149_v33  ;;  %7230 = vmatmul.msk.f32.gmra.mxu2 %vm537_vm1, %v8215_v48 }
 0x12d   : > { %6957 = vmatmul.msk.f32.gmra.mxu1 %vm537_vm1, %v8592_v1  ;;  %7052 = vmatmul.msk.f32.gmra.mxu3 %vm537_vm1, %v8548_v32 }
 0x130   : > { %v1413_v26 = vpop.f32.mrf.mxu3 }
 0x131   : > { %v8601_v52 = vadd.f32 %v1413_v26, %v1216_v61  ;;  %v8603_v46 = vpop.f32.mrf.mxu0  ;;  %v1149_v22 = vpop.f32.mrf.mxu2 }
 0x132   : > { %v8605_v7 = vpop.f32.mrf.mxu1  ;;  %v1221_v39 = vadd.f32 %v1149_v22, %v904_v40 }
 0x133   : > { %14189 = vst [vmem:[#allocation69_spill] sm:$0xff] %v8601_v52 }
 0x134   : > { %7102 = vmatmul.msk.f32.gmra.mxu0 %vm537_vm1, %v8163_v37  ;;  %7231 = vmatmul.msk.f32.gmra.mxu2 %vm537_vm1, %v8232_v51 }
 0x135   : > { %6958 = vmatmul.msk.f32.gmra.mxu1 %vm537_vm1, %v8608_v6  ;;  %7053 = vmatmul.msk.f32.gmra.mxu3 %vm537_vm1, %v8562_v63 }
 0x138   : > { %v1416_v61 = vpop.f32.mrf.mxu3 }
 0x139   : > { %v8617_v26 = vadd.f32 %v1416_v61, %v1217_v13  ;;  %v8619_v52 = vpop.f32.mrf.mxu0 }
 0x13a   : > { %v8621_v32 = vpop.f32.mrf.mxu1 }
 0x13b   : > { %14190 = vst [vmem:[#allocation70_spill] sm:$0xff] %v8617_v26 }
 0x13c   : > { %7103 = vmatmul.msk.f32.gmra.mxu0 %vm537_vm1, %v8180_v41  ;;  %7232 = vmatmul.msk.f32.gmra.mxu2 %vm537_vm1, %v8249_v54 }
 0x13d   : > { %6959 = vmatmul.msk.f32.gmra.mxu1 %vm537_vm1, %v8624_v5  ;;  %7054 = vmatmul.msk.f32.gmra.mxu3 %vm537_vm1, %v8576_v34  ;;  %v8646_v34 = vld [vmem:[%s8036_s8 + $0x170] sm:$0xff] }
 0x140   : > { %v1419_v13 = vpop.f32.mrf.mxu3 }
 0x141   : > { %v8637_v61 = vadd.f32 %v1419_v13, %v1218_v12  ;;  %v8639_v55 = vpop.f32.mrf.mxu0  ;;  %v963_v13 = vld [vmem:[%s8036_s8 + $0x2] sm:$0xff] }
 0x142   : > { %v8643_v26 = vpop.f32.mrf.mxu1 }
 0x143   : > { %14191 = vst [vmem:[#allocation71_spill] sm:$0xff] %v8637_v61  ;;  %v1152_v61 = vpop.f32.mrf.mxu2 }
 0x144   : > { %7104 = vmatmul.msk.f32.gmra.mxu0 %vm537_vm1, %v8196_v44  ;;  %7233 = vmatmul.msk.f32.gmra.mxu2 %vm537_vm1, %v8266_v57 }
 0x145   : > { %6960 = vmatmul.msk.f32.gmra.mxu1 %vm537_vm1, %v8646_v34  ;;  %7055 = vmatmul.msk.f32.gmra.mxu3 %vm537_vm1, %v8592_v1 }
 0x148   : > { %v1422_v12 = vpop.f32.mrf.mxu3 }
 0x149   : > { %v8659_v24 = vadd.f32 %v1422_v12, %v1219_v38  ;;  %v8661_v36 = vpop.f32.mrf.mxu0 }
 0x14a   : > { %v915_v21 = vpop.f32.mrf.mxu1 }
 0x14b   : > { %14192 = vst [vmem:[#allocation72_spill] sm:$0xff] %v8659_v24  ;;  %v1155_v45 = vpop.f32.mrf.mxu2 }
 0x14c   : > { %7105 = vmatmul.msk.f32.gmra.mxu0 %vm537_vm1, %v8212_v47  ;;  %7234 = vmatmul.msk.f32.gmra.mxu2 %vm537_vm1, %v8287_v62 }
 0x14d   : > { %6963 = vmatmul.msk.f32.vlgmr.msra.gmra.mxu1 %vm537_vm1, %v963_v13  ;;  %7056 = vmatmul.msk.f32.gmra.mxu3 %vm537_vm1, %v8608_v6  ;;  %v7291_v13 = vld [vmem:[%s14128_s2 + $0x1c] sm:$0xf] }
 0x14e   : > { %7292 = vmatpush.msk.msra.mxu3 %vm634_vm0, %v7291_v13  ;;  %v907_v13 = vadd.f32 %v8605_v7, %v8531_v35  ;;  %v8711_v35 = vld [vmem:[%s8036_s8 + $0x180] sm:$0xff] }
 0x150   : > { %v1425_v0 = vpop.f32.mrf.mxu3  ;;  %v1222_v22 = vadd.f32 %v1152_v61, %v907_v13 }
 0x151   : > { %v8672_v38 = vadd.f32 %v1425_v0, %v1220_v9  ;;  %v8674_v12 = vpop.f32.mrf.mxu0  ;;  %v965_v0 = vld [vmem:[%s8036_s8 + $0x1a] sm:$0xff] }
 0x152   : > { %v918_v42 = vpop.f32.mrf.mxu1 }
 0x154   : > { %7106 = vmatmul.msk.f32.gmra.mxu0 %vm537_vm1, %v8227_v50  ;;  %7235 = vmatmul.msk.f32.gmra.mxu2 %vm537_vm1, %v8310_v4 }
 0x155   : > { %6964 = vmatmul.msk.f32.gmra.mxu1 %vm537_vm1, %v964_v49  ;;  %7057 = vmatmul.msk.f32.gmra.mxu3 %vm537_vm1, %v8624_v5  ;;  %v1158_v49 = vpop.f32.mrf.mxu2 }
 0x158   : > { %v1428_v14 = vpop.f32.mrf.mxu3 }
 0x159   : > { %v8690_v9 = vadd.f32 %v1428_v14, %v1221_v39  ;;  %v8692_v31 = vpop.f32.mrf.mxu0  ;;  %v910_v14 = vadd.f32 %v8621_v32, %v8545_v3  ;;  %v8727_v32 = vld [vmem:[%s8036_s8 + $0x188] sm:$0xff] }
 0x15a   : > { %v921_v58 = vpop.f32.mrf.mxu1 }
 0x15b   : > { %v1223_v61 = vadd.f32 %v1155_v45, %v910_v14 }
 0x15c   : > { %7107 = vmatmul.msk.f32.gmra.mxu0 %vm537_vm1, %v8244_v53  ;;  %7236 = vmatmul.msk.f32.gmra.mxu2 %vm537_vm1, %v8333_v11 }
 0x15d   : > { %6965 = vmatmul.msk.f32.gmra.mxu1 %vm537_vm1, %v965_v0  ;;  %7058 = vmatmul.msk.f32.gmra.mxu3 %vm537_vm1, %v8646_v34  ;;  %v1161_v51 = vpop.f32.mrf.mxu2 }
 0x160   : > { %v1431_v40 = vpop.f32.mrf.mxu3 }
 0x161   : > { %v8704_v39 = vadd.f32 %v1431_v40, %v1222_v22  ;;  %v8706_v48 = vpop.f32.mrf.mxu0 }
 0x162   : > { %v924_v7 = vpop.f32.mrf.mxu1 }
 0x164   : > { %7108 = vmatmul.msk.f32.gmra.mxu0 %vm537_vm1, %v8261_v56  ;;  %v913_v56 = vadd.f32 %v8643_v26, %v8559_v59  ;;  %v916_v59 = vadd.f32 %v915_v21, %v8573_v17  ;;  %v919_v17 = vadd.f32 %v918_v42, %v8587_v27  ;;  %v922_v27 = vadd.f32 %v921_v58, %v8603_v46 }
 0x165   : > { %7059 = vmatmul.msk.f32.gmra.mxu3 %vm537_vm1, %v8711_v35  ;;  %7161 = vmatmul.msk.f32.vlgmr.msrb.gmra.mxu1 %vm537_vm1, %v965_v0  ;;  %v1164_v26 = vpop.f32.mrf.mxu2  ;;  %v925_v46 = vadd.f32 %v924_v7, %v8619_v52 }
 0x166   : > { %v1224_v3 = vadd.f32 %v1158_v49, %v913_v56 }
 0x168   : > { %v1434_v13 = vpop.f32.mrf.mxu3 }
 0x169   : > { %v8720_v22 = vadd.f32 %v1434_v13, %v1223_v61  ;;  %v8722_v40 = vpop.f32.mrf.mxu0 }
 0x16a   : > { %v927_v24 = vpop.f32.mrf.mxu1 }
 0x16b   : > { %v928_v7 = vadd.f32 %v927_v24, %v8639_v55 }
 0x16c   : > { %7109 = vmatmul.msk.f32.gmra.mxu0 %vm537_vm1, %v8280_v60 }
 0x16d   : > { %7060 = vmatmul.msk.f32.gmra.mxu3 %vm537_vm1, %v8727_v32  ;;  %7162 = vmatmul.msk.f32.gmra.mxu1 %vm537_vm1, %v8084_v15  ;;  %v1225_v15 = vadd.f32 %v1161_v51, %v916_v59 }
 0x170   : > { %v1437_v45 = vpop.f32.mrf.mxu3 }
 0x171   : > { %v8737_v0 = vadd.f32 %v1437_v45, %v1224_v3  ;;  %v8739_v54 = vpop.f32.mrf.mxu0  ;;  %v14198_v3 = vld [vmem:[#allocation31_spill] sm:$0xff]  ;;  %v14200_v45 = vld [vmem:[#allocation10_spill] sm:$0xff] }
 0x172   : > { %v930_v14 = vpop.f32.mrf.mxu1  ;;  %7237 = vmatmul.msk.f32.gmra.mxu2 %vm537_vm1, %v14198_v3 }
 0x173   : > { %v931_v55 = vadd.f32 %v930_v14, %v8661_v36 }
 0x174   : > { %7110 = vmatmul.msk.f32.gmra.mxu0 %vm537_vm1, %v8303_v2 }
 0x175   : > { %7163 = vmatmul.msk.f32.gmra.mxu1 %vm537_vm1, %v8098_v19  ;;  %7293 = vmatmul.msk.f32.vlgmr.msra.gmra.mxu3 %vm537_vm1, %v8089_v16  ;;  %v1167_v16 = vpop.f32.mrf.mxu2  ;;  %v1226_v19 = vadd.f32 %v1164_v26, %v919_v17 }
 0x178   : > { %v1440_v60 = vpop.f32.mrf.mxu3 }
 0x179   : > { %v8750_v49 = vadd.f32 %v1440_v60, %v1225_v15  ;;  %v8752_v61 = vpop.f32.mrf.mxu0  ;;  %v14202_v60 = vld [vmem:[#allocation35_spill] sm:$0xff] }
 0x17a   : > { %v933_v57 = vpop.f32.mrf.mxu1  ;;  %7238 = vmatmul.msk.f32.gmra.mxu2 %vm537_vm1, %v14202_v60 }
 0x17b   : > { %14193 = vst [vmem:[#allocation73_spill] sm:$0xff] %v8750_v49  ;;  %v934_v14 = vadd.f32 %v933_v57, %v8674_v12  ;;  %v14247_v49 = vld [vmem:[#allocation62_spill] sm:$0xff] }
 0x17c   : > { %7111 = vmatmul.msk.f32.gmra.mxu0 %vm537_vm1, %v8326_v8 }
 0x17d   : > { %7164 = vmatmul.msk.f32.gmra.mxu1 %vm537_vm1, %v8112_v23  ;;  %7294 = vmatmul.msk.f32.gmra.mxu3 %vm537_vm1, %v8103_v20  ;;  %v1227_v20 = vadd.f32 %v1167_v16, %v922_v27  ;;  %v1170_v23 = vpop.f32.mrf.mxu2  ;;  %v14203_v16 = vld [vmem:[#allocation43_spill] sm:$0xff] }
 0x180   : > { %v1443_v2 = vpop.f32.mrf.mxu3 }
 0x181   : > { %v8763_v21 = vadd.f32 %v1443_v2, %v1226_v19  ;;  %v8765_v13 = vpop.f32.mrf.mxu0  ;;  %v14204_v19 = vld [vmem:[#allocation11_spill] sm:$0xff] }
 0x182   : > { %v936_v62 = vpop.f32.mrf.mxu1 }
 0x183   : > { %14194 = vst [vmem:[#allocation74_spill] sm:$0xff] %v8763_v21  ;;  %v937_v57 = vadd.f32 %v936_v62, %v8692_v31 }
 0x184   : > { %7112 = vmatmul.msk.f32.gmra.mxu0 %vm537_vm1, %v8349_v18 }
 0x185   : > { %7165 = vmatmul.msk.f32.gmra.mxu1 %vm537_vm1, %v8130_v28  ;;  %7295 = vmatmul.msk.f32.gmra.mxu3 %vm537_vm1, %v8121_v25  ;;  %v14196_v28 = vld [vmem:[#allocation9_spill] sm:$0xff]  ;;  %v1228_v25 = vadd.f32 %v1170_v23, %v925_v46  ;;  %v1173_v11 = vpop.f32.mrf.mxu2  ;;  %v14206_v23 = vld [vmem:[#allocation40_spill] sm:$0xff] }
 0x186   : > { %7239 = vmatmul.msk.f32.gmra.mxu2 %vm537_vm1, %v14206_v23  ;;  %v14209_v46 = vld [vmem:[#allocation12_spill] sm:$0xff] }
 0x188   : > { %v1446_v8 = vpop.f32.mrf.mxu3 }
 0x189   : > { %v8776_v42 = vadd.f32 %v1446_v8, %v1227_v20  ;;  %v8778_v51 = vpop.f32.mrf.mxu0  ;;  %v14208_v8 = vld [vmem:[#allocation47_spill] sm:$0xff] }
 0x18a   : > { %v939_v4 = vpop.f32.mrf.mxu1 }
 0x18b   : > { %14195 = vst [vmem:[#allocation75_spill] sm:$0xff] %v8776_v42  ;;  %v940_v62 = vadd.f32 %v939_v4, %v8706_v48 }
 0x18c   : > { %7113 = vmatmul.msk.f32.gmra.mxu0 %vm537_vm1, %v8372_v30  ;;  %v14199_v30 = vld [vmem:[#allocation38_spill] sm:$0xff] }
 0x18d   : > { %7166 = vmatmul.msk.f32.gmra.mxu1 %vm537_vm1, %v14196_v28  ;;  %7296 = vmatmul.msk.f32.gmra.mxu3 %vm537_vm1, %v8135_v29  ;;  %v1229_v29 = vadd.f32 %v1173_v11, %v928_v7  ;;  %v1176_v24 = vpop.f32.mrf.mxu2  ;;  %v14212_v11 = vld [vmem:[#allocation45_spill] sm:$0xff]  ;;  %v14214_v7 = vld [vmem:[#allocation51_spill] sm:$0xff] }
 0x18e   : > { %7240 = vmatmul.msk.f32.gmra.mxu2 %vm537_vm1, %v14212_v11  ;;  %v8888_v11 = vld [vmem:[%s8036_s8 + $0x141] sm:$0xff] }
 0x190   : > { %v1449_v18 = vpop.f32.mrf.mxu3 }
 0x191   : > { %v8789_v58 = vadd.f32 %v1449_v18, %v1228_v25  ;;  %v8791_v56 = vpop.f32.mrf.mxu0 }
 0x192   : > { %v942_v52 = vpop.f32.mrf.mxu1 }
 0x193   : > { %14197 = vst [vmem:[#allocation9_spill] sm:$0xff] %v8789_v58  ;;  %v943_v4 = vadd.f32 %v942_v52, %v8722_v40  ;;  %v8977_v58 = vld [vmem:[%s8036_s8 + $0x181] sm:$0xff] }
 0x194   : > { %7114 = vmatmul.msk.f32.gmra.mxu0 %vm537_vm1, %v14199_v30  ;;  %v14215_v30 = vld [vmem:[#allocation13_spill] sm:$0xff] }
 0x195   : > { %7167 = vmatmul.msk.f32.gmra.mxu1 %vm537_vm1, %v14200_v45  ;;  %7297 = vmatmul.msk.f32.gmra.mxu3 %vm537_vm1, %v8149_v33  ;;  %v1230_v33 = vadd.f32 %v1176_v24, %v931_v55  ;;  %v14218_v55 = vld [vmem:[#allocation49_spill] sm:$0xff]  ;;  %v14220_v24 = vld [vmem:[#allocation54_spill] sm:$0xff] }
 0x196   : > { %7241 = vmatmul.msk.f32.gmra.mxu2 %vm537_vm1, %v14218_v55 }
 0x198   : > { %v1452_v59 = vpop.f32.mrf.mxu3 }
 0x199   : > { %v8802_v26 = vadd.f32 %v1452_v59, %v1229_v29  ;;  %v8804_v15 = vpop.f32.mrf.mxu0 }
 0x19a   : > { %v945_v17 = vpop.f32.mrf.mxu1 }
 0x19b   : > { %14201 = vst [vmem:[#allocation31_spill] sm:$0xff] %v8802_v26  ;;  %v14262_v26 = vld [vmem:[#allocation42_spill] sm:$0xff] }
 0x19c   : > { %7115 = vmatmul.msk.f32.gmra.mxu0 %vm537_vm1, %v14203_v16  ;;  %v14221_v16 = vld [vmem:[#allocation14_spill] sm:$0xff] }
 0x19d   : > { %7168 = vmatmul.msk.f32.gmra.mxu1 %vm537_vm1, %v14204_v19  ;;  %7298 = vmatmul.msk.f32.gmra.mxu3 %vm537_vm1, %v8163_v37  ;;  %v14210_v37 = vld [vmem:[#allocation20_spill] sm:$0xff] }
 0x19e   : > { %v1231_v28 = vadd.f32 %v14210_v37, %v934_v14  ;;  %v14224_v14 = vld [vmem:[#allocation52_spill] sm:$0xff] }
 0x19f   : > { %7242 = vmatmul.msk.f32.gmra.mxu2 %vm537_vm1, %v14224_v14  ;;  %v14228_v37 = vld [vmem:[#allocation32_spill] sm:$0xff] }
 0x1a0   : > { %v1455_v2 = vpop.f32.mrf.mxu3 }
 0x1a1   : > { %v8815_v27 = vadd.f32 %v1455_v2, %v1230_v33  ;;  %v8817_v20 = vpop.f32.mrf.mxu0 }
 0x1a2   : > { %v8821_v36 = vpop.f32.mrf.mxu1 }
 0x1a3   : > { %14205 = vst [vmem:[#allocation38_spill] sm:$0xff] %v8815_v27  ;;  %v7342_v27 = vld [vmem:[%s8036_s8 + $0xfa] sm:$0xff] }
 0x1a4   : > { %14207 = vst [vmem:[#allocation10_spill] sm:$0xff] %v8821_v36  ;;  %7116 = vmatmul.msk.f32.gmra.mxu0 %vm537_vm1, %v14208_v8  ;;  %v14226_v8 = vld [vmem:[#allocation57_spill] sm:$0xff] }
 0x1a5   : > { %7169 = vmatmul.msk.f32.gmra.mxu1 %vm537_vm1, %v14209_v46  ;;  %7299 = vmatmul.msk.f32.gmra.mxu3 %vm537_vm1, %v8180_v41  ;;  %v14216_v41 = vld [vmem:[#allocation24_spill] sm:$0xff]  ;;  %v14227_v46 = vld [vmem:[#allocation15_spill] sm:$0xff] }
 0x1a6   : > { %v1232_v45 = vadd.f32 %v14216_v41, %v937_v57  ;;  %v14230_v57 = vld [vmem:[#allocation55_spill] sm:$0xff]  ;;  %v14233_v41 = vld [vmem:[#allocation36_spill] sm:$0xff] }
 0x1a7   : > { %7243 = vmatmul.msk.f32.gmra.mxu2 %vm537_vm1, %v14230_v57 }
 0x1a8   : > { %v1458_v25 = vpop.f32.mrf.mxu3 }
 0x1a9   : > { %v8831_v18 = vadd.f32 %v1458_v25, %v1231_v28  ;;  %v8833_v3 = vpop.f32.mrf.mxu0  ;;  %v1234_v28 = vadd.f32 %v14228_v37, %v943_v4  ;;  %v7271_v4 = vld [vmem:[%s8036_s8 + $0xc1] sm:$0xff] }
 0x1aa   : > { %v8837_v12 = vpop.f32.mrf.mxu1  ;;  %v14240_v37 = vld [vmem:[#allocation39_spill] sm:$0xff] }
 0x1ab   : > { %14211 = vst [vmem:[#allocation35_spill] sm:$0xff] %v8831_v18 }
 0x1ac   : > { %14213 = vst [vmem:[#allocation43_spill] sm:$0xff] %v8837_v12  ;;  %7117 = vmatmul.msk.f32.gmra.mxu0 %vm537_vm1, %v14214_v7  ;;  %v946_v7 = vadd.f32 %v945_v17, %v8739_v54  ;;  %v14235_v54 = vld [vmem:[#allocation58_spill] sm:$0xff] }
 0x1ad   : > { %7170 = vmatmul.msk.f32.gmra.mxu1 %vm537_vm1, %v14215_v30  ;;  %7300 = vmatmul.msk.f32.gmra.mxu3 %vm537_vm1, %v8196_v44  ;;  %v14222_v44 = vld [vmem:[#allocation28_spill] sm:$0xff] }
 0x1ae   : > { %v1233_v19 = vadd.f32 %v14222_v44, %v940_v62  ;;  %v14232_v30 = vld [vmem:[#allocation16_spill] sm:$0xff]  ;;  %v14236_v44 = vld [vmem:[#allocation17_spill] sm:$0xff] }
 0x1af   : > { %7244 = vmatmul.msk.f32.gmra.mxu2 %vm537_vm1, %v14235_v54  ;;  %v14243_v54 = vld [vmem:[#allocation25_spill] sm:$0xff] }
 0x1b0   : > { %v1461_v29 = vpop.f32.mrf.mxu3 }
 0x1b1   : > { %v8847_v59 = vadd.f32 %v1461_v29, %v1232_v45  ;;  %v8849_v60 = vpop.f32.mrf.mxu0  ;;  %v1235_v45 = vadd.f32 %v14233_v41, %v946_v7  ;;  %v7272_v41 = vld [vmem:[%s8036_s8 + $0xc9] sm:$0xff] }
 0x1b2   : > { %v8853_v31 = vpop.f32.mrf.mxu1 }
 0x1b3   : > { %14217 = vst [vmem:[#allocation11_spill] sm:$0xff] %v8847_v59 }
 0x1b4   : > { %14219 = vst [vmem:[#allocation40_spill] sm:$0xff] %v8853_v31  ;;  %7118 = vmatmul.msk.f32.gmra.mxu0 %vm537_vm1, %v14220_v24  ;;  %v8907_v24 = vld [vmem:[%s8036_s8 + $0x151] sm:$0xff] }
 0x1b5   : > { %7171 = vmatmul.msk.f32.gmra.mxu1 %vm537_vm1, %v14221_v16  ;;  %7301 = vmatmul.msk.f32.gmra.mxu3 %vm537_vm1, %v8212_v47  ;;  %v7357_v47 = vld [vmem:[%s14128_s2 + $0x20] sm:$0xf]  ;;  %v7270_v16 = vld [vmem:[%s8036_s8 + $0xb1] sm:$0xff]  ;;  %s6799_s2 = scalar_lea.hbm %s13963_s13, %s7462_s16  ;;  %s7845_s16 = scalar_lea.hbm %s13963_s13, 512 }
 0x1b6   : > { %7358 = vmatpush.msk.msra.mxu0 %vm634_vm0, %v7357_v47  ;;  %v14239_v47 = vld [vmem:[#allocation18_spill] sm:$0xff]  ;;  %s6802_s21 = sshll.u32 %s6799_s2, 4  ;;  %s6803_s21 = int_to_ptr.hbm [resolvable:$true] %s6802_s21 }
 0x1b7   : > { %7245 = vmatmul.msk.f32.gmra.mxu2 %vm537_vm1, %v8508_v43  ;;  %v8939_v43 = vld [vmem:[%s8036_s8 + $0x169] sm:$0xff]  ;;  %s7839_s23 = sshra.s32 %s6803_s21, 4  ;;  %s7840_s23 = int_to_ptr.hbm [resolvable:$true] %s7839_s23 }
 0x1b8   : > { %v1464_v33 = vpop.f32.mrf.mxu3  ;;  %s7841_s22 = scalar_lea.hbm %s7840_s23, 256  ;;  %p7846_p3 = scmp.lt.s32.totalorder %s7840_s23, %s13963_s13 }
 0x1b9   : > { %v8863_v2 = vadd.f32 %v1464_v33, %v1233_v19  ;;  %v8865_v23 = vpop.f32.mrf.mxu0  ;;  %v8922_v33 = vld [vmem:[%s8036_s8 + $0x159] sm:$0xff]  ;;  %p7842_p0 = scmp.ne.s32.totalorder %s7840_s23, %s7841_s22  ;;  %p7847_p4 = scmp.lt.s32.totalorder %s7845_s16, %s7841_s22 }
 0x1ba   : > { %v8869_v48 = vpop.f32.mrf.mxu1 }
 0x1bb   : > { %14223 = vst [vmem:[#allocation47_spill] sm:$0xff] %v8863_v2  ;;  %p7843_p1 = pnand %p7842_p0, %p8008_p5  ;;  %p7848_p7 = por %p7847_p4, %p7846_p3 }
 0x1bc   : > { %14225 = vst [vmem:[#allocation12_spill] sm:$0xff] %v8869_v48  ;;  %7119 = vmatmul.msk.f32.gmra.mxu0 %vm537_vm1, %v14226_v8  ;;  %v2227_v8 = vpop.f32.mrf.mxu2 }
 0x1bd   : > { %7172 = vmatmul.msk.f32.gmra.mxu1 %vm537_vm1, %v14227_v46  ;;  %7302 = vmatmul.msk.f32.gmra.mxu3 %vm537_vm1, %v8227_v50  ;;  %v14238_v46 = vld [vmem:[#allocation21_spill] sm:$0xff]  ;;  %p7844_p2 = pneg %p7843_p1 }
 0x1bf   : > { %7246 = vmatmul.msk.f32.gmra.mxu2 %vm537_vm1, %v8521_v10  ;;  %p7849_p8 = pnand %p7848_p7, %p7844_p2 }
 0x1c0   : > { %v1467_v25 = vpop.f32.mrf.mxu3 }
 0x1c1   : > { %v8883_v40 = vadd.f32 %v1467_v25, %v1234_v28  ;;  %v8885_v52 = vpop.f32.mrf.mxu0  ;;  %v868_v28 = vadd.f32 %v14240_v37, %v14239_v47 }
 0x1c2   : > { %v8892_v50 = vpop.f32.mrf.mxu1 }
 0x1c3   : > { %14229 = vst [vmem:[#allocation20_spill] sm:$0xff] %v8883_v40 }
 0x1c4   : > { %14231 = vst [vmem:[#allocation45_spill] sm:$0xff] %v8892_v50  ;;  %7120 = vmatmul.msk.f32.gmra.mxu0 %vm537_vm1, %v8888_v11 }
 0x1c5   : > { %7173 = vmatmul.msk.f32.gmra.mxu1 %vm537_vm1, %v14232_v30  ;;  %7303 = vmatmul.msk.f32.gmra.mxu3 %vm537_vm1, %v8244_v53 }
 0x1c7   : > { %7247 = vmatmul.msk.f32.gmra.mxu2 %vm537_vm1, %v14247_v49 }
 0x1c8   : > { %v1470_v29 = vpop.f32.mrf.mxu3 }
 0x1c9   : > { %v8902_v55 = vadd.f32 %v1470_v29, %v1235_v45  ;;  %v8904_v62 = vpop.f32.mrf.mxu0  ;;  %v14242_v45 = vld [vmem:[#allocation59_spill] sm:$0xff] }
 0x1ca   : > { %v1113_v17 = vpop.f32.mrf.mxu1 }
 0x1cb   : > { %14234 = vst [vmem:[#allocation51_spill] sm:$0xff] %v8902_v55  ;;  %v1209_v57 = vadd.f32 %v1113_v17, %v868_v28  ;;  %v2230_v17 = vpop.f32.mrf.mxu2  ;;  %v8958_v28 = vld [vmem:[%s8036_s8 + $0x171] sm:$0xff] }
 0x1cc   : > { %7121 = vmatmul.msk.f32.gmra.mxu0 %vm537_vm1, %v8907_v24 }
 0x1cd   : > { %7174 = vmatmul.msk.f32.gmra.mxu1 %vm537_vm1, %v14236_v44  ;;  %7304 = vmatmul.msk.f32.gmra.mxu3 %vm537_vm1, %v7270_v16  ;;  %v1488_v29 = vadd.f32 %v14242_v45, %v1209_v57  ;;  %v14244_v16 = vld [vmem:[#allocation22_spill] sm:$0xff]  ;;  %v14245_v44 = vld [vmem:[#allocation44_spill] sm:$0xff] }
 0x1ce   : > { %v7273_v45 = vld [vmem:[%s8036_s8 + $0xd9] sm:$0xff] }
 0x1cf   : > { %v1766_v37 = vadd.f32 %v8752_v61, %v1488_v29  ;;  %v14250_v61 = vld [vmem:[#allocation26_spill] sm:$0xff]  ;;  %v14251_v29 = vld [vmem:[#allocation48_spill] sm:$0xff] }
 0x1d0   : > { %v8917_v53 = vpop.f32.mrf.mxu3 }
 0x1d1   : > { %14237 = vst [vmem:[#allocation13_spill] sm:$0xff] %v8917_v53  ;;  %v8919_v19 = vpop.f32.mrf.mxu0 }
 0x1d2   : > { %v1116_v14 = vpop.f32.mrf.mxu1 }
 0x1d3   : > { %v2233_v49 = vpop.f32.mrf.mxu2 }
 0x1d4   : > { %7122 = vmatmul.msk.f32.gmra.mxu0 %vm537_vm1, %v8922_v33 }
 0x1d5   : > { %7175 = vmatmul.msk.f32.gmra.mxu1 %vm537_vm1, %v14238_v46  ;;  %7305 = vmatmul.msk.f32.gmra.mxu3 %vm537_vm1, %v7271_v4  ;;  %v871_v4 = vadd.f32 %v14245_v44, %v14244_v16  ;;  %v14249_v44 = vld [vmem:[#allocation29_spill] sm:$0xff] }
 0x1d7   : > { %v1210_v10 = vadd.f32 %v1116_v14, %v871_v4  ;;  %v874_v4 = vadd.f32 %v14251_v29, %v14250_v61  ;;  %v14255_v61 = vld [vmem:[#allocation33_spill] sm:$0xff] }
 0x1d8   : > { %v8934_v25 = vpop.f32.mrf.mxu3 }
 0x1d9   : > { %14241 = vst [vmem:[#allocation24_spill] sm:$0xff] %v8934_v25  ;;  %v8936_v7 = vpop.f32.mrf.mxu0 }
 0x1da   : > { %v1119_v30 = vpop.f32.mrf.mxu1 }
 0x1db   : > { %v1211_v42 = vadd.f32 %v1119_v30, %v874_v4  ;;  %v8994_v4 = vld [vmem:[%s8036_s8 + $0x189] sm:$0xff] }
 0x1dc   : > { %7123 = vmatmul.msk.f32.gmra.mxu0 %vm537_vm1, %v8939_v43 }
 0x1dd   : > { %7176 = vmatmul.msk.f32.gmra.mxu1 %vm537_vm1, %v14243_v54  ;;  %7306 = vmatmul.msk.f32.gmra.mxu3 %vm537_vm1, %v7272_v41  ;;  %v14248_v54 = vld [vmem:[#allocation60_spill] sm:$0xff] }
 0x1de   : > { %v1489_v16 = vadd.f32 %v14248_v54, %v1210_v10  ;;  %v14254_v54 = vld [vmem:[#allocation61_spill] sm:$0xff] }
 0x1e0   : > { %v8952_v46 = vpop.f32.mrf.mxu3 }
 0x1e1   : > { %14246 = vst [vmem:[#allocation49_spill] sm:$0xff] %v8952_v46  ;;  %v8954_v47 = vpop.f32.mrf.mxu0 }
 0x1e2   : > { %v1948_v57 = vpop.f32.mrf.mxu1 }
 0x1e3   : > { %v2044_v41 = vadd.f32 %v1948_v57, %v1766_v37  ;;  %v1767_v57 = vadd.f32 %v8765_v13, %v1489_v16 }
 0x1e4   : > { %7124 = vmatmul.msk.f32.gmra.mxu0 %vm537_vm1, %v8958_v28 }
 0x1e5   : > { %v2323_v14 = vadd.f32 %v2227_v8, %v2044_v41  ;;  %7177 = vmatmul.msk.f32.gmra.mxu1 %vm537_vm1, %v14249_v44  ;;  %7307 = vmatmul.msk.f32.gmra.mxu3 %vm537_vm1, %v7273_v45  ;;  %v14253_v8 = vld [vmem:[#allocation64_spill] sm:$0xff]  ;;  %v1490_v44 = vadd.f32 %v14254_v54, %v1211_v42 }
 0x1e6   : > { %7248 = vmatmul.msk.f32.gmra.mxu2 %vm537_vm1, %v14253_v8  ;;  %v7274_v45 = vld [vmem:[%s8036_s8 + $0xe1] sm:$0xff] }
 0x1e7   : > { %v1768_v29 = vadd.f32 %v8778_v51, %v1490_v44 }
 0x1e8   : > { %v8971_v21 = vpop.f32.mrf.mxu3 }
 0x1e9   : > { %14252 = vst [vmem:[#allocation54_spill] sm:$0xff] %v8971_v21  ;;  %v8973_v37 = vpop.f32.mrf.mxu0 }
 0x1ea   : > { %v1951_v10 = vpop.f32.mrf.mxu1 }
 0x1eb   : > { %v2045_v41 = vadd.f32 %v1951_v10, %v1767_v57  ;;  %v2236_v57 = vpop.f32.mrf.mxu2 }
 0x1ec   : > { %7125 = vmatmul.msk.f32.gmra.mxu0 %vm537_vm1, %v8977_v58 }
 0x1ed   : > { %v2324_v30 = vadd.f32 %v2230_v17, %v2045_v41  ;;  %7178 = vmatmul.msk.f32.gmra.mxu1 %vm537_vm1, %v14255_v61  ;;  %7308 = vmatmul.msk.f32.gmra.mxu3 %vm537_vm1, %v7274_v45  ;;  %v7275_v17 = vld [vmem:[%s8036_s8 + $0xf1] sm:$0xff]  ;;  %v14258_v41 = vld [vmem:[#allocation63_spill] sm:$0xff] }
 0x1ee   : > { %7249 = vmatmul.msk.f32.gmra.mxu2 %vm537_vm1, %v8562_v63  ;;  %v14257_v45 = vld [vmem:[#allocation37_spill] sm:$0xff]  ;;  %v1769_v54 = vadd.f32 %v8791_v56, %v14258_v41 }
 0x1ef   : > { %v7325_v61 = vld [vmem:[%s8036_s8 + $0x32] sm:$0xff] }
 0x1f0   : > { %v8988_v13 = vpop.f32.mrf.mxu3 }
 0x1f1   : > { %14256 = vst [vmem:[#allocation14_spill] sm:$0xff] %v8988_v13  ;;  %v8990_v16 = vpop.f32.mrf.mxu0 }
 0x1f2   : > { %v1954_v42 = vpop.f32.mrf.mxu1 }
 0x1f3   : > { %v2046_v8 = vadd.f32 %v1954_v42, %v1768_v29  ;;  %v14261_v29 = vld [vmem:[#allocation67_spill] sm:$0xff] }
 0x1f4   : > { %7126 = vmatmul.msk.f32.gmra.mxu0 %vm537_vm1, %v8994_v4  ;;  %v7276_v42 = vld [vmem:[%s8036_s8 + $0xf9] sm:$0xff] }
 0x1f5   : > { %v2325_v10 = vadd.f32 %v2233_v49, %v2046_v8  ;;  %7179 = vmatmul.msk.f32.gmra.mxu1 %vm537_vm1, %v14257_v45  ;;  %7309 = vmatmul.msk.f32.gmra.mxu3 %vm537_vm1, %v7275_v17  ;;  %v2239_v17 = vpop.f32.mrf.mxu2 }
 0x1f6   : > { %7250 = vmatmul.msk.f32.gmra.mxu2 %vm537_vm1, %v14261_v29 }
 0x1f8   : > { %v2505_v51 = vpop.f32.mrf.mxu3 }
 0x1f9   : > { %v9006_v44 = vadd.f32 %v2505_v51, %v2323_v14  ;;  %v9008_v63 = vpop.f32.mrf.mxu0  ;;  %v14263_v14 = vld [vmem:[#allocation65_spill] sm:$0xff] }
 0x1fa   : > { %14260 = vst [vmem:[#allocation52_spill] sm:$0xff] %v9008_v63  ;;  %v1957_v49 = vpop.f32.mrf.mxu1  ;;  %v1770_v51 = vadd.f32 %v8804_v15, %v14263_v14  ;;  %v7326_v63 = vld [vmem:[%s8036_s8 + $0x3a] sm:$0xff]  ;;  %v7327_v14 = vld [vmem:[%s8036_s8 + $0x4a] sm:$0xff] }
 0x1fb   : > { %14259 = vst [vmem:[#allocation28_spill] sm:$0xff] %v9006_v44  ;;  %v2047_v8 = vadd.f32 %v1957_v49, %v1769_v54 }
 0x1fc   : > { %7359 = vmatmul.msk.f32.vlgmr.msra.gmra.mxu0 %vm537_vm1, %v7325_v61 }
 0x1fd   : > { %v2326_v45 = vadd.f32 %v2236_v57, %v2047_v8  ;;  %7180 = vmatmul.msk.f32.gmra.mxu1 %vm537_vm1, %v14262_v26  ;;  %7310 = vmatmul.msk.f32.gmra.mxu3 %vm537_vm1, %v7276_v42  ;;  %v9028_v57 = vld [vmem:[%s8036_s8 + $0x10a] sm:$0xff]  ;;  %v2242_v15 = vpop.f32.mrf.mxu2  ;;  %v14266_v42 = vld [vmem:[#allocation66_spill] sm:$0xff] }
 0x1fe   : > { %7251 = vmatmul.msk.f32.gmra.mxu2 %vm537_vm1, %v8592_v1  ;;  %v7277_v26 = vld [vmem:[%s8036_s8 + $0x109] sm:$0xff]  ;;  %v1771_v1 = vadd.f32 %v8817_v20, %v14266_v42 }
 0x200   : > { %v2508_v56 = vpop.f32.mrf.mxu3 }
 0x201   : > { %v9020_v41 = vadd.f32 %v2508_v56, %v2324_v30  ;;  %v9022_v29 = vpop.f32.mrf.mxu0 }
 0x202   : > { %14265 = vst [vmem:[#allocation15_spill] sm:$0xff] %v9022_v29  ;;  %v1960_v54 = vpop.f32.mrf.mxu1  ;;  %v7328_v29 = vld [vmem:[%s8036_s8 + $0x52] sm:$0xff] }
 0x203   : > { %14264 = vst [vmem:[#allocation57_spill] sm:$0xff] %v9020_v41  ;;  %v2048_v61 = vadd.f32 %v1960_v54, %v1770_v51  ;;  %v7278_v51 = vld [vmem:[%s8036_s8 + $0x111] sm:$0xff] }
 0x204   : > { %7360 = vmatmul.msk.f32.gmra.mxu0 %vm537_vm1, %v7326_v63 }
 0x205   : > { %v2327_v49 = vadd.f32 %v2239_v17, %v2048_v61  ;;  %7181 = vmatmul.msk.f32.gmra.mxu1 %vm537_vm1, %v9028_v57  ;;  %7311 = vmatmul.msk.f32.gmra.mxu3 %vm537_vm1, %v7277_v26  ;;  %v9045_v17 = vld [vmem:[%s8036_s8 + $0x112] sm:$0xff]  ;;  %v14269_v61 = vld [vmem:[#allocation68_spill] sm:$0xff] }
 0x206   : > { %7252 = vmatmul.msk.f32.gmra.mxu2 %vm537_vm1, %v8608_v6  ;;  %v1772_v6 = vadd.f32 %v8833_v3, %v14269_v61  ;;  %v7329_v61 = vld [vmem:[%s8036_s8 + $0x62] sm:$0xff] }
 0x208   : > { %v2511_v30 = vpop.f32.mrf.mxu3 }
 0x209   : > { %v9037_v8 = vadd.f32 %v2511_v30, %v2325_v10  ;;  %v9039_v56 = vpop.f32.mrf.mxu0  ;;  %v2245_v10 = vpop.f32.mrf.mxu2 }
 0x20a   : > { %14268 = vst [vmem:[#allocation55_spill] sm:$0xff] %v9039_v56  ;;  %v1963_v63 = vpop.f32.mrf.mxu1  ;;  %v9181_v56 = vld [vmem:[%s8036_s8 + $0x18a] sm:$0xff] }
 0x20b   : > { %14267 = vst [vmem:[#allocation32_spill] sm:$0xff] %v9037_v8  ;;  %v2049_v54 = vadd.f32 %v1963_v63, %v1771_v1  ;;  %v9062_v1 = vld [vmem:[%s8036_s8 + $0x122] sm:$0xff] }
 0x20c   : > { %7361 = vmatmul.msk.f32.gmra.mxu0 %vm537_vm1, %v7327_v14  ;;  %v7279_v14 = vld [vmem:[%s8036_s8 + $0x121] sm:$0xff] }
 0x20d   : > { %v2328_v26 = vadd.f32 %v2242_v15, %v2049_v54  ;;  %7182 = vmatmul.msk.f32.gmra.mxu1 %vm537_vm1, %v9045_v17  ;;  %7312 = vmatmul.msk.f32.gmra.mxu3 %vm537_vm1, %v7278_v51 }
 0x20e   : > { %7253 = vmatmul.msk.f32.gmra.mxu2 %vm537_vm1, %v8624_v5 }
 0x210   : > { %v2514_v20 = vpop.f32.mrf.mxu3 }
 0x211   : > { %v9054_v30 = vadd.f32 %v2514_v20, %v2326_v45  ;;  %v9056_v42 = vpop.f32.mrf.mxu0  ;;  %v14271_v45 = vld [vmem:[#allocation69_spill] sm:$0xff] }
 0x212   : > { %14270 = vst [vmem:[#allocation16_spill] sm:$0xff] %v9056_v42  ;;  %v1966_v15 = vpop.f32.mrf.mxu1  ;;  %v1773_v54 = vadd.f32 %v8849_v60, %v14271_v45  ;;  %v9094_v45 = vld [vmem:[%s8036_s8 + $0x13a] sm:$0xff] }
 0x213   : > { %v2050_v63 = vadd.f32 %v1966_v15, %v1772_v6  ;;  %v9079_v6 = vld [vmem:[%s8036_s8 + $0x12a] sm:$0xff]  ;;  %v7339_v42 = vld [vmem:[%s8036_s8 + $0xda] sm:$0xff] }
 0x214   : > { %7362 = vmatmul.msk.f32.gmra.mxu0 %vm537_vm1, %v7328_v29  ;;  %v7280_v15 = vld [vmem:[%s8036_s8 + $0x129] sm:$0xff] }
 0x215   : > { %v2329_v51 = vadd.f32 %v2245_v10, %v2050_v63  ;;  %7183 = vmatmul.msk.f32.gmra.mxu1 %vm537_vm1, %v9062_v1  ;;  %7313 = vmatmul.msk.f32.gmra.mxu3 %vm537_vm1, %v7279_v14  ;;  %v2248_v10 = vpop.f32.mrf.mxu2 }
 0x216   : > { %7254 = vmatmul.msk.f32.gmra.mxu2 %vm537_vm1, %v8646_v34 }
 0x218   : > { %v2517_v3 = vpop.f32.mrf.mxu3 }
 0x219   : > { %v9071_v5 = vadd.f32 %v2517_v3, %v2327_v49  ;;  %v9073_v20 = vpop.f32.mrf.mxu0  ;;  %v7330_v3 = vld [vmem:[%s8036_s8 + $0x6a] sm:$0xff] }
 0x21a   : > { %14272 = vst [vmem:[#allocation36_spill] sm:$0xff] %v9073_v20  ;;  %v1969_v29 = vpop.f32.mrf.mxu1  ;;  %v7290_v20 = vld [vmem:[%s8036_s8 + $0x1a1] sm:$0xff] }
 0x21b   : > { %v2051_v14 = vadd.f32 %v1969_v29, %v1773_v54  ;;  %v7281_v54 = vld [vmem:[%s8036_s8 + $0x139] sm:$0xff] }
 0x21c   : > { %7363 = vmatmul.msk.f32.gmra.mxu0 %vm537_vm1, %v7329_v61 }
 0x21d   : > { %v2330_v60 = vadd.f32 %v2248_v10, %v2051_v14  ;;  %7184 = vmatmul.msk.f32.gmra.mxu1 %vm537_vm1, %v9079_v6  ;;  %7314 = vmatmul.msk.f32.gmra.mxu3 %vm537_vm1, %v7280_v15  ;;  %v7331_v10 = vld [vmem:[%s8036_s8 + $0x7a] sm:$0xff] }
 0x21e   : > { %7255 = vmatmul.msk.f32.gmra.mxu2 %vm537_vm1, %v8711_v35  ;;  %v9109_v35 = vld [vmem:[%s8036_s8 + $0x142] sm:$0xff]  ;;  %v7223_v15 = vld [vmem:[%s8036_s8 + $0x198] sm:$0xff] }
 0x220   : > { %v2520_v49 = vpop.f32.mrf.mxu3 }
 0x221   : > { %v9086_v63 = vadd.f32 %v2520_v49, %v2328_v26  ;;  %v9088_v34 = vpop.f32.mrf.mxu0 }
 0x222   : > { %14273 = vst [vmem:[#allocation58_spill] sm:$0xff] %v9088_v34 }
 0x224   : > { %7364 = vmatmul.msk.f32.gmra.mxu0 %vm537_vm1, %v7330_v3  ;;  %v9124_v3 = vld [vmem:[%s8036_s8 + $0x152] sm:$0xff] }
 0x225   : > { %7185 = vmatmul.msk.f32.gmra.mxu1 %vm537_vm1, %v9094_v45  ;;  %7315 = vmatmul.msk.f32.gmra.mxu3 %vm537_vm1, %v7281_v54  ;;  %v7333_v54 = vld [vmem:[%s8036_s8 + $0x92] sm:$0xff] }
 0x226   : > { %7256 = vmatmul.msk.f32.gmra.mxu2 %vm537_vm1, %v8727_v32  ;;  %v7332_v32 = vld [vmem:[%s8036_s8 + $0x82] sm:$0xff] }
 0x228   : > { %v2523_v26 = vpop.f32.mrf.mxu3 }
 0x229   : > { %v9101_v61 = vadd.f32 %v2523_v26, %v2329_v51  ;;  %v9103_v29 = vpop.f32.mrf.mxu0  ;;  %v9137_v26 = vld [vmem:[%s8036_s8 + $0x15a] sm:$0xff] }
 0x22a   : > { %14274 = vst [vmem:[#allocation17_spill] sm:$0xff] %v9103_v29 }
 0x22c   : > { %7365 = vmatmul.msk.f32.gmra.mxu0 %vm537_vm1, %v7331_v10  ;;  %v7334_v10 = vld [vmem:[%s8036_s8 + $0x9a] sm:$0xff] }
 0x22d   : > { %7186 = vmatmul.msk.f32.gmra.mxu1 %vm537_vm1, %v9109_v35  ;;  %7316 = vmatmul.msk.f32.gmra.mxu3 %vm537_vm1, %v8888_v11  ;;  %v7224_v11 = vld [vmem:[%s8036_s8 + $0x1a0] sm:$0xff] }
 0x22e   : > { %7257 = vmatmul.msk.f32.gmra.mxu2 %vm537_vm1, %v7223_v15 }
 0x230   : > { %v2526_v51 = vpop.f32.mrf.mxu3 }
 0x231   : > { %v9117_v14 = vadd.f32 %v2526_v51, %v2330_v60  ;;  %v9119_v49 = vpop.f32.mrf.mxu0  ;;  %v9148_v51 = vld [vmem:[%s8036_s8 + $0x16a] sm:$0xff] }
 0x232   : > { %14275 = vst [vmem:[#allocation21_spill] sm:$0xff] %v9119_v49 }
 0x234   : > { %7366 = vmatmul.msk.f32.gmra.mxu0 %vm537_vm1, %v7332_v32  ;;  %v7335_v32 = vld [vmem:[%s8036_s8 + $0xaa] sm:$0xff] }
 0x235   : > { %7187 = vmatmul.msk.f32.gmra.mxu1 %vm537_vm1, %v9124_v3  ;;  %7317 = vmatmul.msk.f32.gmra.mxu3 %vm537_vm1, %v8907_v24 }
 0x236   : > { %7258 = vmatmul.msk.f32.gmra.mxu2 %vm537_vm1, %v7224_v11  ;;  %v9159_v11 = vld [vmem:[%s8036_s8 + $0x172] sm:$0xff] }
 0x238   : > { %v9258_v29 = vpop.f32.mrf.mxu3 }
 0x239   : > { %v9132_v60 = vpop.f32.mrf.mxu0 }
 0x23a   : > { %14276 = vst [vmem:[#allocation18_spill] sm:$0xff] %v9132_v60 }
 0x23c   : > { %7367 = vmatmul.msk.f32.gmra.mxu0 %vm537_vm1, %v7333_v54  ;;  %v7336_v54 = vld [vmem:[%s8036_s8 + $0xb2] sm:$0xff] }
 0x23d   : > { %7188 = vmatmul.msk.f32.gmra.mxu1 %vm537_vm1, %v9137_v26  ;;  %7318 = vmatmul.msk.f32.gmra.mxu3 %vm537_vm1, %v8922_v33 }
 0x240   : > { %v9278_v59 = vpop.f32.mrf.mxu3 }
 0x241   : > { %v9144_v24 = vpop.f32.mrf.mxu0 }
 0x242   : > { %14277 = vst [vmem:[#allocation39_spill] sm:$0xff] %v9144_v24 }
 0x244   : > { %7368 = vmatmul.msk.f32.gmra.mxu0 %vm537_vm1, %v7334_v10  ;;  %v9170_v10 = vld [vmem:[%s8036_s8 + $0x182] sm:$0xff] }
 0x245   : > { %7189 = vmatmul.msk.f32.gmra.mxu1 %vm537_vm1, %v9148_v51  ;;  %7319 = vmatmul.msk.f32.gmra.mxu3 %vm537_vm1, %v8939_v43 }
 0x248   : > { %v9292_v40 = vpop.f32.mrf.mxu3 }
 0x249   : > { %v9155_v15 = vpop.f32.mrf.mxu0 }
 0x24a   : > { %14278 = vst [vmem:[#allocation59_spill] sm:$0xff] %v9155_v15 }
 0x24c   : > { %7369 = vmatmul.msk.f32.gmra.mxu0 %vm537_vm1, %v7335_v32  ;;  %v7337_v32 = vld [vmem:[%s8036_s8 + $0xc2] sm:$0xff] }
 0x24d   : > { %7190 = vmatmul.msk.f32.gmra.mxu1 %vm537_vm1, %v9159_v11  ;;  %7320 = vmatmul.msk.f32.gmra.mxu3 %vm537_vm1, %v8958_v28  ;;  %v7896_v28 = vmov 0.0  }
 0x24e   : > { %3993 = vst [vmem:[#allocation2 + $0x18] sm:$0xff] %v7896_v28 }
 0x24f   : > { %3994 = vst [vmem:[#allocation2 + $0x20] sm:$0xff] %v7896_v28 }
 0x250   : > { %3990 = vst [vmem:[#allocation2] sm:$0xff] %v7896_v28 }
 0x251   : > { %v9166_v33 = vpop.f32.mrf.mxu0  ;;  %3991 = vst [vmem:[#allocation2 + $0x8] sm:$0xff] %v7896_v28 }
 0x252   : > { %14279 = vst [vmem:[#allocation25_spill] sm:$0xff] %v9166_v33 }
 0x253   : > { %3992 = vst [vmem:[#allocation2 + $0x10] sm:$0x3] %v7896_v28 }
 0x254   : > { %7370 = vmatmul.msk.f32.gmra.mxu0 %vm537_vm1, %v7336_v54  ;;  %v7338_v54 = vld [vmem:[%s8036_s8 + $0xca] sm:$0xff]  ;;  %3995 = vst [vmem:[#allocation2 + $0x28] sm:$0x3] %v7896_v28 }
 0x255   : > { %7191 = vmatmul.msk.f32.gmra.mxu1 %vm537_vm1, %v9170_v10  ;;  %7321 = vmatmul.msk.f32.gmra.mxu3 %vm537_vm1, %v8977_v58  ;;  %3996 = vst [vmem:[#allocation2 + $0x30] sm:$0xff] %v7896_v28 }
 0x256   : > { %3997 = vst [vmem:[#allocation2 + $0x38] sm:$0xff] %v7896_v28 }
 0x257   : > { %3998 = vst [vmem:[#allocation2 + $0x40] sm:$0x3] %v7896_v28 }
 0x258   : > { %3999 = vst [vmem:[#allocation2 + $0x48] sm:$0xff] %v7896_v28 }
 0x259   : > { %v9177_v43 = vpop.f32.mrf.mxu0  ;;  %4000 = vst [vmem:[#allocation2 + $0x50] sm:$0xff] %v7896_v28 }
 0x25a   : > { %14280 = vst [vmem:[#allocation22_spill] sm:$0xff] %v9177_v43 }
 0x25b   : > { %4001 = vst [vmem:[#allocation2 + $0x58] sm:$0x3] %v7896_v28 }
 0x25c   : > { %7371 = vmatmul.msk.f32.gmra.mxu0 %vm537_vm1, %v7337_v32  ;;  %v7289_v32 = vld [vmem:[%s8036_s8 + $0x199] sm:$0xff]  ;;  %4002 = vst [vmem:[#allocation2 + $0x60] sm:$0xff] %v7896_v28 }
 0x25d   : > { %7192 = vmatmul.msk.f32.gmra.mxu1 %vm537_vm1, %v9181_v56  ;;  %7322 = vmatmul.msk.f32.gmra.mxu3 %vm537_vm1, %v8994_v4  ;;  %4003 = vst [vmem:[#allocation2 + $0x68] sm:$0xff] %v7896_v28 }
 0x25e   : > { %4004 = vst [vmem:[#allocation2 + $0x70] sm:$0x3] %v7896_v28 }
 0x25f   : > { %4005 = vst [vmem:[#allocation2 + $0x78] sm:$0xff] %v7896_v28 }
 0x260   : > { %4006 = vst [vmem:[#allocation2 + $0x80] sm:$0xff] %v7896_v28 }
 0x261   : > { %v9192_v58 = vpop.f32.mrf.mxu0  ;;  %4007 = vst [vmem:[#allocation2 + $0x88] sm:$0x3] %v7896_v28 }
 0x262   : > { %14281 = vst [vmem:[#allocation44_spill] sm:$0xff] %v9192_v58 }
 0x263   : > { %4008 = vst [vmem:[#allocation2 + $0x90] sm:$0xff] %v7896_v28 }
 0x264   : > { %7372 = vmatmul.msk.f32.gmra.mxu0 %vm537_vm1, %v7338_v54  ;;  %4009 = vst [vmem:[#allocation2 + $0x98] sm:$0xff] %v7896_v28 }
 0x265   : > { %7323 = vmatmul.msk.f32.gmra.mxu3 %vm537_vm1, %v7289_v32  ;;  %v7340_v32 = vld [vmem:[%s8036_s8 + $0xe2] sm:$0xff]  ;;  %4010 = vst [vmem:[#allocation2 + $0xa0] sm:$0x3] %v7896_v28 }
 0x266   : > { %4011 = vst [vmem:[#allocation2 + $0xa8] sm:$0xff] %v7896_v28 }
 0x267   : > { %4012 = vst [vmem:[#allocation2 + $0xb0] sm:$0xff] %v7896_v28 }
 0x268   : > { %4013 = vst [vmem:[#allocation2 + $0xb8] sm:$0x3] %v7896_v28 }
 0x269   : > { %v9206_v4 = vpop.f32.mrf.mxu0  ;;  %4014 = vst [vmem:[#allocation2 + $0xc0] sm:$0xff] %v7896_v28 }
 0x26a   : > { %14282 = vst [vmem:[#allocation62_spill] sm:$0xff] %v9206_v4 }
 0x26b   : > { %4015 = vst [vmem:[#allocation2 + $0xc8] sm:$0xff] %v7896_v28 }
 0x26c   : > { %7373 = vmatmul.msk.f32.gmra.mxu0 %vm537_vm1, %v7339_v42  ;;  %4016 = vst [vmem:[#allocation2 + $0xd0] sm:$0x3] %v7896_v28 }
 0x26d   : > { %7324 = vmatmul.msk.f32.gmra.mxu3 %vm537_vm1, %v7290_v20  ;;  %4017 = vst [vmem:[#allocation2 + $0xd8] sm:$0xff] %v7896_v28  ;;  %v7341_v20 = vld [vmem:[%s8036_s8 + $0xf2] sm:$0xff] }
 0x26e   : > { %4018 = vst [vmem:[#allocation2 + $0xe0] sm:$0xff] %v7896_v28 }
 0x26f   : > { %4019 = vst [vmem:[#allocation2 + $0xe8] sm:$0x3] %v7896_v28 }
 0x270   : > { %4020 = vst [vmem:[#allocation2 + $0xf0] sm:$0xff] %v7896_v28 }
 0x271   : > { %v9220_v54 = vpop.f32.mrf.mxu0  ;;  %4021 = vst [vmem:[#allocation2 + $0xf8] sm:$0xff] %v7896_v28 }
 0x272   : > { %14283 = vst [vmem:[#allocation60_spill] sm:$0xff] %v9220_v54 }
 0x273   : > { %4022 = vst [vmem:[#allocation2 + $0x100] sm:$0x3] %v7896_v28 }
 0x274   : > { %7374 = vmatmul.msk.f32.gmra.mxu0 %vm537_vm1, %v7340_v32  ;;  %4023 = vst [vmem:[#allocation2 + $0x108] sm:$0xff] %v7896_v28  ;;  %v9244_v32 = vpop.f32.mrf.mxu1 }
 0x275   : > { %4024 = vst [vmem:[#allocation2 + $0x110] sm:$0xff] %v7896_v28 }
 0x276   : > { %4025 = vst [vmem:[#allocation2 + $0x118] sm:$0x3] %v7896_v28 }
 0x277   : > { %4026 = vst [vmem:[#allocation2 + $0x120] sm:$0xff] %v7896_v28 }
 0x278   : > { %4027 = vst [vmem:[#allocation2 + $0x128] sm:$0xff] %v7896_v28 }
 0x279   : > { %v9232_v42 = vpop.f32.mrf.mxu0  ;;  %4028 = vst [vmem:[#allocation2 + $0x130] sm:$0x3] %v7896_v28 }
 0x27a   : > { %14284 = vst [vmem:[#allocation29_spill] sm:$0xff] %v9232_v42 }
 0x27b   : > { %4029 = vst [vmem:[#allocation2 + $0x138] sm:$0xff] %v7896_v28 }
 0x27c   : > { %7375 = vmatmul.msk.f32.gmra.mxu0 %vm537_vm1, %v7341_v20  ;;  %v9254_v20 = vpop.f32.mrf.mxu2  ;;  %4030 = vst [vmem:[#allocation2 + $0x140] sm:$0xff] %v7896_v28  ;;  %v9266_v49 = vpop.f32.mrf.mxu1 }
 0x27d   : > { %4031 = vst [vmem:[#allocation2 + $0x148] sm:$0x3] %v7896_v28 }
 0x27e   : > { %4032 = vst [vmem:[#allocation2 + $0x150] sm:$0xff] %v7896_v28 }
 0x27f   : > { %4033 = vst [vmem:[#allocation2 + $0x158] sm:$0xff] %v7896_v28 }
 0x280   : > { %4034 = vst [vmem:[#allocation2 + $0x160] sm:$0x3] %v7896_v28 }
 0x281   : > { %v9247_v34 = vpop.f32.mrf.mxu0  ;;  %4035 = vst [vmem:[#allocation2 + $0x168] sm:$0xff] %v7896_v28 }
 0x282   : > { %14285 = vst [vmem:[#allocation26_spill] sm:$0xff] %v9247_v34 }
 0x283   : > { %4036 = vst [vmem:[#allocation2 + $0x170] sm:$0xff] %v7896_v28 }
 0x284   : > { %7376 = vmatmul.msk.f32.gmra.mxu0 %vm537_vm1, %v7342_v27  ;;  %4037 = vst [vmem:[#allocation2 + $0x178] sm:$0x3] %v7896_v28  ;;  %v9274_v27 = vpop.f32.mrf.mxu2 }
 0x285   : > { %4038 = vst [vmem:[#allocation2 + $0x180] sm:$0xff] %v7896_v28 }
 0x286   : > { %4039 = vst [vmem:[#allocation2 + $0x188] sm:$0xff] %v7896_v28 }
 0x287   : > { %4040 = vst [vmem:[#allocation2 + $0x190] sm:$0x3] %v7896_v28 }
 0x288   : > { %4041 = vst [vmem:[#allocation2 + $0x198] sm:$0xff] %v7896_v28 }
 0x289   : > { %v9263_v18 = vpop.f32.mrf.mxu0  ;;  %4042 = vst [vmem:[#allocation2 + $0x1a0] sm:$0xff] %v7896_v28 }
 0x28a   : > { %14286 = vst [vmem:[#allocation48_spill] sm:$0xff] %v9263_v18  ;;  %v1778_v18 = vadd.f32 %v8936_v7, %v8690_v9  ;;  %v14297_v9 = vld [vmem:[#allocation71_spill] sm:$0xff] }
 0x28b   : > { %4043 = vst [vmem:[#allocation2 + $0x1a8] sm:$0x3] %v7896_v28 }
 0x28c   : > { %7377 = vmatmul.msk.f32.gmra.mxu0 %vm537_vm1, %v9028_v57  ;;  %v9286_v57 = vpop.f32.mrf.mxu1  ;;  %v9288_v2 = vpop.f32.mrf.mxu2 }
 0x291   : > { %v9281_v60 = vpop.f32.mrf.mxu0 }
 0x294   : > { %7378 = vmatmul.msk.f32.gmra.mxu0 %vm537_vm1, %v9045_v17  ;;  %v1981_v15 = vpop.f32.mrf.mxu1  ;;  %v9298_v33 = vpop.f32.mrf.mxu2 }
 0x295   : > { %v9302_v17 = vpop.f32.mrf.mxu3 }
 0x299   : > { %v9290_v24 = vpop.f32.mrf.mxu0 }
 0x29c   : > { %7379 = vmatmul.msk.f32.gmra.mxu0 %vm537_vm1, %v9062_v1  ;;  %v1984_v28 = vpop.f32.mrf.mxu1  ;;  %v2263_v53 = vpop.f32.mrf.mxu2 }
 0x29d   : > { %v9308_v54 = vpop.f32.mrf.mxu3 }
 0x2a1   : > { %v9296_v55 = vpop.f32.mrf.mxu0 }
 0x2a4   : > { %7380 = vmatmul.msk.f32.gmra.mxu0 %vm537_vm1, %v9079_v6  ;;  %v1987_v58 = vpop.f32.mrf.mxu1  ;;  %v2266_v25 = vpop.f32.mrf.mxu2 }
 0x2a5   : > { %v2544_v4 = vpop.f32.mrf.mxu3 }
 0x2a9   : > { %v9304_v43 = vpop.f32.mrf.mxu0 }
 0x2ac   : > { %7381 = vmatmul.msk.f32.gmra.mxu0 %vm537_vm1, %v9094_v45  ;;  %v1990_v13 = vpop.f32.mrf.mxu1  ;;  %v2269_v46 = vpop.f32.mrf.mxu2 }
 0x2ad   : > { %v2547_v45 = vpop.f32.mrf.mxu3 }
 0x2b1   : > { %v9310_v1 = vpop.f32.mrf.mxu0 }
 0x2b4   : > { %7382 = vmatmul.msk.f32.gmra.mxu0 %vm537_vm1, %v9109_v35  ;;  %v1993_v36 = vpop.f32.mrf.mxu1  ;;  %v2272_v50 = vpop.f32.mrf.mxu2 }
 0x2b5   : > { %v2550_v35 = vpop.f32.mrf.mxu3 }
 0x2b9   : > { %v9314_v6 = vpop.f32.mrf.mxu0 }
 0x2bc   : > { %7383 = vmatmul.msk.f32.gmra.mxu0 %vm537_vm1, %v9124_v3  ;;  %v9326_v31 = vpop.f32.mrf.mxu1  ;;  %v9330_v3 = vpop.f32.mrf.mxu2 }
 0x2bd   : > { %14287 = vst [vmem:[#allocation64_spill] sm:$0xff] %v9326_v31  ;;  %v9332_v42 = vpop.f32.mrf.mxu3 }
 0x2be   : > { %14288 = vst [vmem:[#allocation61_spill] sm:$0xff] %v9330_v3  ;;  %v1780_v3 = vadd.f32 %v8973_v37, %v8720_v22  ;;  %v1777_v22 = vadd.f32 %v8919_v19, %v8672_v38  ;;  %v2056_v37 = vadd.f32 %v1984_v28, %v1778_v18 }
 0x2bf   : > { %14289 = vst [vmem:[#allocation33_spill] sm:$0xff] %v9332_v42  ;;  %v1779_v42 = vadd.f32 %v8954_v47, %v8704_v39 }
 0x2c0   : > { %v2335_v38 = vadd.f32 %v2263_v53, %v2056_v37 }
 0x2c1   : > { %v9318_v21 = vpop.f32.mrf.mxu0 }
 0x2c4   : > { %7384 = vmatmul.msk.f32.gmra.mxu0 %vm537_vm1, %v9137_v26  ;;  %v9334_v44 = vpop.f32.mrf.mxu1  ;;  %v9338_v34 = vpop.f32.mrf.mxu2 }
 0x2c5   : > { %14290 = vst [vmem:[#allocation37_spill] sm:$0xff] %v9334_v44  ;;  %v1781_v44 = vadd.f32 %v8990_v16, %v8737_v0  ;;  %v14296_v0 = vld [vmem:[#allocation72_spill] sm:$0xff] }
 0x2c6   : > { %14291 = vst [vmem:[#allocation63_spill] sm:$0xff] %v9338_v34  ;;  %v1776_v47 = vadd.f32 %v8904_v62, %v14296_v0 }
 0x2c7   : > { %v2059_v8 = vadd.f32 %v1993_v36, %v1781_v44  ;;  %v1775_v36 = vadd.f32 %v8885_v52, %v14297_v9  ;;  %v9378_v52 = vld [vmem:[%s14299_s3] ss:$0 sm:$0xff]  ;;  %s6800_s3 = sshll.u32 %s13636_s20, 4  ;;  %s6801_s3 = int_to_ptr.vmem [resolvable:$true] %s6800_s3 }
 0x2c8   : > { %v2054_v7 = vadd.f32 %v9286_v57, %v1776_v47 }
 0x2c9   : > { %v9322_v12 = vpop.f32.mrf.mxu0  ;;  %v2053_v62 = vadd.f32 %v9266_v49, %v1775_v36  ;;  %v2883_v36 = vadd.f32 %v9290_v24, %v9071_v5 }
 0x2cc   : > { %7385 = vmatmul.msk.f32.gmra.mxu0 %vm537_vm1, %v9148_v51  ;;  %v9340_v51 = vpop.f32.mrf.mxu3  ;;  %v9352_v41 = vpop.f32.mrf.mxu2 }
 0x2cd   : > { %14292 = vst [vmem:[#allocation67_spill] sm:$0xff] %v9340_v51  ;;  %v7355_v51 = vld [vmem:[%s8036_s8 + $0x19a] sm:$0xff] }
 0x2ce   : > { %14294 = vst [vmem:[#allocation65_spill] sm:$0xff] %v9352_v41 }
 0x2d1   : > { %v2816_v48 = vpop.f32.mrf.mxu0 }
 0x2d4   : > { %7386 = vmatmul.msk.f32.gmra.mxu0 %vm537_vm1, %v9159_v11  ;;  %v9344_v11 = vpop.f32.mrf.mxu1 }
 0x2d5   : > { %14293 = vst [vmem:[#allocation42_spill] sm:$0xff] %v9344_v11  ;;  %v9357_v11 = vpop.f32.mrf.mxu3 }
 0x2d6   : > { %14295 = vst [vmem:[#allocation66_spill] sm:$0xff] %v9357_v11 }
 0x2d9   : > { %v2819_v26 = vpop.f32.mrf.mxu0 }
 0x2dc   : > { %7387 = vmatmul.msk.f32.gmra.mxu0 %vm537_vm1, %v9170_v10  ;;  %v2058_v10 = vadd.f32 %v1990_v13, %v1780_v3  ;;  %v2055_v13 = vadd.f32 %v1981_v15, %v1777_v22  ;;  %v2338_v3 = vadd.f32 %v2272_v50, %v2059_v8  ;;  %v9367_v44 = vpop.f32.mrf.mxu1  ;;  %v2613_v8 = vadd.f32 %v9308_v54, %v2335_v38 }
 0x2dd   : > { %v9393_v28 = vpop.f32.mrf.mxu3 }
 0x2de   : > { %v2337_v39 = vadd.f32 %v2269_v46, %v2058_v10  ;;  %v2616_v19 = vadd.f32 %v2550_v35, %v2338_v3  ;;  %v2334_v50 = vadd.f32 %v9298_v33, %v2055_v13  ;;  %v2891_v57 = vadd.f32 %v2819_v26, %v2613_v8  ;;  %14303 = vst [vmem:[#allocation71_spill] sm:$0xff] %v9393_v28 }
 0x2df   : > { %v2885_v13 = vadd.f32 %v9304_v43, %v9101_v61  ;;  %v2884_v3 = vadd.f32 %v9296_v55, %v9086_v63  ;;  %v2882_v63 = vadd.f32 %v9281_v60, %v9054_v30 }
 0x2e0   : > { %v2615_v41 = vadd.f32 %v2547_v45, %v2337_v39  ;;  %v2612_v49 = vadd.f32 %v9302_v17, %v2334_v50  ;;  %v2886_v39 = vadd.f32 %v9310_v1, %v9117_v14 }
 0x2e1   : > { %v2822_v31 = vpop.f32.mrf.mxu0  ;;  %v9473_v38 = vadd.f32 %v9378_v52, %v2884_v3  ;;  %v9495_v50 = vadd.f32 %v9378_v52, %v2882_v63 }
 0x2e2   : > { %v9455_v9 = vadd.f32 %v9378_v52, %v2886_v39 }
 0x2e3   : > { %14316 = vst [vmem:[#allocation87_spill] sm:$0xff] %v9473_v38  ;;  %v2994_v8 = vmul.f32 %v9473_v38, %v9473_v38 }
 0x2e4   : > { %7388 = vmatmul.msk.f32.gmra.mxu0 %vm537_vm1, %v9181_v56  ;;  %v2057_v56 = vadd.f32 %v1987_v58, %v1779_v42  ;;  %v14298_v58 = vld [vmem:[#allocation70_spill] sm:$0xff]  ;;  %v9412_v10 = vpop.f32.mrf.mxu1  ;;  %14314 = vst [vmem:[#allocation85_spill] sm:$0xff] %v9455_v9  ;;  %v2996_v5 = vmul.f32 %v9455_v9, %v9455_v9 }
 0x2e5   : > { %v1774_v42 = vadd.f32 %v8865_v23, %v14298_v58  ;;  %v9382_v23 = vpop.f32.mrf.mxu2  ;;  %v9440_v47 = vpop.f32.mrf.mxu3  ;;  %v9483_v58 = vadd.f32 %v9378_v52, %v2883_v36 }
 0x2e6   : > { %v2336_v16 = vadd.f32 %v2266_v25, %v2057_v56  ;;  %v7356_v25 = vld [vmem:[%s8036_s8 + $0x1a2] sm:$0xff]  ;;  %14300 = vst [vmem:[#allocation68_spill] sm:$0xff] %v9382_v23  ;;  %v14352_v23 = vld [vmem:[#allocation14_spill] sm:$0xff]  ;;  %s6788_s8 = scalar_lea.sflag [#allocation5], %s459_s30 }
 0x2e7   : > { %14311 = vst [vmem:[#allocation82_spill] sm:$0xff] %v9440_v47 }
 0x2e8   : > { %v2614_v18 = vadd.f32 %v2544_v4, %v2336_v16 }
 0x2e9   : > { %v2825_v34 = vpop.f32.mrf.mxu0 }
 0x2ea   : > { %v2893_v46 = vadd.f32 %v2825_v34, %v2615_v41  ;;  %v2892_v53 = vadd.f32 %v2822_v31, %v2614_v18  ;;  %v2052_v41 = vadd.f32 %v9244_v32, %v1774_v42  ;;  %v2333_v34 = vadd.f32 %v9288_v2, %v2054_v7  ;;  %v14317_v18 = vld [vmem:[#allocation32_spill] sm:$0xff] }
 0x2eb   : > { %v2332_v31 = vadd.f32 %v9274_v27, %v2053_v62  ;;  %v2890_v2 = vadd.f32 %v2816_v48, %v2612_v49  ;;  %v9406_v27 = vadd.f32 %v9378_v52, %v2891_v57  ;;  %v9465_v7 = vadd.f32 %v9378_v52, %v2885_v13  ;;  %14319 = vst [vmem:[#allocation32_spill] sm:$0xff] %v9483_v58  ;;  %v14322_v62 = vld [vmem:[#allocation57_spill] sm:$0xff] }
 0x2ec   : > { %7389 = vmatmul.msk.f32.gmra.mxu0 %vm537_vm1, %v7355_v51  ;;  %v9386_v33 = vadd.f32 %v9378_v52, %v2893_v46  ;;  %v2611_v32 = vadd.f32 %v9292_v40, %v2333_v34  ;;  %v9397_v45 = vadd.f32 %v9378_v52, %v2892_v53  ;;  %v2331_v35 = vadd.f32 %v9254_v20, %v2052_v41  ;;  %v9460_v43 = vpop.f32.mrf.mxu1  ;;  %v14325_v53 = vld [vmem:[#allocation28_spill] sm:$0xff] }
 0x2ed   : > { %v2610_v26 = vadd.f32 %v9278_v59, %v2332_v31  ;;  %14305 = vst [vmem:[#allocation76_spill] sm:$0xff] %v9406_v27  ;;  %v9418_v59 = vadd.f32 %v9378_v52, %v2890_v2  ;;  %v2995_v30 = vmul.f32 %v9465_v7, %v9465_v7  ;;  %v9488_v60 = vpop.f32.mrf.mxu3  ;;  %v2993_v49 = vmul.f32 %v9483_v58, %v9483_v58 }
 0x2ee   : > { %14301 = vst [vmem:[#allocation69_spill] sm:$0xff] %v9386_v33  ;;  %v2889_v51 = vadd.f32 %v9322_v12, %v2611_v32  ;;  %v3003_v48 = vmul.f32 %v9386_v33, %v9386_v33  ;;  %v2609_v40 = vadd.f32 %v9258_v29, %v2331_v35  ;;  %v3002_v12 = vmul.f32 %v9397_v45, %v9397_v45  ;;  %v9430_v29 = vpop.f32.mrf.mxu2 }
 0x2ef   : > { %14304 = vst [vmem:[#allocation70_spill] sm:$0xff] %v9397_v45  ;;  %v2888_v20 = vadd.f32 %v9318_v21, %v2610_v26  ;;  %v3001_v21 = vmul.f32 %v9406_v27, %v9406_v27  ;;  %v2992_v32 = vmul.f32 %v9495_v50, %v9495_v50 }
 0x2f0   : > { %14307 = vst [vmem:[#allocation78_spill] sm:$0xff] %v9418_v59  ;;  %v2887_v22 = vadd.f32 %v9314_v6, %v2609_v40  ;;  %v9425_v37 = vadd.f32 %v9378_v52, %v2889_v51  ;;  %v3000_v6 = vmul.f32 %v9418_v59, %v9418_v59 }
 0x2f1   : > { %v2828_v15 = vpop.f32.mrf.mxu0  ;;  %14309 = vst [vmem:[#allocation80_spill] sm:$0xff] %v9430_v29  ;;  %v9435_v0 = vadd.f32 %v9378_v52, %v2888_v20  ;;  %v14355_v29 = vld [vmem:[#allocation24_spill] sm:$0xff] }
 0x2f2   : > { %v2894_v4 = vadd.f32 %v2828_v15, %v2616_v19  ;;  %14308 = vst [vmem:[#allocation79_spill] sm:$0xff] %v9425_v37  ;;  %v9445_v16 = vadd.f32 %v9378_v52, %v2887_v22  ;;  %v2999_v14 = vmul.f32 %v9425_v37, %v9425_v37  ;;  %v14318_v19 = vld [vmem:[#allocation48_spill] sm:$0xff]  ;;  %v14323_v15 = vld [vmem:[#allocation26_spill] sm:$0xff] }
 0x2f3   : > { %14310 = vst [vmem:[#allocation81_spill] sm:$0xff] %v9435_v0  ;;  %v2998_v61 = vmul.f32 %v9435_v0, %v9435_v0  ;;  %v2881_v46 = vadd.f32 %v14318_v19, %v14317_v18 }
 0x2f4   : > { %v9389_v54 = vadd.f32 %v9378_v52, %v2894_v4  ;;  %7390 = vmatmul.msk.f32.gmra.mxu0 %vm537_vm1, %v7356_v25  ;;  %14312 = vst [vmem:[#allocation83_spill] sm:$0xff] %v9445_v16  ;;  %v2997_v55 = vmul.f32 %v9445_v16, %v9445_v16  ;;  %v2880_v25 = vadd.f32 %v14323_v15, %v14322_v62  ;;  %v14326_v4 = vld [vmem:[#allocation29_spill] sm:$0xff]  ;;  %v9508_v57 = vpop.f32.mrf.mxu1 }
 0x2f5   : > { %14315 = vst [vmem:[#allocation86_spill] sm:$0xff] %v9465_v7  ;;  %v2879_v41 = vadd.f32 %v14326_v4, %v14325_v53  ;;  %v9503_v34 = vadd.f32 %v9378_v52, %v2881_v46 }
 0x2f6   : > { %14302 = vst [vmem:[#allocation72_spill] sm:$0xff] %v9389_v54  ;;  %2949 = vmatpush.msra.mxu1 %v9389_v54  ;;  %v3004_v17 = vmul.f32 %v9389_v54, %v9389_v54  ;;  %v9478_v24 = vpop.f32.mrf.mxu2  ;;  %v9511_v31 = vadd.f32 %v9378_v52, %v2880_v25 }
 0x2f7   : > { %14320 = vst [vmem:[#allocation48_spill] sm:$0xff] %v9488_v60  ;;  %v9517_v2 = vadd.f32 %v9378_v52, %v2879_v41  ;;  %v14353_v60 = vld [vmem:[#allocation62_spill] sm:$0xff] }
 0x2f8   : > { %2950 = vmatpush.msra.mxu1 %v9386_v33  ;;  %3021 = vmatpush.msrb.mxu3 %v3004_v17  ;;  %14324 = vst [vmem:[#allocation57_spill] sm:$0xff] %v9495_v50  ;;  %v2991_v17 = vmul.f32 %v9503_v34, %v9503_v34  ;;  %v2990_v51 = vmul.f32 %v9511_v31, %v9511_v31  ;;  %v14336_v33 = vld [vmem:[#allocation30_spill] sm:$0xff] }
 0x2f9   : > { %v9414_v56 = vpop.f32.mrf.mxu0  ;;  %14327 = vst [vmem:[#allocation26_spill] sm:$0xff] %v9503_v34  ;;  %v2989_v40 = vmul.f32 %v9517_v2, %v9517_v2 }
 0x2fa   : > { %14306 = vst [vmem:[#allocation77_spill] sm:$0xff] %v9414_v56  ;;  %2951 = vmatpush.msra.mxu1 %v9397_v45  ;;  %3022 = vmatpush.msrb.mxu3 %v3003_v48  ;;  %v9529_v48 = vpop.f32.mrf.mxu3  ;;  %v14337_v45 = vld [vmem:[#allocation12_spill] sm:$0xff] }
 0x2fb   : > { %14328 = vst [vmem:[#allocation28_spill] sm:$0xff] %v9511_v31 }
 0x2fc   : > { %2952 = vmatpush.msra.mxu1 %v9406_v27  ;;  %3023 = vmatpush.msrb.mxu3 %v3002_v12  ;;  %14329 = vst [vmem:[#allocation29_spill] sm:$0xff] %v9517_v2  ;;  %v9534_v20 = vpop.f32.mrf.mxu1  ;;  %v958_v27 = vadd.f32 %v14337_v45, %v14336_v33  ;;  %v14348_v33 = vld [vmem:[#allocation54_spill] sm:$0xff] }
 0x2fd   : > { %14331 = vst [vmem:[#allocation90_spill] sm:$0xff] %v9529_v48  ;;  %v14362_v48 = vld [vmem:[#allocation59_spill] sm:$0xff] }
 0x2fe   : > { %2953 = vmatpush.msra.mxu1 %v9418_v59  ;;  %3024 = vmatpush.msrb.mxu3 %v3001_v21  ;;  %v9522_v35 = vpop.f32.mrf.mxu2  ;;  %v14338_v59 = vld [vmem:[#allocation27_spill] sm:$0xff] }
 0x300   : > { %2954 = vmatpush.msra.mxu1 %v9425_v37  ;;  %3025 = vmatpush.msrb.mxu3 %v3000_v6  ;;  %v14339_v37 = vld [vmem:[#allocation40_spill] sm:$0xff] }
 0x301   : > { %v9450_v1 = vpop.f32.mrf.mxu0 }
 0x302   : > { %14313 = vst [vmem:[#allocation84_spill] sm:$0xff] %v9450_v1  ;;  %2955 = vmatpush.msra.mxu1 %v9435_v0  ;;  %3026 = vmatpush.msrb.mxu3 %v2999_v14  ;;  %v9540_v21 = vpop.f32.mrf.mxu3  ;;  %v955_v0 = vadd.f32 %v14339_v37, %v14338_v59  ;;  %v14345_v1 = vld [vmem:[#allocation19_spill] sm:$0xff]  ;;  %v14350_v37 = vld [vmem:[#allocation46_spill] sm:$0xff] }
 0x304   : > { %2956 = vmatpush.msra.mxu1 %v9445_v16  ;;  %3027 = vmatpush.msrb.mxu3 %v2998_v61  ;;  %v9542_v39 = vpop.f32.mrf.mxu1  ;;  %v14340_v16 = vld [vmem:[#allocation34_spill] sm:$0xff] }
 0x306   : > { %2957 = vmatpush.msra.mxu1 %v9455_v9  ;;  %3028 = vmatpush.msrb.mxu3 %v2997_v55  ;;  %v9538_v22 = vpop.f32.mrf.mxu2  ;;  %v14341_v9 = vld [vmem:[#allocation45_spill] sm:$0xff] }
 0x308   : > { %2958 = vmatpush.msra.mxu1 %v9465_v7  ;;  %3029 = vmatpush.msrb.mxu3 %v2996_v5  ;;  %v961_v7 = vadd.f32 %v14341_v9, %v14340_v16  ;;  %v14351_v16 = vld [vmem:[#allocation49_spill] sm:$0xff] }
 0x309   : > { %v9490_v42 = vpop.f32.mrf.mxu0 }
 0x30a   : > { %14321 = vst [vmem:[#allocation88_spill] sm:$0xff] %v9490_v42  ;;  %2959 = vmatpush.msra.mxu1 %v9473_v38  ;;  %3030 = vmatpush.msrb.mxu3 %v2995_v30  ;;  %v9548_v14 = vpop.f32.mrf.mxu3  ;;  %v14346_v42 = vld [vmem:[#allocation10_spill] sm:$0xff] }
 0x30c   : > { %2960 = vmatpush.msra.mxu1 %v9483_v58  ;;  %3031 = vmatpush.msrb.mxu3 %v2994_v8  ;;  %v9552_v61 = vpop.f32.mrf.mxu1 }
 0x30e   : > { %2961 = vmatpush.msra.mxu1 %v9495_v50  ;;  %3032 = vmatpush.msrb.mxu3 %v2993_v49  ;;  %v9546_v13 = vpop.f32.mrf.mxu2  ;;  %v14342_v50 = vld [vmem:[#allocation23_spill] sm:$0xff] }
 0x310   : > { %2962 = vmatpush.msra.mxu1 %v9503_v34  ;;  %3033 = vmatpush.msrb.mxu3 %v2992_v32  ;;  %v14343_v34 = vld [vmem:[#allocation43_spill] sm:$0xff] }
 0x311   : > { %v9524_v26 = vpop.f32.mrf.mxu0 }
 0x312   : > { %14330 = vst [vmem:[#allocation89_spill] sm:$0xff] %v9524_v26  ;;  %2963 = vmatpush.msra.mxu1 %v9511_v31  ;;  %3034 = vmatpush.msrb.mxu3 %v2991_v17  ;;  %v9556_v55 = vpop.f32.mrf.mxu3  ;;  %v952_v31 = vadd.f32 %v14343_v34, %v14342_v50  ;;  %v949_v26 = vadd.f32 %v14346_v42, %v14345_v1  ;;  %v14354_v34 = vld [vmem:[#allocation41_spill] sm:$0xff]  ;;  %v14356_v42 = vld [vmem:[#allocation44_spill] sm:$0xff] }
 0x314   : > { %2964 = vmatpush.msra.mxu1 %v9517_v2  ;;  %3035 = vmatpush.msrb.mxu3 %v2990_v51  ;;  %v2026_v5 = vpop.f32.mrf.mxu1  ;;  %v14344_v2 = vld [vmem:[#allocation53_spill] sm:$0xff]  ;;  %v1237_v47 = vadd.f32 %v14350_v37, %v952_v31  ;;  %v14359_v31 = vld [vmem:[#allocation22_spill] sm:$0xff] }
 0x315   : > { %v1239_v56 = vadd.f32 %v14344_v2, %v958_v27  ;;  %v1236_v27 = vadd.f32 %v14354_v34, %v949_v26  ;;  %v14361_v34 = vld [vmem:[#allocation51_spill] sm:$0xff] }
 0x316   : > { %3036 = vmatpush.msrb.mxu3 %v2989_v40  ;;  %v9554_v36 = vpop.f32.mrf.mxu2  ;;  %v1516_v1 = vadd.f32 %v14355_v29, %v1237_v47  ;;  %v1792_v29 = vadd.f32 %v14362_v48, %v14361_v34 }
 0x317   : > { %v1518_v45 = vadd.f32 %v14348_v33, %v1239_v56  ;;  %v14358_v33 = vld [vmem:[#allocation13_spill] sm:$0xff] }
 0x318   : > { %v1794_v37 = vadd.f32 %v14359_v31, %v1516_v1 }
 0x319   : > { %v9536_v12 = vpop.f32.mrf.mxu0  ;;  %v1796_v50 = vadd.f32 %v14353_v60, %v1518_v45 }
 0x31a   : > { %14332 = vst [vmem:[#allocation91_spill] sm:$0xff] %v9536_v12  ;;  %v9564_v46 = vpop.f32.mrf.mxu3  ;;  %v14347_v12 = vld [vmem:[#allocation50_spill] sm:$0xff] }
 0x31b   : > { %v1238_v28 = vadd.f32 %v14347_v12, %v955_v0  ;;  %v14357_v0 = vld [vmem:[#allocation60_spill] sm:$0xff] }
 0x31c   : > { %v2029_v30 = vpop.f32.mrf.mxu1 }
 0x31d   : > { %v1517_v9 = vadd.f32 %v14351_v16, %v1238_v28 }
 0x31e   : > { %v9560_v18 = vpop.f32.mrf.mxu2 }
 0x321   : > { %v9544_v6 = vpop.f32.mrf.mxu0 }
 0x322   : > { %14333 = vst [vmem:[#allocation92_spill] sm:$0xff] %v9544_v6  ;;  %v9568_v25 = vpop.f32.mrf.mxu3  ;;  %v14349_v6 = vld [vmem:[#allocation56_spill] sm:$0xff] }
 0x323   : > { %v1240_v59 = vadd.f32 %v14349_v6, %v961_v7  ;;  %v1515_v7 = vadd.f32 %v14358_v33, %v1236_v27  ;;  %v14364_v27 = vld [vmem:[#allocation39_spill] sm:$0xff]  ;;  %v2070_v33 = vadd.f32 %v2026_v5, %v1792_v29 }
 0x324   : > { %v2032_v8 = vpop.f32.mrf.mxu1 }
 0x325   : > { %v2072_v45 = vadd.f32 %v2032_v8, %v1794_v37  ;;  %v14367_v37 = vld [vmem:[#allocation11_spill] sm:$0xff]  ;;  %v2349_v5 = vadd.f32 %v9560_v18, %v2070_v33 }
 0x326   : > { %v2308_v15 = vpop.f32.mrf.mxu2 }
 0x329   : > { %v9550_v3 = vpop.f32.mrf.mxu0 }
 0x32a   : > { %14334 = vst [vmem:[#allocation93_spill] sm:$0xff] %v9550_v3  ;;  %v2589_v41 = vpop.f32.mrf.mxu3  ;;  %v1519_v3 = vadd.f32 %v14352_v23, %v1240_v59  ;;  %v14360_v23 = vld [vmem:[#allocation25_spill] sm:$0xff] }
 0x32b   : > { %v1793_v59 = vadd.f32 %v14360_v23, %v1515_v7  ;;  %v14366_v7 = vld [vmem:[#allocation18_spill] sm:$0xff] }
 0x32c   : > { %v2035_v32 = vpop.f32.mrf.mxu1  ;;  %v1797_v12 = vadd.f32 %v14357_v0, %v1519_v3 }
 0x32d   : > { %v2071_v47 = vadd.f32 %v2029_v30, %v1793_v59 }
 0x32e   : > { %v2311_v4 = vpop.f32.mrf.mxu2 }
 0x32f   : > { %v2351_v1 = vadd.f32 %v2311_v4, %v2072_v45  ;;  %v14372_v45 = vld [vmem:[#allocation58_spill] sm:$0xff] }
 0x331   : > { %v9558_v63 = vpop.f32.mrf.mxu0  ;;  %v2629_v30 = vadd.f32 %v2589_v41, %v2351_v1  ;;  %v14370_v41 = vld [vmem:[#allocation17_spill] sm:$0xff] }
 0x332   : > { %14335 = vst [vmem:[#allocation94_spill] sm:$0xff] %v9558_v63  ;;  %v2592_v51 = vpop.f32.mrf.mxu3  ;;  %v1795_v63 = vadd.f32 %v14356_v42, %v1517_v9 }
 0x334   : > { %v2038_v54 = vpop.f32.mrf.mxu1  ;;  %v2073_v28 = vadd.f32 %v2035_v32, %v1795_v63 }
 0x335   : > { %v2074_v56 = vadd.f32 %v2038_v54, %v1796_v50  ;;  %v14363_v50 = vld [vmem:[#allocation20_spill] sm:$0xff] }
 0x336   : > { %v2314_v17 = vpop.f32.mrf.mxu2  ;;  %v1791_v0 = vadd.f32 %v14364_v27, %v14363_v50 }
 0x337   : > { %v2352_v42 = vadd.f32 %v2314_v17, %v2073_v28 }
 0x339   : > { %v9562_v19 = vpop.f32.mrf.mxu0  ;;  %v2630_v63 = vadd.f32 %v2592_v51, %v2352_v42 }
 0x33a   : > { %v2595_v11 = vpop.f32.mrf.mxu3 }
 0x33c   : > { %v2041_v2 = vpop.f32.mrf.mxu1 }
 0x33d   : > { %v2075_v16 = vadd.f32 %v2041_v2, %v1797_v12  ;;  %v14365_v12 = vld [vmem:[#allocation47_spill] sm:$0xff] }
 0x33e   : > { %v2317_v38 = vpop.f32.mrf.mxu2  ;;  %v1790_v8 = vadd.f32 %v14366_v7, %v14365_v12 }
 0x33f   : > { %v2353_v26 = vadd.f32 %v2317_v38, %v2074_v56  ;;  %v2069_v38 = vadd.f32 %v9552_v61, %v1791_v0  ;;  %v2350_v56 = vadd.f32 %v2308_v15, %v2071_v47  ;;  %v14369_v15 = vld [vmem:[#allocation35_spill] sm:$0xff] }
 0x341   : > { %v9566_v62 = vpop.f32.mrf.mxu0  ;;  %v2631_v54 = vadd.f32 %v2595_v11, %v2353_v26  ;;  %v14368_v11 = vld [vmem:[#allocation21_spill] sm:$0xff]  ;;  %v2628_v4 = vadd.f32 %v9568_v25, %v2350_v56  ;;  %v2348_v59 = vadd.f32 %v9554_v36, %v2069_v38  ;;  %v14380_v56 = vld [vmem:[#allocation94_spill] sm:$0xff] }
 0x342   : > { %v2598_v9 = vpop.f32.mrf.mxu3  ;;  %v1789_v28 = vadd.f32 %v14368_v11, %v14367_v37  ;;  %v14383_v11 = vld [vmem:[#allocation42_spill] sm:$0xff] }
 0x343   : > { %v2626_v29 = vadd.f32 %v9556_v55, %v2348_v59  ;;  %v9718_v59 = vld [vmem:[%s13962_s12 + $0x58] sm:$0xff] }
 0x344   : > { %v2067_v23 = vadd.f32 %v9534_v20, %v1789_v28  ;;  %v14371_v20 = vld [vmem:[#allocation38_spill] sm:$0xff] }
 0x345   : > { %v1787_v36 = vadd.f32 %v14372_v45, %v14371_v20  ;;  %v14389_v20 = vld [vmem:[#allocation37_spill] sm:$0xff] }
 0x346   : > { %v2320_v60 = vpop.f32.mrf.mxu2 }
 0x347   : > { %v2354_v3 = vadd.f32 %v2320_v60, %v2075_v16  ;;  %v2068_v16 = vadd.f32 %v9542_v39, %v1790_v8  ;;  %v14012_v60 = vmov 1.0   ;;  %v2627_v39 = vadd.f32 %v9564_v46, %v2349_v5  ;;  %v14379_v8 = vld [vmem:[#allocation90_spill] sm:$0xff] }
 0x348   : > { %2965 = vmatmul.f32.vlgmr.msra.gmra.mxu1 %v14012_v60  ;;  %3037 = vmatmul.f32.vlgmr.msrb.gmra.mxu3 %v14012_v60  ;;  %v2065_v55 = vadd.f32 %v9460_v43, %v1787_v36  ;;  %v9664_v43 = vld [vmem:[%s13962_s12 + $0x70] sm:$0xff]  ;;  %v14390_v36 = vld [vmem:[#allocation68_spill] sm:$0xff] }
 0x349   : > { %v9570_v53 = vpop.f32.mrf.mxu0  ;;  %v2632_v32 = vadd.f32 %v2598_v9, %v2354_v3  ;;  %v2347_v34 = vadd.f32 %v9546_v13, %v2068_v16  ;;  %v9646_v9 = vld [vmem:[%s13962_s12 + $0x78] sm:$0xff]  ;;  %v14374_v13 = vld [vmem:[#allocation36_spill] sm:$0xff] }
 0x34a   : > { %v2905_v46 = vadd.f32 %v9570_v53, %v2627_v39  ;;  %v2346_v53 = vadd.f32 %v9538_v22, %v2067_v23  ;;  %3097 = vmatpush.msra.mxu3 %v9646_v9  ;;  %v14375_v22 = vld [vmem:[#allocation9_spill] sm:$0xff]  ;;  %v14384_v16 = vld [vmem:[#allocation80_spill] sm:$0xff] }
 0x34b   : > { %v2625_v3 = vadd.f32 %v9548_v14, %v2347_v34  ;;  %v14376_v14 = vld [vmem:[#allocation16_spill] sm:$0xff]  ;;  %v14387_v39 = vld [vmem:[#allocation73_spill] sm:$0xff]  ;;  %v14391_v34 = vld [vmem:[#allocation82_spill] sm:$0xff] }
 0x34c   : > { %v1785_v0 = vadd.f32 %v14376_v14, %v14375_v22  ;;  %v2624_v1 = vadd.f32 %v9540_v21, %v2346_v53  ;;  %3098 = vmatpush.msra.mxu3 %v9664_v43  ;;  %v14378_v21 = vld [vmem:[#allocation55_spill] sm:$0xff] }
 0x34d   : > { %v14396_v14 = vld [vmem:[#allocation91_spill] sm:$0xff] }
 0x34e   : > { %v2063_v7 = vadd.f32 %v9367_v44, %v1785_v0  ;;  %v9700_v44 = vld [vmem:[%s13962_s12 + $0x60] sm:$0xff] }
 0x351   : > { %v9572_v49 = vpop.f32.mrf.mxu0 }
 0x352   : > { %v2906_v18 = vadd.f32 %v9572_v49, %v2628_v4  ;;  %v14385_v4 = vld [vmem:[#allocation48_spill] sm:$0xff] }
 0x354   : > { %v9656_v50 = vadd.f32 %v9378_v52, %v2906_v18  ;;  %v14388_v18 = vld [vmem:[#allocation52_spill] sm:$0xff] }
 0x359   : > { %v2867_v40 = vpop.f32.mrf.mxu0 }
 0x35a   : > { %v2907_v51 = vadd.f32 %v2867_v40, %v2629_v30 }
 0x35c   : > { %v9638_v49 = vadd.f32 %v9378_v52, %v2907_v51 }
 0x361   : > { %v2870_v58 = vpop.f32.mrf.mxu0 }
 0x362   : > { %v2908_v31 = vadd.f32 %v2870_v58, %v2630_v63  ;;  %v1788_v58 = vadd.f32 %v14370_v41, %v14369_v15  ;;  %v2903_v63 = vadd.f32 %v9562_v19, %v2625_v3  ;;  %v2344_v19 = vadd.f32 %v9478_v24, %v2065_v55  ;;  %v14381_v24 = vld [vmem:[#allocation74_spill] sm:$0xff]  ;;  %v14386_v15 = vld [vmem:[#allocation93_spill] sm:$0xff]  ;;  %v14393_v55 = vld [vmem:[#allocation64_spill] sm:$0xff] }
 0x363   : > { %v14394_v3 = vld [vmem:[#allocation65_spill] sm:$0xff] }
 0x364   : > { %v9626_v25 = vadd.f32 %v9378_v52, %v2908_v31  ;;  %v2066_v26 = vadd.f32 %v9508_v57, %v1788_v58  ;;  %v14373_v57 = vld [vmem:[#allocation31_spill] sm:$0xff]  ;;  %v3016_v31 = vmul.f32 %v9656_v50, %v9656_v50  ;;  %v2622_v51 = vadd.f32 %v14385_v4, %v2344_v19 }
 0x365   : > { %v1786_v42 = vadd.f32 %v14374_v13, %v14373_v57  ;;  %v9710_v58 = vadd.f32 %v9378_v52, %v2903_v63  ;;  %v14397_v63 = vld [vmem:[#allocation63_spill] sm:$0xff] }
 0x366   : > { %v3018_v27 = vmul.f32 %v9626_v25, %v9626_v25 }
 0x367   : > { %v2064_v33 = vadd.f32 %v9412_v10, %v1786_v42  ;;  %v9682_v10 = vld [vmem:[%s13962_s12 + $0x68] sm:$0xff]  ;;  %v9736_v42 = vld [vmem:[%s13962_s12 + $0x50] sm:$0xff] }
 0x368   : > { %3099 = vmatpush.msra.mxu3 %v9682_v10 }
 0x369   : > { %v2873_v6 = vpop.f32.mrf.mxu0  ;;  %v2343_v5 = vadd.f32 %v14384_v16, %v2064_v33  ;;  %v3068_v16 = vld [vmem:[%s13962_s12 + $0x38] sm:$0xff] }
 0x36a   : > { %v2909_v2 = vadd.f32 %v2873_v6, %v2631_v54  ;;  %v2904_v54 = vadd.f32 %v9566_v62, %v2626_v29  ;;  %v2345_v62 = vadd.f32 %v9522_v35, %v2066_v26  ;;  %v14377_v35 = vld [vmem:[#allocation75_spill] sm:$0xff]  ;;  %3100 = vmatpush.msra.mxu3 %v9700_v44  ;;  %v2342_v26 = vadd.f32 %v14390_v36, %v2063_v7  ;;  %v3066_v36 = vld [vmem:[%s13962_s12 + $0x28] sm:$0xff] }
 0x36b   : > { %v1784_v12 = vadd.f32 %v14378_v21, %v14377_v35  ;;  %v2621_v29 = vadd.f32 %v14391_v34, %v2343_v5  ;;  %v14398_v35 = vld [vmem:[#allocation66_spill] sm:$0xff]  ;;  %v14403_v5 = vld [vmem:[#allocation33_spill] sm:$0xff] }
 0x36c   : > { %v9612_v6 = vadd.f32 %v9378_v52, %v2909_v2  ;;  %v3017_v2 = vmul.f32 %v9638_v49, %v9638_v49  ;;  %v2623_v38 = vadd.f32 %v14379_v8, %v2345_v62  ;;  %v9692_v30 = vadd.f32 %v9378_v52, %v2904_v54  ;;  %3101 = vmatpush.msra.mxu3 %v9718_v59 }
 0x36d   : > { %v2062_v28 = vadd.f32 %v14383_v11, %v1784_v12  ;;  %v2899_v0 = vadd.f32 %v14396_v14, %v2621_v29  ;;  %v3013_v62 = vmul.f32 %v9710_v58, %v9710_v58  ;;  %v14399_v12 = vld [vmem:[#allocation89_spill] sm:$0xff] }
 0x36e   : > { %v3019_v47 = vmul.f32 %v9612_v6, %v9612_v6  ;;  %v2901_v41 = vadd.f32 %v14386_v15, %v2623_v38  ;;  %v3014_v13 = vmul.f32 %v9692_v30, %v9692_v30  ;;  %3102 = vmatpush.msra.mxu3 %v9736_v42  ;;  %v3069_v38 = vld [vmem:[%s13962_s12 + $0x40] sm:$0xff] }
 0x36f   : > { %v2341_v54 = vadd.f32 %v14394_v3, %v2062_v28  ;;  %v9768_v11 = vadd.f32 %v9378_v52, %v2899_v0 }
 0x370   : > { %v9744_v33 = vadd.f32 %v9378_v52, %v2901_v41 }
 0x371   : > { %v2876_v48 = vpop.f32.mrf.mxu0  ;;  %v2619_v21 = vadd.f32 %v14398_v35, %v2341_v54  ;;  %v3288_v54 = vld [vmem:[%s13956_s6] sm:$0xff] }
 0x372   : > { %v2910_v17 = vadd.f32 %v2876_v48, %v2632_v32  ;;  %v9674_v32 = vadd.f32 %v9378_v52, %v2905_v46  ;;  %v2902_v48 = vadd.f32 %v14380_v56, %v2624_v1  ;;  %v14392_v46 = vld [vmem:[#allocation92_spill] sm:$0xff]  ;;  %v14400_v56 = vld [vmem:[#allocation61_spill] sm:$0xff]  ;;  %v3011_v28 = vmul.f32 %v9744_v33, %v9744_v33 }
 0x373   : > { %v3070_v1 = vld [vmem:[%s13962_s12 + $0x48] sm:$0xff] }
 0x374   : > { %v9615_v61 = vadd.f32 %v9378_v52, %v2910_v17  ;;  %v14382_v17 = vld [vmem:[#allocation15_spill] sm:$0xff]  ;;  %v3015_v23 = vmul.f32 %v9674_v32, %v9674_v32  ;;  %v9728_v57 = vadd.f32 %v9378_v52, %v2902_v48  ;;  %3103 = vmatpush.msra.mxu3 %v3070_v1 }
 0x375   : > { %v1783_v37 = vadd.f32 %v14382_v17, %v14381_v24  ;;  %v14402_v17 = vld [vmem:[#allocation88_spill] sm:$0xff] }
 0x376   : > { %2969 = vmatpush.msra.mxu2 %v9615_v61  ;;  %v3020_v40 = vmul.f32 %v9615_v61, %v9615_v61  ;;  %v3012_v8 = vmul.f32 %v9728_v57, %v9728_v57  ;;  %3104 = vmatpush.msra.mxu3 %v3069_v38 }
 0x377   : > { %v2061_v45 = vadd.f32 %v14389_v20, %v1783_v37  ;;  %v2897_v37 = vadd.f32 %v14402_v17, %v2619_v21 }
 0x378   : > { %2970 = vmatpush.msra.mxu2 %v9612_v6  ;;  %3041 = vmatpush.msrb.mxu1 %v3020_v40  ;;  %v1782_v40 = vadd.f32 %v14388_v18, %v14387_v39  ;;  %v3067_v39 = vld [vmem:[%s13962_s12 + $0x30] sm:$0xff] }
 0x379   : > { %3105 = vmatpush.msra.mxu3 %v3068_v16  ;;  %v14405_v18 = vld [vmem:[#allocation77_spill] sm:$0xff]  ;;  %v9789_v20 = vadd.f32 %v9378_v52, %v2897_v37  ;;  %v4173_v37 = vld [vmem:[#allocation3 + $0xf8] sm:$0xff] }
 0x37a   : > { %2971 = vmatpush.msra.mxu2 %v9626_v25  ;;  %3042 = vmatpush.msrb.mxu1 %v3019_v47  ;;  %v2900_v47 = vadd.f32 %v14392_v46, %v2622_v51  ;;  %v2060_v53 = vadd.f32 %v14393_v55, %v1782_v40  ;;  %v14404_v51 = vld [vmem:[#allocation84_spill] sm:$0xff]  ;;  %v3267_v55 = vld [vmem:[%s469_s0] sm:$0x1] }
 0x37b   : > { %3106 = vmatpush.msra.mxu3 %v3067_v39  ;;  %v3007_v46 = vmul.f32 %v9789_v20, %v9789_v20  ;;  %v7391_v3 = vmul.f32 -1.442695, %v3267_v55 }
 0x37c   : > { %2972 = vmatpush.msra.mxu2 %v9638_v49  ;;  %3043 = vmatpush.msrb.mxu1 %v3018_v27  ;;  %v14395_v27 = vld [vmem:[#allocation71_spill] sm:$0xff]  ;;  %v9756_v19 = vadd.f32 %v9378_v52, %v2900_v47  ;;  %v2339_v48 = vadd.f32 %v14400_v56, %v2060_v53  ;;  %v3289_v53 = vld [vmem:[%s13956_s6 + $0x8] sm:$0xff] }
 0x37d   : > { %v2620_v22 = vadd.f32 %v14395_v27, %v2342_v26  ;;  %3107 = vmatpush.msra.mxu3 %v3066_v36  ;;  %7529 = vpow2.f32 %v7391_v3  ;;  %v14411_v3 = vld [vmem:[#allocation87_spill] sm:$0xff] }
 0x37e   : > { %2973 = vmatpush.msra.mxu2 %v9656_v50  ;;  %3044 = vmatpush.msrb.mxu1 %v3017_v2  ;;  %v2340_v2 = vadd.f32 %v14397_v63, %v2061_v45  ;;  %v2617_v4 = vadd.f32 %v14403_v5, %v2339_v48  ;;  %v3009_v45 = vmul.f32 %v9768_v11, %v9768_v11 }
 0x37f   : > { %v2898_v7 = vadd.f32 %v14399_v12, %v2620_v22 }
 0x380   : > { %2974 = vmatpush.msra.mxu2 %v9674_v32  ;;  %3045 = vmatpush.msrb.mxu1 %v3016_v31  ;;  %v14401_v31 = vld [vmem:[#allocation67_spill] sm:$0xff]  ;;  %v2895_v40 = vadd.f32 %v14405_v18, %v2617_v4 }
 0x381   : > { %v2618_v24 = vadd.f32 %v14401_v31, %v2340_v2  ;;  %v9779_v41 = vadd.f32 %v9378_v52, %v2898_v7 }
 0x382   : > { %2975 = vmatpush.msra.mxu2 %v9692_v30  ;;  %3046 = vmatpush.msrb.mxu1 %v3015_v23  ;;  %v3010_v23 = vmul.f32 %v9756_v19, %v9756_v19  ;;  %v9804_v29 = vadd.f32 %v9378_v52, %v2895_v40 }
 0x383   : > { %v2896_v15 = vadd.f32 %v14404_v51, %v2618_v24  ;;  %v3008_v34 = vmul.f32 %v9779_v41, %v9779_v41  ;;  %v7530_v27 = vpop.eup %7529 }
 0x384   : > { %2976 = vmatpush.msra.mxu2 %v9710_v58  ;;  %3047 = vmatpush.msrb.mxu1 %v3014_v13  ;;  %v3005_v13 = vmul.f32 %v9804_v29, %v9804_v29  ;;  %v3271_v22 = vadd.f32 1.0, %v7530_v27  ;;  %v14412_v27 = vld [vmem:[#allocation86_spill] sm:$0xff] }
 0x385   : > { %v9798_v26 = vadd.f32 %v9378_v52, %v2896_v15  ;;  %v3065_v52 = vld [vmem:[%s13962_s12 + $0x20] sm:$0xff] }
 0x386   : > { %2977 = vmatpush.msra.mxu2 %v9728_v57  ;;  %3048 = vmatpush.msrb.mxu1 %v3013_v62  ;;  %7531 = vrcp.f32 %v3271_v22  ;;  %vm3277_vm2 = vweird.f32 %v3271_v22  ;;  %v3281_v2 = vand.u32 2147483647, %v3271_v22 }
 0x387   : > { %v3006_v47 = vmul.f32 %v9798_v26, %v9798_v26  ;;  %3108 = vmatpush.msra.mxu3 %v3065_v52 }
 0x388   : > { %2978 = vmatpush.msra.mxu2 %v9744_v33  ;;  %3049 = vmatpush.msrb.mxu1 %v3012_v8  ;;  %vm3282_vm5 = vcmp.eq.f32.partialorder %v3281_v2, 8.507059e+37  ;;  %v14416_v2 = vld [vmem:[#allocation83_spill] sm:$0xff] }
 0x38a   : > { %2979 = vmatpush.msra.mxu2 %v9756_v19  ;;  %3050 = vmatpush.msrb.mxu1 %v3011_v28 }
 0x38c   : > { %2980 = vmatpush.msra.mxu2 %v9768_v11  ;;  %3051 = vmatpush.msrb.mxu1 %v3010_v23  ;;  %v7532_v0 = vpop.eup %7531 }
 0x38d   : > { %v3273_v62 = vmul.f32 %v7532_v0, %v3271_v22  ;;  %vm3278_vm3 = vweird.f32 %v7532_v0 }
 0x38e   : > { %2981 = vmatpush.msra.mxu2 %v9779_v41  ;;  %3052 = vmatpush.msrb.mxu1 %v3009_v45  ;;  %vm3279_vm4 = vmor %vm3277_vm2, %vm3278_vm3 }
 0x38f   : > { %v3274_v63 = vsub.f32 1.0, %v3273_v62 }
 0x390   : > { %2982 = vmatpush.msra.mxu2 %v9789_v20  ;;  %3053 = vmatpush.msrb.mxu1 %v3008_v34 }
 0x391   : > { %v3275_v21 = vmul.f32 %v7532_v0, %v3274_v63 }
 0x392   : > { %2983 = vmatpush.msra.mxu2 %v9798_v26  ;;  %3054 = vmatpush.msrb.mxu1 %v3007_v46 }
 0x394   : > { %2984 = vmatpush.msra.mxu2 %v9804_v29  ;;  %3055 = vmatpush.msrb.mxu1 %v3006_v47 }
 0x395   : > { %2985 = vmatmul.f32.vlgmr.msra.gmra.mxu2 %v14012_v60 }
 0x396   : > { %3056 = vmatpush.msrb.mxu1 %v3005_v13  ;;  %3077 = vmatpush.msrb.mxu2 %v9646_v9  ;;  %v3064_v9 = vld [vmem:[%s13962_s12 + $0x18] sm:$0xff]  ;;  %v14406_v13 = vld [vmem:[#allocation29_spill] sm:$0xff] }
 0x397   : > { %3057 = vmatmul.f32.vlgmr.msrb.gmra.mxu1 %v14012_v60  ;;  %3109 = vmatpush.msra.mxu3 %v3064_v9 }
 0x398   : > { %3078 = vmatpush.msrb.mxu2 %v9664_v43  ;;  %v3063_v43 = vld [vmem:[%s13962_s12 + $0x10] sm:$0xff] }
 0x399   : > { %3110 = vmatpush.msra.mxu3 %v3063_v43 }
 0x39a   : > { %3079 = vmatpush.msrb.mxu2 %v9682_v10  ;;  %v3062_v10 = vld [vmem:[%s13962_s12 + $0x8] sm:$0xff] }
 0x39b   : > { %3111 = vmatpush.msra.mxu3 %v3062_v10 }
 0x39c   : > { %3080 = vmatpush.msrb.mxu2 %v9700_v44  ;;  %v3061_v44 = vld [vmem:[%s13962_s12] sm:$0xff] }
 0x39d   : > { %3112 = vmatpush.msra.mxu3 %v3061_v44 }
 0x39e   : > { %3081 = vmatpush.msrb.mxu2 %v9718_v59  ;;  %v3291_v59 = vld [vmem:[%s13956_s6 + $0x18] sm:$0xff] }
 0x39f   : > { %3309 = vmatpush.msra.mxu1 %v3291_v59  ;;  %v14409_v59 = vld [vmem:[#allocation57_spill] sm:$0xff] }
 0x3a0   : > { %3082 = vmatpush.msrb.mxu2 %v9736_v42  ;;  %v3290_v42 = vld [vmem:[%s13956_s6 + $0x10] sm:$0xff] }
 0x3a1   : > { %3310 = vmatpush.msra.mxu1 %v3290_v42 }
 0x3a2   : > { %3083 = vmatpush.msrb.mxu2 %v3070_v1  ;;  %v3283_v1 = vand.u32 2147483648, %v3271_v22 }
 0x3a3   : > { %3311 = vmatpush.msra.mxu1 %v3289_v53 }
 0x3a4   : > { %3084 = vmatpush.msrb.mxu2 %v3069_v38  ;;  %v3284_v7 = vor.u32 1.1754944e-38, %v3283_v1  ;;  %v3276_v38 = vadd.f32 %v7532_v0, %v3275_v21  ;;  %v3292_v1 = vld [vmem:[%s13957_s7] sm:$0x1]  ;;  %v14417_v21 = vld [vmem:[#allocation81_spill] sm:$0xff] }
 0x3a5   : > { %3312 = vmatpush.msra.mxu1 %v3288_v54 }
 0x3a6   : > { %3085 = vmatpush.msrb.mxu2 %v3068_v16  ;;  %v3280_v56 = vsel %vm3279_vm4, %v7532_v0, %v3276_v38  ;;  %v4124_v16 = vld [vmem:[#allocation3 + $0x78] sm:$0xff] }
 0x3a7   : > { %v3285_v31 = vsel %vm3282_vm5, %v3284_v7, %v3280_v56  ;;  %4287 = vmatpush.msrb.mxu3 %v4124_v16  ;;  %v14418_v7 = vld [vmem:[#allocation79_spill] sm:$0xff]  ;;  %v14419_v56 = vld [vmem:[#allocation78_spill] sm:$0xff] }
 0x3a8   : > { %3086 = vmatpush.msrb.mxu2 %v3067_v39  ;;  %v3287_v17 = vmul.f32 %v3285_v31, %v3267_v55  ;;  %v4448_v39 = vld [vmem:[#allocation3 + $0x178] sm:$0xff] }
 0x3a9   : > { %4449 = vmatpush.msrb.mxu1 %v4448_v39  ;;  %v14410_v55 = vld [vmem:[#allocation32_spill] sm:$0xff] }
 0x3aa   : > { %3087 = vmatpush.msrb.mxu2 %v3066_v36  ;;  %7392 = vmatmul.msk.f32.vlgmr.msra.gmra.mxu1 %vm3293_vm6, %v3287_v17  ;;  %v14420_v31 = vld [vmem:[#allocation76_spill] sm:$0xff]  ;;  %v14421_v17 = vld [vmem:[#allocation70_spill] sm:$0xff] }
 0x3ac   : > { %3088 = vmatpush.msrb.mxu2 %v3065_v52 }
 0x3ae   : > { %3089 = vmatpush.msrb.mxu2 %v3064_v9  ;;  %v14407_v9 = vld [vmem:[#allocation28_spill] sm:$0xff] }
 0x3b0   : > { %3090 = vmatpush.msrb.mxu2 %v3063_v43 }
 0x3b2   : > { %3091 = vmatpush.msrb.mxu2 %v3062_v10  ;;  %v14408_v10 = vld [vmem:[#allocation26_spill] sm:$0xff] }
 0x3b4   : > { %3092 = vmatpush.msrb.mxu2 %v3061_v44 }
 0x3b6   : > { %4174 = vmatpush.msra.mxu2 %v4173_v37 }
 0x3c5   : > { %v2966_v14 = vpop.f32.mrf.mxu1 }
 0x3cb   : > { %v3038_v35 = vpop.f32.mrf.mxu3 }
 0x414   : > { %v3058_v12 = vpop.f32.mrf.mxu1 }
 0x415   : > { %v3059_v8 = vadd.f32 %v3058_v12, %v3038_v35 }
 0x417   : > { %3113 = vmatmul.f32.vlgmr.msra.gmra.mxu3 %v3059_v8 }
 0x418   : > { %v2986_v48 = vpop.f32.mrf.mxu2 }
 0x419   : > { %v2987_v24 = vadd.f32 %v2986_v48, %v2966_v14  ;;  %v14413_v14 = vld [vmem:[#allocation85_spill] sm:$0xff] }
 0x41b   : > { %3093 = vmatmul.f32.vlgmr.msrb.gmra.mxu2 %v2987_v24 }
 0x427   : > { %v3314_v63 = vpop.f32.mrf.mxu1 }
 0x49a   : > { %v3114_v4 = vpop.f32.mrf.mxu3 }
 0x49e   : > { %v3094_v28 = vpop.f32.mrf.mxu2 }
 0x49f   : > { %v3117_v5 = vmul.f32 %v3094_v28, %v3094_v28  ;;  %v9854_v46 = vperm.slane %v3094_v28, 0  ;;  %v14422_v28 = vld [vmem:[#allocation69_spill] sm:$0xff] }
 0x4a1   : > { %v3118_v51 = vsub.f32 %v3114_v4, %v3117_v5  ;;  %v3121_v52 = vsub.f32 %v14406_v13, %v9854_v46  ;;  %v3122_v43 = vsub.f32 %v14407_v9, %v9854_v46  ;;  %v3123_v44 = vsub.f32 %v14408_v10, %v9854_v46  ;;  %v14423_v5 = vld [vmem:[#allocation72_spill] sm:$0xff] }
 0x4a2   : > { %v3124_v42 = vsub.f32 %v14409_v59, %v9854_v46  ;;  %v3125_v53 = vsub.f32 %v14410_v55, %v9854_v46  ;;  %v3126_v54 = vsub.f32 %v14411_v3, %v9854_v46  ;;  %v3127_v22 = vsub.f32 %v14412_v27, %v9854_v46 }
 0x4a3   : > { %v3119_v15 = vmax.f32 %v3118_v51, 0.0  ;;  %v3128_v0 = vsub.f32 %v14413_v14, %v9854_v46  ;;  %v3129_v35 = vsub.f32 %v14416_v2, %v9854_v46  ;;  %v3130_v12 = vsub.f32 %v14417_v21, %v9854_v46  ;;  %v9939_v21 = vld [vmem:[%s13955_s5] ss:$0 sm:$0xff] }
 0x4a4   : > { %v3131_v8 = vsub.f32 %v14418_v7, %v9854_v46  ;;  %v3132_v48 = vsub.f32 %v14419_v56, %v9854_v46  ;;  %v3133_v24 = vsub.f32 %v14420_v31, %v9854_v46  ;;  %v3134_v37 = vsub.f32 %v14421_v17, %v9854_v46 }
 0x4a5   : > { %v3153_v23 = vadd.f32 1e-05, %v3119_v15  ;;  %v3135_v16 = vsub.f32 %v14422_v28, %v9854_v46  ;;  %v3136_v4 = vsub.f32 %v14423_v5, %v9854_v46  ;;  %v3137_v51 = vsub.f32 %v9804_v29, %v9854_v46 }
 0x4a6   : > { %v3138_v15 = vsub.f32 %v9798_v26, %v9854_v46  ;;  %v3139_v39 = vsub.f32 %v9789_v20, %v9854_v46  ;;  %v3143_v29 = vsub.f32 %v9744_v33, %v9854_v46  ;;  %v3144_v26 = vsub.f32 %v9728_v57, %v9854_v46 }
 0x4a7   : > { %7533 = vrsqrt.f32 %v3153_v23  ;;  %vm3160_vm8 = vweird.f32 %v3153_v23  ;;  %v3146_v20 = vsub.f32 %v9692_v30, %v9854_v46  ;;  %v3150_v33 = vsub.f32 %v9626_v25, %v9854_v46 }
 0x4a8   : > { %v3151_v57 = vsub.f32 %v9612_v6, %v9854_v46  ;;  %v9934_v6 = vld [vmem:[%s13954_s4] ss:$0 sm:$0xff] }
 0x4ad   : > { %v7534_v18 = vpop.eup %7533 }
 0x4ae   : > { %v3155_v40 = vmul.f32 %v7534_v18, %v3153_v23  ;;  %vm3161_vm7 = vweird.f32 %v7534_v18  ;;  %v3315_v23 = vadd.f32 %v3314_v63, %v3292_v1 }
 0x4af   : > { %vm9872_vm9 = vmor %vm3160_vm8, %vm3161_vm7 }
 0x4b0   : > { %v3156_v45 = vmul.f32 %v7534_v18, %v3155_v40  ;;  %v3141_v40 = vsub.f32 %v9768_v11, %v9854_v46  ;;  %v3148_v11 = vsub.f32 %v9656_v50, %v9854_v46 }
 0x4b2   : > { %v3157_v36 = vmul.f32 0.5, %v3156_v45 }
 0x4b4   : > { %v3158_v34 = vsub.f32 1.5, %v3157_v36  ;;  %v3142_v36 = vsub.f32 %v9756_v19, %v9854_v46  ;;  %v3149_v19 = vsub.f32 %v9638_v49, %v9854_v46 }
 0x4b6   : > { %v3159_v47 = vmul.f32 %v7534_v18, %v3158_v34  ;;  %v3145_v34 = vsub.f32 %v9710_v58, %v9854_v46  ;;  %v3152_v58 = vsub.f32 %v9615_v61, %v9854_v46 }
 0x4b8   : > { %v3163_v38 = vsel %vm9872_vm9, %v7534_v18, %v3159_v47  ;;  %v3140_v18 = vsub.f32 %v9779_v41, %v9854_v46  ;;  %v3147_v41 = vsub.f32 %v9674_v32, %v9854_v46  ;;  %v9929_v47 = vperm.slane %v3315_v23, 0 }
 0x4b9   : > { %v3164_v45 = vperm.slane %v3163_v38, 0 }
 0x4bb   : > { %v3165_v30 = vmul.f32 %v3164_v45, %v3121_v52  ;;  %v3166_v13 = vmul.f32 %v3164_v45, %v3122_v43  ;;  %v3167_v32 = vmul.f32 %v3164_v45, %v3123_v44  ;;  %v3168_v9 = vmul.f32 %v3164_v45, %v3124_v42 }
 0x4bc   : > { %v3169_v10 = vmul.f32 %v3164_v45, %v3125_v53  ;;  %v3170_v50 = vmul.f32 %v3164_v45, %v3126_v54  ;;  %v3171_v59 = vmul.f32 %v3164_v45, %v3127_v22  ;;  %v3172_v55 = vmul.f32 %v3164_v45, %v3128_v0 }
 0x4bd   : > { %v3173_v49 = vmul.f32 %v3164_v45, %v3129_v35  ;;  %v3174_v3 = vmul.f32 %v3164_v45, %v3130_v12  ;;  %v3175_v27 = vmul.f32 %v3164_v45, %v3131_v8  ;;  %v3176_v25 = vmul.f32 %v3164_v45, %v3132_v48 }
 0x4be   : > { %v3177_v61 = vmul.f32 %v3164_v45, %v3133_v24  ;;  %v3178_v46 = vmul.f32 %v3164_v45, %v3134_v37  ;;  %v3179_v14 = vmul.f32 %v3164_v45, %v3135_v16  ;;  %v3180_v52 = vmul.f32 %v3164_v45, %v3136_v4 }
 0x4bf   : > { %v3181_v43 = vmul.f32 %v3164_v45, %v3137_v51  ;;  %v3182_v44 = vmul.f32 %v3164_v45, %v3138_v15  ;;  %v3183_v42 = vmul.f32 %v3164_v45, %v3139_v39  ;;  %v3184_v53 = vmul.f32 %v3164_v45, %v3140_v18 }
 0x4c0   : > { %v3185_v54 = vmul.f32 %v3164_v45, %v3141_v40  ;;  %v3186_v22 = vmul.f32 %v3164_v45, %v3142_v36  ;;  %v3187_v0 = vmul.f32 %v3164_v45, %v3143_v29  ;;  %v3188_v62 = vmul.f32 %v3164_v45, %v3144_v26 }
 0x4c1   : > { %v3189_v1 = vmul.f32 %v3164_v45, %v3145_v34  ;;  %v3190_v63 = vmul.f32 %v3164_v45, %v3146_v20  ;;  %v3191_v2 = vmul.f32 %v3164_v45, %v3147_v41  ;;  %v3192_v35 = vmul.f32 %v3164_v45, %v3148_v11 }
 0x4c2   : > { %v3193_v12 = vmul.f32 %v3164_v45, %v3149_v19  ;;  %v3194_v7 = vmul.f32 %v3164_v45, %v3150_v33  ;;  %v3195_v8 = vmul.f32 %v3164_v45, %v3151_v57  ;;  %v3200_v38 = vmul.f32 %v9934_v6, %v3165_v30 }
 0x4c3   : > { %v3196_v56 = vmul.f32 %v3164_v45, %v3152_v58  ;;  %v3201_v48 = vmul.f32 %v9934_v6, %v3166_v13  ;;  %v3202_v31 = vmul.f32 %v9934_v6, %v3167_v32  ;;  %v3203_v24 = vmul.f32 %v9934_v6, %v3168_v9 }
 0x4c4   : > { %v3204_v17 = vmul.f32 %v9934_v6, %v3169_v10  ;;  %v3205_v37 = vmul.f32 %v9934_v6, %v3170_v50  ;;  %v3206_v28 = vmul.f32 %v9934_v6, %v3171_v59  ;;  %v3207_v16 = vmul.f32 %v9934_v6, %v3172_v55 }
 0x4c5   : > { %v3208_v5 = vmul.f32 %v9934_v6, %v3173_v49  ;;  %v3209_v4 = vmul.f32 %v9934_v6, %v3174_v3  ;;  %v3210_v51 = vmul.f32 %v9934_v6, %v3175_v27  ;;  %v3211_v15 = vmul.f32 %v9934_v6, %v3176_v25 }
 0x4c6   : > { %v3212_v23 = vmul.f32 %v9934_v6, %v3177_v61  ;;  %v3213_v39 = vmul.f32 %v9934_v6, %v3178_v46  ;;  %v3214_v18 = vmul.f32 %v9934_v6, %v3179_v14  ;;  %v3235_v40 = vadd.f32 %v9939_v21, %v3200_v38 }
 0x4c7   : > { %v3215_v45 = vmul.f32 %v9934_v6, %v3180_v52  ;;  %v3216_v36 = vmul.f32 %v9934_v6, %v3181_v43  ;;  %v3217_v29 = vmul.f32 %v9934_v6, %v3182_v44  ;;  %v3236_v26 = vadd.f32 %v9939_v21, %v3201_v48 }
 0x4c8   : > { %v3218_v34 = vmul.f32 %v9934_v6, %v3183_v42  ;;  %v3219_v20 = vmul.f32 %v9934_v6, %v3184_v53  ;;  %v3220_v41 = vmul.f32 %v9934_v6, %v3185_v54  ;;  %v3237_v11 = vadd.f32 %v9939_v21, %v3202_v31 }
 0x4c9   : > { %v3221_v19 = vmul.f32 %v9934_v6, %v3186_v22  ;;  %v3222_v33 = vmul.f32 %v9934_v6, %v3187_v0  ;;  %v9968_v57 = vmul.f32 %v9934_v6, %v3188_v62  ;;  %v3238_v58 = vadd.f32 %v9939_v21, %v3203_v24 }
 0x4ca   : > { %v9972_v30 = vmul.f32 %v9934_v6, %v3189_v1  ;;  %v9975_v13 = vmul.f32 %v9934_v6, %v3190_v63  ;;  %v3239_v32 = vadd.f32 %v9939_v21, %v3204_v17  ;;  %v9979_v9 = vadd.f32 %v9929_v47, %v3235_v40 }
 0x4cb   : > { %v9982_v10 = vmul.f32 %v9934_v6, %v3191_v2  ;;  %v9985_v50 = vmul.f32 %v9934_v6, %v3192_v35  ;;  %v3240_v59 = vadd.f32 %v9939_v21, %v3205_v37  ;;  %v9989_v55 = vadd.f32 %v9929_v47, %v3236_v26 }
 0x4cc   : > { %14424 = vst [vmem:[#allocation30_spill] sm:$0xff] %v9979_v9  ;;  %v9992_v49 = vmul.f32 %v9934_v6, %v3193_v12  ;;  %v9995_v3 = vmul.f32 %v9934_v6, %v3194_v7  ;;  %v3241_v27 = vadd.f32 %v9939_v21, %v3206_v28  ;;  %v9999_v25 = vadd.f32 %v9929_v47, %v3237_v11 }
 0x4cd   : > { %14425 = vst [vmem:[#allocation12_spill] sm:$0xff] %v9989_v55  ;;  %v10002_v61 = vmul.f32 %v9934_v6, %v3195_v8  ;;  %v10005_v46 = vmul.f32 %v9934_v6, %v3196_v56  ;;  %v3242_v14 = vadd.f32 %v9939_v21, %v3207_v16  ;;  %v10009_v52 = vadd.f32 %v9929_v47, %v3238_v58 }
 0x4ce   : > { %14426 = vst [vmem:[#allocation27_spill] sm:$0xff] %v9999_v25  ;;  %v3243_v43 = vadd.f32 %v9939_v21, %v3208_v5  ;;  %v3244_v44 = vadd.f32 %v9939_v21, %v3209_v4  ;;  %v10014_v42 = vadd.f32 %v9929_v47, %v3239_v32  ;;  %v7393_v53 = vmul.f32 -1.442695, %v9979_v9 }
 0x4cf   : > { %14427 = vst [vmem:[#allocation40_spill] sm:$0xff] %v10009_v52  ;;  %v3245_v54 = vadd.f32 %v9939_v21, %v3210_v51  ;;  %v3246_v22 = vadd.f32 %v9939_v21, %v3211_v15  ;;  %v10020_v6 = vadd.f32 %v9929_v47, %v3240_v59  ;;  %v7394_v0 = vmul.f32 -1.442695, %v9989_v55 }
 0x4d0   : > { %14428 = vst [vmem:[#allocation34_spill] sm:$0xff] %v10014_v42  ;;  %v3247_v62 = vadd.f32 %v9939_v21, %v3212_v23  ;;  %v3248_v1 = vadd.f32 %v9939_v21, %v3213_v39  ;;  %v10026_v63 = vadd.f32 %v9929_v47, %v3241_v27  ;;  %v7395_v2 = vmul.f32 -1.442695, %v9999_v25 }
 0x4d1   : > { %14429 = vst [vmem:[#allocation45_spill] sm:$0xff] %v10020_v6  ;;  %v3249_v35 = vadd.f32 %v9939_v21, %v3214_v18  ;;  %v3250_v12 = vadd.f32 %v9939_v21, %v3215_v45  ;;  %v10032_v7 = vadd.f32 %v9929_v47, %v3242_v14  ;;  %v7396_v8 = vmul.f32 -1.442695, %v10009_v52 }
 0x4d2   : > { %14430 = vst [vmem:[#allocation23_spill] sm:$0xff] %v10026_v63  ;;  %v3251_v38 = vadd.f32 %v9939_v21, %v3216_v36  ;;  %v10037_v56 = vadd.f32 %v9929_v47, %v3243_v43  ;;  %7535 = vpow2.f32 %v7393_v53  ;;  %v7397_v48 = vmul.f32 -1.442695, %v10014_v42 }
 0x4d3   : > { %14431 = vst [vmem:[#allocation43_spill] sm:$0xff] %v10032_v7  ;;  %v3252_v31 = vadd.f32 %v9939_v21, %v3217_v29  ;;  %v10042_v24 = vadd.f32 %v9929_v47, %v3244_v44  ;;  %7537 = vpow2.f32 %v7394_v0  ;;  %v7398_v17 = vmul.f32 -1.442695, %v10020_v6 }
 0x4d4   : > { %14432 = vst [vmem:[#allocation53_spill] sm:$0xff] %v10037_v56  ;;  %v3253_v37 = vadd.f32 %v9939_v21, %v3218_v34  ;;  %v10047_v28 = vadd.f32 %v9929_v47, %v3245_v54  ;;  %7539 = vpow2.f32 %v7395_v2  ;;  %v7399_v16 = vmul.f32 -1.442695, %v10026_v63 }
 0x4d5   : > { %14433 = vst [vmem:[#allocation19_spill] sm:$0xff] %v10042_v24  ;;  %v3254_v5 = vadd.f32 %v9939_v21, %v3219_v20  ;;  %v10052_v4 = vadd.f32 %v9929_v47, %v3246_v22  ;;  %7541 = vpow2.f32 %v7396_v8  ;;  %v7400_v51 = vmul.f32 -1.442695, %v10032_v7 }
 0x4d6   : > { %14434 = vst [vmem:[#allocation10_spill] sm:$0xff] %v10047_v28  ;;  %v3255_v15 = vadd.f32 %v9939_v21, %v3220_v41  ;;  %v10057_v23 = vadd.f32 %v9929_v47, %v3247_v62  ;;  %7543 = vpow2.f32 %v7397_v48  ;;  %v7401_v39 = vmul.f32 -1.442695, %v10037_v56 }
 0x4d7   : > { %14435 = vst [vmem:[#allocation50_spill] sm:$0xff] %v10052_v4  ;;  %v3256_v18 = vadd.f32 %v9939_v21, %v3221_v19  ;;  %v10062_v40 = vadd.f32 %v9929_v47, %v3248_v1  ;;  %7545 = vpow2.f32 %v7398_v17  ;;  %v7402_v45 = vmul.f32 -1.442695, %v10042_v24 }
 0x4d8   : > { %14436 = vst [vmem:[#allocation54_spill] sm:$0xff] %v10057_v23  ;;  %v10065_v36 = vpop.eup %7535  ;;  %v3257_v29 = vadd.f32 %v9939_v21, %v3222_v33  ;;  %v10069_v26 = vadd.f32 %v9929_v47, %v3249_v35  ;;  %7547 = vpow2.f32 %v7399_v16  ;;  %v7403_v34 = vmul.f32 -1.442695, %v10047_v28 }
 0x4d9   : > { %14437 = vst [vmem:[#allocation56_spill] sm:$0xff] %v10062_v40  ;;  %v10072_v20 = vpop.eup %7537  ;;  %v3258_v41 = vadd.f32 %v9939_v21, %v9968_v57  ;;  %v10077_v11 = vadd.f32 %v9929_v47, %v3250_v12  ;;  %7549 = vpow2.f32 %v7400_v51  ;;  %v7404_v19 = vmul.f32 -1.442695, %v10052_v4 }
 0x4da   : > { %14438 = vst [vmem:[#allocation46_spill] sm:$0xff] %v10069_v26  ;;  %v10080_v58 = vpop.eup %7539  ;;  %v3259_v33 = vadd.f32 %v9939_v21, %v9972_v30  ;;  %v10085_v32 = vadd.f32 %v9929_v47, %v3251_v38  ;;  %7551 = vpow2.f32 %v7401_v39  ;;  %v7405_v59 = vmul.f32 -1.442695, %v10057_v23 }
 0x4db   : > { %14439 = vst [vmem:[#allocation49_spill] sm:$0xff] %v10077_v11  ;;  %v10088_v27 = vpop.eup %7541  ;;  %v3260_v57 = vadd.f32 %v9939_v21, %v9975_v13  ;;  %v10093_v14 = vadd.f32 %v9929_v47, %v3252_v31  ;;  %7553 = vpow2.f32 %v7402_v45  ;;  %v7406_v43 = vmul.f32 -1.442695, %v10062_v40 }
 0x4dc   : > { %14440 = vst [vmem:[#allocation14_spill] sm:$0xff] %v10085_v32  ;;  %v10096_v44 = vpop.eup %7543  ;;  %v3261_v30 = vadd.f32 %v9939_v21, %v9982_v10  ;;  %v10101_v53 = vadd.f32 %v9929_v47, %v3253_v37  ;;  %7555 = vpow2.f32 %v7403_v34  ;;  %v7407_v54 = vmul.f32 -1.442695, %v10069_v26 }
 0x4dd   : > { %14441 = vst [vmem:[#allocation62_spill] sm:$0xff] %v10093_v14  ;;  %v10104_v22 = vpop.eup %7545  ;;  %v3262_v13 = vadd.f32 %v9939_v21, %v9985_v50  ;;  %v10109_v0 = vadd.f32 %v9929_v47, %v3254_v5  ;;  %7557 = vpow2.f32 %v7404_v19  ;;  %v7408_v62 = vmul.f32 -1.442695, %v10077_v11 }
 0x4de   : > { %14442 = vst [vmem:[#allocation41_spill] sm:$0xff] %v10101_v53  ;;  %v10112_v1 = vpop.eup %7547  ;;  %v3263_v10 = vadd.f32 %v9939_v21, %v9992_v49  ;;  %v10117_v2 = vadd.f32 %v9929_v47, %v3255_v15  ;;  %7559 = vpow2.f32 %v7405_v59  ;;  %v7409_v35 = vmul.f32 -1.442695, %v10085_v32 }
 0x4df   : > { %14443 = vst [vmem:[#allocation24_spill] sm:$0xff] %v10109_v0  ;;  %v10120_v12 = vpop.eup %7549  ;;  %v3264_v50 = vadd.f32 %v9939_v21, %v9995_v3  ;;  %v10125_v8 = vadd.f32 %v9929_v47, %v3256_v18  ;;  %7561 = vpow2.f32 %v7406_v43  ;;  %v7410_v38 = vmul.f32 -1.442695, %v10093_v14 }
 0x4e0   : > { %14444 = vst [vmem:[#allocation44_spill] sm:$0xff] %v10117_v2  ;;  %v10128_v48 = vpop.eup %7551  ;;  %v3265_v49 = vadd.f32 %v9939_v21, %v10002_v61  ;;  %v10133_v31 = vadd.f32 %v9929_v47, %v3257_v29  ;;  %7563 = vpow2.f32 %v7407_v54  ;;  %v7411_v17 = vmul.f32 -1.442695, %v10101_v53 }
 0x4e1   : > { %14445 = vst [vmem:[#allocation60_spill] sm:$0xff] %v10125_v8  ;;  %v10136_v37 = vpop.eup %7553  ;;  %v3266_v3 = vadd.f32 %v9939_v21, %v10005_v46  ;;  %v10141_v16 = vadd.f32 %v9929_v47, %v3258_v41  ;;  %7565 = vpow2.f32 %v7408_v62  ;;  %v7412_v5 = vmul.f32 -1.442695, %v10109_v0 }
 0x4e2   : > { %14446 = vst [vmem:[#allocation13_spill] sm:$0xff] %v10133_v31  ;;  %v10144_v51 = vpop.eup %7555  ;;  %v10147_v61 = vadd.f32 %v9929_v47, %v3259_v33  ;;  %v10150_v15 = vadd.f32 %v9929_v47, %v3260_v57  ;;  %7567 = vpow2.f32 %v7409_v35  ;;  %v7413_v39 = vmul.f32 -1.442695, %v10117_v2 }
 0x4e3   : > { %14447 = vst [vmem:[#allocation22_spill] sm:$0xff] %v10141_v16  ;;  %v10153_v18 = vpop.eup %7557  ;;  %v10156_v21 = vadd.f32 %v9929_v47, %v3261_v30  ;;  %v10159_v46 = vadd.f32 %v9929_v47, %v3262_v13  ;;  %7569 = vpow2.f32 %v7410_v38  ;;  %v7414_v45 = vmul.f32 -1.442695, %v10125_v8 }
 0x4e4   : > { %14448 = vst [vmem:[#allocation25_spill] sm:$0xff] %v10147_v61  ;;  %v7560_v29 = vpop.eup %7559  ;;  %v10163_v34 = vadd.f32 %v9929_v47, %v3263_v10  ;;  %7571 = vpow2.f32 %v7411_v17  ;;  %v7415_v41 = vmul.f32 -1.442695, %v10133_v31  ;;  %v10167_v19 = vadd.f32 1.0, %v10065_v36 }
 0x4e5   : > { %14449 = vst [vmem:[#allocation51_spill] sm:$0xff] %v10150_v15  ;;  %v7562_v33 = vpop.eup %7561  ;;  %v10170_v59 = vadd.f32 %v9929_v47, %v3264_v50  ;;  %v10173_v57 = vadd.f32 %v9929_v47, %v3265_v49  ;;  %7573 = vpow2.f32 %v7412_v5  ;;  %v7416_v43 = vmul.f32 -1.442695, %v10141_v16 }
 0x4e6   : > { %14450 = vst [vmem:[#allocation59_spill] sm:$0xff] %v10156_v21  ;;  %v7564_v30 = vpop.eup %7563  ;;  %v10177_v54 = vadd.f32 %v9929_v47, %v3266_v3  ;;  %7575 = vpow2.f32 %v7413_v39  ;;  %v7417_v13 = vmul.f32 -1.442695, %v10147_v61  ;;  %v10181_v36 = vadd.f32 1.0, %v10072_v20 }
 0x4e7   : > { %14451 = vst [vmem:[#allocation20_spill] sm:$0xff] %v10159_v46  ;;  %v7566_v62 = vpop.eup %7565  ;;  %7577 = vpow2.f32 %v7414_v45  ;;  %v7418_v10 = vmul.f32 -1.442695, %v10150_v15  ;;  %v7419_v35 = vmul.f32 -1.442695, %v10156_v21  ;;  %v10188_v47 = vadd.f32 1.0, %v10080_v58 }
 0x4e8   : > { %14452 = vst [vmem:[#allocation39_spill] sm:$0xff] %v10163_v34  ;;  %v7420_v50 = vmul.f32 -1.442695, %v10159_v46  ;;  %v7568_v38 = vpop.eup %7567  ;;  %7579 = vpow2.f32 %v7415_v41  ;;  %v7421_v49 = vmul.f32 -1.442695, %v10163_v34  ;;  %v3489_v17 = vand.u32 2147483648, %v10167_v19 }
 0x4e9   : > { %14453 = vst [vmem:[#allocation47_spill] sm:$0xff] %v10170_v59  ;;  %v7570_v3 = vpop.eup %7569  ;;  %7581 = vpow2.f32 %v7416_v43  ;;  %v7422_v20 = vmul.f32 -1.442695, %v10170_v59  ;;  %v10193_v5 = vmul.f32 -1.442695, %v10173_v57  ;;  %v10196_v39 = vadd.f32 1.0, %v10088_v27 }
 0x4ea   : > { %14454 = vst [vmem:[#allocation18_spill] sm:$0xff] %v10173_v57  ;;  %v7572_v45 = vpop.eup %7571  ;;  %7583 = vpow2.f32 %v7417_v13  ;;  %v10199_v41 = vmul.f32 -1.442695, %v10177_v54  ;;  %v3504_v60 = vand.u32 2147483648, %v10181_v36  ;;  %v10204_v43 = vadd.f32 1.0, %v10096_v44 }
 0x4eb   : > { %14455 = vst [vmem:[#allocation11_spill] sm:$0xff] %v10177_v54  ;;  %v7574_v34 = vpop.eup %7573  ;;  %7585 = vpow2.f32 %v7418_v10  ;;  %v10207_v57 = vadd.f32 1.0, %v10104_v22  ;;  %v10211_v13 = vadd.f32 1.0, %v10112_v1  ;;  %v10213_v54 = vor.u32 1.1754944e-38, %v3489_v17 }
 0x4ec   : > { %v7576_v59 = vpop.eup %7575  ;;  %7587 = vpow2.f32 %v7419_v35  ;;  %v3519_v58 = vand.u32 2147483648, %v10188_v47  ;;  %v10217_v10 = vadd.f32 1.0, %v10120_v12  ;;  %v10220_v44 = vadd.f32 1.0, %v10128_v48 }
 0x4ed   : > { %v7578_v46 = vpop.eup %7577  ;;  %7589 = vrcp.f32 %v10167_v19  ;;  %v3534_v22 = vand.u32 2147483648, %v10196_v39  ;;  %v10225_v35 = vadd.f32 1.0, %v10136_v37  ;;  %v10228_v1 = vor.u32 1.1754944e-38, %v3504_v60 }
 0x4ee   : > { %v7580_v27 = vpop.eup %7579  ;;  %7591 = vrcp.f32 %v10181_v36  ;;  %v10232_v12 = vadd.f32 1.0, %v10144_v51  ;;  %v3549_v15 = vand.u32 2147483648, %v10204_v43  ;;  %v10237_v16 = vadd.f32 1.0, %v10153_v18 }
 0x4ef   : > { %v7582_v21 = vpop.eup %7581  ;;  %7593 = vpow2.f32 %v7420_v50  ;;  %v10239_v37 = vadd.f32 1.0, %v7560_v29  ;;  %v10242_v60 = vor.u32 1.1754944e-38, %v3519_v58  ;;  %v10244_v31 = vadd.f32 1.0, %v7562_v33 }
 0x4f0   : > { %v7584_v61 = vpop.eup %7583  ;;  %7595 = vrcp.f32 %v10188_v47  ;;  %v10247_v51 = vor.u32 1.1754944e-38, %v3534_v22  ;;  %v3564_v50 = vand.u32 2147483648, %v10207_v57  ;;  %v10250_v8 = vadd.f32 1.0, %v7564_v30 }
 0x4f1   : > { %v7586_v17 = vpop.eup %7585  ;;  %7597 = vrcp.f32 %v10196_v39  ;;  %v10252_v18 = vadd.f32 1.0, %v7566_v62  ;;  %v10258_v2 = vadd.f32 1.0, %v7568_v38  ;;  %v10260_v33 = vor.u32 1.1754944e-38, %v3549_v15 }
 0x4f2   : > { %v7588_v48 = vpop.eup %7587  ;;  %7599 = vrcp.f32 %v10204_v43  ;;  %v10266_v30 = vadd.f32 1.0, %v7570_v3  ;;  %v10268_v62 = vadd.f32 1.0, %v7572_v45  ;;  %v3579_v53 = vand.u32 2147483648, %v10211_v13 }
 0x4f3   : > { %v10256_v58 = vpop.eup %7589  ;;  %7601 = vrcp.f32 %v10207_v57  ;;  %v10271_v14 = vor.u32 1.1754944e-38, %v3564_v50  ;;  %v3594_v38 = vand.u32 2147483648, %v10217_v10  ;;  %v10277_v22 = vadd.f32 1.0, %v7574_v34 }
 0x4f4   : > { %v10264_v0 = vpop.eup %7591  ;;  %7603 = vpow2.f32 %v7421_v49  ;;  %v10279_v11 = vadd.f32 1.0, %v7576_v59  ;;  %v3479_v49 = vmul.f32 %v10256_v58, %v10167_v19  ;;  %v10294_v59 = vadd.f32 1.0, %v7580_v27 }
 0x4f5   : > { %v7594_v29 = vpop.eup %7593  ;;  %7605 = vpow2.f32 %v7422_v20  ;;  %14456 = vst [vmem:[#allocation21_spill] sm:$0xff] %v10277_v22  ;;  %v10287_v20 = vadd.f32 1.0, %v7578_v46  ;;  %v3494_v45 = vmul.f32 %v10264_v0, %v10181_v36  ;;  %v10296_v15 = vadd.f32 1.0, %v7582_v21 }
 0x4f6   : > { %v10275_v32 = vpop.eup %7595  ;;  %14457 = vst [vmem:[#allocation35_spill] sm:$0xff] %v10279_v11  ;;  %7607 = vrcp.f32 %v10211_v13  ;;  %v10298_v26 = vor.u32 1.1754944e-38, %v3579_v53  ;;  %v10304_v46 = vor.u32 1.1754944e-38, %v3594_v38  ;;  %v3609_v50 = vand.u32 2147483648, %v10220_v44 }
 0x4f7   : > { %v10284_v3 = vpop.eup %7597  ;;  %7609 = vpow2.f32 %v10193_v5  ;;  %14458 = vst [vmem:[#allocation17_spill] sm:$0xff] %v10287_v20  ;;  %v10308_v4 = vadd.f32 1.0, %v7584_v61  ;;  %v3480_v27 = vsub.f32 1.0, %v3479_v49  ;;  %v3509_v53 = vmul.f32 %v10275_v32, %v10188_v47 }
 0x4f8   : > { %v10292_v34 = vpop.eup %7599  ;;  %14459 = vst [vmem:[#allocation38_spill] sm:$0xff] %v10294_v59  ;;  %7611 = vrcp.f32 %v10217_v10  ;;  %v3624_v21 = vand.u32 2147483648, %v10225_v35  ;;  %v10313_v24 = vadd.f32 1.0, %v7586_v17  ;;  %v3495_v56 = vsub.f32 1.0, %v3494_v45 }
 0x4f9   : > { %14460 = vst [vmem:[#allocation58_spill] sm:$0xff] %v10296_v15  ;;  %v10301_v40 = vpop.eup %7601  ;;  %7613 = vpow2.f32 %v10199_v41  ;;  %v3524_v41 = vmul.f32 %v10284_v3, %v10196_v39  ;;  %vm3483_vm10 = vweird.f32 %v10167_v19  ;;  %v3539_v61 = vmul.f32 %v10292_v34, %v10204_v43 }
 0x4fa   : > { %v7604_v23 = vpop.eup %7603  ;;  %14461 = vst [vmem:[#allocation31_spill] sm:$0xff] %v10308_v4  ;;  %7615 = vrcp.f32 %v10220_v44  ;;  %v3554_v49 = vmul.f32 %v10301_v40, %v10207_v57  ;;  %v10327_v5 = vadd.f32 1.0, %v7588_v48  ;;  %v10329_v7 = vadd.f32 1.0, %v7594_v29 }
 0x4fb   : > { %v7606_v28 = vpop.eup %7605  ;;  %14462 = vst [vmem:[#allocation36_spill] sm:$0xff] %v10313_v24  ;;  %7617 = vrcp.f32 %v10225_v35  ;;  %v10331_v63 = vadd.f32 1.0, %v7604_v23  ;;  %vm3498_vm11 = vweird.f32 %v10181_v36  ;;  %v10334_v6 = vor.u32 1.1754944e-38, %v3609_v50 }
 0x4fc   : > { %v10318_v38 = vpop.eup %7607  ;;  %14463 = vst [vmem:[#allocation9_spill] sm:$0xff] %v10327_v5  ;;  %v3481_v52 = vmul.f32 %v10256_v58, %v3480_v27  ;;  %v3510_v25 = vsub.f32 1.0, %v3509_v53  ;;  %v10339_v55 = vor.u32 1.1754944e-38, %v3624_v21  ;;  %v3496_v48 = vmul.f32 %v10264_v0, %v3495_v56 }
 0x4fd   : > { %v7610_v45 = vpop.eup %7609  ;;  %14464 = vst [vmem:[#allocation16_spill] sm:$0xff] %v10329_v7  ;;  %vm3513_vm12 = vweird.f32 %v10188_v47  ;;  %v3525_v23 = vsub.f32 1.0, %v3524_v41  ;;  %v3569_v29 = vmul.f32 %v10318_v38, %v10211_v13  ;;  %7619 = vrcp.f32 %v10232_v12  ;;  %v4121_v41 = vld [vmem:[#allocation3 + $0x60] sm:$0xff] }
 0x4fe   : > { %14465 = vst [vmem:[#allocation75_spill] sm:$0xff] %v10331_v63  ;;  %v10336_v42 = vpop.eup %7611  ;;  %v10347_v50 = vadd.f32 1.0, %v7606_v28  ;;  %vm3528_vm13 = vweird.f32 %v10196_v39  ;;  %v3540_v27 = vsub.f32 1.0, %v3539_v61  ;;  %v3555_v53 = vsub.f32 1.0, %v3554_v49 }
 0x4ff   : > { %v7614_v9 = vpop.eup %7613  ;;  %v3639_v21 = vand.u32 2147483648, %v10232_v12  ;;  %v10353_v63 = vadd.f32 1.0, %v7610_v45  ;;  %vm3543_vm14 = vweird.f32 %v10204_v43  ;;  %v3584_v56 = vmul.f32 %v10336_v42, %v10217_v10 }
 0x500   : > { %14466 = vst [vmem:[#allocation55_spill] sm:$0xff] %v10347_v50  ;;  %v10351_v17 = vpop.eup %7615  ;;  %v3654_v28 = vand.u32 2147483648, %v10237_v16  ;;  %v3482_v61 = vadd.f32 %v10256_v58, %v3481_v52  ;;  %vm3484_vm15 = vweird.f32 %v10256_v58  ;;  %v14468_v49 = vand.u32 2147483647, %v10167_v19 }
 0x501   : > { %14467 = vst [vmem:[#allocation90_spill] sm:$0xff] %v10353_v63  ;;  %v10360_v50 = vpop.eup %7617  ;;  %vm3499_vm1 = vweird.f32 %v10264_v0  ;;  %v14471_v63 = vand.u32 2147483647, %v10181_v36  ;;  %v3511_v7 = vmul.f32 %v10275_v32, %v3510_v25  ;;  %v3497_v52 = vadd.f32 %v10264_v0, %v3496_v48  ;;  %vm10399_vm5 = vmor %vm3483_vm10, %vm3484_vm15 }
 0x502   : > { %vm10366_vm0 = vcmp.eq.f32.partialorder %v14468_v49, 8.507059e+37  ;;  %v3526_v5 = vmul.f32 %v10284_v3, %v3525_v23  ;;  %v3570_v49 = vsub.f32 1.0, %v3569_v29  ;;  %7621 = vrcp.f32 %v10237_v16  ;;  %vm10418_vm9 = vmor %vm3498_vm11, %vm3499_vm1 }
 0x503   : > { %vm10373_vm2 = vcmp.eq.f32.partialorder %v14471_v63, 8.507059e+37  ;;  %v14474_v24 = vand.u32 2147483647, %v10188_v47  ;;  %v3541_v63 = vmul.f32 %v10292_v34, %v3540_v27  ;;  %v3556_v15 = vmul.f32 %v10301_v40, %v3555_v53  ;;  %v10393_v48 = vpop.eup %7619 }
 0x504   : > { %v3599_v25 = vmul.f32 %v10351_v17, %v10220_v44  ;;  %7623 = vrcp.f32 %v10239_v37  ;;  %vm3514_vm6 = vweird.f32 %v10275_v32  ;;  %v14479_v23 = vand.u32 2147483647, %v10196_v39 }
 0x505   : > { %vm10384_vm4 = vcmp.eq.f32.partialorder %v14474_v24, 8.507059e+37  ;;  %v3585_v27 = vsub.f32 1.0, %v3584_v56  ;;  %v3614_v53 = vmul.f32 %v10360_v50, %v10225_v35  ;;  %7625 = vrcp.f32 %v10244_v31  ;;  %vm10451_vm3 = vmor %vm3513_vm12, %vm3514_vm6 }
 0x506   : > { %vm10406_vm7 = vcmp.eq.f32.partialorder %v14479_v23, 8.507059e+37  ;;  %v3512_v23 = vadd.f32 %v10275_v32, %v3511_v7  ;;  %vm3529_vm10 = vweird.f32 %v10284_v3  ;;  %vm3544_vm15 = vweird.f32 %v10292_v34 }
 0x507   : > { %v14484_v56 = vand.u32 2147483647, %v10204_v43  ;;  %v14487_v36 = vand.u32 2147483647, %v10207_v57  ;;  %v3486_v7 = vsel %vm10399_vm5, %v10256_v58, %v3482_v61  ;;  %v3501_v11 = vsel %vm10418_vm9, %v10264_v0, %v3497_v52  ;;  %vm10467_vm12 = vmor %vm3528_vm13, %vm3529_vm10 }
 0x508   : > { %v3571_v22 = vmul.f32 %v10318_v38, %v3570_v49  ;;  %vm3588_vm1 = vweird.f32 %v10217_v10  ;;  %v3542_v58 = vadd.f32 %v10292_v34, %v3541_v63  ;;  %v3557_v61 = vadd.f32 %v10301_v40, %v3556_v15  ;;  %vm10489_vm13 = vmor %vm3543_vm14, %vm3544_vm15 }
 0x509   : > { %vm10427_vm8 = vcmp.eq.f32.partialorder %v14484_v56, 8.507059e+37  ;;  %vm10434_vm11 = vcmp.eq.f32.partialorder %v14487_v36, 8.507059e+37  ;;  %v3527_v56 = vadd.f32 %v10284_v3, %v3526_v5  ;;  %v3600_v24 = vsub.f32 1.0, %v3599_v25  ;;  %v10459_v5 = vpop.eup %7621 }
 0x50a   : > { %v3629_v0 = vmul.f32 %v10393_v48, %v10232_v12  ;;  %v10461_v52 = vadd.f32 1.0, %v7614_v9  ;;  %v14494_v49 = vand.u32 2147483647, %v10211_v13  ;;  %v3586_v63 = vmul.f32 %v10336_v42, %v3585_v27  ;;  %v10480_v9 = vpop.eup %7623 }
 0x50b   : > { %v3615_v25 = vsub.f32 1.0, %v3614_v53  ;;  %v10478_v19 = vor.u32 1.1754944e-38, %v3639_v21  ;;  %v3516_v39 = vsel %vm10451_vm3, %v10275_v32, %v3512_v23  ;;  %vm3574_vm6 = vweird.f32 %v10318_v38  ;;  %v10498_v27 = vpop.eup %7625 }
 0x50c   : > { %vm10473_vm5 = vcmp.eq.f32.partialorder %v14494_v49, 8.507059e+37  ;;  %vm3603_vm9 = vweird.f32 %v10220_v44  ;;  %v10495_v21 = vor.u32 1.1754944e-38, %v3654_v28  ;;  %7627 = vrcp.f32 %v10250_v8  ;;  %v4171_v28 = vld [vmem:[#allocation3 + $0xe8] sm:$0xff] }
 0x50d   : > { %v10503_v32 = vsel %vm10366_vm0, %v10213_v54, %v3486_v7  ;;  %v10508_v43 = vsel %vm10373_vm2, %v10228_v1, %v3501_v11  ;;  %v3531_v53 = vsel %vm10467_vm12, %v10284_v3, %v3527_v56  ;;  %vm14499_vm14 = vweird.f32 %v10301_v40 }
 0x50e   : > { %vm14500_vm3 = vweird.f32 %v10207_v57  ;;  %v3572_v54 = vadd.f32 %v10318_v38, %v3571_v22  ;;  %v14503_v45 = vand.u32 2147483647, %v10217_v10  ;;  %vm3618_vm2 = vweird.f32 %v10225_v35 }
 0x50f   : > { %vm10517_vm10 = vmor %vm14500_vm3, %vm14499_vm14  ;;  %v3546_v11 = vsel %vm10489_vm13, %v10292_v34, %v3542_v58  ;;  %v3601_v1 = vmul.f32 %v10351_v17, %v3600_v24  ;;  %v3630_v3 = vsub.f32 1.0, %v3629_v0  ;;  %v10539_v22 = vsel %vm10384_vm4, %v10242_v60, %v3516_v39  ;;  %v4123_v0 = vld [vmem:[#allocation3 + $0x70] sm:$0xff] }
 0x510   : > { %vm10524_vm0 = vcmp.eq.f32.partialorder %v14503_v45, 8.507059e+37  ;;  %v3561_v57 = vsel %vm10517_vm10, %v10301_v40, %v3557_v61  ;;  %v3587_v23 = vadd.f32 %v10336_v42, %v3586_v63  ;;  %vm3589_vm15 = vweird.f32 %v10336_v42  ;;  %4288 = vmatpush.msrb.mxu3 %v4123_v0  ;;  %v4447_v0 = vld [vmem:[#allocation3 + $0x170] sm:$0xff] }
 0x511   : > { %v3616_v7 = vmul.f32 %v10360_v50, %v3615_v25  ;;  %v10547_v34 = vsel %vm10406_vm7, %v10247_v51, %v3531_v53  ;;  %vm14506_vm12 = vweird.f32 %v10211_v13  ;;  %v14509_v4 = vand.u32 2147483647, %v10220_v44  ;;  %4450 = vmatpush.msrb.mxu1 %v4447_v0  ;;  %v4116_v0 = vld [vmem:[#allocation3 + $0x38] sm:$0xff] }
 0x512   : > { %vm10553_vm13 = vmor %vm14506_vm12, %vm3574_vm6  ;;  %vm3633_vm14 = vweird.f32 %v10232_v12  ;;  %v3644_v51 = vmul.f32 %v10459_v5, %v10237_v16  ;;  %v3659_v29 = vmul.f32 %v10480_v9, %v10239_v37  ;;  %v3674_v13 = vmul.f32 %v10498_v27, %v10244_v31  ;;  %v10590_v59 = vpop.eup %7627 }
 0x513   : > { %vm10559_vm4 = vcmp.eq.f32.partialorder %v14509_v4, 8.507059e+37  ;;  %v10573_v56 = vsel %vm10427_vm8, %v10260_v33, %v3546_v11  ;;  %v10578_v36 = vsel %vm10434_vm11, %v10271_v14, %v3561_v57  ;;  %v3576_v58 = vsel %vm10553_vm13, %v10318_v38, %v3572_v54  ;;  %vm10596_vm8 = vmor %vm3588_vm1, %vm3589_vm15  ;;  %v4172_v38 = vld [vmem:[#allocation3 + $0xf0] sm:$0xff]  ;;  %v4446_v54 = vld [vmem:[#allocation3 + $0x168] sm:$0xff] }
 0x514   : > { %v14512_v61 = vand.u32 2147483647, %v10225_v35  ;;  %7629 = vrcp.f32 %v10252_v18  ;;  %v3602_v33 = vadd.f32 %v10351_v17, %v3601_v1  ;;  %vm3604_vm11 = vweird.f32 %v10351_v17  ;;  %4175 = vmatpush.msra.mxu2 %v4172_v38  ;;  %4451 = vmatpush.msrb.mxu1 %v4446_v54 }
 0x515   : > { %v3631_v20 = vmul.f32 %v10393_v48, %v3630_v3  ;;  %7631 = vrcp.f32 %v10258_v2  ;;  %v3591_v47 = vsel %vm10596_vm8, %v10336_v42, %v3587_v23  ;;  %v3617_v10 = vadd.f32 %v10360_v50, %v3616_v7  ;;  %v4122_v42 = vld [vmem:[#allocation3 + $0x68] sm:$0xff]  ;;  %vm10620_vm3 = vmor %vm3603_vm9, %vm3604_vm11  ;;  %v4170_v23 = vld [vmem:[#allocation3 + $0xe0] sm:$0xff] }
 0x516   : > { %vm10585_vm7 = vcmp.eq.f32.partialorder %v14512_v61, 8.507059e+37  ;;  %vm3619_vm1 = vweird.f32 %v10360_v50  ;;  %vm3648_vm6 = vweird.f32 %v10237_v16  ;;  %v3669_v63 = vand.u32 2147483648, %v10239_v37  ;;  %4176 = vmatpush.msra.mxu2 %v4171_v28  ;;  %4289 = vmatpush.msrb.mxu3 %v4122_v42 }
 0x517   : > { %v10614_v25 = vsel %vm10473_vm5, %v10298_v26, %v3576_v58  ;;  %v3645_v39 = vsub.f32 1.0, %v3644_v51  ;;  %v3660_v49 = vsub.f32 1.0, %v3659_v29  ;;  %v3675_v53 = vsub.f32 1.0, %v3674_v13  ;;  %vm10647_vm9 = vmor %vm3618_vm2, %vm3619_vm1  ;;  %v4169_v13 = vld [vmem:[#allocation3 + $0xd8] sm:$0xff] }
 0x518   : > { %vm3634_vm10 = vweird.f32 %v10393_v48  ;;  %v14519_v45 = vand.u32 2147483647, %v10232_v12  ;;  %vm3663_vm5 = vweird.f32 %v10239_v37  ;;  %v3667_v15 = vand.u32 2147483647, %v10239_v37  ;;  %4177 = vmatpush.msra.mxu2 %v4170_v23  ;;  %4290 = vmatpush.msrb.mxu3 %v4121_v41  ;;  %v4118_v23 = vld [vmem:[#allocation3 + $0x48] sm:$0xff] }
 0x519   : > { %v3689_v11 = vmul.f32 %v10590_v59, %v10250_v8  ;;  %v10638_v44 = vsel %vm10524_vm0, %v10304_v46, %v3591_v47  ;;  %v3606_v57 = vsel %vm10620_vm3, %v10351_v17, %v3602_v33  ;;  %v3632_v3 = vadd.f32 %v10393_v48, %v3631_v20  ;;  %vm10677_vm0 = vmor %vm3633_vm14, %vm3634_vm10  ;;  %v4168_v47 = vld [vmem:[#allocation3 + $0xd0] sm:$0xff] }
 0x51a   : > { %vm10627_vm15 = vcmp.eq.f32.partialorder %v14519_v45, 8.507059e+37  ;;  %vm3678_vm12 = vweird.f32 %v10244_v31  ;;  %v10653_v46 = vpop.eup %7629  ;;  %v3621_v17 = vsel %vm10647_vm9, %v10360_v50, %v3617_v10  ;;  %v10658_v7 = vor.u32 1.1754944e-38, %v3669_v63  ;;  %v4120_v50 = vld [vmem:[#allocation3 + $0x58] sm:$0xff]  ;;  %4178 = vmatpush.msra.mxu2 %v4169_v13  ;;  %v14531_v63 = vld [vmem:[#allocation21_spill] sm:$0xff]  ;;  %v4167_v45 = vld [vmem:[#allocation3 + $0xc8] sm:$0xff] }
 0x51b   : > { %v3682_v35 = vand.u32 2147483647, %v10244_v31  ;;  %7633 = vrcp.f32 %v10266_v30  ;;  %v10662_v40 = vpop.eup %7631  ;;  %v3646_v4 = vmul.f32 %v10459_v5, %v3645_v39  ;;  %v3661_v51 = vmul.f32 %v10480_v9, %v3660_v49  ;;  %4291 = vmatpush.msrb.mxu3 %v4120_v50  ;;  %v4119_v39 = vld [vmem:[#allocation3 + $0x50] sm:$0xff] }
 0x51c   : > { %v3676_v29 = vmul.f32 %v10498_v27, %v3675_v53  ;;  %7635 = vrcp.f32 %v10268_v62  ;;  %v10671_v58 = vsel %vm10559_vm4, %v10334_v6, %v3606_v57  ;;  %vm3649_vm2 = vweird.f32 %v10459_v5  ;;  %4179 = vmatpush.msra.mxu2 %v4168_v47  ;;  %v4164_v53 = vld [vmem:[#allocation3 + $0xb0] sm:$0xff] }
 0x51d   : > { %v3684_v14 = vand.u32 2147483648, %v10244_v31  ;;  %v3690_v33 = vsub.f32 1.0, %v3689_v11  ;;  %v10686_v6 = vsel %vm10585_vm7, %v10339_v55, %v3621_v17  ;;  %v3636_v12 = vsel %vm10677_vm0, %v10393_v48, %v3632_v3  ;;  %vm10716_vm7 = vmor %vm3648_vm6, %vm3649_vm2  ;;  %4292 = vmatpush.msrb.mxu3 %v4119_v39  ;;  %v14538_v3 = vld [vmem:[#allocation35_spill] sm:$0xff]  ;;  %v4442_v55 = vld [vmem:[#allocation3 + $0x148] sm:$0xff] }
 0x51e   : > { %v14526_v60 = vand.u32 2147483647, %v10237_v16  ;;  %vm3664_vm4 = vweird.f32 %v10480_v9  ;;  %v3704_v38 = vmul.f32 %v10653_v46, %v10252_v18  ;;  %vm10700_vm14 = vcmp.eq.f32.partialorder %v3667_v15, 8.507059e+37  ;;  %4180 = vmatpush.msra.mxu2 %v4167_v45  ;;  %v4163_v11 = vld [vmem:[#allocation3 + $0xa8] sm:$0xff] }
 0x51f   : > { %v3697_v24 = vand.u32 2147483647, %v10250_v8  ;;  %v3699_v48 = vand.u32 2147483648, %v10250_v8  ;;  %v10708_v10 = vmul.f32 %v10662_v40, %v10258_v2  ;;  %7637 = vrcp.f32 %v14531_v63  ;;  %vm10733_vm11 = vmor %vm3663_vm5, %vm3664_vm4  ;;  %4293 = vmatpush.msrb.mxu3 %v4118_v23 }
 0x520   : > { %vm10693_vm13 = vcmp.eq.f32.partialorder %v14526_v60, 8.507059e+37  ;;  %v3647_v49 = vadd.f32 %v10459_v5, %v3646_v4  ;;  %v10721_v28 = vadd.f32 %v10480_v9, %v3661_v51  ;;  %v10724_v42 = vadd.f32 %v10498_v27, %v3676_v29  ;;  %v4445_v4 = vld [vmem:[#allocation3 + $0x160] sm:$0xff]  ;;  %v4444_v60 = vld [vmem:[#allocation3 + $0x158] sm:$0xff] }
 0x521   : > { %vm3679_vm8 = vweird.f32 %v10498_v27  ;;  %v10727_v15 = vpop.eup %7633  ;;  %vm10737_vm1 = vcmp.eq.f32.partialorder %v3682_v35, 8.507059e+37  ;;  %v3685_v57 = vor.u32 1.1754944e-38, %v3684_v14  ;;  %v3691_v1 = vmul.f32 %v10590_v59, %v3690_v33  ;;  %v4166_v51 = vld [vmem:[#allocation3 + $0xc0] sm:$0xff]  ;;  %4452 = vmatpush.msrb.mxu1 %v4445_v4 }
 0x522   : > { %7639 = vrcp.f32 %v14538_v3  ;;  %v10743_v41 = vpop.eup %7635  ;;  %v10748_v37 = vsel %vm10627_vm15, %v10478_v19, %v3636_v12  ;;  %vm3693_vm6 = vweird.f32 %v10250_v8  ;;  %v3705_v17 = vsub.f32 1.0, %v3704_v38  ;;  %v4117_v29 = vld [vmem:[#allocation3 + $0x40] sm:$0xff]  ;;  %vm10756_vm3 = vmor %vm3678_vm12, %vm3679_vm8  ;;  %4181 = vmatpush.msra.mxu2 %v4166_v51  ;;  %v4165_v38 = vld [vmem:[#allocation3 + $0xb8] sm:$0xff] }
 0x523   : > { %v3714_v35 = vand.u32 2147483648, %v10252_v18  ;;  %vm3694_vm10 = vweird.f32 %v10590_v59  ;;  %vm10761_vm15 = vcmp.eq.f32.partialorder %v3697_v24, 8.507059e+37  ;;  %v10765_v26 = vor.u32 1.1754944e-38, %v3699_v48  ;;  %4294 = vmatpush.msrb.mxu3 %v4117_v29  ;;  %4453 = vmatpush.msrb.mxu1 %v4444_v60  ;;  %v4114_v51 = vld [vmem:[#allocation3 + $0x28] sm:$0xff] }
 0x524   : > { %v3712_v50 = vand.u32 2147483647, %v10252_v18  ;;  %v3720_v61 = vsub.f32 1.0, %v10708_v10  ;;  %v3651_v31 = vsel %vm10716_vm7, %v10459_v5, %v3647_v49  ;;  %v3666_v14 = vsel %vm10733_vm11, %v10480_v9, %v10721_v28  ;;  %4182 = vmatpush.msra.mxu2 %v4165_v38  ;;  %v4443_v49 = vld [vmem:[#allocation3 + $0x150] sm:$0xff]  ;;  %vm10822_vm12 = vmor %vm3693_vm6, %vm3694_vm10 }
 0x525   : > { %v3681_v33 = vsel %vm10756_vm3, %v10498_v27, %v10724_v42  ;;  %vm3708_vm5 = vweird.f32 %v10252_v18  ;;  %v3729_v12 = vand.u32 2147483648, %v10258_v2  ;;  %v10782_v47 = vpop.eup %7637  ;;  %v3692_v5 = vadd.f32 %v10590_v59, %v3691_v1  ;;  %v14543_v27 = vld [vmem:[#allocation17_spill] sm:$0xff]  ;;  %4295 = vmatpush.msrb.mxu3 %v4116_v0  ;;  %v4115_v28 = vld [vmem:[#allocation3 + $0x30] sm:$0xff]  ;;  %v14544_v1 = vld [vmem:[#allocation38_spill] sm:$0xff]  ;;  %4454 = vmatpush.msrb.mxu1 %v4443_v49 }
 0x526   : > { %v10787_v9 = vmul.f32 %v10727_v15, %v10266_v30  ;;  %v10791_v24 = vmul.f32 %v10743_v41, %v10268_v62  ;;  %7641 = vrcp.f32 %v14543_v27  ;;  %v3706_v48 = vmul.f32 %v10653_v46, %v3705_v17  ;;  %4183 = vmatpush.msra.mxu2 %v4164_v53 }
 0x527   : > { %v10795_v10 = vor.u32 1.1754944e-38, %v3714_v35  ;;  %vm3723_vm9 = vweird.f32 %v10258_v2  ;;  %v3727_v39 = vand.u32 2147483647, %v10258_v2  ;;  %v10804_v54 = vsel %vm10693_vm13, %v10495_v21, %v3651_v31  ;;  %4296 = vmatpush.msrb.mxu3 %v4115_v28  ;;  %4455 = vmatpush.msrb.mxu1 %v4442_v55  ;;  %v4162_v31 = vld [vmem:[#allocation3 + $0xa0] sm:$0xff] }
 0x528   : > { %v10799_v42 = vpop.eup %7639  ;;  %v3721_v45 = vmul.f32 %v10662_v40, %v3720_v61  ;;  %v3744_v16 = vand.u32 2147483648, %v10266_v30  ;;  %7643 = vrcp.f32 %v14544_v1  ;;  %v10812_v23 = vsel %vm10700_vm14, %v10658_v7, %v3666_v14  ;;  %4184 = vmatpush.msra.mxu2 %v4163_v11  ;;  %v4441_v61 = vld [vmem:[#allocation3 + $0x140] sm:$0xff]  ;;  %v14556_v11 = vld [vmem:[#allocation31_spill] sm:$0xff] }
 0x529   : > { %v10816_v17 = vsel %vm10737_vm1, %v3685_v57, %v3681_v33  ;;  %vm3709_vm0 = vweird.f32 %v10653_v46  ;;  %vm10827_vm2 = vcmp.eq.f32.partialorder %v3712_v50, 8.507059e+37  ;;  %v10833_v7 = vmul.f32 %v10782_v47, %v14531_v63  ;;  %4297 = vmatpush.msrb.mxu3 %v4114_v51  ;;  %v4113_v14 = vld [vmem:[#allocation3 + $0x20] sm:$0xff]  ;;  %4456 = vmatpush.msrb.mxu1 %v4441_v61 }
 0x52a   : > { %v3696_v8 = vsel %vm10822_vm12, %v10590_v59, %v3692_v5  ;;  %v10838_v57 = vor.u32 1.1754944e-38, %v3729_v12  ;;  %v3735_v35 = vsub.f32 1.0, %v10787_v9  ;;  %v3750_v4 = vsub.f32 1.0, %v10791_v24  ;;  %4185 = vmatpush.msra.mxu2 %v4162_v31  ;;  %v4440_v24 = vld [vmem:[#allocation3 + $0x138] sm:$0xff]  ;;  %vm10879_vm11 = vmor %vm3708_vm5, %vm3709_vm0 }
 0x52b   : > { %v10843_v29 = vadd.f32 %v10653_v46, %v3706_v48  ;;  %vm3724_vm13 = vweird.f32 %v10662_v40  ;;  %vm10846_vm4 = vcmp.eq.f32.partialorder %v3727_v39, 8.507059e+37  ;;  %vm3738_vm14 = vweird.f32 %v10266_v30  ;;  %v4642_v48 = vld [vmem:[#allocation3 + $0x1f8] sm:$0xff]  ;;  %4298 = vmatpush.msrb.mxu3 %v4113_v14  ;;  %4457 = vmatpush.msrb.mxu1 %v4440_v24  ;;  %v4159_v24 = vld [vmem:[#allocation3 + $0x88] sm:$0xff] }
 0x52c   : > { %v3742_v59 = vand.u32 2147483647, %v10266_v30  ;;  %v10854_v50 = vmul.f32 %v10799_v42, %v14538_v3  ;;  %v10856_v33 = vpop.eup %7641  ;;  %v10859_v12 = vadd.f32 %v10662_v40, %v3721_v45  ;;  %v10861_v60 = vor.u32 1.1754944e-38, %v3744_v16  ;;  %v4161_v39 = vld [vmem:[#allocation3 + $0x98] sm:$0xff]  ;;  %v14553_v45 = vld [vmem:[#allocation58_spill] sm:$0xff]  ;;  %4643 = vmatpush.msrb.mxu0 %v4642_v48  ;;  %vm10895_vm1 = vmor %vm3723_vm9, %vm3724_vm13 }
 0x52d   : > { %vm3753_vm7 = vweird.f32 %v10268_v62  ;;  %v3759_v38 = vand.u32 2147483648, %v10268_v62  ;;  %v10868_v0 = vsel %vm10761_vm15, %v10765_v26, %v3696_v8  ;;  %vm3739_vm8 = vweird.f32 %v10727_v15  ;;  %v4112_v16 = vld [vmem:[#allocation3 + $0x18] sm:$0xff]  ;;  %v4439_v8 = vld [vmem:[#allocation3 + $0x130] sm:$0xff]  ;;  %4186 = vmatpush.msra.mxu2 %v4161_v39  ;;  %v4110_v39 = vld [vmem:[#allocation3 + $0x8] sm:$0xff] }
 0x52e   : > { %v3757_v5 = vand.u32 2147483647, %v10268_v62  ;;  %v3765_v9 = vsub.f32 1.0, %v10833_v7  ;;  %v10873_v49 = vpop.eup %7643  ;;  %v3736_v26 = vmul.f32 %v10727_v15, %v3735_v35  ;;  %v3751_v53 = vmul.f32 %v10743_v41, %v3750_v4  ;;  %v4641_v35 = vld [vmem:[#allocation3 + $0x1f0] sm:$0xff]  ;;  %4299 = vmatpush.msrb.mxu3 %v4112_v16  ;;  %4458 = vmatpush.msrb.mxu1 %v4439_v8  ;;  %vm10956_vm9 = vmor %vm3738_vm14, %vm3739_vm8  ;;  %v4109_v8 = vld [vmem:[#allocation3] sm:$0xff] }
 0x52f   : > { %v3772_v28 = vand.u32 2147483647, %v14531_v63  ;;  %7645 = vrcp.f32 %v14553_v45  ;;  %v3711_v18 = vsel %vm10879_vm11, %v10653_v46, %v10843_v29  ;;  %v3780_v7 = vsub.f32 1.0, %v10854_v50  ;;  %4644 = vmatpush.msrb.mxu0 %v4641_v35  ;;  %v4160_v29 = vld [vmem:[#allocation3 + $0x90] sm:$0xff]  ;;  %v4636_v30 = vld [vmem:[#allocation3 + $0x1c8] sm:$0xff] }
 0x530   : > { %v10902_v55 = vmul.f32 %v10856_v33, %v14543_v27  ;;  %7647 = vrcp.f32 %v14556_v11  ;;  %v3726_v2 = vsel %vm10895_vm1, %v10662_v40, %v10859_v12  ;;  %vm10909_vm6 = vcmp.eq.f32.partialorder %v3742_v59, 8.507059e+37  ;;  %v4111_v50 = vld [vmem:[#allocation3 + $0x10] sm:$0xff]  ;;  %v4438_v12 = vld [vmem:[#allocation3 + $0x128] sm:$0xff]  ;;  %4187 = vmatpush.msra.mxu2 %v4160_v29 }
 0x531   : > { %v10913_v4 = vor.u32 1.1754944e-38, %v3759_v38  ;;  %vm3768_vm3 = vweird.f32 %v14531_v63  ;;  %v3774_v51 = vand.u32 2147483648, %v14531_v63  ;;  %vm10917_vm10 = vcmp.eq.f32.partialorder %v3757_v5, 8.507059e+37  ;;  %v4640_v38 = vld [vmem:[#allocation3 + $0x1e8] sm:$0xff]  ;;  %4300 = vmatpush.msrb.mxu3 %v4111_v50  ;;  %4459 = vmatpush.msrb.mxu1 %v4438_v12  ;;  %v4125_v35 = vld [vmem:[#allocation2 + $0x1] sm:$0xff] }
 0x532   : > { %v3766_v40 = vmul.f32 %v10782_v47, %v3765_v9  ;;  %v3787_v59 = vand.u32 2147483647, %v14538_v3  ;;  %v3789_v31 = vand.u32 2147483648, %v14538_v3  ;;  %v10926_v14 = vmul.f32 %v10873_v49, %v14544_v1  ;;  %4645 = vmatpush.msrb.mxu0 %v4640_v38  ;;  %4188 = vmatpush.msra.mxu2 %v4159_v24  ;;  %v4436_v12 = vld [vmem:[#allocation3 + $0x118] sm:$0xff] }
 0x533   : > { %v10931_v5 = vsel %vm10827_vm2, %v10795_v10, %v3711_v18  ;;  %v3737_v9 = vadd.f32 %v10727_v15, %v3736_v26  ;;  %v10935_v48 = vadd.f32 %v10743_v41, %v3751_v53  ;;  %vm3754_vm15 = vweird.f32 %v10743_v41  ;;  %v14563_v10 = vld [vmem:[#allocation36_spill] sm:$0xff]  ;;  %v4437_v18 = vld [vmem:[#allocation3 + $0x120] sm:$0xff]  ;;  %4301 = vmatpush.msrb.mxu3 %v4110_v39  ;;  %v4637_v39 = vld [vmem:[#allocation3 + $0x1d0] sm:$0xff] }
 0x534   : > { %vm10938_vm5 = vcmp.eq.f32.partialorder %v3772_v28, 8.507059e+37  ;;  %v3781_v16 = vmul.f32 %v10799_v42, %v3780_v7  ;;  %v3795_v20 = vsub.f32 1.0, %v10902_v55  ;;  %7649 = vrcp.f32 %v14563_v10  ;;  %v4639_v26 = vld [vmem:[#allocation3 + $0x1e0] sm:$0xff]  ;;  %4460 = vmatpush.msrb.mxu1 %v4437_v18  ;;  %vm10968_vm2 = vmor %vm3753_vm7, %vm3754_vm15  ;;  %v4638_v38 = vld [vmem:[#allocation3 + $0x1d8] sm:$0xff] }
 0x535   : > { %v4158_v53 = vld [vmem:[#allocation3 + $0x80] sm:$0xff]  ;;  %v10945_v21 = vpop.eup %7645  ;;  %v10950_v28 = vsel %vm10846_vm4, %v10838_v57, %v3726_v2  ;;  %vm3769_vm12 = vweird.f32 %v10782_v47  ;;  %v3775_v55 = vor.u32 1.1754944e-38, %v3774_v51  ;;  %vm3783_vm0 = vweird.f32 %v14538_v3  ;;  %4646 = vmatpush.msrb.mxu0 %v4639_v26  ;;  %4302 = vmatpush.msrb.mxu3 %v4109_v8  ;;  %v10995_v18 = vld [vmem:[#allocation2 + $0x18] sm:$0xff]  ;;  %v14593_v3 = vld [vmem:[#allocation27_spill] sm:$0xff] }
 0x536   : > { %v10962_v13 = vpop.eup %7647  ;;  %v3767_v57 = vadd.f32 %v10782_v47, %v3766_v40  ;;  %vm10973_vm13 = vcmp.eq.f32.partialorder %v3787_v59, 8.507059e+37  ;;  %v10977_v51 = vor.u32 1.1754944e-38, %v3789_v31  ;;  %v3802_v29 = vand.u32 2147483647, %v14543_v27  ;;  %4189 = vmatpush.msra.mxu2 %v4158_v53  ;;  %4461 = vmatpush.msrb.mxu1 %v4436_v12  ;;  %vm11002_vm14 = vmor %vm3768_vm3, %vm3769_vm12 }
 0x537   : > { %v3810_v50 = vsub.f32 1.0, %v10926_v14  ;;  %v3741_v62 = vsel %vm10956_vm9, %v10727_v15, %v3737_v9  ;;  %v3756_v40 = vsel %vm10968_vm2, %v10743_v41, %v10935_v48  ;;  %vm3784_vm4 = vweird.f32 %v10799_v42  ;;  %4647 = vmatpush.msrb.mxu0 %v4638_v38  ;;  %v4435_v9 = vld [vmem:[#allocation3 + $0x110] sm:$0xff]  ;;  %4190 = vmatmul.f32.vlgmr.msra.gmra.mxu2 %v4125_v35  ;;  %v4434_v35 = vld [vmem:[#allocation3 + $0x108] sm:$0xff] }
 0x538   : > { %v3804_v59 = vand.u32 2147483648, %v14543_v27  ;;  %v3782_v31 = vadd.f32 %v10799_v42, %v3781_v16  ;;  %v3796_v14 = vmul.f32 %v10856_v33, %v3795_v20  ;;  %v3817_v24 = vand.u32 2147483647, %v14544_v1  ;;  %4303 = vmatmul.f32.vlgmr.msrb.gmra.mxu3 %v10995_v18  ;;  %v14572_v20 = vld [vmem:[#allocation9_spill] sm:$0xff]  ;;  %4462 = vmatpush.msrb.mxu1 %v4435_v9  ;;  %vm11035_vm11 = vmor %vm3783_vm0, %vm3784_vm4 }
 0x539   : > { %v3824_v15 = vmul.f32 %v10945_v21, %v14553_v45  ;;  %vm3798_vm7 = vweird.f32 %v14543_v27  ;;  %v3819_v48 = vand.u32 2147483648, %v14544_v1  ;;  %v3839_v16 = vmul.f32 %v10962_v13, %v14556_v11  ;;  %4648 = vmatpush.msrb.mxu0 %v4637_v39 }
 0x53a   : > { %7651 = vrcp.f32 %v14572_v20  ;;  %v11011_v26 = vpop.eup %7649  ;;  %v11016_v63 = vsel %vm10909_vm6, %v10861_v60, %v3741_v62  ;;  %v3771_v53 = vsel %vm11002_vm14, %v10782_v47, %v3767_v57  ;;  %vm11021_vm8 = vcmp.eq.f32.partialorder %v3802_v29, 8.507059e+37  ;;  %4463 = vmatpush.msrb.mxu1 %v4434_v35  ;;  %v4433_v29 = vld [vmem:[#allocation3 + $0x100] sm:$0xff]  ;;  %v14585_v60 = vld [vmem:[#allocation55_spill] sm:$0xff] }
 0x53b   : > { %v3811_v8 = vmul.f32 %v10873_v49, %v3810_v50  ;;  %v11029_v12 = vsel %vm10917_vm10, %v10913_v4, %v3756_v40  ;;  %v3805_v47 = vor.u32 1.1754944e-38, %v3804_v59  ;;  %vm3813_vm1 = vweird.f32 %v14544_v1  ;;  %4649 = vmatpush.msrb.mxu0 %v4636_v30  ;;  %v4635_v50 = vld [vmem:[#allocation3 + $0x1c0] sm:$0xff]  ;;  %v4400_v59 = vld [vmem:[#allocation2 + $0x2] sm:$0xff] }
 0x53c   : > { %v3834_v46 = vand.u32 2147483648, %v14553_v45  ;;  %v3786_v61 = vsel %vm11035_vm11, %v10799_v42, %v3782_v31  ;;  %v3797_v4 = vadd.f32 %v10856_v33, %v3796_v14  ;;  %vm3799_vm6 = vweird.f32 %v10856_v33  ;;  %4464 = vmatpush.msrb.mxu1 %v4433_v29  ;;  %v4126_v31 = vld [vmem:[#allocation2 + $0x9] sm:$0xff]  ;;  %v4632_v29 = vld [vmem:[#allocation3 + $0x1a8] sm:$0xff] }
 0x53d   : > { %vm11046_vm3 = vcmp.eq.f32.partialorder %v3817_v24, 8.507059e+37  ;;  %v3825_v57 = vsub.f32 1.0, %v3824_v15  ;;  %v11052_v38 = vsel %vm10938_vm5, %v3775_v55, %v3771_v53  ;;  %v3820_v62 = vor.u32 1.1754944e-38, %v3819_v48  ;;  %4650 = vmatpush.msrb.mxu0 %v4635_v50  ;;  %4465 = vmatmul.f32.vlgmr.msrb.gmra.mxu1 %v4400_v59  ;;  %v4634_v55 = vld [vmem:[#allocation3 + $0x1b8] sm:$0xff]  ;;  %vm11072_vm5 = vmor %vm3798_vm7, %vm3799_vm6  ;;  %v14582_v53 = vld [vmem:[#allocation75_spill] sm:$0xff] }
 0x53e   : > { %v3840_v40 = vsub.f32 1.0, %v3839_v16  ;;  %v3854_v42 = vmul.f32 %v11011_v26, %v14563_v10  ;;  %v3812_v14 = vadd.f32 %v10873_v49, %v3811_v8  ;;  %vm3814_vm10 = vweird.f32 %v10873_v49  ;;  %v14581_v16 = vld [vmem:[#allocation16_spill] sm:$0xff]  ;;  %v4633_v8 = vld [vmem:[#allocation3 + $0x1b0] sm:$0xff] }
 0x53f   : > { %vm3828_vm15 = vweird.f32 %v14553_v45  ;;  %v3832_v24 = vand.u32 2147483647, %v14553_v45  ;;  %v3847_v19 = vand.u32 2147483647, %v14556_v11  ;;  %v11066_v9 = vsel %vm10973_vm13, %v10977_v51, %v3786_v61  ;;  %4651 = vmatpush.msrb.mxu0 %v4634_v55  ;;  %4193 = vmatmul.f32.gmra.mxu2 %v4126_v31  ;;  %vm11091_vm12 = vmor %vm3813_vm1, %vm3814_vm10  ;;  %v14591_v55 = vld [vmem:[#allocation30_spill] sm:$0xff] }
 0x540   : > { %v11061_v15 = vpop.eup %7651  ;;  %v11076_v41 = vor.u32 1.1754944e-38, %v3834_v46  ;;  %vm3843_vm9 = vweird.f32 %v14556_v11  ;;  %v3849_v48 = vand.u32 2147483648, %v14556_v11  ;;  %7653 = vrcp.f32 %v14581_v16  ;;  %4306 = vmatmul.f32.gmra.mxu3 %v10995_v18 }
 0x541   : > { %v3801_v2 = vsel %vm11072_vm5, %v10856_v33, %v3797_v4  ;;  %v3826_v51 = vmul.f32 %v10945_v21, %v3825_v57  ;;  %v3864_v27 = vand.u32 2147483648, %v14563_v10  ;;  %7655 = vrcp.f32 %v14582_v53  ;;  %v14588_v57 = vld [vmem:[#allocation90_spill] sm:$0xff]  ;;  %4652 = vmatpush.msrb.mxu0 %v4633_v8 }
 0x542   : > { %vm3829_vm0 = vweird.f32 %v10945_v21  ;;  %v3841_v33 = vmul.f32 %v10962_v13, %v3840_v40  ;;  %v3855_v30 = vsub.f32 1.0, %v3854_v42  ;;  %7657 = vrcp.f32 %v14585_v60 }
 0x543   : > { %v3816_v46 = vsel %vm11091_vm12, %v10873_v49, %v3812_v14  ;;  %vm11102_vm2 = vcmp.eq.f32.partialorder %v3832_v24, 8.507059e+37  ;;  %v3862_v1 = vand.u32 2147483647, %v14563_v10  ;;  %v3869_v4 = vmul.f32 %v11061_v15, %v14572_v20  ;;  %4653 = vmatpush.msrb.mxu0 %v4632_v29  ;;  %v4630_v29 = vld [vmem:[#allocation3 + $0x198] sm:$0xff] }
 0x544   : > { %7659 = vrcp.f32 %v14588_v57  ;;  %v11112_v18 = vsel %vm11021_vm8, %v3805_v47, %v3801_v2  ;;  %v11114_v50 = vor.u32 1.1754944e-38, %v3849_v48  ;;  %v3879_v49 = vand.u32 2147483648, %v14572_v20  ;;  %v4631_v47 = vld [vmem:[#allocation3 + $0x1a0] sm:$0xff]  ;;  %vm11155_vm8 = vmor %vm3828_vm15, %vm3829_vm0 }
 0x545   : > { %7661 = vrcp.f32 %v10461_v52  ;;  %v3827_v40 = vadd.f32 %v10945_v21, %v3826_v51  ;;  %vm3844_vm13 = vweird.f32 %v10962_v13  ;;  %vm11120_vm4 = vcmp.eq.f32.partialorder %v3847_v19, 8.507059e+37  ;;  %v4401_v48 = vld [vmem:[#allocation2 + $0xa] sm:$0xff]  ;;  %4654 = vmatpush.msrb.mxu0 %v4631_v47 }
 0x546   : > { %vm3858_vm14 = vweird.f32 %v14563_v10  ;;  %v11125_v59 = vor.u32 1.1754944e-38, %v3864_v27  ;;  %v3877_v7 = vand.u32 2147483647, %v14572_v20  ;;  %v11128_v31 = vpop.eup %7653  ;;  %v11132_v14 = vsel %vm11046_vm3, %v3820_v62, %v3816_v46  ;;  %v14592_v27 = vld [vmem:[#allocation12_spill] sm:$0xff]  ;;  %4468 = vmatmul.f32.gmra.mxu1 %v4401_v48  ;;  %v14597_v46 = vld [vmem:[#allocation34_spill] sm:$0xff]  ;;  %vm11179_vm11 = vmor %vm3843_vm9, %vm3844_vm13 }
 0x547   : > { %v3842_v24 = vadd.f32 %v10962_v13, %v3841_v33  ;;  %v3856_v19 = vmul.f32 %v11011_v26, %v3855_v30  ;;  %v3958_v39 = vmul.f32 %v10503_v32, %v14591_v55  ;;  %v11138_v2 = vpop.eup %7655  ;;  %vm3859_vm7 = vweird.f32 %v11011_v26  ;;  %v14596_v30 = vld [vmem:[#allocation40_spill] sm:$0xff]  ;;  %4655 = vmatpush.msrb.mxu0 %v4630_v29 }
 0x548   : > { %v3870_v51 = vsub.f32 1.0, %v3869_v4  ;;  %v11143_v8 = vmul.f32 %v10508_v43, %v14592_v27  ;;  %v11147_v62 = vmul.f32 %v10539_v22, %v14593_v3  ;;  %v11149_v35 = vpop.eup %7657  ;;  %v11159_v33 = vor.u32 1.1754944e-38, %v3879_v49  ;;  %v14603_v3 = vld [vmem:[#allocation23_spill] sm:$0xff]  ;;  %vm11253_vm15 = vmor %vm3858_vm14, %vm3859_vm7 }
 0x549   : > { %v3892_v43 = vand.u32 2147483647, %v14581_v16  ;;  %v11164_v22 = vmul.f32 %v10547_v34, %v14596_v30  ;;  %v11168_v4 = vmul.f32 %v10573_v56, %v14597_v46  ;;  %4045 = vst [vmem:[#allocation2 + $0x19] sm:$0xff] %v3958_v39  ;;  %v3831_v45 = vsel %vm11155_vm8, %v10945_v21, %v3827_v40  ;;  %v14602_v21 = vld [vmem:[#allocation45_spill] sm:$0xff]  ;;  %v14604_v46 = vld [vmem:[#allocation43_spill] sm:$0xff]  ;;  %4196 = vmatmul.f32.gmra.mxu2 %v3958_v39 }
 0x54a   : > { %v11170_v47 = vpop.eup %7659  ;;  %vm11183_vm1 = vcmp.eq.f32.partialorder %v3862_v1, 8.507059e+37  ;;  %vm3873_vm6 = vweird.f32 %v14572_v20  ;;  %v3884_v56 = vmul.f32 %v11128_v31, %v14581_v16  ;;  %v3894_v55 = vand.u32 2147483648, %v14581_v16  ;;  %4046 = vst [vmem:[#allocation2 + $0x21] sm:$0xff] %v11143_v8 }
 0x54b   : > { %v11193_v40 = vmul.f32 %v10578_v36, %v14602_v21  ;;  %v11196_v11 = vpop.eup %7661  ;;  %v3846_v1 = vsel %vm11179_vm11, %v10962_v13, %v3842_v24  ;;  %v3857_v48 = vadd.f32 %v11011_v26, %v3856_v19  ;;  %v3899_v27 = vmul.f32 %v11138_v2, %v14582_v53  ;;  %4047 = vst [vmem:[#allocation2 + $0x31] sm:$0xff] %v11147_v62 }
 0x54c   : > { %v11206_v32 = vmul.f32 %v10614_v25, %v14603_v3  ;;  %v3871_v36 = vmul.f32 %v11061_v15, %v3870_v51  ;;  %vm3874_vm3 = vweird.f32 %v11061_v15  ;;  %v3914_v30 = vmul.f32 %v11149_v35, %v14585_v60  ;;  %4048 = vst [vmem:[#allocation2 + $0x39] sm:$0xff] %v11164_v22  ;;  %v14605_v51 = vld [vmem:[#allocation53_spill] sm:$0xff] }
 0x54d   : > { %v11215_v13 = vmul.f32 %v10638_v44, %v14604_v46  ;;  %v11221_v25 = vsel %vm11102_vm2, %v11076_v41, %v3831_v45  ;;  %v3909_v24 = vand.u32 2147483648, %v14582_v53  ;;  %v3929_v19 = vmul.f32 %v11170_v47, %v14588_v57  ;;  %4049 = vst [vmem:[#allocation2 + $0x49] sm:$0xff] %v11168_v4  ;;  %v14608_v45 = vld [vmem:[#allocation19_spill] sm:$0xff]  ;;  %v14613_v46 = vld [vmem:[#allocation54_spill] sm:$0xff]  ;;  %vm11300_vm2 = vmor %vm3873_vm6, %vm3874_vm3 }
 0x54e   : > { %v11228_v49 = vmul.f32 %v10671_v58, %v14605_v51  ;;  %vm11231_vm10 = vcmp.eq.f32.partialorder %v3877_v7, 8.507059e+37  ;;  %v3885_v29 = vsub.f32 1.0, %v3884_v56  ;;  %v11235_v61 = vor.u32 1.1754944e-38, %v3894_v55  ;;  %4050 = vst [vmem:[#allocation2 + $0x51] sm:$0xff] %v11193_v40  ;;  %v14614_v51 = vld [vmem:[#allocation56_spill] sm:$0xff] }
 0x54f   : > { %v3944_v41 = vmul.f32 %v11196_v11, %v10461_v52  ;;  %v11241_v21 = vmul.f32 %v10686_v6, %v14608_v45  ;;  %v11247_v58 = vsel %vm11120_vm4, %v11114_v50, %v3846_v1  ;;  %v3900_v39 = vsub.f32 1.0, %v3899_v27  ;;  %v14611_v6 = vld [vmem:[#allocation10_spill] sm:$0xff]  ;;  %4051 = vst [vmem:[#allocation2 + $0x61] sm:$0xff] %v11206_v32  ;;  %v14628_v44 = vld [vmem:[#allocation24_spill] sm:$0xff] }
 0x550   : > { %v3907_v56 = vand.u32 2147483647, %v14582_v53  ;;  %v11260_v55 = vmul.f32 %v10748_v37, %v14611_v6  ;;  %v3861_v50 = vsel %vm11253_vm15, %v11011_v26, %v3857_v48  ;;  %v3872_v42 = vadd.f32 %v11061_v15, %v3871_v36  ;;  %v14612_v1 = vld [vmem:[#allocation50_spill] sm:$0xff]  ;;  %4052 = vst [vmem:[#allocation2 + $0x69] sm:$0xff] %v11215_v13  ;;  %v4629_v48 = vld [vmem:[#allocation3 + $0x190] sm:$0xff]  ;;  %v14620_v6 = vld [vmem:[#allocation49_spill] sm:$0xff] }
 0x551   : > { %vm3888_vm5 = vweird.f32 %v14581_v16  ;;  %v3915_v10 = vsub.f32 1.0, %v3914_v30  ;;  %v11270_v27 = vmul.f32 %v10804_v54, %v14612_v1  ;;  %vm3889_vm9 = vweird.f32 %v11128_v31  ;;  %4053 = vst [vmem:[#allocation2 + $0x79] sm:$0xff] %v11228_v49  ;;  %v4079_v36 = vld [vmem:[#allocation2 + $0x18] sm:$0xff]  ;;  %4656 = vmatpush.msrb.mxu0 %v4629_v48  ;;  %4199 = vmatmul.f32.gmra.mxu2 %v11143_v8  ;;  %v14625_v8 = vld [vmem:[#allocation41_spill] sm:$0xff] }
 0x552   : > { %vm3903_vm12 = vweird.f32 %v14582_v53  ;;  %v11275_v37 = vor.u32 1.1754944e-38, %v3909_v24  ;;  %v3930_v3 = vsub.f32 1.0, %v3929_v19  ;;  %v11279_v26 = vmul.f32 %v10812_v23, %v14613_v46  ;;  %4054 = vst [vmem:[#allocation2 + $0x81] sm:$0xff] %v11241_v21  ;;  %v11289_v24 = vld [vmem:[#allocation2 + $0x1a] sm:$0xff]  ;;  %4309 = vmatmul.f32.gmra.mxu3 %v4079_v36 }
 0x553   : > { %v3886_v54 = vmul.f32 %v11128_v31, %v3885_v29  ;;  %vm3918_vm0 = vweird.f32 %v14585_v60  ;;  %v3945_v30 = vsub.f32 1.0, %v3944_v41  ;;  %v11286_v45 = vmul.f32 %v10816_v17, %v14614_v51  ;;  %v14617_v41 = vld [vmem:[#allocation46_spill] sm:$0xff]  ;;  %4055 = vst [vmem:[#allocation2 + $0x91] sm:$0xff] %v11260_v55  ;;  %4471 = vmatmul.f32.gmra.mxu1 %v11289_v24 }
 0x554   : > { %v11294_v23 = vsel %vm11183_vm1, %v11125_v59, %v3861_v50  ;;  %v3901_v17 = vmul.f32 %v11138_v2, %v3900_v39  ;;  %v3922_v29 = vand.u32 2147483647, %v14585_v60  ;;  %v11308_v7 = vmul.f32 %v10868_v0, %v14617_v41  ;;  %v4628_v59 = vld [vmem:[#allocation3 + $0x188] sm:$0xff]  ;;  %4056 = vst [vmem:[#allocation2 + $0x99] sm:$0xff] %v11270_v27  ;;  %vm11373_vm1 = vmor %vm3888_vm5, %vm3889_vm9  ;;  %v14646_v0 = vld [vmem:[#allocation20_spill] sm:$0xff] }
 0x555   : > { %v3876_v34 = vsel %vm11300_vm2, %v11061_v15, %v3872_v42  ;;  %vm11316_vm13 = vcmp.eq.f32.partialorder %v3892_v43, 8.507059e+37  ;;  %v3916_v39 = vmul.f32 %v11149_v35, %v3915_v10  ;;  %v11323_v50 = vmul.f32 %v10931_v5, %v14620_v6  ;;  %v14623_v42 = vld [vmem:[#allocation14_spill] sm:$0xff]  ;;  %4057 = vst [vmem:[#allocation2 + $0xa9] sm:$0xff] %v11279_v26  ;;  %v4627_v5 = vld [vmem:[#allocation3 + $0x180] sm:$0xff]  ;;  %4657 = vmatpush.msrb.mxu0 %v4628_v59 }
 0x556   : > { %vm11326_vm4 = vcmp.eq.f32.partialorder %v3907_v56, 8.507059e+37  ;;  %v3924_v15 = vand.u32 2147483648, %v14585_v60  ;;  %v3931_v43 = vmul.f32 %v11170_v47, %v3930_v3  ;;  %vm3933_vm14 = vweird.f32 %v14588_v57  ;;  %v14624_v3 = vld [vmem:[#allocation62_spill] sm:$0xff]  ;;  %4058 = vst [vmem:[#allocation2 + $0xb1] sm:$0xff] %v11286_v45  ;;  %v14637_v6 = vld [vmem:[#allocation13_spill] sm:$0xff] }
 0x557   : > { %v11335_v10 = vmul.f32 %v10950_v28, %v14623_v42  ;;  %v3887_v56 = vadd.f32 %v11128_v31, %v3886_v54  ;;  %v3937_v1 = vand.u32 2147483647, %v14588_v57  ;;  %v3946_v46 = vmul.f32 %v11196_v11, %v3945_v30  ;;  %4059 = vst [vmem:[#allocation2 + $0xc1] sm:$0xff] %v11308_v7  ;;  %4658 = vmatpush.msrb.mxu0 %v4627_v5  ;;  %v11499_v41 = vld [vmem:[#allocation2 + $0x38] sm:$0xff] }
 0x558   : > { %v11345_v48 = vmul.f32 %v11016_v63, %v14624_v3  ;;  %v3881_v28 = vsel %vm11231_vm10, %v11159_v33, %v3876_v34  ;;  %v3902_v51 = vadd.f32 %v11138_v2, %v3901_v17  ;;  %vm3904_vm7 = vweird.f32 %v11138_v2  ;;  %4060 = vst [vmem:[#allocation2 + $0xc9] sm:$0xff] %v11323_v50  ;;  %4659 = vmatmul.f32.vlgmr.msrb.gmra.mxu0 %v4079_v36  ;;  %v11518_v53 = vld [vmem:[#allocation2 + $0x52] sm:$0xff] }
 0x559   : > { %v11355_v54 = vmul.f32 %v11029_v12, %v14625_v8  ;;  %v3917_v63 = vadd.f32 %v11149_v35, %v3916_v39  ;;  %vm3919_vm8 = vweird.f32 %v11149_v35  ;;  %vm11360_vm11 = vcmp.eq.f32.partialorder %v3922_v29, 8.507059e+37  ;;  %v14631_v29 = vld [vmem:[#allocation44_spill] sm:$0xff]  ;;  %4061 = vst [vmem:[#allocation2 + $0xd9] sm:$0xff] %v11335_v10  ;;  %vm11392_vm3 = vmor %vm3903_vm12, %vm3904_vm7  ;;  %4202 = vmatmul.f32.gmra.mxu2 %v11147_v62 }
 0x55a   : > { %v11366_v33 = vmul.f32 %v11052_v38, %v14628_v44  ;;  %v3932_v19 = vadd.f32 %v11170_v47, %v3931_v43  ;;  %vm3934_vm6 = vweird.f32 %v11170_v47  ;;  %v3939_v17 = vand.u32 2147483648, %v14588_v57  ;;  %4062 = vst [vmem:[#allocation2 + $0xe1] sm:$0xff] %v11345_v48  ;;  %vm11410_vm15 = vmor %vm3918_vm0, %vm3919_vm8  ;;  %v4080_v43 = vld [vmem:[#allocation2 + $0x20] sm:$0xff] }
 0x55b   : > { %v11382_v38 = vmul.f32 %v11066_v9, %v14631_v29  ;;  %v3891_v16 = vsel %vm11373_vm1, %v11128_v31, %v3887_v56  ;;  %v3947_v59 = vadd.f32 %v11196_v11, %v3946_v46  ;;  %vm3949_vm10 = vweird.f32 %v11196_v11  ;;  %v14634_v9 = vld [vmem:[#allocation60_spill] sm:$0xff]  ;;  %4063 = vst [vmem:[#allocation2 + $0xf1] sm:$0xff] %v11355_v54  ;;  %vm11427_vm5 = vmor %vm3933_vm14, %vm3934_vm6  ;;  %4312 = vmatmul.f32.gmra.mxu3 %v4080_v43  ;;  %v14644_v46 = vld [vmem:[#allocation51_spill] sm:$0xff] }
 0x55c   : > { %v11400_v34 = vmul.f32 %v11112_v18, %v14634_v9  ;;  %v3906_v31 = vsel %vm11392_vm3, %v11138_v2, %v3902_v51  ;;  %v3925_v36 = vor.u32 1.1754944e-38, %v3924_v15  ;;  %v3954_v39 = vand.u32 2147483648, %v10461_v52  ;;  %v14640_v15 = vld [vmem:[#allocation22_spill] sm:$0xff]  ;;  %4064 = vst [vmem:[#allocation2 + $0xf9] sm:$0xff] %v11366_v33  ;;  %v14645_v51 = vld [vmem:[#allocation59_spill] sm:$0xff]  ;;  %v11507_v9 = vld [vmem:[#allocation2 + $0x48] sm:$0xff] }
 0x55d   : > { %v11417_v18 = vmul.f32 %v11132_v14, %v14637_v6  ;;  %v3921_v2 = vsel %vm11410_vm15, %v11149_v35, %v3917_v63  ;;  %vm3948_vm9 = vweird.f32 %v10461_v52  ;;  %v3952_v14 = vand.u32 2147483647, %v10461_v52  ;;  %v11438_v35 = vld [vmem:[#allocation2 + $0x22] sm:$0xff]  ;;  %4065 = vst [vmem:[#allocation2 + $0x109] sm:$0xff] %v11382_v38  ;;  %v4410_v6 = vld [vmem:[#allocation2 + $0x7a] sm:$0xff] }
 0x55e   : > { %v11435_v42 = vmul.f32 %v11221_v25, %v14640_v15  ;;  %v3896_v57 = vsel %vm11316_vm13, %v11235_v61, %v3891_v16  ;;  %v3936_v5 = vsel %vm11427_vm5, %v11170_v47, %v3932_v19  ;;  %vm11448_vm12 = vmor %vm3948_vm9, %vm3949_vm10  ;;  %v14643_v25 = vld [vmem:[#allocation25_spill] sm:$0xff]  ;;  %4474 = vmatmul.f32.gmra.mxu1 %v11438_v35  ;;  %v3911_v47 = vsel %vm11326_vm4, %v11275_v37, %v3906_v31  ;;  %v14647_v63 = vld [vmem:[#allocation39_spill] sm:$0xff] }
 0x55f   : > { %v11454_v56 = vmul.f32 %v11247_v58, %v14643_v25  ;;  %v3940_v61 = vor.u32 1.1754944e-38, %v3939_v17  ;;  %v3951_v20 = vsel %vm11448_vm12, %v11196_v11, %v3947_v59  ;;  %v11467_v3 = vmul.f32 %v11294_v23, %v14644_v46  ;;  %4066 = vst [vmem:[#allocation2 + $0x111] sm:$0xff] %v11400_v34  ;;  %v11488_v19 = vld [vmem:[#allocation2 + $0x30] sm:$0xff]  ;;  %v14650_v17 = vld [vmem:[#allocation11_spill] sm:$0xff]  ;;  %v4090_v60 = vld [vmem:[#allocation2 + $0x98] sm:$0xff] }
 0x560   : > { %v3926_v58 = vsel %vm11360_vm11, %v3925_v36, %v3921_v2  ;;  %vm3938_vm0 = vcmp.eq.f32.partialorder %v3937_v1, 8.507059e+37  ;;  %v3955_v62 = vor.u32 1.1754944e-38, %v3954_v39  ;;  %v11473_v8 = vmul.f32 %v3881_v28, %v14645_v51  ;;  %4067 = vst [vmem:[#allocation2 + $0x121] sm:$0xff] %v11417_v18  ;;  %4662 = vmatmul.f32.gmra.mxu0 %v4080_v43  ;;  %v14648_v1 = vld [vmem:[#allocation47_spill] sm:$0xff]  ;;  %v14649_v28 = vld [vmem:[#allocation18_spill] sm:$0xff]  ;;  %v11515_v31 = vld [vmem:[#allocation2 + $0x50] sm:$0xff] }
 0x561   : > { %v3941_v37 = vsel %vm3938_vm0, %v3940_v61, %v3936_v5  ;;  %vm3953_vm2 = vcmp.eq.f32.partialorder %v3952_v14, 8.507059e+37  ;;  %v11477_v11 = vmul.f32 %v3896_v57, %v14646_v0  ;;  %4068 = vst [vmem:[#allocation2 + $0x129] sm:$0xff] %v11435_v42  ;;  %v11481_v44 = vmul.f32 %v3911_v47, %v14647_v63  ;;  %v11493_v16 = vld [vmem:[#allocation2 + $0x32] sm:$0xff]  ;;  %4205 = vmatmul.f32.gmra.mxu2 %v11164_v22  ;;  %v11502_v59 = vld [vmem:[#allocation2 + $0x3a] sm:$0xff]  ;;  %v11510_v22 = vld [vmem:[#allocation2 + $0x4a] sm:$0xff] }
 0x562   : > { %v3956_v23 = vsel %vm3953_vm2, %v3955_v62, %v3951_v20  ;;  %4069 = vst [vmem:[#allocation2 + $0x139] sm:$0xff] %v11454_v56  ;;  %v3987_v30 = vmul.f32 %v3926_v58, %v14648_v1  ;;  %v3988_v12 = vmul.f32 %v3941_v37, %v14649_v28  ;;  %v4408_v36 = vld [vmem:[#allocation2 + $0x62] sm:$0xff]  ;;  %v4409_v39 = vld [vmem:[#allocation2 + $0x6a] sm:$0xff]  ;;  %v4412_v2 = vld [vmem:[#allocation2 + $0x92] sm:$0xff] }
 0x563   : > { %4070 = vst [vmem:[#allocation2 + $0x141] sm:$0xff] %v11467_v3  ;;  %v3989_v29 = vmul.f32 %v3956_v23, %v14650_v17  ;;  %4315 = vmatmul.f32.gmra.mxu3 %v11488_v19  ;;  %v4411_v43 = vld [vmem:[#allocation2 + $0x82] sm:$0xff]  ;;  %v4413_v14 = vld [vmem:[#allocation2 + $0x9a] sm:$0xff]  ;;  %v4414_v15 = vld [vmem:[#allocation2 + $0xaa] sm:$0xff] }
 0x564   : > { %4071 = vst [vmem:[#allocation2 + $0x151] sm:$0xff] %v11473_v8  ;;  %v4415_v57 = vld [vmem:[#allocation2 + $0xb2] sm:$0xff]  ;;  %v4416_v52 = vld [vmem:[#allocation2 + $0xc2] sm:$0xff]  ;;  %v4418_v51 = vld [vmem:[#allocation2 + $0xda] sm:$0xff] }
 0x565   : > { %4072 = vst [vmem:[#allocation2 + $0x159] sm:$0xff] %v11477_v11  ;;  %v4094_v61 = vld [vmem:[#allocation2 + $0xc8] sm:$0xff]  ;;  %v4095_v62 = vld [vmem:[#allocation2 + $0xd8] sm:$0xff] }
 0x566   : > { %4073 = vst [vmem:[#allocation2 + $0x169] sm:$0xff] %v11481_v44  ;;  %4477 = vmatmul.f32.gmra.mxu1 %v11493_v16 }
 0x567   : > { %4074 = vst [vmem:[#allocation2 + $0x171] sm:$0xff] %v3987_v30  ;;  %v4419_v30 = vld [vmem:[#allocation2 + $0xe2] sm:$0xff] }
 0x568   : > { %4075 = vst [vmem:[#allocation2 + $0x181] sm:$0xff] %v3988_v12  ;;  %4665 = vmatmul.f32.gmra.mxu0 %v11488_v19 }
 0x569   : > { %4076 = vst [vmem:[#allocation2 + $0x189] sm:$0xff] %v3989_v29  ;;  %4208 = vmatmul.f32.gmra.mxu2 %v11168_v4  ;;  %v11523_v4 = vld [vmem:[#allocation2 + $0x60] sm:$0xff] }
 0x56b   : > { %4318 = vmatmul.f32.gmra.mxu3 %v11499_v41 }
 0x56e   : > { %4480 = vmatmul.f32.gmra.mxu1 %v11502_v59 }
 0x570   : > { %4668 = vmatmul.f32.gmra.mxu0 %v11499_v41 }
 0x571   : > { %4211 = vmatmul.f32.gmra.mxu2 %v11193_v40  ;;  %v11528_v40 = vld [vmem:[#allocation2 + $0x68] sm:$0xff] }
 0x573   : > { %4321 = vmatmul.f32.gmra.mxu3 %v11507_v9 }
 0x576   : > { %4483 = vmatmul.f32.gmra.mxu1 %v11510_v22 }
 0x578   : > { %4671 = vmatmul.f32.gmra.mxu0 %v11507_v9 }
 0x579   : > { %4214 = vmatmul.f32.gmra.mxu2 %v11206_v32  ;;  %v11533_v32 = vld [vmem:[#allocation2 + $0x78] sm:$0xff] }
 0x57b   : > { %4324 = vmatmul.f32.gmra.mxu3 %v11515_v31 }
 0x57e   : > { %4486 = vmatmul.f32.gmra.mxu1 %v11518_v53 }
 0x580   : > { %4674 = vmatmul.f32.gmra.mxu0 %v11515_v31 }
 0x581   : > { %4217 = vmatmul.f32.gmra.mxu2 %v11215_v13  ;;  %v4088_v13 = vld [vmem:[#allocation2 + $0x80] sm:$0xff] }
 0x583   : > { %4327 = vmatmul.f32.gmra.mxu3 %v11523_v4 }
 0x586   : > { %4489 = vmatmul.f32.gmra.mxu1 %v4408_v36 }
 0x588   : > { %4677 = vmatmul.f32.gmra.mxu0 %v11523_v4 }
 0x589   : > { %4220 = vmatmul.f32.gmra.mxu2 %v11228_v49  ;;  %v4089_v49 = vld [vmem:[#allocation2 + $0x90] sm:$0xff] }
 0x58b   : > { %4330 = vmatmul.f32.gmra.mxu3 %v11528_v40 }
 0x58e   : > { %4492 = vmatmul.f32.gmra.mxu1 %v4409_v39  ;;  %v4097_v39 = vld [vmem:[#allocation2 + $0xf0] sm:$0xff] }
 0x590   : > { %4680 = vmatmul.f32.gmra.mxu0 %v11528_v40 }
 0x591   : > { %4223 = vmatmul.f32.gmra.mxu2 %v11241_v21  ;;  %v4091_v21 = vld [vmem:[#allocation2 + $0xa8] sm:$0xff] }
 0x593   : > { %4333 = vmatmul.f32.gmra.mxu3 %v11533_v32 }
 0x596   : > { %4495 = vmatmul.f32.gmra.mxu1 %v4410_v6  ;;  %v4420_v6 = vld [vmem:[#allocation2 + $0xf2] sm:$0xff] }
 0x598   : > { %4683 = vmatmul.f32.gmra.mxu0 %v11533_v32 }
 0x599   : > { %4226 = vmatmul.f32.gmra.mxu2 %v11260_v55  ;;  %v4092_v55 = vld [vmem:[#allocation2 + $0xb0] sm:$0xff] }
 0x59b   : > { %4336 = vmatmul.f32.gmra.mxu3 %v4088_v13 }
 0x59e   : > { %4498 = vmatmul.f32.gmra.mxu1 %v4411_v43 }
 0x5a0   : > { %4686 = vmatmul.f32.gmra.mxu0 %v4088_v13 }
 0x5a1   : > { %4229 = vmatmul.f32.gmra.mxu2 %v11270_v27 }
 0x5a3   : > { %4339 = vmatmul.f32.gmra.mxu3 %v4089_v49 }
 0x5a6   : > { %4501 = vmatmul.f32.gmra.mxu1 %v4412_v2 }
 0x5a8   : > { %4689 = vmatmul.f32.gmra.mxu0 %v4089_v49 }
 0x5a9   : > { %4232 = vmatmul.f32.gmra.mxu2 %v11279_v26  ;;  %v4093_v26 = vld [vmem:[#allocation2 + $0xc0] sm:$0xff] }
 0x5ab   : > { %4342 = vmatmul.f32.gmra.mxu3 %v4090_v60 }
 0x5ae   : > { %4504 = vmatmul.f32.gmra.mxu1 %v4413_v14  ;;  %v4098_v14 = vld [vmem:[#allocation2 + $0xf8] sm:$0xff] }
 0x5b0   : > { %4692 = vmatmul.f32.gmra.mxu0 %v4090_v60 }
 0x5b1   : > { %4235 = vmatmul.f32.gmra.mxu2 %v11286_v45 }
 0x5b3   : > { %4345 = vmatmul.f32.gmra.mxu3 %v4091_v21 }
 0x5b6   : > { %4507 = vmatmul.f32.gmra.mxu1 %v4414_v15 }
 0x5b8   : > { %4695 = vmatmul.f32.gmra.mxu0 %v4091_v21  ;;  %v4421_v21 = vld [vmem:[#allocation2 + $0xfa] sm:$0xff] }
 0x5b9   : > { %4238 = vmatmul.f32.gmra.mxu2 %v11308_v7  ;;  %v4417_v7 = vld [vmem:[#allocation2 + $0xca] sm:$0xff] }
 0x5ba   : > { %v11543_v27 = vpop.f32.mrf.mxu2  ;;  %v11545_v5 = vpop.f32.mrf.mxu1 }
 0x5bb   : > { %4348 = vmatmul.f32.gmra.mxu3 %v4092_v55  ;;  %v11547_v25 = vpop.f32.mrf.mxu3 }
 0x5be   : > { %4510 = vmatmul.f32.gmra.mxu1 %v4415_v57 }
 0x5c0   : > { %4698 = vmatmul.f32.gmra.mxu0 %v4092_v55 }
 0x5c1   : > { %4241 = vmatmul.f32.gmra.mxu2 %v11323_v50 }
 0x5c2   : > { %v11550_v45 = vpop.f32.mrf.mxu2 }
 0x5c3   : > { %4351 = vmatmul.f32.gmra.mxu3 %v4093_v26  ;;  %v11552_v47 = vpop.f32.mrf.mxu1  ;;  %v11555_v20 = vpop.f32.mrf.mxu3 }
 0x5c6   : > { %4513 = vmatmul.f32.gmra.mxu1 %v4416_v52 }
 0x5c8   : > { %4701 = vmatmul.f32.gmra.mxu0 %v4093_v26 }
 0x5c9   : > { %4244 = vmatmul.f32.gmra.mxu2 %v11335_v10  ;;  %v4096_v10 = vld [vmem:[#allocation2 + $0xe0] sm:$0xff] }
 0x5cb   : > { %4354 = vmatmul.f32.gmra.mxu3 %v4094_v61 }
 0x5cc   : > { %v4197_v46 = vpop.f32.mrf.mxu2 }
 0x5ce   : > { %4516 = vmatmul.f32.gmra.mxu1 %v4417_v7  ;;  %v4422_v7 = vld [vmem:[#allocation2 + $0x10a] sm:$0xff] }
 0x5d0   : > { %4704 = vmatmul.f32.gmra.mxu0 %v4094_v61  ;;  %v4472_v58 = vpop.f32.mrf.mxu1  ;;  %v4099_v61 = vld [vmem:[#allocation2 + $0x108] sm:$0xff] }
 0x5d1   : > { %4247 = vmatmul.f32.gmra.mxu2 %v11345_v48 }
 0x5d3   : > { %4357 = vmatmul.f32.gmra.mxu3 %v4095_v62 }
 0x5d4   : > { %v4200_v23 = vpop.f32.mrf.mxu2 }
 0x5d5   : > { %v11558_v50 = vpop.f32.mrf.mxu0  ;;  %v4310_v37 = vpop.f32.mrf.mxu3 }
 0x5d6   : > { %4519 = vmatmul.f32.gmra.mxu1 %v4418_v51  ;;  %v4311_v0 = vadd.f32 %v4310_v37, %v4197_v46 }
 0x5d8   : > { %4707 = vmatmul.f32.gmra.mxu0 %v4095_v62  ;;  %v11560_v1 = vadd.f32 %v4472_v58, %v4311_v0  ;;  %v4100_v0 = vld [vmem:[#allocation2 + $0x110] sm:$0xff] }
 0x5d9   : > { %4250 = vmatmul.f32.gmra.mxu2 %v11355_v54 }
 0x5db   : > { %v4475_v63 = vpop.f32.mrf.mxu1  ;;  %4360 = vmatmul.f32.gmra.mxu3 %v4096_v10 }
 0x5dc   : > { %v4203_v48 = vpop.f32.mrf.mxu2 }
 0x5dd   : > { %v11563_v28 = vpop.f32.mrf.mxu0 }
 0x5de   : > { %4522 = vmatmul.f32.gmra.mxu1 %v4419_v30  ;;  %v4313_v12 = vpop.f32.mrf.mxu3 }
 0x5df   : > { %v4314_v17 = vadd.f32 %v4313_v12, %v4200_v23  ;;  %v4423_v23 = vld [vmem:[#allocation2 + $0x112] sm:$0xff] }
 0x5e0   : > { %4710 = vmatmul.f32.gmra.mxu0 %v4096_v10 }
 0x5e1   : > { %v11565_v36 = vadd.f32 %v4475_v63, %v4314_v17  ;;  %4253 = vmatmul.f32.gmra.mxu2 %v11366_v33 }
 0x5e3   : > { %v4478_v29 = vpop.f32.mrf.mxu1  ;;  %4363 = vmatmul.f32.gmra.mxu3 %v4097_v39 }
 0x5e4   : > { %v4206_v54 = vpop.f32.mrf.mxu2 }
 0x5e5   : > { %v11568_v13 = vpop.f32.mrf.mxu0 }
 0x5e6   : > { %4525 = vmatmul.f32.gmra.mxu1 %v4420_v6  ;;  %v4316_v43 = vpop.f32.mrf.mxu3 }
 0x5e7   : > { %v4317_v49 = vadd.f32 %v4316_v43, %v4203_v48  ;;  %v4101_v48 = vld [vmem:[#allocation2 + $0x120] sm:$0xff] }
 0x5e8   : > { %4713 = vmatmul.f32.gmra.mxu0 %v4097_v39 }
 0x5e9   : > { %v11570_v60 = vadd.f32 %v4478_v29, %v4317_v49  ;;  %4256 = vmatmul.f32.gmra.mxu2 %v11382_v38  ;;  %v4424_v29 = vld [vmem:[#allocation2 + $0x122] sm:$0xff] }
 0x5ea   : > { %v4836_v49 = vld [vmem:[#allocation3 + $0x278] sm:$0xff] }
 0x5eb   : > { %v4481_v2 = vpop.f32.mrf.mxu1  ;;  %4366 = vmatmul.f32.gmra.mxu3 %v4098_v14  ;;  %4837 = vmatpush.msrb.mxu2 %v4836_v49  ;;  %v5025_v49 = vld [vmem:[#allocation3 + $0x2d0] sm:$0xff] }
 0x5ec   : > { %v4209_v33 = vpop.f32.mrf.mxu2 }
 0x5ed   : > { %v11573_v15 = vpop.f32.mrf.mxu0 }
 0x5ee   : > { %4528 = vmatmul.f32.gmra.mxu1 %v4421_v21  ;;  %v4319_v55 = vpop.f32.mrf.mxu3 }
 0x5ef   : > { %v4320_v57 = vadd.f32 %v4319_v55, %v4206_v54  ;;  %v5030_v54 = vld [vmem:[#allocation3 + $0x2f8] sm:$0xff]  ;;  %v4835_v55 = vld [vmem:[#allocation3 + $0x270] sm:$0xff] }
 0x5f0   : > { %4716 = vmatmul.f32.gmra.mxu0 %v4098_v14  ;;  %5031 = vmatpush.msra.mxu3 %v5030_v54  ;;  %v5220_v54 = vld [vmem:[#allocation3 + $0x350] sm:$0xff] }
 0x5f1   : > { %v11575_v52 = vadd.f32 %v4481_v2, %v4320_v57  ;;  %4259 = vmatmul.f32.gmra.mxu2 %v11400_v34  ;;  %v5225_v2 = vld [vmem:[#allocation3 + $0x378] sm:$0xff] }
 0x5f2   : > { %v4102_v57 = vld [vmem:[#allocation2 + $0x128] sm:$0xff]  ;;  %5226 = vmatpush.msra.mxu1 %v5225_v2  ;;  %4838 = vmatpush.msrb.mxu2 %v4835_v55  ;;  %v4830_v55 = vld [vmem:[#allocation3 + $0x248] sm:$0xff] }
 0x5f3   : > { %v4484_v26 = vpop.f32.mrf.mxu1  ;;  %4369 = vmatmul.f32.gmra.mxu3 %v4099_v61 }
 0x5f4   : > { %v4212_v38 = vpop.f32.mrf.mxu2 }
 0x5f5   : > { %v11578_v46 = vpop.f32.mrf.mxu0 }
 0x5f6   : > { %4531 = vmatmul.f32.gmra.mxu1 %v4422_v7  ;;  %v4322_v58 = vpop.f32.mrf.mxu3 }
 0x5f7   : > { %v4323_v62 = vadd.f32 %v4322_v58, %v4209_v33  ;;  %v5029_v33 = vld [vmem:[#allocation3 + $0x2f0] sm:$0xff]  ;;  %v4834_v58 = vld [vmem:[#allocation3 + $0x268] sm:$0xff] }
 0x5f8   : > { %4719 = vmatmul.f32.gmra.mxu0 %v4099_v61  ;;  %5032 = vmatpush.msra.mxu3 %v5029_v33  ;;  %v5219_v33 = vld [vmem:[#allocation3 + $0x348] sm:$0xff] }
 0x5f9   : > { %v11580_v37 = vadd.f32 %v4484_v26, %v4323_v62  ;;  %4262 = vmatmul.f32.gmra.mxu2 %v11417_v18  ;;  %v5224_v26 = vld [vmem:[#allocation3 + $0x370] sm:$0xff]  ;;  %v5028_v62 = vld [vmem:[#allocation3 + $0x2e8] sm:$0xff] }
 0x5fa   : > { %5227 = vmatpush.msra.mxu1 %v5224_v26  ;;  %4839 = vmatpush.msrb.mxu2 %v4834_v58  ;;  %v5218_v58 = vld [vmem:[#allocation3 + $0x340] sm:$0xff] }
 0x5fb   : > { %v4487_v51 = vpop.f32.mrf.mxu1  ;;  %4372 = vmatmul.f32.gmra.mxu3 %v4100_v0 }
 0x5fc   : > { %v4215_v34 = vpop.f32.mrf.mxu2  ;;  %5033 = vmatpush.msra.mxu3 %v5028_v62 }
 0x5fd   : > { %v11583_v63 = vpop.f32.mrf.mxu0 }
 0x5fe   : > { %4534 = vmatmul.f32.gmra.mxu1 %v4423_v23  ;;  %v4325_v10 = vpop.f32.mrf.mxu3  ;;  %v4833_v23 = vld [vmem:[#allocation3 + $0x260] sm:$0xff] }
 0x5ff   : > { %v4326_v30 = vadd.f32 %v4325_v10, %v4212_v38  ;;  %v5223_v38 = vld [vmem:[#allocation3 + $0x368] sm:$0xff]  ;;  %v5027_v10 = vld [vmem:[#allocation3 + $0x2e0] sm:$0xff]  ;;  %4840 = vmatpush.msrb.mxu2 %v4833_v23 }
 0x600   : > { %4722 = vmatmul.f32.gmra.mxu0 %v4100_v0  ;;  %5228 = vmatpush.msra.mxu1 %v5223_v38  ;;  %v5419_v38 = vld [vmem:[#allocation3 + $0x3f8] sm:$0xff]  ;;  %v5023_v23 = vld [vmem:[#allocation3 + $0x2c0] sm:$0xff] }
 0x601   : > { %v11585_v17 = vadd.f32 %v4487_v51, %v4326_v30  ;;  %4265 = vmatmul.f32.gmra.mxu2 %v11435_v42  ;;  %v4425_v42 = vld [vmem:[#allocation2 + $0x12a] sm:$0xff]  ;;  %5034 = vmatpush.msra.mxu3 %v5027_v10 }
 0x602   : > { %v5222_v30 = vld [vmem:[#allocation3 + $0x360] sm:$0xff]  ;;  %v4828_v10 = vld [vmem:[#allocation3 + $0x238] sm:$0xff]  ;;  %5420 = vmatpush.msra.mxu0 %v5419_v38 }
 0x603   : > { %v4490_v12 = vpop.f32.mrf.mxu1  ;;  %4375 = vmatmul.f32.gmra.mxu3 %v4101_v48  ;;  %5229 = vmatpush.msra.mxu1 %v5222_v30  ;;  %v5217_v30 = vld [vmem:[#allocation3 + $0x338] sm:$0xff]  ;;  %v5214_v38 = vld [vmem:[#allocation3 + $0x320] sm:$0xff] }
 0x604   : > { %v4218_v18 = vpop.f32.mrf.mxu2 }
 0x605   : > { %v11588_v39 = vpop.f32.mrf.mxu0 }
 0x606   : > { %4537 = vmatmul.f32.gmra.mxu1 %v4424_v29  ;;  %v4328_v6 = vpop.f32.mrf.mxu3  ;;  %v5026_v29 = vld [vmem:[#allocation3 + $0x2d8] sm:$0xff] }
 0x607   : > { %v4329_v43 = vadd.f32 %v4328_v6, %v4215_v34  ;;  %v4832_v34 = vld [vmem:[#allocation3 + $0x258] sm:$0xff]  ;;  %5035 = vmatpush.msra.mxu3 %v5026_v29  ;;  %v4827_v29 = vld [vmem:[#allocation3 + $0x230] sm:$0xff] }
 0x608   : > { %4725 = vmatmul.f32.gmra.mxu0 %v4101_v48  ;;  %v4103_v48 = vld [vmem:[#allocation2 + $0x138] sm:$0xff]  ;;  %v5221_v6 = vld [vmem:[#allocation3 + $0x358] sm:$0xff]  ;;  %4841 = vmatpush.msrb.mxu2 %v4832_v34  ;;  %v5418_v34 = vld [vmem:[#allocation3 + $0x3f0] sm:$0xff] }
 0x609   : > { %v11590_v21 = vadd.f32 %v4490_v12, %v4329_v43  ;;  %4268 = vmatmul.f32.gmra.mxu2 %v11454_v56  ;;  %v4426_v43 = vld [vmem:[#allocation2 + $0x13a] sm:$0xff]  ;;  %5230 = vmatpush.msra.mxu1 %v5221_v6 }
 0x60a   : > { %5036 = vmatpush.msra.mxu3 %v5025_v49  ;;  %v5216_v6 = vld [vmem:[#allocation3 + $0x330] sm:$0xff]  ;;  %5421 = vmatpush.msra.mxu0 %v5418_v34  ;;  %v4826_v49 = vld [vmem:[#allocation3 + $0x228] sm:$0xff] }
 0x60b   : > { %v4493_v14 = vpop.f32.mrf.mxu1  ;;  %4378 = vmatmul.f32.gmra.mxu3 %v4102_v57  ;;  %5231 = vmatpush.msra.mxu1 %v5220_v54 }
 0x60c   : > { %v4221_v0 = vpop.f32.mrf.mxu2 }
 0x60d   : > { %v11593_v61 = vpop.f32.mrf.mxu0  ;;  %5232 = vmatpush.msra.mxu1 %v5219_v33 }
 0x60e   : > { %4540 = vmatmul.f32.gmra.mxu1 %v4425_v42  ;;  %v4331_v7 = vpop.f32.mrf.mxu3 }
 0x60f   : > { %v4332_v51 = vadd.f32 %v4331_v7, %v4218_v18  ;;  %v4831_v18 = vld [vmem:[#allocation3 + $0x250] sm:$0xff]  ;;  %v4829_v7 = vld [vmem:[#allocation3 + $0x240] sm:$0xff]  ;;  %5233 = vmatpush.msra.mxu1 %v5218_v58  ;;  %v5020_v58 = vld [vmem:[#allocation3 + $0x2a8] sm:$0xff] }
 0x610   : > { %4728 = vmatmul.f32.gmra.mxu0 %v4102_v57  ;;  %4842 = vmatpush.msrb.mxu2 %v4831_v18  ;;  %v5024_v57 = vld [vmem:[#allocation3 + $0x2c8] sm:$0xff]  ;;  %v5021_v18 = vld [vmem:[#allocation3 + $0x2b0] sm:$0xff] }
 0x611   : > { %v11595_v56 = vadd.f32 %v4493_v14, %v4332_v51  ;;  %4271 = vmatmul.f32.gmra.mxu2 %v11467_v3  ;;  %5037 = vmatpush.msra.mxu3 %v5024_v57  ;;  %v4104_v51 = vld [vmem:[#allocation2 + $0x140] sm:$0xff]  ;;  %v5417_v57 = vld [vmem:[#allocation3 + $0x3e8] sm:$0xff] }
 0x612   : > { %4843 = vmatpush.msrb.mxu2 %v4830_v55  ;;  %5234 = vmatpush.msra.mxu1 %v5217_v30  ;;  %v5215_v55 = vld [vmem:[#allocation3 + $0x328] sm:$0xff] }
 0x613   : > { %v4496_v12 = vpop.f32.mrf.mxu1  ;;  %4381 = vmatmul.f32.gmra.mxu3 %v4103_v48  ;;  %5422 = vmatpush.msra.mxu0 %v5417_v57  ;;  %v4106_v57 = vld [vmem:[#allocation2 + $0x158] sm:$0xff] }
 0x614   : > { %v4224_v42 = vpop.f32.mrf.mxu2  ;;  %4844 = vmatpush.msrb.mxu2 %v4829_v7  ;;  %5038 = vmatpush.msra.mxu3 %v5023_v23  ;;  %v4105_v7 = vld [vmem:[#allocation2 + $0x150] sm:$0xff] }
 0x615   : > { %v11598_v2 = vpop.f32.mrf.mxu0  ;;  %5235 = vmatpush.msra.mxu1 %v5216_v6  ;;  %v5416_v23 = vld [vmem:[#allocation3 + $0x3e0] sm:$0xff] }
 0x616   : > { %4543 = vmatmul.f32.gmra.mxu1 %v4426_v43  ;;  %v4334_v14 = vpop.f32.mrf.mxu3  ;;  %4845 = vmatpush.msrb.mxu2 %v4828_v10  ;;  %v4824_v10 = vld [vmem:[#allocation3 + $0x218] sm:$0xff] }
 0x617   : > { %v4335_v26 = vadd.f32 %v4334_v14, %v4221_v0  ;;  %v4427_v0 = vld [vmem:[#allocation2 + $0x142] sm:$0xff]  ;;  %5236 = vmatpush.msra.mxu1 %v5215_v55  ;;  %5423 = vmatpush.msra.mxu0 %v5416_v23  ;;  %v5210_v23 = vld [vmem:[#allocation3 + $0x300] sm:$0xff] }
 0x618   : > { %4731 = vmatmul.f32.gmra.mxu0 %v4103_v48  ;;  %v5022_v48 = vld [vmem:[#allocation3 + $0x2b8] sm:$0xff]  ;;  %4846 = vmatpush.msrb.mxu2 %v4827_v29 }
 0x619   : > { %v11600_v62 = vadd.f32 %v4496_v12, %v4335_v26  ;;  %4274 = vmatmul.f32.gmra.mxu2 %v11473_v8  ;;  %5039 = vmatpush.msra.mxu3 %v5022_v48  ;;  %v4825_v8 = vld [vmem:[#allocation3 + $0x220] sm:$0xff]  ;;  %v5018_v48 = vld [vmem:[#allocation3 + $0x298] sm:$0xff] }
 0x61a   : > { %4847 = vmatpush.msrb.mxu2 %v4826_v49  ;;  %5237 = vmatpush.msra.mxu1 %v5214_v38  ;;  %v5415_v29 = vld [vmem:[#allocation3 + $0x3d8] sm:$0xff]  ;;  %v4822_v49 = vld [vmem:[#allocation3 + $0x208] sm:$0xff] }
 0x61b   : > { %v4499_v3 = vpop.f32.mrf.mxu1  ;;  %4384 = vmatmul.f32.gmra.mxu3 %v4104_v51  ;;  %5424 = vmatpush.msra.mxu0 %v5415_v29  ;;  %v5413_v38 = vld [vmem:[#allocation3 + $0x3c8] sm:$0xff] }
 0x61c   : > { %v4227_v14 = vpop.f32.mrf.mxu2  ;;  %5040 = vmatpush.msra.mxu3 %v5021_v18  ;;  %4848 = vmatpush.msrb.mxu2 %v4825_v8  ;;  %v5212_v18 = vld [vmem:[#allocation3 + $0x310] sm:$0xff] }
 0x61d   : > { %v11603_v12 = vpop.f32.mrf.mxu0  ;;  %v5017_v8 = vld [vmem:[#allocation3 + $0x290] sm:$0xff] }
 0x61e   : > { %4546 = vmatmul.f32.gmra.mxu1 %v4427_v0  ;;  %v4337_v43 = vpop.f32.mrf.mxu3  ;;  %v5213_v0 = vld [vmem:[#allocation3 + $0x318] sm:$0xff]  ;;  %5041 = vmatpush.msra.mxu3 %v5020_v58  ;;  %v5211_v58 = vld [vmem:[#allocation3 + $0x308] sm:$0xff] }
 0x61f   : > { %v4338_v54 = vadd.f32 %v4337_v43, %v4224_v42  ;;  %v4428_v42 = vld [vmem:[#allocation2 + $0x152] sm:$0xff]  ;;  %4849 = vmatpush.msrb.mxu2 %v4824_v10  ;;  %5238 = vmatpush.msra.mxu1 %v5213_v0 }
 0x620   : > { %4734 = vmatmul.f32.gmra.mxu0 %v4104_v51  ;;  %v5019_v51 = vld [vmem:[#allocation3 + $0x2a0] sm:$0xff] }
 0x621   : > { %v11605_v26 = vadd.f32 %v4499_v3, %v4338_v54  ;;  %4277 = vmatmul.f32.gmra.mxu2 %v11477_v11  ;;  %v4823_v3 = vld [vmem:[#allocation3 + $0x210] sm:$0xff]  ;;  %5042 = vmatpush.msra.mxu3 %v5019_v51  ;;  %v5015_v51 = vld [vmem:[#allocation3 + $0x280] sm:$0xff] }
 0x622   : > { %4850 = vmatpush.msrb.mxu2 %v4823_v3  ;;  %v5414_v11 = vld [vmem:[#allocation3 + $0x3d0] sm:$0xff]  ;;  %5239 = vmatpush.msra.mxu1 %v5212_v18  ;;  %v5412_v0 = vld [vmem:[#allocation3 + $0x3c0] sm:$0xff] }
 0x623   : > { %v4502_v33 = vpop.f32.mrf.mxu1  ;;  %4387 = vmatmul.f32.gmra.mxu3 %v4105_v7  ;;  %5425 = vmatpush.msra.mxu0 %v5414_v11  ;;  %v5410_v18 = vld [vmem:[#allocation3 + $0x3b0] sm:$0xff]  ;;  %v4156_v11 = vld [vmem:[#allocation2 + $0x171] sm:$0xff] }
 0x624   : > { %v4230_v43 = vpop.f32.mrf.mxu2  ;;  %5043 = vmatpush.msra.mxu3 %v5018_v48  ;;  %4851 = vmatpush.msrb.mxu2 %v4822_v49  ;;  %v5411_v48 = vld [vmem:[#allocation3 + $0x3b8] sm:$0xff] }
 0x625   : > { %v11608_v30 = vpop.f32.mrf.mxu0  ;;  %5240 = vmatpush.msra.mxu1 %v5211_v58  ;;  %5426 = vmatpush.msra.mxu0 %v5413_v38  ;;  %v4430_v49 = vld [vmem:[#allocation2 + $0x16a] sm:$0xff] }
 0x626   : > { %4549 = vmatmul.f32.gmra.mxu1 %v4428_v42  ;;  %v4340_v34 = vpop.f32.mrf.mxu3  ;;  %v4821_v42 = vld [vmem:[#allocation3 + $0x200] sm:$0xff]  ;;  %5044 = vmatpush.msra.mxu3 %v5017_v8  ;;  %v5407_v38 = vld [vmem:[#allocation3 + $0x398] sm:$0xff] }
 0x627   : > { %v4341_v6 = vadd.f32 %v4340_v34, %v4227_v14  ;;  %v4429_v14 = vld [vmem:[#allocation2 + $0x15a] sm:$0xff]  ;;  %4852 = vmatpush.msrb.mxu2 %v4821_v42  ;;  %5241 = vmatpush.msra.mxu1 %v5210_v23  ;;  %v5408_v58 = vld [vmem:[#allocation3 + $0x3a0] sm:$0xff] }
 0x628   : > { %4737 = vmatmul.f32.gmra.mxu0 %v4105_v7  ;;  %v5016_v7 = vld [vmem:[#allocation3 + $0x288] sm:$0xff]  ;;  %v11625_v23 = vld [vmem:[#allocation2 + $0x170] sm:$0xff] }
 0x629   : > { %v11610_v55 = vadd.f32 %v4502_v33, %v4341_v6  ;;  %4280 = vmatmul.f32.gmra.mxu2 %v11481_v44  ;;  %5045 = vmatpush.msra.mxu3 %v5016_v7  ;;  %v11617_v44 = vld [vmem:[#allocation2 + $0x168] sm:$0xff] }
 0x62a   : > { %5427 = vmatpush.msra.mxu0 %v5412_v0  ;;  %v4788_v0 = vld [vmem:[#allocation2 + $0x19] sm:$0xff] }
 0x62b   : > { %v4505_v54 = vpop.f32.mrf.mxu1  ;;  %4390 = vmatmul.f32.gmra.mxu3 %v4106_v57 }
 0x62c   : > { %v4233_v34 = vpop.f32.mrf.mxu2  ;;  %5046 = vmatpush.msra.mxu3 %v5015_v51  ;;  %5428 = vmatpush.msra.mxu0 %v5411_v48  ;;  %v4431_v51 = vld [vmem:[#allocation2 + $0x172] sm:$0xff] }
 0x62d   : > { %v11613_v10 = vpop.f32.mrf.mxu0 }
 0x62e   : > { %4552 = vmatmul.f32.gmra.mxu1 %v4429_v14  ;;  %v4343_v33 = vpop.f32.mrf.mxu3  ;;  %5429 = vmatpush.msra.mxu0 %v5410_v18  ;;  %v5404_v18 = vld [vmem:[#allocation3 + $0x380] sm:$0xff] }
 0x62f   : > { %v4344_v3 = vadd.f32 %v4343_v33, %v4230_v43  ;;  %v5409_v43 = vld [vmem:[#allocation3 + $0x3a8] sm:$0xff]  ;;  %v5406_v33 = vld [vmem:[#allocation3 + $0x390] sm:$0xff] }
 0x630   : > { %4740 = vmatmul.f32.gmra.mxu0 %v4106_v57 }
 0x631   : > { %v11615_v6 = vadd.f32 %v4505_v54, %v4344_v3  ;;  %4283 = vmatmul.f32.gmra.mxu2 %v4156_v11  ;;  %5430 = vmatpush.msra.mxu0 %v5409_v43  ;;  %v5405_v3 = vld [vmem:[#allocation3 + $0x388] sm:$0xff] }
 0x633   : > { %v4508_v29 = vpop.f32.mrf.mxu1  ;;  %4393 = vmatmul.f32.gmra.mxu3 %v11617_v44  ;;  %5431 = vmatpush.msra.mxu0 %v5408_v58 }
 0x634   : > { %v4236_v14 = vpop.f32.mrf.mxu2 }
 0x635   : > { %v11620_v8 = vpop.f32.mrf.mxu0  ;;  %5432 = vmatpush.msra.mxu0 %v5407_v38  ;;  %v11637_v38 = vld [vmem:[#allocation2 + $0x180] sm:$0xff] }
 0x636   : > { %4555 = vmatmul.f32.gmra.mxu1 %v4430_v49  ;;  %v4346_v57 = vpop.f32.mrf.mxu3 }
 0x637   : > { %v4347_v54 = vadd.f32 %v4346_v57, %v4233_v34  ;;  %5433 = vmatpush.msra.mxu0 %v5406_v33  ;;  %v4789_v57 = vld [vmem:[#allocation2 + $0x21] sm:$0xff] }
 0x638   : > { %4743 = vmatmul.f32.gmra.mxu0 %v11617_v44 }
 0x639   : > { %v11623_v7 = vadd.f32 %v4508_v29, %v4347_v54  ;;  %4853 = vmatmul.f32.vlgmr.msrb.gmra.mxu2 %v4788_v0  ;;  %5434 = vmatpush.msra.mxu0 %v5405_v3  ;;  %v11646_v3 = vld [vmem:[#allocation2 + $0x188] sm:$0xff] }
 0x63b   : > { %v4511_v42 = vpop.f32.mrf.mxu1  ;;  %4396 = vmatmul.f32.gmra.mxu3 %v11625_v23  ;;  %5435 = vmatpush.msra.mxu0 %v5404_v18 }
 0x63c   : > { %v4239_v29 = vpop.f32.mrf.mxu2 }
 0x63d   : > { %v11628_v34 = vpop.f32.mrf.mxu0 }
 0x63e   : > { %4558 = vmatmul.f32.gmra.mxu1 %v4431_v51  ;;  %v4349_v48 = vpop.f32.mrf.mxu3 }
 0x63f   : > { %v4350_v49 = vadd.f32 %v4349_v48, %v4236_v14 }
 0x640   : > { %4746 = vmatmul.f32.gmra.mxu0 %v11625_v23 }
 0x641   : > { %v11631_v43 = vadd.f32 %v4511_v42, %v4350_v49  ;;  %4856 = vmatmul.f32.gmra.mxu2 %v4789_v57  ;;  %v4790_v42 = vld [vmem:[#allocation2 + $0x31] sm:$0xff] }
 0x643   : > { %v4514_v11 = vpop.f32.mrf.mxu1  ;;  %5047 = vmatmul.f32.vlgmr.msra.gmra.mxu3 %v11289_v24 }
 0x644   : > { %v4242_v33 = vpop.f32.mrf.mxu2 }
 0x645   : > { %v11635_v58 = vpop.f32.mrf.mxu0 }
 0x646   : > { %5242 = vmatmul.f32.vlgmr.msra.gmra.mxu1 %v11488_v19  ;;  %v4352_v54 = vpop.f32.mrf.mxu3 }
 0x647   : > { %v4353_v14 = vadd.f32 %v4352_v54, %v4239_v29 }
 0x648   : > { %4749 = vmatmul.f32.gmra.mxu0 %v11637_v38 }
 0x649   : > { %v11640_v0 = vadd.f32 %v4514_v11, %v4353_v14  ;;  %4859 = vmatmul.f32.gmra.mxu2 %v4790_v42  ;;  %v4791_v11 = vld [vmem:[#allocation2 + $0x39] sm:$0xff] }
 0x64b   : > { %v4517_v51 = vpop.f32.mrf.mxu1  ;;  %5050 = vmatmul.f32.gmra.mxu3 %v11438_v35 }
 0x64c   : > { %v4245_v18 = vpop.f32.mrf.mxu2 }
 0x64d   : > { %v11644_v24 = vpop.f32.mrf.mxu0 }
 0x64e   : > { %5245 = vmatmul.f32.gmra.mxu1 %v11499_v41  ;;  %v4355_v19 = vpop.f32.mrf.mxu3 }
 0x64f   : > { %v4356_v48 = vadd.f32 %v4355_v19, %v4242_v33  ;;  %v4792_v19 = vld [vmem:[#allocation2 + $0x49] sm:$0xff] }
 0x650   : > { %4752 = vmatmul.f32.gmra.mxu0 %v11646_v3 }
 0x651   : > { %v11649_v29 = vadd.f32 %v4517_v51, %v4356_v48  ;;  %4862 = vmatmul.f32.gmra.mxu2 %v4791_v11 }
 0x653   : > { %v4520_v49 = vpop.f32.mrf.mxu1  ;;  %14651 = vst [vmem:[#allocation94_spill] sm:$0xff] %v11649_v29  ;;  %5053 = vmatmul.f32.gmra.mxu3 %v11493_v16 }
 0x654   : > { %v4248_v54 = vpop.f32.mrf.mxu2 }
 0x655   : > { %v11653_v35 = vpop.f32.mrf.mxu0 }
 0x656   : > { %5248 = vmatmul.f32.gmra.mxu1 %v11507_v9  ;;  %14652 = vst [vmem:[#allocation74_spill] sm:$0xff] %v11653_v35  ;;  %v4358_v41 = vpop.f32.mrf.mxu3 }
 0x657   : > { %v4359_v57 = vadd.f32 %v4358_v41, %v4245_v18 }
 0x658   : > { %5436 = vmatmul.f32.vlgmr.msra.gmra.mxu0 %v4790_v42  ;;  %v4793_v42 = vld [vmem:[#allocation2 + $0x51] sm:$0xff] }
 0x659   : > { %v11655_v33 = vadd.f32 %v4520_v49, %v4359_v57  ;;  %4865 = vmatmul.f32.gmra.mxu2 %v4792_v19 }
 0x65b   : > { %v4523_v14 = vpop.f32.mrf.mxu1  ;;  %5056 = vmatmul.f32.gmra.mxu3 %v11502_v59 }
 0x65c   : > { %v4251_v48 = vpop.f32.mrf.mxu2 }
 0x65d   : > { %v11659_v16 = vpop.f32.mrf.mxu0 }
 0x65e   : > { %5251 = vmatmul.f32.gmra.mxu1 %v11515_v31  ;;  %v4361_v51 = vpop.f32.mrf.mxu3 }
 0x65f   : > { %v4362_v9 = vadd.f32 %v4361_v51, %v4248_v54 }
 0x660   : > { %5439 = vmatmul.f32.gmra.mxu0 %v4791_v11  ;;  %v4794_v11 = vld [vmem:[#allocation2 + $0x61] sm:$0xff] }
 0x661   : > { %v11661_v35 = vadd.f32 %v4523_v14, %v4362_v9  ;;  %4868 = vmatmul.f32.gmra.mxu2 %v4793_v42 }
 0x663   : > { %v4526_v29 = vpop.f32.mrf.mxu1  ;;  %5059 = vmatmul.f32.gmra.mxu3 %v11510_v22 }
 0x664   : > { %v4254_v49 = vpop.f32.mrf.mxu2 }
 0x665   : > { %v11665_v59 = vpop.f32.mrf.mxu0 }
 0x666   : > { %5254 = vmatmul.f32.gmra.mxu1 %v11523_v4  ;;  %v4364_v18 = vpop.f32.mrf.mxu3 }
 0x667   : > { %v4365_v31 = vadd.f32 %v4364_v18, %v4251_v48  ;;  %v11675_v48 = vld [vmem:[#allocation2 + $0x62] sm:$0xff] }
 0x668   : > { %5442 = vmatmul.f32.gmra.mxu0 %v4792_v19 }
 0x669   : > { %v11667_v57 = vadd.f32 %v4526_v29, %v4365_v31  ;;  %4871 = vmatmul.f32.gmra.mxu2 %v4794_v11  ;;  %v4795_v29 = vld [vmem:[#allocation2 + $0x69] sm:$0xff] }
 0x66b   : > { %v4529_v41 = vpop.f32.mrf.mxu1  ;;  %5062 = vmatmul.f32.gmra.mxu3 %v11518_v53 }
 0x66c   : > { %v4257_v14 = vpop.f32.mrf.mxu2 }
 0x66d   : > { %v11671_v22 = vpop.f32.mrf.mxu0 }
 0x66e   : > { %5257 = vmatmul.f32.gmra.mxu1 %v11528_v40  ;;  %v4367_v54 = vpop.f32.mrf.mxu3 }
 0x66f   : > { %v4368_v4 = vadd.f32 %v4367_v54, %v4254_v49  ;;  %v4796_v54 = vld [vmem:[#allocation2 + $0x79] sm:$0xff] }
 0x670   : > { %5445 = vmatmul.f32.gmra.mxu0 %v4793_v42  ;;  %v11683_v42 = vld [vmem:[#allocation2 + $0x6a] sm:$0xff] }
 0x671   : > { %v11673_v9 = vadd.f32 %v4529_v41, %v4368_v4  ;;  %4874 = vmatmul.f32.gmra.mxu2 %v4795_v29  ;;  %14656 = vst [vmem:[#allocation48_spill] sm:$0xff] %v11683_v42  ;;  %v5184_v41 = vld [vmem:[#allocation2 + $0x80] sm:$0xff] }
 0x673   : > { %v4532_v51 = vpop.f32.mrf.mxu1  ;;  %14653 = vst [vmem:[#allocation15_spill] sm:$0xff] %v11673_v9  ;;  %5065 = vmatmul.f32.gmra.mxu3 %v11675_v48 }
 0x674   : > { %v4260_v18 = vpop.f32.mrf.mxu2 }
 0x675   : > { %v11679_v53 = vpop.f32.mrf.mxu0 }
 0x676   : > { %5260 = vmatmul.f32.gmra.mxu1 %v11533_v32  ;;  %14654 = vst [vmem:[#allocation42_spill] sm:$0xff] %v11679_v53  ;;  %v4370_v40 = vpop.f32.mrf.mxu3 }
 0x677   : > { %v4371_v19 = vadd.f32 %v4370_v40, %v4257_v14 }
 0x678   : > { %5448 = vmatmul.f32.gmra.mxu0 %v4794_v11  ;;  %v11690_v11 = vld [vmem:[#allocation2 + $0x7a] sm:$0xff] }
 0x679   : > { %v11681_v49 = vadd.f32 %v4532_v51, %v4371_v19  ;;  %4877 = vmatmul.f32.gmra.mxu2 %v4796_v54  ;;  %14659 = vst [vmem:[#allocation52_spill] sm:$0xff] %v11690_v11  ;;  %v5185_v51 = vld [vmem:[#allocation2 + $0x90] sm:$0xff]  ;;  %v4797_v19 = vld [vmem:[#allocation2 + $0x81] sm:$0xff] }
 0x67b   : > { %v4535_v31 = vpop.f32.mrf.mxu1  ;;  %14655 = vst [vmem:[#allocation80_spill] sm:$0xff] %v11681_v49  ;;  %5068 = vmatmul.f32.gmra.mxu3 %v11683_v42 }
 0x67c   : > { %v4263_v53 = vpop.f32.mrf.mxu2 }
 0x67d   : > { %v11686_v4 = vpop.f32.mrf.mxu0 }
 0x67e   : > { %5263 = vmatmul.f32.gmra.mxu1 %v5184_v41  ;;  %14657 = vst [vmem:[#allocation93_spill] sm:$0xff] %v11686_v4  ;;  %v4373_v32 = vpop.f32.mrf.mxu3 }
 0x67f   : > { %v4374_v9 = vadd.f32 %v4373_v32, %v4260_v18 }
 0x680   : > { %5451 = vmatmul.f32.gmra.mxu0 %v4795_v29  ;;  %v11697_v29 = vld [vmem:[#allocation2 + $0x82] sm:$0xff] }
 0x681   : > { %v11688_v40 = vadd.f32 %v4535_v31, %v4374_v9  ;;  %4880 = vmatmul.f32.gmra.mxu2 %v4797_v19  ;;  %14662 = vst [vmem:[#allocation82_spill] sm:$0xff] %v11697_v29  ;;  %v5186_v9 = vld [vmem:[#allocation2 + $0x98] sm:$0xff] }
 0x682   : > { %v4798_v31 = vld [vmem:[#allocation2 + $0x91] sm:$0xff] }
 0x683   : > { %v4538_v14 = vpop.f32.mrf.mxu1  ;;  %14658 = vst [vmem:[#allocation73_spill] sm:$0xff] %v11688_v40  ;;  %5071 = vmatmul.f32.gmra.mxu3 %v11690_v11 }
 0x684   : > { %v4266_v4 = vpop.f32.mrf.mxu2 }
 0x685   : > { %v11693_v49 = vpop.f32.mrf.mxu0 }
 0x686   : > { %5266 = vmatmul.f32.gmra.mxu1 %v5185_v51  ;;  %14660 = vst [vmem:[#allocation37_spill] sm:$0xff] %v11693_v49  ;;  %v4376_v41 = vpop.f32.mrf.mxu3 }
 0x687   : > { %v4377_v42 = vadd.f32 %v4376_v41, %v4263_v53 }
 0x688   : > { %5454 = vmatmul.f32.gmra.mxu0 %v4796_v54  ;;  %v11704_v54 = vld [vmem:[#allocation2 + $0x92] sm:$0xff] }
 0x689   : > { %v11695_v32 = vadd.f32 %v4538_v14, %v4377_v42  ;;  %4883 = vmatmul.f32.gmra.mxu2 %v4798_v31  ;;  %14665 = vst [vmem:[#allocation65_spill] sm:$0xff] %v11704_v54  ;;  %v5187_v42 = vld [vmem:[#allocation2 + $0xa8] sm:$0xff]  ;;  %v4799_v14 = vld [vmem:[#allocation2 + $0x99] sm:$0xff] }
 0x68b   : > { %v4541_v18 = vpop.f32.mrf.mxu1  ;;  %14661 = vst [vmem:[#allocation68_spill] sm:$0xff] %v11695_v32  ;;  %5074 = vmatmul.f32.gmra.mxu3 %v11697_v29 }
 0x68c   : > { %v4269_v49 = vpop.f32.mrf.mxu2 }
 0x68d   : > { %v11700_v40 = vpop.f32.mrf.mxu0 }
 0x68e   : > { %5269 = vmatmul.f32.gmra.mxu1 %v5186_v9  ;;  %14663 = vst [vmem:[#allocation92_spill] sm:$0xff] %v11700_v40  ;;  %v4379_v51 = vpop.f32.mrf.mxu3 }
 0x68f   : > { %v4380_v11 = vadd.f32 %v4379_v51, %v4266_v4 }
 0x690   : > { %5457 = vmatmul.f32.gmra.mxu0 %v4797_v19  ;;  %v11711_v19 = vld [vmem:[#allocation2 + $0x9a] sm:$0xff] }
 0x691   : > { %v11702_v41 = vadd.f32 %v4541_v18, %v4380_v11  ;;  %4886 = vmatmul.f32.gmra.mxu2 %v4799_v14  ;;  %14668 = vst [vmem:[#allocation63_spill] sm:$0xff] %v11711_v19  ;;  %v5188_v11 = vld [vmem:[#allocation2 + $0xb0] sm:$0xff] }
 0x692   : > { %v4800_v18 = vld [vmem:[#allocation2 + $0xa9] sm:$0xff] }
 0x693   : > { %v4544_v53 = vpop.f32.mrf.mxu1  ;;  %14664 = vst [vmem:[#allocation64_spill] sm:$0xff] %v11702_v41  ;;  %5077 = vmatmul.f32.gmra.mxu3 %v11704_v54 }
 0x694   : > { %v4272_v40 = vpop.f32.mrf.mxu2 }
 0x695   : > { %v11707_v32 = vpop.f32.mrf.mxu0 }
 0x696   : > { %5272 = vmatmul.f32.gmra.mxu1 %v5187_v42  ;;  %14666 = vst [vmem:[#allocation71_spill] sm:$0xff] %v11707_v32  ;;  %v4382_v9 = vpop.f32.mrf.mxu3 }
 0x697   : > { %v4383_v29 = vadd.f32 %v4382_v9, %v4269_v49 }
 0x698   : > { %5460 = vmatmul.f32.gmra.mxu0 %v4798_v31  ;;  %v11718_v31 = vld [vmem:[#allocation2 + $0xaa] sm:$0xff] }
 0x699   : > { %v11709_v51 = vadd.f32 %v4544_v53, %v4383_v29  ;;  %4889 = vmatmul.f32.gmra.mxu2 %v4800_v18  ;;  %14671 = vst [vmem:[#allocation61_spill] sm:$0xff] %v11718_v31  ;;  %v5189_v29 = vld [vmem:[#allocation2 + $0xc0] sm:$0xff]  ;;  %v4801_v53 = vld [vmem:[#allocation2 + $0xb1] sm:$0xff] }
 0x69b   : > { %v4547_v4 = vpop.f32.mrf.mxu1  ;;  %14667 = vst [vmem:[#allocation91_spill] sm:$0xff] %v11709_v51  ;;  %5080 = vmatmul.f32.gmra.mxu3 %v11711_v19 }
 0x69c   : > { %v4275_v32 = vpop.f32.mrf.mxu2 }
 0x69d   : > { %v11714_v41 = vpop.f32.mrf.mxu0 }
 0x69e   : > { %5275 = vmatmul.f32.gmra.mxu1 %v5188_v11  ;;  %14669 = vst [vmem:[#allocation66_spill] sm:$0xff] %v11714_v41  ;;  %v4385_v42 = vpop.f32.mrf.mxu3 }
 0x69f   : > { %v4386_v54 = vadd.f32 %v4385_v42, %v4272_v40 }
 0x6a0   : > { %5463 = vmatmul.f32.gmra.mxu0 %v4799_v14  ;;  %v11725_v14 = vld [vmem:[#allocation2 + $0xb2] sm:$0xff] }
 0x6a1   : > { %v11716_v9 = vadd.f32 %v4547_v4, %v4386_v54  ;;  %4892 = vmatmul.f32.gmra.mxu2 %v4801_v53  ;;  %14674 = vst [vmem:[#allocation33_spill] sm:$0xff] %v11725_v14  ;;  %v5190_v54 = vld [vmem:[#allocation2 + $0xc8] sm:$0xff] }
 0x6a2   : > { %v4802_v4 = vld [vmem:[#allocation2 + $0xc1] sm:$0xff] }
 0x6a3   : > { %v4550_v49 = vpop.f32.mrf.mxu1  ;;  %14670 = vst [vmem:[#allocation89_spill] sm:$0xff] %v11716_v9  ;;  %5083 = vmatmul.f32.gmra.mxu3 %v11718_v31 }
 0x6a4   : > { %v4278_v41 = vpop.f32.mrf.mxu2 }
 0x6a5   : > { %v11721_v51 = vpop.f32.mrf.mxu0 }
 0x6a6   : > { %5278 = vmatmul.f32.gmra.mxu1 %v5189_v29  ;;  %14672 = vst [vmem:[#allocation67_spill] sm:$0xff] %v11721_v51  ;;  %v4388_v11 = vpop.f32.mrf.mxu3 }
 0x6a7   : > { %v4389_v19 = vadd.f32 %v4388_v11, %v4275_v32 }
 0x6a8   : > { %5466 = vmatmul.f32.gmra.mxu0 %v4800_v18  ;;  %v11732_v18 = vld [vmem:[#allocation2 + $0xc2] sm:$0xff] }
 0x6a9   : > { %v11723_v42 = vadd.f32 %v4550_v49, %v4389_v19  ;;  %4895 = vmatmul.f32.gmra.mxu2 %v4802_v4  ;;  %v5191_v19 = vld [vmem:[#allocation2 + $0xd8] sm:$0xff]  ;;  %v4803_v49 = vld [vmem:[#allocation2 + $0xc9] sm:$0xff] }
 0x6ab   : > { %v4553_v40 = vpop.f32.mrf.mxu1  ;;  %14673 = vst [vmem:[#allocation88_spill] sm:$0xff] %v11723_v42  ;;  %5086 = vmatmul.f32.gmra.mxu3 %v11725_v14 }
 0x6ac   : > { %v4281_v51 = vpop.f32.mrf.mxu2 }
 0x6ad   : > { %v11728_v9 = vpop.f32.mrf.mxu0 }
 0x6ae   : > { %5281 = vmatmul.f32.gmra.mxu1 %v5190_v54  ;;  %14675 = vst [vmem:[#allocation84_spill] sm:$0xff] %v11728_v9  ;;  %v4391_v29 = vpop.f32.mrf.mxu3 }
 0x6af   : > { %v4392_v31 = vadd.f32 %v4391_v29, %v4278_v41  ;;  %v4305_v41 = vadd.f32 %v11547_v25, %v11543_v27  ;;  %v5192_v29 = vld [vmem:[#allocation2 + $0xe0] sm:$0xff] }
 0x6b0   : > { %5469 = vmatmul.f32.gmra.mxu0 %v4801_v53 }
 0x6b1   : > { %v11730_v11 = vadd.f32 %v4553_v40, %v4392_v31  ;;  %4898 = vmatmul.f32.gmra.mxu2 %v4803_v49  ;;  %v11741_v40 = vld [vmem:[#allocation2 + $0xca] sm:$0xff] }
 0x6b2   : > { %14679 = vst [vmem:[#allocation26_spill] sm:$0xff] %v11741_v40 }
 0x6b3   : > { %v4556_v32 = vpop.f32.mrf.mxu1  ;;  %14676 = vst [vmem:[#allocation77_spill] sm:$0xff] %v11730_v11  ;;  %5089 = vmatmul.f32.gmra.mxu3 %v11732_v18  ;;  %v4804_v11 = vld [vmem:[#allocation2 + $0xd9] sm:$0xff] }
 0x6b4   : > { %v4284_v9 = vpop.f32.mrf.mxu2 }
 0x6b5   : > { %v11735_v42 = vpop.f32.mrf.mxu0 }
 0x6b6   : > { %5284 = vmatmul.f32.gmra.mxu1 %v5191_v19  ;;  %14677 = vst [vmem:[#allocation29_spill] sm:$0xff] %v11735_v42  ;;  %v4394_v54 = vpop.f32.mrf.mxu3  ;;  %v4562_v19 = vadd.f32 %v11545_v5, %v4305_v41  ;;  %v5193_v5 = vld [vmem:[#allocation2 + $0xf0] sm:$0xff]  ;;  %v4805_v41 = vld [vmem:[#allocation2 + $0xe1] sm:$0xff] }
 0x6b7   : > { %v4395_v14 = vadd.f32 %v4394_v54, %v4281_v51 }
 0x6b8   : > { %5472 = vmatmul.f32.gmra.mxu0 %v4802_v4  ;;  %v4756_v51 = vadd.f32 %v11558_v50, %v4562_v19 }
 0x6b9   : > { %v11739_v31 = vadd.f32 %v4556_v32, %v4395_v14  ;;  %4901 = vmatmul.f32.gmra.mxu2 %v4804_v11  ;;  %v4308_v14 = vadd.f32 %v11555_v20, %v11550_v45 }
 0x6bb   : > { %v4559_v53 = vpop.f32.mrf.mxu1  ;;  %14678 = vst [vmem:[#allocation28_spill] sm:$0xff] %v11739_v31  ;;  %5092 = vmatmul.f32.gmra.mxu3 %v11741_v40  ;;  %v11752_v40 = vld [vmem:[#allocation2 + $0xda] sm:$0xff] }
 0x6bc   : > { %v4854_v25 = vpop.f32.mrf.mxu2 }
 0x6bd   : > { %v11745_v42 = vpop.f32.mrf.mxu0  ;;  %v4950_v4 = vadd.f32 %v4854_v25, %v4756_v51 }
 0x6be   : > { %5287 = vmatmul.f32.gmra.mxu1 %v5192_v29  ;;  %v4397_v54 = vpop.f32.mrf.mxu3  ;;  %v4563_v29 = vadd.f32 %v11552_v47, %v4308_v14  ;;  %v4806_v47 = vld [vmem:[#allocation2 + $0xf1] sm:$0xff] }
 0x6bf   : > { %v4398_v27 = vadd.f32 %v4397_v54, %v4284_v9  ;;  %v11761_v54 = vld [vmem:[#allocation2 + $0xe2] sm:$0xff] }
 0x6c0   : > { %5475 = vmatmul.f32.gmra.mxu0 %v4803_v49  ;;  %v4757_v9 = vadd.f32 %v11563_v28, %v4563_v29  ;;  %v4758_v28 = vadd.f32 %v11568_v13, %v11560_v1  ;;  %v4759_v1 = vadd.f32 %v11573_v15, %v11565_v36  ;;  %v4760_v36 = vadd.f32 %v11578_v46, %v11570_v60 }
 0x6c1   : > { %v11750_v31 = vadd.f32 %v4559_v53, %v4398_v27  ;;  %4904 = vmatmul.f32.gmra.mxu2 %v4805_v41  ;;  %v5194_v27 = vld [vmem:[#allocation2 + $0xf8] sm:$0xff]  ;;  %v4761_v60 = vadd.f32 %v11583_v63, %v11575_v52  ;;  %v4762_v52 = vadd.f32 %v11588_v39, %v11580_v37  ;;  %v4763_v37 = vadd.f32 %v11593_v61, %v11585_v17 }
 0x6c2   : > { %v4764_v17 = vadd.f32 %v11598_v2, %v11590_v21  ;;  %v4765_v21 = vadd.f32 %v11603_v12, %v11595_v56  ;;  %v4766_v12 = vadd.f32 %v11608_v30, %v11600_v62  ;;  %v4815_v62 = vld [vmem:[#allocation2 + $0x159] sm:$0xff] }
 0x6c3   : > { %v5243_v32 = vpop.f32.mrf.mxu1  ;;  %5095 = vmatmul.f32.gmra.mxu3 %v11752_v40 }
 0x6c4   : > { %v4857_v49 = vpop.f32.mrf.mxu2 }
 0x6c5   : > { %v11756_v50 = vpop.f32.mrf.mxu0  ;;  %v4951_v53 = vadd.f32 %v4857_v49, %v4757_v9  ;;  %v11770_v9 = vld [vmem:[#allocation2 + $0xf2] sm:$0xff] }
 0x6c6   : > { %5290 = vmatmul.f32.gmra.mxu1 %v5193_v5  ;;  %v5048_v45 = vpop.f32.mrf.mxu3 }
 0x6c7   : > { %v5144_v20 = vadd.f32 %v5048_v45, %v4950_v4  ;;  %v5195_v45 = vld [vmem:[#allocation2 + $0x108] sm:$0xff] }
 0x6c8   : > { %5478 = vmatmul.f32.gmra.mxu0 %v4804_v11 }
 0x6c9   : > { %v11759_v51 = vadd.f32 %v5243_v32, %v5144_v20  ;;  %4907 = vmatmul.f32.gmra.mxu2 %v4806_v47  ;;  %v4807_v20 = vld [vmem:[#allocation2 + $0xf9] sm:$0xff] }
 0x6cb   : > { %v5246_v19 = vpop.f32.mrf.mxu1  ;;  %5098 = vmatmul.f32.gmra.mxu3 %v11761_v54 }
 0x6cc   : > { %v4860_v11 = vpop.f32.mrf.mxu2 }
 0x6cd   : > { %v11764_v25 = vpop.f32.mrf.mxu0  ;;  %v4952_v5 = vadd.f32 %v4860_v11, %v4758_v28  ;;  %v4808_v11 = vld [vmem:[#allocation2 + $0x109] sm:$0xff] }
 0x6ce   : > { %5293 = vmatmul.f32.gmra.mxu1 %v5194_v27  ;;  %v5051_v14 = vpop.f32.mrf.mxu3 }
 0x6cf   : > { %v5145_v4 = vadd.f32 %v5051_v14, %v4951_v53  ;;  %v11779_v14 = vld [vmem:[#allocation2 + $0xfa] sm:$0xff] }
 0x6d0   : > { %5481 = vmatmul.f32.gmra.mxu0 %v4805_v41 }
 0x6d1   : > { %v11768_v29 = vadd.f32 %v5246_v19, %v5145_v4  ;;  %4910 = vmatmul.f32.gmra.mxu2 %v4807_v20  ;;  %v5196_v4 = vld [vmem:[#allocation2 + $0x110] sm:$0xff] }
 0x6d3   : > { %v5249_v32 = vpop.f32.mrf.mxu1  ;;  %5101 = vmatmul.f32.gmra.mxu3 %v11770_v9 }
 0x6d4   : > { %v4863_v41 = vpop.f32.mrf.mxu2 }
 0x6d5   : > { %v11773_v49 = vpop.f32.mrf.mxu0  ;;  %v4953_v27 = vadd.f32 %v4863_v41, %v4759_v1  ;;  %v5197_v41 = vld [vmem:[#allocation2 + $0x120] sm:$0xff] }
 0x6d6   : > { %5296 = vmatmul.f32.gmra.mxu1 %v5195_v45  ;;  %v5054_v13 = vpop.f32.mrf.mxu3 }
 0x6d7   : > { %v5146_v53 = vadd.f32 %v5054_v13, %v4952_v5 }
 0x6d8   : > { %5484 = vmatmul.f32.gmra.mxu0 %v4806_v47 }
 0x6d9   : > { %v11777_v28 = vadd.f32 %v5249_v32, %v5146_v53  ;;  %4913 = vmatmul.f32.gmra.mxu2 %v4808_v11  ;;  %v11788_v53 = vld [vmem:[#allocation2 + $0x10a] sm:$0xff] }
 0x6db   : > { %v5252_v19 = vpop.f32.mrf.mxu1  ;;  %14680 = vst [vmem:[#allocation57_spill] sm:$0xff] %v11777_v28  ;;  %5104 = vmatmul.f32.gmra.mxu3 %v11779_v14 }
 0x6dc   : > { %v4866_v47 = vpop.f32.mrf.mxu2 }
 0x6dd   : > { %v11782_v45 = vpop.f32.mrf.mxu0  ;;  %v4954_v1 = vadd.f32 %v4866_v47, %v4760_v36  ;;  %v5198_v47 = vld [vmem:[#allocation2 + $0x128] sm:$0xff] }
 0x6de   : > { %5299 = vmatmul.f32.gmra.mxu1 %v5196_v4  ;;  %v5057_v15 = vpop.f32.mrf.mxu3  ;;  %v4809_v4 = vld [vmem:[#allocation2 + $0x111] sm:$0xff] }
 0x6df   : > { %v5147_v5 = vadd.f32 %v5057_v15, %v4953_v27 }
 0x6e0   : > { %5487 = vmatmul.f32.gmra.mxu0 %v4807_v20 }
 0x6e1   : > { %v11786_v13 = vadd.f32 %v5252_v19, %v5147_v5  ;;  %4916 = vmatmul.f32.gmra.mxu2 %v4809_v4  ;;  %v11797_v5 = vld [vmem:[#allocation2 + $0x112] sm:$0xff] }
 0x6e3   : > { %v5255_v32 = vpop.f32.mrf.mxu1  ;;  %14681 = vst [vmem:[#allocation32_spill] sm:$0xff] %v11786_v13  ;;  %5107 = vmatmul.f32.gmra.mxu3 %v11788_v53 }
 0x6e4   : > { %v4869_v20 = vpop.f32.mrf.mxu2 }
 0x6e5   : > { %v11791_v28 = vpop.f32.mrf.mxu0  ;;  %v4955_v36 = vadd.f32 %v4869_v20, %v4761_v60  ;;  %v5199_v20 = vld [vmem:[#allocation2 + $0x138] sm:$0xff] }
 0x6e6   : > { %5302 = vmatmul.f32.gmra.mxu1 %v5197_v41  ;;  %v5060_v46 = vpop.f32.mrf.mxu3  ;;  %v4810_v41 = vld [vmem:[#allocation2 + $0x121] sm:$0xff] }
 0x6e7   : > { %v5148_v27 = vadd.f32 %v5060_v46, %v4954_v1 }
 0x6e8   : > { %5490 = vmatmul.f32.gmra.mxu0 %v4808_v11 }
 0x6e9   : > { %v11795_v15 = vadd.f32 %v5255_v32, %v5148_v27  ;;  %4919 = vmatmul.f32.gmra.mxu2 %v4810_v41  ;;  %v11806_v27 = vld [vmem:[#allocation2 + $0x122] sm:$0xff] }
 0x6eb   : > { %v5258_v19 = vpop.f32.mrf.mxu1  ;;  %14682 = vst [vmem:[#allocation87_spill] sm:$0xff] %v11795_v15  ;;  %5110 = vmatmul.f32.gmra.mxu3 %v11797_v5 }
 0x6ec   : > { %v4872_v11 = vpop.f32.mrf.mxu2 }
 0x6ed   : > { %v11800_v13 = vpop.f32.mrf.mxu0  ;;  %v4956_v60 = vadd.f32 %v4872_v11, %v4762_v52  ;;  %v5200_v11 = vld [vmem:[#allocation2 + $0x140] sm:$0xff] }
 0x6ee   : > { %5305 = vmatmul.f32.gmra.mxu1 %v5198_v47  ;;  %v5063_v63 = vpop.f32.mrf.mxu3  ;;  %v4811_v47 = vld [vmem:[#allocation2 + $0x129] sm:$0xff] }
 0x6ef   : > { %v5149_v1 = vadd.f32 %v5063_v63, %v4955_v36 }
 0x6f0   : > { %5493 = vmatmul.f32.gmra.mxu0 %v4809_v4 }
 0x6f1   : > { %v11804_v46 = vadd.f32 %v5258_v19, %v5149_v1  ;;  %4922 = vmatmul.f32.gmra.mxu2 %v4811_v47  ;;  %v11815_v1 = vld [vmem:[#allocation2 + $0x12a] sm:$0xff] }
 0x6f3   : > { %v5261_v32 = vpop.f32.mrf.mxu1  ;;  %14683 = vst [vmem:[#allocation86_spill] sm:$0xff] %v11804_v46  ;;  %5113 = vmatmul.f32.gmra.mxu3 %v11806_v27 }
 0x6f4   : > { %v4875_v4 = vpop.f32.mrf.mxu2 }
 0x6f5   : > { %v11809_v15 = vpop.f32.mrf.mxu0  ;;  %v4957_v52 = vadd.f32 %v4875_v4, %v4763_v37  ;;  %v5201_v4 = vld [vmem:[#allocation2 + $0x150] sm:$0xff] }
 0x6f6   : > { %5308 = vmatmul.f32.gmra.mxu1 %v5199_v20  ;;  %v5066_v39 = vpop.f32.mrf.mxu3  ;;  %v4812_v20 = vld [vmem:[#allocation2 + $0x139] sm:$0xff] }
 0x6f7   : > { %v5150_v36 = vadd.f32 %v5066_v39, %v4956_v60 }
 0x6f8   : > { %5496 = vmatmul.f32.gmra.mxu0 %v4810_v41 }
 0x6f9   : > { %v11813_v63 = vadd.f32 %v5261_v32, %v5150_v36  ;;  %4925 = vmatmul.f32.gmra.mxu2 %v4812_v20  ;;  %v11824_v36 = vld [vmem:[#allocation2 + $0x13a] sm:$0xff] }
 0x6fb   : > { %v5264_v19 = vpop.f32.mrf.mxu1  ;;  %14684 = vst [vmem:[#allocation85_spill] sm:$0xff] %v11813_v63  ;;  %5116 = vmatmul.f32.gmra.mxu3 %v11815_v1 }
 0x6fc   : > { %v4878_v41 = vpop.f32.mrf.mxu2 }
 0x6fd   : > { %v11818_v46 = vpop.f32.mrf.mxu0  ;;  %v4958_v37 = vadd.f32 %v4878_v41, %v4764_v17  ;;  %v5612_v17 = vld [vmem:[#allocation3 + $0x470] sm:$0xff]  ;;  %v5202_v41 = vld [vmem:[#allocation2 + $0x158] sm:$0xff] }
 0x6fe   : > { %5311 = vmatmul.f32.gmra.mxu1 %v5200_v11  ;;  %v5069_v61 = vpop.f32.mrf.mxu3  ;;  %v4813_v11 = vld [vmem:[#allocation2 + $0x141] sm:$0xff] }
 0x6ff   : > { %v5151_v60 = vadd.f32 %v5069_v61, %v4957_v52 }
 0x700   : > { %5499 = vmatmul.f32.gmra.mxu0 %v4811_v47 }
 0x701   : > { %v11822_v39 = vadd.f32 %v5264_v19, %v5151_v60  ;;  %4928 = vmatmul.f32.gmra.mxu2 %v4813_v11  ;;  %v5613_v19 = vld [vmem:[#allocation3 + $0x478] sm:$0xff] }
 0x702   : > { %5614 = vmatpush.msra.mxu2 %v5613_v19  ;;  %v11835_v60 = vld [vmem:[#allocation2 + $0x142] sm:$0xff] }
 0x703   : > { %v5267_v32 = vpop.f32.mrf.mxu1  ;;  %14685 = vst [vmem:[#allocation83_spill] sm:$0xff] %v11822_v39  ;;  %5119 = vmatmul.f32.gmra.mxu3 %v11824_v36  ;;  %v5609_v39 = vld [vmem:[#allocation3 + $0x458] sm:$0xff] }
 0x704   : > { %v4881_v52 = vpop.f32.mrf.mxu2  ;;  %14688 = vst [vmem:[#allocation78_spill] sm:$0xff] %v11835_v60  ;;  %5615 = vmatpush.msra.mxu2 %v5612_v17  ;;  %v11848_v17 = vld [vmem:[#allocation2 + $0x152] sm:$0xff] }
 0x705   : > { %v11827_v63 = vpop.f32.mrf.mxu0  ;;  %v11831_v47 = vadd.f32 %v4881_v52, %v4765_v21  ;;  %v5611_v21 = vld [vmem:[#allocation3 + $0x468] sm:$0xff]  ;;  %v5610_v52 = vld [vmem:[#allocation3 + $0x460] sm:$0xff] }
 0x706   : > { %5314 = vmatmul.f32.gmra.mxu1 %v5201_v4  ;;  %v5072_v2 = vpop.f32.mrf.mxu3  ;;  %v4814_v4 = vld [vmem:[#allocation2 + $0x151] sm:$0xff]  ;;  %5616 = vmatpush.msra.mxu2 %v5611_v21 }
 0x707   : > { %14686 = vst [vmem:[#allocation81_spill] sm:$0xff] %v11831_v47  ;;  %v5152_v19 = vadd.f32 %v5072_v2, %v4958_v37  ;;  %v4767_v37 = vadd.f32 %v11613_v10, %v11605_v26  ;;  %v4816_v26 = vld [vmem:[#allocation2 + $0x169] sm:$0xff] }
 0x708   : > { %5502 = vmatmul.f32.gmra.mxu0 %v4812_v20  ;;  %5617 = vmatpush.msra.mxu2 %v5610_v52 }
 0x709   : > { %4931 = vmatmul.f32.gmra.mxu2 %v4814_v4  ;;  %v5347_v30 = vadd.f32 %v5267_v32, %v5152_v19  ;;  %v5605_v32 = vld [vmem:[#allocation3 + $0x438] sm:$0xff]  ;;  %v5604_v19 = vld [vmem:[#allocation3 + $0x430] sm:$0xff] }
 0x70a   : > { %5618 = vmatpush.msra.mxu2 %v5609_v39 }
 0x70b   : > { %v11833_v61 = vpop.f32.mrf.mxu1  ;;  %5122 = vmatmul.f32.gmra.mxu3 %v11835_v60 }
 0x70c   : > { %14687 = vst [vmem:[#allocation79_spill] sm:$0xff] %v11833_v61  ;;  %v4884_v61 = vpop.f32.mrf.mxu2 }
 0x70d   : > { %v11838_v56 = vpop.f32.mrf.mxu0  ;;  %v11844_v47 = vadd.f32 %v4884_v61, %v4766_v12  ;;  %v5607_v61 = vld [vmem:[#allocation3 + $0x448] sm:$0xff]  ;;  %v5606_v12 = vld [vmem:[#allocation3 + $0x440] sm:$0xff] }
 0x70e   : > { %5317 = vmatmul.f32.gmra.mxu1 %v5202_v41  ;;  %v11842_v20 = vpop.f32.mrf.mxu3  ;;  %v5608_v41 = vld [vmem:[#allocation3 + $0x450] sm:$0xff] }
 0x70f   : > { %14689 = vst [vmem:[#allocation76_spill] sm:$0xff] %v11842_v20  ;;  %5619 = vmatpush.msra.mxu2 %v5608_v41 }
 0x710   : > { %5505 = vmatmul.f32.gmra.mxu0 %v4813_v11  ;;  %14690 = vst [vmem:[#allocation70_spill] sm:$0xff] %v11844_v47  ;;  %v5401_v47 = vld [vmem:[#allocation2 + $0x199] sm:$0xff] }
 0x711   : > { %4934 = vmatmul.f32.gmra.mxu2 %v4815_v62 }
 0x712   : > { %5620 = vmatpush.msra.mxu2 %v5607_v61 }
 0x713   : > { %v11846_v60 = vpop.f32.mrf.mxu1  ;;  %5125 = vmatmul.f32.gmra.mxu3 %v11848_v17 }
 0x714   : > { %14691 = vst [vmem:[#allocation69_spill] sm:$0xff] %v11846_v60  ;;  %v4887_v52 = vpop.f32.mrf.mxu2  ;;  %5621 = vmatpush.msra.mxu2 %v5606_v12  ;;  %v5601_v12 = vld [vmem:[#allocation3 + $0x418] sm:$0xff] }
 0x715   : > { %v5461_v21 = vpop.f32.mrf.mxu0  ;;  %v11858_v60 = vadd.f32 %v4887_v52, %v4767_v37 }
 0x716   : > { %5320 = vmatmul.f32.gmra.mxu1 %v11617_v44  ;;  %v11854_v11 = vadd.f32 %v5461_v21, %v5347_v30  ;;  %v11856_v2 = vpop.f32.mrf.mxu3  ;;  %v11862_v44 = vld [vmem:[#allocation2 + $0x15a] sm:$0xff]  ;;  %5622 = vmatpush.msra.mxu2 %v5605_v32  ;;  %v5602_v21 = vld [vmem:[#allocation3 + $0x420] sm:$0xff] }
 0x717   : > { %14692 = vst [vmem:[#allocation72_spill] sm:$0xff] %v11856_v2  ;;  %v5603_v30 = vld [vmem:[#allocation3 + $0x428] sm:$0xff]  ;;  %v5600_v32 = vld [vmem:[#allocation3 + $0x410] sm:$0xff] }
 0x718   : > { %5508 = vmatmul.f32.gmra.mxu0 %v4814_v4  ;;  %14693 = vst [vmem:[#allocation21_spill] sm:$0xff] %v11858_v60  ;;  %5623 = vmatpush.msra.mxu2 %v5604_v19  ;;  %v4768_v4 = vadd.f32 %v11620_v8, %v11610_v55  ;;  %v4817_v19 = vld [vmem:[#allocation2 + $0x171] sm:$0xff]  ;;  %v4769_v8 = vadd.f32 %v11628_v34, %v11615_v6 }
 0x719   : > { %4937 = vmatmul.f32.gmra.mxu2 %v4816_v26  ;;  %v4770_v34 = vadd.f32 %v11635_v58, %v11623_v7  ;;  %v4771_v7 = vadd.f32 %v11644_v24, %v11631_v43 }
 0x71a   : > { %5624 = vmatpush.msra.mxu2 %v5603_v30  ;;  %v5598_v30 = vld [vmem:[#allocation3 + $0x400] sm:$0xff] }
 0x71b   : > { %v11860_v39 = vpop.f32.mrf.mxu1  ;;  %5128 = vmatmul.f32.gmra.mxu3 %v11862_v44 }
 0x71c   : > { %14694 = vst [vmem:[#allocation35_spill] sm:$0xff] %v11860_v39  ;;  %v4890_v37 = vpop.f32.mrf.mxu2  ;;  %5625 = vmatpush.msra.mxu2 %v5602_v21  ;;  %v5565_v39 = vld [vmem:[#allocation2 + $0x32] sm:$0xff] }
 0x71d   : > { %v11866_v10 = vpop.f32.mrf.mxu0  ;;  %v11872_v61 = vadd.f32 %v4890_v37, %v4768_v4  ;;  %v5599_v4 = vld [vmem:[#allocation3 + $0x408] sm:$0xff] }
 0x71e   : > { %5323 = vmatmul.f32.gmra.mxu1 %v11625_v23  ;;  %14695 = vst [vmem:[#allocation17_spill] sm:$0xff] %v11866_v10  ;;  %v11870_v41 = vpop.f32.mrf.mxu3  ;;  %v11876_v23 = vld [vmem:[#allocation2 + $0x16a] sm:$0xff]  ;;  %5626 = vmatpush.msra.mxu2 %v5601_v12  ;;  %v4818_v12 = vld [vmem:[#allocation2 + $0x181] sm:$0xff] }
 0x71f   : > { %14696 = vst [vmem:[#allocation38_spill] sm:$0xff] %v11870_v41 }
 0x720   : > { %5511 = vmatmul.f32.gmra.mxu0 %v4815_v62  ;;  %5627 = vmatpush.msra.mxu2 %v5600_v32 }
 0x721   : > { %4940 = vmatmul.f32.gmra.mxu2 %v4817_v19 }
 0x722   : > { %5628 = vmatpush.msra.mxu2 %v5599_v4 }
 0x723   : > { %v11874_v52 = vpop.f32.mrf.mxu1  ;;  %5131 = vmatmul.f32.gmra.mxu3 %v11876_v23 }
 0x724   : > { %14697 = vst [vmem:[#allocation58_spill] sm:$0xff] %v11874_v52  ;;  %v4893_v21 = vpop.f32.mrf.mxu2  ;;  %5629 = vmatpush.msra.mxu2 %v5598_v30  ;;  %v11904_v30 = vld [vmem:[#allocation2 + $0x182] sm:$0xff] }
 0x725   : > { %v11880_v55 = vpop.f32.mrf.mxu0  ;;  %v11886_v37 = vadd.f32 %v4893_v21, %v4769_v8  ;;  %v4819_v21 = vld [vmem:[#allocation2 + $0x189] sm:$0xff] }
 0x726   : > { %5326 = vmatmul.f32.gmra.mxu1 %v11637_v38  ;;  %14698 = vst [vmem:[#allocation31_spill] sm:$0xff] %v11880_v55  ;;  %v11884_v62 = vpop.f32.mrf.mxu3  ;;  %v11890_v38 = vld [vmem:[#allocation2 + $0x172] sm:$0xff] }
 0x728   : > { %5514 = vmatmul.f32.gmra.mxu0 %v4816_v26 }
 0x729   : > { %4943 = vmatmul.f32.gmra.mxu2 %v4818_v12 }
 0x72b   : > { %v11888_v10 = vpop.f32.mrf.mxu1  ;;  %5134 = vmatmul.f32.gmra.mxu3 %v11890_v38 }
 0x72c   : > { %14699 = vst [vmem:[#allocation36_spill] sm:$0xff] %v11888_v10  ;;  %v4896_v26 = vpop.f32.mrf.mxu2  ;;  %v14707_v10 = vld [vmem:[#allocation94_spill] sm:$0xff] }
 0x72d   : > { %v11894_v6 = vpop.f32.mrf.mxu0  ;;  %v11900_v8 = vadd.f32 %v4896_v26, %v4770_v34 }
 0x72e   : > { %5329 = vmatmul.f32.gmra.mxu1 %v11646_v3  ;;  %14700 = vst [vmem:[#allocation9_spill] sm:$0xff] %v11894_v6  ;;  %v11898_v32 = vpop.f32.mrf.mxu3  ;;  %v7794_v3 = vld [vmem:[#allocation2] sm:$0xff]  ;;  %v11917_v6 = vld [vmem:[#allocation2 + $0x18a] sm:$0xff] }
 0x730   : > { %5517 = vmatmul.f32.gmra.mxu0 %v4817_v19 }
 0x731   : > { %4946 = vmatmul.f32.gmra.mxu2 %v4819_v21 }
 0x733   : > { %v11902_v4 = vpop.f32.mrf.mxu1  ;;  %5137 = vmatmul.f32.gmra.mxu3 %v11904_v30 }
 0x734   : > { %14701 = vst [vmem:[#allocation16_spill] sm:$0xff] %v11902_v4  ;;  %v4899_v19 = vpop.f32.mrf.mxu2 }
 0x735   : > { %v11907_v55 = vpop.f32.mrf.mxu0  ;;  %v11913_v34 = vadd.f32 %v4899_v19, %v4771_v7  ;;  %v5566_v19 = vld [vmem:[#allocation2 + $0x3a] sm:$0xff] }
 0x736   : > { %5332 = vmatmul.f32.gmra.mxu1 %v7794_v3  ;;  %14702 = vst [vmem:[#allocation75_spill] sm:$0xff] %v11907_v55  ;;  %v11911_v58 = vpop.f32.mrf.mxu3  ;;  %v14705_v55 = vld [vmem:[#allocation74_spill] sm:$0xff] }
 0x737   : > { %v4772_v43 = vadd.f32 %v14705_v55, %v11640_v0 }
 0x738   : > { %5520 = vmatmul.f32.gmra.mxu0 %v4818_v12 }
 0x739   : > { %5630 = vmatmul.f32.vlgmr.msra.gmra.mxu2 %v5565_v39  ;;  %v4773_v39 = vadd.f32 %v11659_v16, %v14707_v10 }
 0x73b   : > { %v11915_v26 = vpop.f32.mrf.mxu1  ;;  %5140 = vmatmul.f32.gmra.mxu3 %v11917_v6 }
 0x73c   : > { %14703 = vst [vmem:[#allocation55_spill] sm:$0xff] %v11915_v26  ;;  %v4902_v52 = vpop.f32.mrf.mxu2  ;;  %v5567_v26 = vld [vmem:[#allocation2 + $0x4a] sm:$0xff] }
 0x73d   : > { %v11920_v20 = vpop.f32.mrf.mxu0  ;;  %v4966_v12 = vadd.f32 %v4902_v52, %v4772_v43  ;;  %v5402_v52 = vld [vmem:[#allocation2 + $0x1a1] sm:$0xff]  ;;  %v4774_v43 = vadd.f32 %v11665_v59, %v11655_v33 }
 0x73e   : > { %5335 = vmatmul.f32.gmra.mxu1 %v7794_v3  ;;  %14704 = vst [vmem:[#allocation90_spill] sm:$0xff] %v11920_v20  ;;  %v11924_v24 = vpop.f32.mrf.mxu3 }
 0x740   : > { %5523 = vmatmul.f32.gmra.mxu0 %v4819_v21 }
 0x741   : > { %5633 = vmatmul.f32.gmra.mxu2 %v5566_v19 }
 0x743   : > { %v5291_v7 = vpop.f32.mrf.mxu1 }
 0x744   : > { %v4905_v20 = vpop.f32.mrf.mxu2 }
 0x745   : > { %v11926_v2 = vpop.f32.mrf.mxu0  ;;  %v4967_v60 = vadd.f32 %v4905_v20, %v4773_v39  ;;  %v4775_v20 = vadd.f32 %v11671_v22, %v11661_v35 }
 0x746   : > { %14706 = vst [vmem:[#allocation30_spill] sm:$0xff] %v11926_v2  ;;  %v5096_v3 = vpop.f32.mrf.mxu3 }
 0x747   : > { %v5160_v41 = vadd.f32 %v5096_v3, %v4966_v12  ;;  %v5568_v3 = vld [vmem:[#allocation2 + $0x52] sm:$0xff] }
 0x748   : > { %5526 = vmatmul.f32.gmra.mxu0 %v5401_v47 }
 0x749   : > { %v5355_v55 = vadd.f32 %v5291_v7, %v5160_v41  ;;  %5636 = vmatmul.f32.gmra.mxu2 %v5567_v26 }
 0x74b   : > { %v5294_v0 = vpop.f32.mrf.mxu1 }
 0x74c   : > { %v4908_v4 = vpop.f32.mrf.mxu2 }
 0x74d   : > { %v11930_v21 = vpop.f32.mrf.mxu0  ;;  %v4968_v16 = vadd.f32 %v4908_v4, %v4774_v43  ;;  %v14709_v4 = vld [vmem:[#allocation42_spill] sm:$0xff] }
 0x74e   : > { %14708 = vst [vmem:[#allocation12_spill] sm:$0xff] %v11930_v21  ;;  %v5099_v19 = vpop.f32.mrf.mxu3 }
 0x74f   : > { %v5161_v2 = vadd.f32 %v5099_v19, %v4967_v60 }
 0x750   : > { %5529 = vmatmul.f32.gmra.mxu0 %v5402_v52 }
 0x751   : > { %v5356_v12 = vadd.f32 %v5294_v0, %v5161_v2  ;;  %5639 = vmatmul.f32.gmra.mxu2 %v5568_v3  ;;  %v4776_v2 = vadd.f32 %v14709_v4, %v11667_v57  ;;  %v14711_v3 = vld [vmem:[#allocation48_spill] sm:$0xff] }
 0x752   : > { %v14715_v4 = vld [vmem:[#allocation52_spill] sm:$0xff] }
 0x753   : > { %v5297_v10 = vpop.f32.mrf.mxu1 }
 0x754   : > { %v4911_v39 = vpop.f32.mrf.mxu2 }
 0x755   : > { %v5485_v47 = vpop.f32.mrf.mxu0  ;;  %v4969_v21 = vadd.f32 %v4911_v39, %v4775_v20  ;;  %v14713_v20 = vld [vmem:[#allocation93_spill] sm:$0xff] }
 0x756   : > { %v11936_v41 = vadd.f32 %v5485_v47, %v5355_v55  ;;  %v5102_v26 = vpop.f32.mrf.mxu3  ;;  %v14712_v47 = vld [vmem:[#allocation15_spill] sm:$0xff] }
 0x757   : > { %v5162_v7 = vadd.f32 %v5102_v26, %v4968_v16 }
 0x759   : > { %v5357_v59 = vadd.f32 %v5297_v10, %v5162_v7  ;;  %5642 = vmatmul.f32.gmra.mxu2 %v11675_v48  ;;  %v4777_v10 = vadd.f32 %v14713_v20, %v14712_v47  ;;  %v14719_v20 = vld [vmem:[#allocation82_spill] sm:$0xff] }
 0x75b   : > { %v5300_v33 = vpop.f32.mrf.mxu1 }
 0x75c   : > { %v4914_v19 = vpop.f32.mrf.mxu2 }
 0x75d   : > { %v5488_v60 = vpop.f32.mrf.mxu0  ;;  %v4970_v35 = vadd.f32 %v4914_v19, %v4776_v2  ;;  %v14716_v2 = vld [vmem:[#allocation80_spill] sm:$0xff] }
 0x75e   : > { %v11941_v0 = vadd.f32 %v5488_v60, %v5356_v12  ;;  %v5105_v52 = vpop.f32.mrf.mxu3 }
 0x75f   : > { %v5163_v43 = vadd.f32 %v5105_v52, %v4969_v21  ;;  %v14717_v52 = vld [vmem:[#allocation37_spill] sm:$0xff] }
 0x760   : > { %14710 = vst [vmem:[#allocation27_spill] sm:$0xff] %v11941_v0 }
 0x761   : > { %v5358_v55 = vadd.f32 %v5300_v33, %v5163_v43  ;;  %5645 = vmatmul.f32.gmra.mxu2 %v14711_v3  ;;  %v4778_v33 = vadd.f32 %v14717_v52, %v14716_v2  ;;  %v14723_v52 = vld [vmem:[#allocation68_spill] sm:$0xff] }
 0x763   : > { %v5303_v22 = vpop.f32.mrf.mxu1 }
 0x764   : > { %v4917_v39 = vpop.f32.mrf.mxu2 }
 0x765   : > { %v5491_v16 = vpop.f32.mrf.mxu0  ;;  %v4971_v57 = vadd.f32 %v4917_v39, %v4777_v10  ;;  %v14720_v10 = vld [vmem:[#allocation73_spill] sm:$0xff] }
 0x766   : > { %v11946_v26 = vadd.f32 %v5491_v16, %v5357_v59  ;;  %v5108_v48 = vpop.f32.mrf.mxu3 }
 0x767   : > { %v5164_v7 = vadd.f32 %v5108_v48, %v4970_v35 }
 0x768   : > { %14714 = vst [vmem:[#allocation40_spill] sm:$0xff] %v11946_v26 }
 0x769   : > { %v5359_v12 = vadd.f32 %v5303_v22, %v5164_v7  ;;  %5648 = vmatmul.f32.gmra.mxu2 %v14715_v4  ;;  %v14721_v22 = vld [vmem:[#allocation92_spill] sm:$0xff] }
 0x76a   : > { %v4779_v48 = vadd.f32 %v14721_v22, %v14720_v10  ;;  %v14726_v22 = vld [vmem:[#allocation64_spill] sm:$0xff] }
 0x76b   : > { %v5306_v60 = vpop.f32.mrf.mxu1 }
 0x76c   : > { %v4920_v0 = vpop.f32.mrf.mxu2 }
 0x76d   : > { %v5494_v21 = vpop.f32.mrf.mxu0  ;;  %v4972_v47 = vadd.f32 %v4920_v0, %v4778_v33  ;;  %v14724_v0 = vld [vmem:[#allocation71_spill] sm:$0xff] }
 0x76e   : > { %v11951_v43 = vadd.f32 %v5494_v21, %v5358_v55  ;;  %v5111_v19 = vpop.f32.mrf.mxu3  ;;  %v14722_v21 = vld [vmem:[#allocation65_spill] sm:$0xff] }
 0x76f   : > { %v5165_v3 = vadd.f32 %v5111_v19, %v4971_v57 }
 0x770   : > { %14718 = vst [vmem:[#allocation34_spill] sm:$0xff] %v11951_v43 }
 0x771   : > { %v5360_v59 = vadd.f32 %v5306_v60, %v5165_v3  ;;  %5651 = vmatmul.f32.gmra.mxu2 %v14719_v20  ;;  %v4780_v60 = vadd.f32 %v14724_v0, %v14723_v52 }
 0x773   : > { %v5309_v16 = vpop.f32.mrf.mxu1 }
 0x774   : > { %v4923_v26 = vpop.f32.mrf.mxu2 }
 0x775   : > { %v5497_v35 = vpop.f32.mrf.mxu0  ;;  %v4973_v2 = vadd.f32 %v4923_v26, %v4779_v48  ;;  %v14727_v26 = vld [vmem:[#allocation66_spill] sm:$0xff] }
 0x776   : > { %v11956_v7 = vadd.f32 %v5497_v35, %v5359_v12  ;;  %v5114_v39 = vpop.f32.mrf.mxu3  ;;  %v14725_v35 = vld [vmem:[#allocation63_spill] sm:$0xff] }
 0x777   : > { %v5166_v4 = vadd.f32 %v5114_v39, %v4972_v47 }
 0x779   : > { %v5361_v55 = vadd.f32 %v5309_v16, %v5166_v4  ;;  %5654 = vmatmul.f32.gmra.mxu2 %v14722_v21  ;;  %v4781_v16 = vadd.f32 %v14727_v26, %v14726_v22  ;;  %v14733_v22 = vld [vmem:[#allocation84_spill] sm:$0xff] }
 0x77b   : > { %v5312_v33 = vpop.f32.mrf.mxu1 }
 0x77c   : > { %v4926_v43 = vpop.f32.mrf.mxu2 }
 0x77d   : > { %v5500_v57 = vpop.f32.mrf.mxu0  ;;  %v4974_v10 = vadd.f32 %v4926_v43, %v4780_v60  ;;  %v14729_v43 = vld [vmem:[#allocation91_spill] sm:$0xff] }
 0x77e   : > { %v11961_v19 = vadd.f32 %v5500_v57, %v5360_v59  ;;  %v5117_v3 = vpop.f32.mrf.mxu3  ;;  %v14728_v57 = vld [vmem:[#allocation61_spill] sm:$0xff]  ;;  %v14730_v60 = vld [vmem:[#allocation67_spill] sm:$0xff] }
 0x77f   : > { %v5167_v20 = vadd.f32 %v5117_v3, %v4973_v2 }
 0x781   : > { %v5362_v12 = vadd.f32 %v5312_v33, %v5167_v20  ;;  %5657 = vmatmul.f32.gmra.mxu2 %v14725_v35  ;;  %v4782_v33 = vadd.f32 %v14730_v60, %v14729_v43  ;;  %v14736_v43 = vld [vmem:[#allocation26_spill] sm:$0xff]  ;;  %v14737_v60 = vld [vmem:[#allocation77_spill] sm:$0xff] }
 0x783   : > { %v5315_v52 = vpop.f32.mrf.mxu1 }
 0x784   : > { %v4929_v21 = vpop.f32.mrf.mxu2 }
 0x785   : > { %v5503_v47 = vpop.f32.mrf.mxu0  ;;  %v11968_v0 = vadd.f32 %v4929_v21, %v4781_v16  ;;  %v14734_v21 = vld [vmem:[#allocation88_spill] sm:$0xff] }
 0x786   : > { %v11966_v48 = vadd.f32 %v5503_v47, %v5361_v55  ;;  %v5120_v39 = vpop.f32.mrf.mxu3  ;;  %v14731_v55 = vld [vmem:[#allocation33_spill] sm:$0xff] }
 0x787   : > { %v5168_v4 = vadd.f32 %v5120_v39, %v4974_v10  ;;  %v14732_v10 = vld [vmem:[#allocation89_spill] sm:$0xff] }
 0x788   : > { %v4783_v26 = vadd.f32 %v14733_v22, %v14732_v10  ;;  %v4787_v22 = vadd.f32 %v11764_v25, %v11750_v31  ;;  %v14739_v31 = vld [vmem:[#allocation57_spill] sm:$0xff] }
 0x789   : > { %v5363_v59 = vadd.f32 %v5315_v52, %v5168_v4  ;;  %5660 = vmatmul.f32.gmra.mxu2 %v14728_v57  ;;  %v14735_v52 = vld [vmem:[#allocation29_spill] sm:$0xff]  ;;  %v5535_v25 = vadd.f32 %v11791_v28, %v14739_v31  ;;  %v14742_v28 = vld [vmem:[#allocation86_spill] sm:$0xff] }
 0x78c   : > { %v4932_v20 = vpop.f32.mrf.mxu2 }
 0x78d   : > { %v5506_v2 = vpop.f32.mrf.mxu0  ;;  %v11975_v35 = vadd.f32 %v4932_v20, %v4782_v33  ;;  %v4785_v33 = vadd.f32 %v11745_v42, %v14737_v60  ;;  %v5533_v42 = vadd.f32 %v11773_v49, %v11759_v51  ;;  %v14740_v51 = vld [vmem:[#allocation32_spill] sm:$0xff]  ;;  %v5538_v60 = vadd.f32 %v11818_v46, %v14742_v28  ;;  %v14755_v28 = vld [vmem:[#allocation58_spill] sm:$0xff] }
 0x78e   : > { %v11973_v3 = vadd.f32 %v5506_v2, %v5362_v12  ;;  %v4784_v12 = vadd.f32 %v14735_v52, %v14734_v21  ;;  %v5536_v49 = vadd.f32 %v11800_v13, %v14740_v51  ;;  %v14743_v13 = vld [vmem:[#allocation85_spill] sm:$0xff]  ;;  %v14749_v51 = vld [vmem:[#allocation38_spill] sm:$0xff] }
 0x791   : > { %5663 = vmatmul.f32.gmra.mxu2 %v14731_v55 }
 0x794   : > { %v4935_v39 = vpop.f32.mrf.mxu2 }
 0x795   : > { %v5509_v47 = vpop.f32.mrf.mxu0  ;;  %v11982_v4 = vadd.f32 %v4935_v39, %v4783_v26 }
 0x796   : > { %v11980_v16 = vadd.f32 %v5509_v47, %v5363_v59  ;;  %v14738_v59 = vld [vmem:[#allocation28_spill] sm:$0xff] }
 0x797   : > { %v4786_v47 = vadd.f32 %v11756_v50, %v14738_v59  ;;  %v5534_v50 = vadd.f32 %v11782_v45, %v11768_v29  ;;  %v14741_v29 = vld [vmem:[#allocation87_spill] sm:$0xff] }
 0x798   : > { %v5537_v45 = vadd.f32 %v11809_v15, %v14741_v29  ;;  %v14744_v15 = vld [vmem:[#allocation78_spill] sm:$0xff] }
 0x799   : > { %5666 = vmatmul.f32.gmra.mxu2 %v11732_v18 }
 0x79c   : > { %v4938_v57 = vpop.f32.mrf.mxu2 }
 0x79d   : > { %v11987_v2 = vadd.f32 %v4938_v57, %v4784_v12 }
 0x7a1   : > { %5669 = vmatmul.f32.gmra.mxu2 %v14736_v43 }
 0x7a4   : > { %v4941_v20 = vpop.f32.mrf.mxu2 }
 0x7a5   : > { %v11992_v55 = vadd.f32 %v4941_v20, %v4785_v33  ;;  %v5539_v20 = vadd.f32 %v11827_v63, %v14743_v13 }
 0x7a9   : > { %5672 = vmatmul.f32.gmra.mxu2 %v11752_v40 }
 0x7ac   : > { %v4944_v18 = vpop.f32.mrf.mxu2 }
 0x7ad   : > { %v11997_v10 = vadd.f32 %v4944_v18, %v4786_v47  ;;  %v14745_v47 = vld [vmem:[#allocation83_spill] sm:$0xff] }
 0x7ae   : > { %v5540_v18 = vadd.f32 %v11838_v56, %v14745_v47 }
 0x7b1   : > { %5675 = vmatmul.f32.gmra.mxu2 %v11761_v54 }
 0x7b4   : > { %v4947_v26 = vpop.f32.mrf.mxu2 }
 0x7b5   : > { %v12002_v39 = vadd.f32 %v4947_v26, %v4787_v22 }
 0x7b9   : > { %5678 = vmatmul.f32.gmra.mxu2 %v11770_v9 }
 0x7bc   : > { %v5631_v40 = vpop.f32.mrf.mxu2 }
 0x7bd   : > { %v12007_v21 = vadd.f32 %v5631_v40, %v5533_v42 }
 0x7c1   : > { %5681 = vmatmul.f32.gmra.mxu2 %v11779_v14 }
 0x7c4   : > { %v5634_v54 = vpop.f32.mrf.mxu2 }
 0x7c5   : > { %v12012_v52 = vadd.f32 %v5634_v54, %v5534_v50  ;;  %v5595_v50 = vld [vmem:[#allocation2 + $0x19a] sm:$0xff]  ;;  %v14746_v54 = vld [vmem:[#allocation16_spill] sm:$0xff] }
 0x7c9   : > { %5684 = vmatmul.f32.gmra.mxu2 %v11788_v53 }
 0x7cc   : > { %v5637_v9 = vpop.f32.mrf.mxu2 }
 0x7cd   : > { %v12017_v12 = vadd.f32 %v5637_v9, %v5535_v25  ;;  %v14748_v9 = vld [vmem:[#allocation21_spill] sm:$0xff] }
 0x7d1   : > { %5687 = vmatmul.f32.gmra.mxu2 %v11797_v5 }
 0x7d4   : > { %v5640_v14 = vpop.f32.mrf.mxu2 }
 0x7d5   : > { %v12022_v57 = vadd.f32 %v5640_v14, %v5536_v49  ;;  %v5155_v49 = vadd.f32 %v14749_v51, %v14748_v9  ;;  %v14750_v14 = vld [vmem:[#allocation36_spill] sm:$0xff]  ;;  %v14766_v9 = vld [vmem:[#allocation31_spill] sm:$0xff] }
 0x7d9   : > { %5690 = vmatmul.f32.gmra.mxu2 %v11806_v27 }
 0x7dc   : > { %v5643_v53 = vpop.f32.mrf.mxu2 }
 0x7dd   : > { %v12027_v43 = vadd.f32 %v5643_v53, %v5537_v45  ;;  %v14753_v45 = vld [vmem:[#allocation70_spill] sm:$0xff]  ;;  %v14754_v53 = vld [vmem:[#allocation72_spill] sm:$0xff] }
 0x7e1   : > { %5693 = vmatmul.f32.gmra.mxu2 %v11815_v1 }
 0x7e4   : > { %v5646_v5 = vpop.f32.mrf.mxu2 }
 0x7e5   : > { %v12032_v33 = vadd.f32 %v5646_v5, %v5538_v60  ;;  %v12073_v5 = vld [vmem:[%s13959_s9] ss:$0 sm:$0xff] }
 0x7e9   : > { %5696 = vmatmul.f32.gmra.mxu2 %v11824_v36 }
 0x7ec   : > { %v5649_v27 = vpop.f32.mrf.mxu2 }
 0x7ed   : > { %v12037_v59 = vadd.f32 %v5649_v27, %v5539_v20  ;;  %v14757_v27 = vld [vmem:[#allocation81_spill] sm:$0xff] }
 0x7f1   : > { %5699 = vmatmul.f32.gmra.mxu2 %v14744_v15  ;;  %v14758_v15 = vld [vmem:[#allocation76_spill] sm:$0xff] }
 0x7f2   : > { %v5153_v47 = vadd.f32 %v14758_v15, %v14757_v27  ;;  %v14780_v15 = vmov 1.0  }
 0x7f4   : > { %v5652_v1 = vpop.f32.mrf.mxu2 }
 0x7f5   : > { %v12042_v22 = vadd.f32 %v5652_v1, %v5540_v18  ;;  %v14759_v18 = vld [vmem:[#allocation35_spill] sm:$0xff] }
 0x7f6   : > { %v5350_v1 = vadd.f32 %v14759_v18, %v5155_v49 }
 0x7f9   : > { %5702 = vmatmul.f32.gmra.mxu2 %v11848_v17 }
 0x7fc   : > { %v5655_v46 = vpop.f32.mrf.mxu2 }
 0x7fd   : > { %v5735_v26 = vadd.f32 %v5655_v46, %v11854_v11  ;;  %v5158_v11 = vadd.f32 %v11911_v58, %v11900_v8  ;;  %v14751_v58 = vld [vmem:[#allocation30_spill] sm:$0xff]  ;;  %v14760_v46 = vld [vmem:[#allocation75_spill] sm:$0xff] }
 0x7ff   : > { %v5353_v31 = vadd.f32 %v14746_v54, %v5158_v11 }
 0x801   : > { %5705 = vmatmul.f32.gmra.mxu2 %v11862_v44  ;;  %v5159_v44 = vadd.f32 %v11924_v24, %v11913_v34  ;;  %v5547_v29 = vadd.f32 %v14751_v58, %v5353_v31  ;;  %v14752_v34 = vld [vmem:[#allocation12_spill] sm:$0xff] }
 0x804   : > { %v5658_v36 = vpop.f32.mrf.mxu2 }
 0x809   : > { %5708 = vmatmul.f32.gmra.mxu2 %v11876_v23  ;;  %v5596_v23 = vld [vmem:[#allocation2 + $0x1a2] sm:$0xff] }
 0x80c   : > { %v5661_v63 = vpop.f32.mrf.mxu2 }
 0x811   : > { %5711 = vmatmul.f32.gmra.mxu2 %v11890_v38  ;;  %v5157_v38 = vadd.f32 %v11898_v32, %v11886_v37  ;;  %v5154_v37 = vadd.f32 %v14754_v53, %v14753_v45  ;;  %v12115_v53 = vadd.f32 %v12073_v5, %v5735_v26  ;;  %v12133_v26 = vadd.f32 %v12073_v5, %v12032_v33 }
 0x812   : > { %v12151_v33 = vadd.f32 %v12073_v5, %v12017_v12 }
 0x813   : > { %v5352_v8 = vadd.f32 %v14750_v14, %v5157_v38  ;;  %14773 = vst [vmem:[#allocation54_spill] sm:$0xff] %v12115_v53 }
 0x814   : > { %v5664_v42 = vpop.f32.mrf.mxu2  ;;  %14777 = vst [vmem:[#allocation49_spill] sm:$0xff] %v12133_v26 }
 0x819   : > { %5714 = vmatmul.f32.gmra.mxu2 %v11904_v30  ;;  %v5156_v30 = vadd.f32 %v11884_v62, %v11872_v61  ;;  %v14756_v62 = vld [vmem:[#allocation90_spill] sm:$0xff] }
 0x81a   : > { %v5546_v60 = vadd.f32 %v14756_v62, %v5352_v8  ;;  %v14768_v8 = vld [vmem:[#allocation17_spill] sm:$0xff]  ;;  %v12138_v62 = vadd.f32 %v12073_v5, %v12027_v43  ;;  %v12156_v43 = vadd.f32 %v12073_v5, %v12012_v52 }
 0x81b   : > { %v5351_v61 = vadd.f32 %v14755_v28, %v5156_v30  ;;  %v14763_v30 = vld [vmem:[#allocation9_spill] sm:$0xff]  ;;  %v12128_v28 = vadd.f32 %v12073_v5, %v12037_v59  ;;  %v12146_v59 = vadd.f32 %v12073_v5, %v12022_v57  ;;  %v14779_v57 = vld [vmem:[#allocation34_spill] sm:$0xff] }
 0x81c   : > { %v5667_v56 = vpop.f32.mrf.mxu2  ;;  %v5544_v54 = vadd.f32 %v14763_v30, %v5350_v1 }
 0x81d   : > { %14776 = vst [vmem:[#allocation46_spill] sm:$0xff] %v12128_v28 }
 0x81e   : > { %v5738_v49 = vadd.f32 %v5664_v42, %v5544_v54  ;;  %v5843_v54 = vmul.f32 %v12128_v28, %v12128_v28 }
 0x820   : > { %v12103_v42 = vadd.f32 %v12073_v5, %v5738_v49  ;;  %v5839_v49 = vmul.f32 %v12151_v33, %v12151_v33 }
 0x821   : > { %5717 = vmatmul.f32.gmra.mxu2 %v11917_v6  ;;  %v14747_v6 = vld [vmem:[#allocation55_spill] sm:$0xff] }
 0x822   : > { %v5354_v25 = vadd.f32 %v14747_v6, %v5159_v44  ;;  %14770 = vst [vmem:[#allocation19_spill] sm:$0xff] %v12103_v42 }
 0x824   : > { %v5670_v40 = vpop.f32.mrf.mxu2  ;;  %v5548_v24 = vadd.f32 %v14752_v34, %v5354_v25 }
 0x825   : > { %v5740_v11 = vadd.f32 %v5670_v40, %v5546_v60 }
 0x827   : > { %v12091_v40 = vadd.f32 %v12073_v5, %v5740_v11 }
 0x829   : > { %5720 = vmatmul.f32.gmra.mxu2 %v5595_v50  ;;  %v5545_v50 = vadd.f32 %v14760_v46, %v5351_v61  ;;  %14767 = vst [vmem:[#allocation43_spill] sm:$0xff] %v12091_v40  ;;  %v5848_v46 = vmul.f32 %v12103_v42, %v12103_v42 }
 0x82b   : > { %v5739_v31 = vadd.f32 %v5667_v56, %v5545_v50 }
 0x82c   : > { %v5673_v17 = vpop.f32.mrf.mxu2 }
 0x82d   : > { %v5741_v13 = vadd.f32 %v5673_v17, %v5547_v29  ;;  %v14765_v17 = vld [vmem:[#allocation79_spill] sm:$0xff]  ;;  %v12096_v56 = vadd.f32 %v12073_v5, %v5739_v31  ;;  %v5842_v31 = vmul.f32 %v12133_v26, %v12133_v26 }
 0x82e   : > { %v5348_v25 = vadd.f32 %v14765_v17, %v5153_v47 }
 0x82f   : > { %v12085_v6 = vadd.f32 %v12073_v5, %v5741_v13  ;;  %14769 = vst [vmem:[#allocation53_spill] sm:$0xff] %v12096_v56  ;;  %v5849_v18 = vmul.f32 %v12096_v56, %v12096_v56 }
 0x830   : > { %v5542_v58 = vadd.f32 %v14768_v8, %v5348_v25  ;;  %v5841_v25 = vmul.f32 %v12138_v62, %v12138_v62  ;;  %v5318_v8 = vpop.f32.mrf.mxu1 }
 0x831   : > { %5723 = vmatmul.f32.gmra.mxu2 %v5596_v23  ;;  %v14762_v23 = vld [vmem:[#allocation69_spill] sm:$0xff]  ;;  %14764 = vst [vmem:[#allocation23_spill] sm:$0xff] %v12085_v6  ;;  %v5851_v52 = vmul.f32 %v12085_v6, %v12085_v6 }
 0x832   : > { %v5349_v38 = vadd.f32 %v14762_v23, %v5154_v37 }
 0x834   : > { %v5676_v32 = vpop.f32.mrf.mxu2  ;;  %v5543_v51 = vadd.f32 %v14766_v9, %v5349_v38  ;;  %v5845_v38 = vmul.f32 %v12115_v53, %v12115_v53  ;;  %v5123_v9 = vpop.f32.mrf.mxu3 }
 0x835   : > { %v5742_v20 = vadd.f32 %v5676_v32, %v5548_v24  ;;  %v5736_v24 = vadd.f32 %v5658_v36, %v5542_v58  ;;  %v14774_v36 = vld [vmem:[#allocation27_spill] sm:$0xff]  ;;  %v12123_v32 = vadd.f32 %v12073_v5, %v12042_v22  ;;  %v14778_v22 = vld [vmem:[#allocation40_spill] sm:$0xff]  ;;  %v12208_v58 = vpop.f32.mrf.mxu0 }
 0x836   : > { %v5737_v29 = vadd.f32 %v5661_v63, %v5543_v51  ;;  %v5840_v51 = vmul.f32 %v12146_v59, %v12146_v59 }
 0x837   : > { %v12080_v44 = vadd.f32 %v12073_v5, %v5742_v20  ;;  %v12111_v63 = vadd.f32 %v12073_v5, %v5736_v24  ;;  %14775 = vst [vmem:[#allocation56_spill] sm:$0xff] %v12123_v32  ;;  %v12161_v20 = vadd.f32 %v12073_v5, %v12007_v21  ;;  %v5850_v21 = vmul.f32 %v12091_v40, %v12091_v40 }
 0x838   : > { %v12107_v45 = vadd.f32 %v12073_v5, %v5737_v29  ;;  %v5844_v30 = vmul.f32 %v12123_v32, %v12123_v32 }
 0x839   : > { %14761 = vst [vmem:[#allocation45_spill] sm:$0xff] %v12080_v44  ;;  %5797 = vmatpush.msrb.mxu3 %v12080_v44  ;;  %v5852_v12 = vmul.f32 %v12080_v44, %v12080_v44  ;;  %v5846_v11 = vmul.f32 %v12111_v63, %v12111_v63 }
 0x83a   : > { %14771 = vst [vmem:[#allocation10_spill] sm:$0xff] %v12107_v45  ;;  %v5847_v50 = vmul.f32 %v12107_v45, %v12107_v45 }
 0x83b   : > { %5798 = vmatpush.msrb.mxu3 %v12085_v6  ;;  %14772 = vst [vmem:[#allocation50_spill] sm:$0xff] %v12111_v63 }
 0x83c   : > { %v5679_v14 = vpop.f32.mrf.mxu2 }
 0x83d   : > { %v12099_v34 = vadd.f32 %v5679_v14, %v11936_v41  ;;  %5799 = vmatpush.msrb.mxu3 %v12091_v40  ;;  %v5838_v14 = vmul.f32 %v12156_v43, %v12156_v43 }
 0x83f   : > { %5800 = vmatpush.msrb.mxu3 %v12096_v56 }
 0x841   : > { %5801 = vmatpush.msrb.mxu3 %v12103_v42 }
 0x843   : > { %5802 = vmatpush.msrb.mxu3 %v12107_v45 }
 0x844   : > { %v5682_v41 = vpop.f32.mrf.mxu2 }
 0x845   : > { %v12118_v37 = vadd.f32 %v5682_v41, %v14774_v36  ;;  %5803 = vmatpush.msrb.mxu3 %v12111_v63  ;;  %v5126_v41 = vpop.f32.mrf.mxu3 }
 0x847   : > { %5804 = vmatpush.msrb.mxu3 %v12115_v53  ;;  %v5170_v53 = vadd.f32 %v5126_v41, %v11975_v35 }
 0x849   : > { %5805 = vmatpush.msrb.mxu3 %v12123_v32 }
 0x84b   : > { %5806 = vmatpush.msrb.mxu3 %v12128_v28 }
 0x84c   : > { %v5685_v61 = vpop.f32.mrf.mxu2 }
 0x84d   : > { %v12141_v60 = vadd.f32 %v5685_v61, %v14778_v22  ;;  %5807 = vmatpush.msrb.mxu3 %v12133_v26  ;;  %v5321_v61 = vpop.f32.mrf.mxu1 }
 0x84f   : > { %5808 = vmatpush.msrb.mxu3 %v12138_v62 }
 0x851   : > { %5809 = vmatpush.msrb.mxu3 %v12146_v59 }
 0x853   : > { %5810 = vmatpush.msrb.mxu3 %v12151_v33 }
 0x854   : > { %v5688_v13 = vpop.f32.mrf.mxu2 }
 0x855   : > { %v12164_v27 = vadd.f32 %v5688_v13, %v14779_v57  ;;  %5811 = vmatpush.msrb.mxu3 %v12156_v43  ;;  %v5515_v13 = vpop.f32.mrf.mxu0  ;;  %v5129_v57 = vpop.f32.mrf.mxu3 }
 0x856   : > { %v5171_v56 = vadd.f32 %v5129_v57, %v11982_v4 }
 0x857   : > { %5812 = vmatpush.msrb.mxu3 %v12161_v20 }
 0x858   : > { %5813 = vmatmul.f32.vlgmr.msrb.gmra.mxu3 %v14780_v15 }
 0x859   : > { %5869 = vmatpush.msra.mxu3 %v5852_v12 }
 0x85b   : > { %5870 = vmatpush.msra.mxu3 %v5851_v52  ;;  %v5324_v52 = vpop.f32.mrf.mxu1 }
 0x85c   : > { %v5691_v47 = vpop.f32.mrf.mxu2 }
 0x85d   : > { %5871 = vmatpush.msra.mxu3 %v5850_v21  ;;  %v12178_v1 = vadd.f32 %v5691_v47, %v11956_v7  ;;  %v5518_v21 = vpop.f32.mrf.mxu0  ;;  %v5132_v47 = vpop.f32.mrf.mxu3 }
 0x85e   : > { %v5172_v44 = vadd.f32 %v5132_v47, %v11987_v2  ;;  %v5365_v47 = vadd.f32 %v5321_v61, %v5170_v53 }
 0x85f   : > { %5872 = vmatpush.msra.mxu3 %v5849_v18  ;;  %v12276_v41 = vadd.f32 %v12073_v5, %v12178_v1  ;;  %v12296_v1 = vadd.f32 %v12073_v5, %v12099_v34  ;;  %v5922_v34 = vld [vmem:[%s13962_s12 + $0x68] sm:$0xff] }
 0x861   : > { %5873 = vmatpush.msra.mxu3 %v5848_v46 }
 0x863   : > { %5874 = vmatpush.msra.mxu3 %v5847_v50  ;;  %v5327_v46 = vpop.f32.mrf.mxu1 }
 0x864   : > { %v5694_v23 = vpop.f32.mrf.mxu2  ;;  %v5367_v28 = vadd.f32 %v5327_v46, %v5172_v44  ;;  %v5559_v44 = vadd.f32 %v5515_v13, %v5365_v47  ;;  %v5918_v46 = vld [vmem:[%s13962_s12 + $0x48] sm:$0xff] }
 0x865   : > { %5875 = vmatpush.msra.mxu3 %v5846_v11  ;;  %v12189_v7 = vadd.f32 %v5694_v23, %v11961_v19  ;;  %v5521_v50 = vpop.f32.mrf.mxu0  ;;  %v5135_v11 = vpop.f32.mrf.mxu3 }
 0x867   : > { %5876 = vmatpush.msra.mxu3 %v5845_v38 }
 0x869   : > { %5877 = vmatpush.msra.mxu3 %v5844_v30 }
 0x86b   : > { %5878 = vmatpush.msra.mxu3 %v5843_v54  ;;  %v5330_v23 = vpop.f32.mrf.mxu1 }
 0x86c   : > { %v5697_v17 = vpop.f32.mrf.mxu2 }
 0x86d   : > { %5879 = vmatpush.msra.mxu3 %v5842_v31  ;;  %v12200_v19 = vadd.f32 %v5697_v17, %v11966_v48  ;;  %v5837_v48 = vmul.f32 %v12161_v20, %v12161_v20  ;;  %v5524_v38 = vpop.f32.mrf.mxu0  ;;  %v5138_v54 = vpop.f32.mrf.mxu3 }
 0x86f   : > { %5880 = vmatpush.msra.mxu3 %v5841_v25 }
 0x871   : > { %5881 = vmatpush.msra.mxu3 %v5840_v51 }
 0x873   : > { %5882 = vmatpush.msra.mxu3 %v5839_v49  ;;  %v5333_v31 = vpop.f32.mrf.mxu1  ;;  %v5174_v49 = vadd.f32 %v5138_v54, %v11997_v10 }
 0x874   : > { %v5700_v29 = vpop.f32.mrf.mxu2 }
 0x875   : > { %5883 = vmatpush.msra.mxu3 %v5838_v14  ;;  %v12213_v24 = vadd.f32 %v5700_v29, %v11973_v3  ;;  %v5527_v25 = vpop.f32.mrf.mxu0  ;;  %v5369_v6 = vadd.f32 %v5333_v31, %v5174_v49  ;;  %v5915_v31 = vld [vmem:[%s13962_s12 + $0x30] sm:$0xff]  ;;  %v5913_v49 = vld [vmem:[%s13962_s12 + $0x20] sm:$0xff] }
 0x877   : > { %5884 = vmatpush.msra.mxu3 %v5837_v48  ;;  %v5173_v48 = vadd.f32 %v5135_v11, %v11992_v55  ;;  %v5563_v45 = vadd.f32 %v5527_v25, %v5369_v6  ;;  %v5366_v55 = vadd.f32 %v5324_v52, %v5171_v56  ;;  %v5561_v11 = vadd.f32 %v5521_v50, %v5367_v28  ;;  %v5914_v25 = vld [vmem:[%s13962_s12 + $0x28] sm:$0xff] }
 0x878   : > { %5885 = vmatmul.f32.vlgmr.msra.gmra.mxu3 %v14780_v15 }
 0x879   : > { %v5368_v42 = vadd.f32 %v5330_v23, %v5173_v48  ;;  %v5560_v4 = vadd.f32 %v5518_v21, %v5366_v55  ;;  %v5919_v21 = vld [vmem:[%s13962_s12 + $0x50] sm:$0xff] }
 0x87b   : > { %v5336_v29 = vpop.f32.mrf.mxu1  ;;  %v5562_v10 = vadd.f32 %v5524_v38, %v5368_v42  ;;  %v5916_v38 = vld [vmem:[%s13962_s12 + $0x38] sm:$0xff] }
 0x87c   : > { %v5703_v36 = vpop.f32.mrf.mxu2 }
 0x87d   : > { %v12217_v22 = vadd.f32 %v5703_v36, %v11980_v16  ;;  %v5141_v16 = vpop.f32.mrf.mxu3  ;;  %v5530_v36 = vpop.f32.mrf.mxu0 }
 0x87e   : > { %v5175_v14 = vadd.f32 %v5141_v16, %v12002_v39  ;;  %v5169_v16 = vadd.f32 %v5123_v9, %v11968_v0  ;;  %v12261_v9 = vadd.f32 %v12073_v5, %v12213_v24  ;;  %v12281_v24 = vadd.f32 %v12073_v5, %v12164_v27 }
 0x880   : > { %v5370_v40 = vadd.f32 %v5336_v29, %v5175_v14  ;;  %v5364_v35 = vadd.f32 %v5318_v8, %v5169_v16  ;;  %v12266_v8 = vadd.f32 %v12073_v5, %v12200_v19  ;;  %v12286_v19 = vadd.f32 %v12073_v5, %v12141_v60  ;;  %v5923_v60 = vld [vmem:[%s13962_s12 + $0x70] sm:$0xff]  ;;  %v5912_v29 = vld [vmem:[%s13962_s12 + $0x18] sm:$0xff]  ;;  %v5910_v16 = vld [vmem:[%s13962_s12 + $0x8] sm:$0xff] }
 0x881   : > { %v5857_v14 = vmul.f32 %v12276_v41, %v12276_v41  ;;  %v5856_v48 = vmul.f32 %v12281_v24, %v12281_v24 }
 0x882   : > { %v5564_v63 = vadd.f32 %v5530_v36, %v5370_v40  ;;  %v5558_v0 = vadd.f32 %v12208_v58, %v5364_v35  ;;  %v12271_v58 = vadd.f32 %v12073_v5, %v12189_v7  ;;  %v12291_v7 = vadd.f32 %v12073_v5, %v12118_v37  ;;  %v5924_v37 = vld [vmem:[%s13962_s12 + $0x78] sm:$0xff]  ;;  %v5911_v36 = vld [vmem:[%s13962_s12 + $0x10] sm:$0xff] }
 0x883   : > { %5925 = vmatpush.msrb.mxu3 %v5924_v37 }
 0x884   : > { %v5706_v12 = vpop.f32.mrf.mxu2 }
 0x885   : > { %5926 = vmatpush.msrb.mxu3 %v5923_v60 }
 0x887   : > { %5927 = vmatpush.msrb.mxu3 %v5922_v34 }
 0x88c   : > { %v5709_v18 = vpop.f32.mrf.mxu2 }
 0x88d   : > { %v5753_v56 = vadd.f32 %v5709_v18, %v5559_v44 }
 0x894   : > { %v5712_v3 = vpop.f32.mrf.mxu2 }
 0x895   : > { %v5754_v40 = vadd.f32 %v5712_v3, %v5560_v4  ;;  %v5917_v3 = vld [vmem:[%s13962_s12 + $0x40] sm:$0xff] }
 0x897   : > { %v12243_v53 = vadd.f32 %v12073_v5, %v5754_v40 }
 0x899   : > { %v5864_v52 = vmul.f32 %v12243_v53, %v12243_v53 }
 0x89c   : > { %v5715_v30 = vpop.f32.mrf.mxu2 }
 0x89d   : > { %v5755_v57 = vadd.f32 %v5715_v30, %v5561_v11  ;;  %v5860_v30 = vmul.f32 %v12261_v9, %v12261_v9 }
 0x8a4   : > { %v5718_v17 = vpop.f32.mrf.mxu2 }
 0x8a5   : > { %v5756_v26 = vadd.f32 %v5718_v17, %v5562_v10  ;;  %v5859_v17 = vmul.f32 %v12266_v8, %v12266_v8  ;;  %v5855_v10 = vmul.f32 %v12286_v19, %v12286_v19 }
 0x8a7   : > { %v12234_v42 = vadd.f32 %v12073_v5, %v5756_v26  ;;  %v12256_v26 = vadd.f32 %v12073_v5, %v12217_v22  ;;  %v5921_v22 = vld [vmem:[%s13962_s12 + $0x60] sm:$0xff] }
 0x8a8   : > { %5928 = vmatpush.msrb.mxu3 %v5921_v22 }
 0x8a9   : > { %v5866_v61 = vmul.f32 %v12234_v42, %v12234_v42  ;;  %v5861_v23 = vmul.f32 %v12256_v26, %v12256_v26 }
 0x8ac   : > { %v5721_v51 = vpop.f32.mrf.mxu2 }
 0x8ad   : > { %v5757_v54 = vadd.f32 %v5721_v51, %v5563_v45  ;;  %v12239_v45 = vadd.f32 %v12073_v5, %v5755_v57  ;;  %v5858_v51 = vmul.f32 %v12271_v58, %v12271_v58 }
 0x8af   : > { %v12230_v6 = vadd.f32 %v12073_v5, %v5757_v54  ;;  %v5865_v13 = vmul.f32 %v12239_v45, %v12239_v45  ;;  %v5854_v54 = vmul.f32 %v12291_v7, %v12291_v7 }
 0x8b4   : > { %v5724_v32 = vpop.f32.mrf.mxu2 }
 0x8b5   : > { %v5758_v39 = vadd.f32 %v5724_v32, %v5564_v63  ;;  %v5752_v63 = vadd.f32 %v5706_v12, %v5558_v0  ;;  %v12247_v32 = vadd.f32 %v12073_v5, %v5753_v56  ;;  %v5920_v12 = vld [vmem:[%s13962_s12 + $0x58] sm:$0xff] }
 0x8b6   : > { %5929 = vmatpush.msrb.mxu3 %v5920_v12 }
 0x8b7   : > { %v12227_v2 = vadd.f32 %v12073_v5, %v5758_v39  ;;  %v12251_v28 = vadd.f32 %v12073_v5, %v5752_v63  ;;  %v5867_v5 = vmul.f32 %v12230_v6, %v12230_v6  ;;  %v5863_v18 = vmul.f32 %v12247_v32, %v12247_v32 }
 0x8b8   : > { %5930 = vmatpush.msrb.mxu3 %v5919_v21  ;;  %v5853_v39 = vmul.f32 %v12296_v1, %v12296_v1 }
 0x8b9   : > { %5817 = vmatpush.msrb.mxu1 %v12227_v2  ;;  %v5868_v27 = vmul.f32 %v12227_v2, %v12227_v2  ;;  %v5862_v50 = vmul.f32 %v12251_v28, %v12251_v28 }
 0x8ba   : > { %5931 = vmatpush.msrb.mxu3 %v5918_v46 }
 0x8bb   : > { %5818 = vmatpush.msrb.mxu1 %v12230_v6 }
 0x8bc   : > { %5932 = vmatpush.msrb.mxu3 %v5917_v3 }
 0x8bd   : > { %5819 = vmatpush.msrb.mxu1 %v12234_v42 }
 0x8be   : > { %5933 = vmatpush.msrb.mxu3 %v5916_v38 }
 0x8bf   : > { %5820 = vmatpush.msrb.mxu1 %v12239_v45 }
 0x8c0   : > { %5934 = vmatpush.msrb.mxu3 %v5915_v31 }
 0x8c1   : > { %5821 = vmatpush.msrb.mxu1 %v12243_v53 }
 0x8c2   : > { %5935 = vmatpush.msrb.mxu3 %v5914_v25 }
 0x8c3   : > { %5822 = vmatpush.msrb.mxu1 %v12247_v32 }
 0x8c4   : > { %5936 = vmatpush.msrb.mxu3 %v5913_v49 }
 0x8c5   : > { %5823 = vmatpush.msrb.mxu1 %v12251_v28 }
 0x8c6   : > { %5937 = vmatpush.msrb.mxu3 %v5912_v29 }
 0x8c7   : > { %5824 = vmatpush.msrb.mxu1 %v12256_v26 }
 0x8c8   : > { %5938 = vmatpush.msrb.mxu3 %v5911_v36 }
 0x8c9   : > { %5825 = vmatpush.msrb.mxu1 %v12261_v9 }
 0x8ca   : > { %5939 = vmatpush.msrb.mxu3 %v5910_v16 }
 0x8cb   : > { %5826 = vmatpush.msrb.mxu1 %v12266_v8 }
 0x8cd   : > { %5827 = vmatpush.msrb.mxu1 %v12271_v58 }
 0x8cf   : > { %5828 = vmatpush.msrb.mxu1 %v12276_v41 }
 0x8d1   : > { %5829 = vmatpush.msrb.mxu1 %v12281_v24 }
 0x8d3   : > { %5830 = vmatpush.msrb.mxu1 %v12286_v19 }
 0x8d5   : > { %5831 = vmatpush.msrb.mxu1 %v12291_v7 }
 0x8d7   : > { %5832 = vmatpush.msrb.mxu1 %v12296_v1 }
 0x8d8   : > { %5833 = vmatmul.f32.vlgmr.msrb.gmra.mxu1 %v14780_v15 }
 0x8d9   : > { %5889 = vmatpush.msra.mxu1 %v5868_v27 }
 0x8db   : > { %5890 = vmatpush.msra.mxu1 %v5867_v5  ;;  %v5814_v55 = vpop.f32.mrf.mxu3 }
 0x8dd   : > { %5891 = vmatpush.msra.mxu1 %v5866_v61 }
 0x8df   : > { %5892 = vmatpush.msra.mxu1 %v5865_v13 }
 0x8e1   : > { %5893 = vmatpush.msra.mxu1 %v5864_v52 }
 0x8e3   : > { %5894 = vmatpush.msra.mxu1 %v5863_v18 }
 0x8e5   : > { %5895 = vmatpush.msra.mxu1 %v5862_v50 }
 0x8e7   : > { %5896 = vmatpush.msra.mxu1 %v5861_v23 }
 0x8e9   : > { %5897 = vmatpush.msra.mxu1 %v5860_v30 }
 0x8eb   : > { %5898 = vmatpush.msra.mxu1 %v5859_v17 }
 0x8ed   : > { %5899 = vmatpush.msra.mxu1 %v5858_v51  ;;  %v14788_v51 = vld [vmem:[#allocation10_spill] sm:$0xff] }
 0x8ef   : > { %5900 = vmatpush.msra.mxu1 %v5857_v14 }
 0x8f1   : > { %5901 = vmatpush.msra.mxu1 %v5856_v48 }
 0x8f3   : > { %5902 = vmatpush.msra.mxu1 %v5855_v10 }
 0x8f5   : > { %5903 = vmatpush.msra.mxu1 %v5854_v54  ;;  %v14792_v54 = vld [vmem:[#allocation23_spill] sm:$0xff] }
 0x8f7   : > { %5904 = vmatpush.msra.mxu1 %v5853_v39 }
 0x8f8   : > { %5905 = vmatmul.f32.vlgmr.msra.gmra.mxu1 %v14780_v15  ;;  %v5909_v15 = vld [vmem:[%s13962_s12] sm:$0xff] }
 0x8f9   : > { %5945 = vmatpush.msrb.mxu1 %v5924_v37  ;;  %5940 = vmatpush.msrb.mxu3 %v5909_v15 }
 0x8fb   : > { %5946 = vmatpush.msrb.mxu1 %v5923_v60  ;;  %v5886_v4 = vpop.f32.mrf.mxu3 }
 0x8fd   : > { %5947 = vmatpush.msrb.mxu1 %v5922_v34 }
 0x8ff   : > { %5948 = vmatpush.msrb.mxu1 %v5921_v22 }
 0x901   : > { %5949 = vmatpush.msrb.mxu1 %v5920_v12 }
 0x903   : > { %5950 = vmatpush.msrb.mxu1 %v5919_v21 }
 0x905   : > { %5951 = vmatpush.msrb.mxu1 %v5918_v46 }
 0x907   : > { %5952 = vmatpush.msrb.mxu1 %v5917_v3 }
 0x909   : > { %5953 = vmatpush.msrb.mxu1 %v5916_v38  ;;  %v14784_v38 = vld [vmem:[#allocation46_spill] sm:$0xff] }
 0x90b   : > { %5954 = vmatpush.msrb.mxu1 %v5915_v31 }
 0x90d   : > { %5955 = vmatpush.msrb.mxu1 %v5914_v25 }
 0x90f   : > { %5956 = vmatpush.msrb.mxu1 %v5913_v49 }
 0x911   : > { %5957 = vmatpush.msrb.mxu1 %v5912_v29  ;;  %v14790_v29 = vld [vmem:[#allocation53_spill] sm:$0xff] }
 0x913   : > { %5958 = vmatpush.msrb.mxu1 %v5911_v36  ;;  %v14791_v36 = vld [vmem:[#allocation43_spill] sm:$0xff] }
 0x915   : > { %5959 = vmatpush.msrb.mxu1 %v5910_v16 }
 0x917   : > { %5960 = vmatpush.msrb.mxu1 %v5909_v15  ;;  %v14793_v15 = vld [vmem:[#allocation45_spill] sm:$0xff] }
 0x955   : > { %v5834_v11 = vpop.f32.mrf.mxu1 }
 0x956   : > { %v5835_v47 = vadd.f32 %v5834_v11, %v5814_v55 }
 0x958   : > { %5941 = vmatmul.f32.vlgmr.msrb.gmra.mxu3 %v5835_v47 }
 0x975   : > { %v5906_v57 = vpop.f32.mrf.mxu1 }
 0x976   : > { %v5907_v35 = vadd.f32 %v5906_v57, %v5886_v4 }
 0x978   : > { %5961 = vmatmul.f32.vlgmr.msrb.gmra.mxu1 %v5907_v35 }
 0x9db   : > { %v5942_v44 = vpop.f32.mrf.mxu3 }
 0x9dc   : > { %v5965_v40 = vmul.f32 %v5942_v44, %v5942_v44  ;;  %v12382_v22 = vperm.slane %v5942_v44, 0 }
 0x9de   : > { %v5969_v12 = vsub.f32 %v12161_v20, %v12382_v22  ;;  %v5970_v21 = vsub.f32 %v12156_v43, %v12382_v22  ;;  %v5971_v18 = vsub.f32 %v12151_v33, %v12382_v22  ;;  %v5972_v46 = vsub.f32 %v12146_v59, %v12382_v22  ;;  %v14783_v20 = vld [vmem:[#allocation49_spill] sm:$0xff]  ;;  %v14785_v43 = vld [vmem:[#allocation56_spill] sm:$0xff]  ;;  %v14786_v33 = vld [vmem:[#allocation54_spill] sm:$0xff] }
 0x9df   : > { %v5973_v3 = vsub.f32 %v12138_v62, %v12382_v22  ;;  %v5974_v23 = vsub.f32 %v14783_v20, %v12382_v22  ;;  %v5975_v30 = vsub.f32 %v14784_v38, %v12382_v22  ;;  %v5976_v31 = vsub.f32 %v14785_v43, %v12382_v22  ;;  %v14787_v59 = vld [vmem:[#allocation50_spill] sm:$0xff]  ;;  %v14789_v62 = vld [vmem:[#allocation19_spill] sm:$0xff] }
 0x9e0   : > { %v5977_v17 = vsub.f32 %v14786_v33, %v12382_v22  ;;  %v5978_v25 = vsub.f32 %v14787_v59, %v12382_v22  ;;  %v5979_v49 = vsub.f32 %v14788_v51, %v12382_v22  ;;  %v5980_v14 = vsub.f32 %v14789_v62, %v12382_v22 }
 0x9e1   : > { %v5981_v48 = vsub.f32 %v14790_v29, %v12382_v22  ;;  %v5982_v10 = vsub.f32 %v14791_v36, %v12382_v22  ;;  %v5983_v39 = vsub.f32 %v14792_v54, %v12382_v22  ;;  %v5984_v55 = vsub.f32 %v14793_v15, %v12382_v22 }
 0x9e2   : > { %v5985_v11 = vsub.f32 %v12296_v1, %v12382_v22  ;;  %v5986_v47 = vsub.f32 %v12291_v7, %v12382_v22  ;;  %v5987_v4 = vsub.f32 %v12286_v19, %v12382_v22  ;;  %v5988_v57 = vsub.f32 %v12281_v24, %v12382_v22 }
 0x9e3   : > { %v5989_v35 = vsub.f32 %v12276_v41, %v12382_v22  ;;  %v5990_v44 = vsub.f32 %v12271_v58, %v12382_v22  ;;  %v5992_v1 = vsub.f32 %v12261_v9, %v12382_v22  ;;  %v5993_v7 = vsub.f32 %v12256_v26, %v12382_v22  ;;  %v12449_v41 = vld [vmem:[%s13960_s10] ss:$0 sm:$0xff] }
 0x9e4   : > { %v5994_v19 = vsub.f32 %v12251_v28, %v12382_v22  ;;  %v5995_v24 = vsub.f32 %v12247_v32, %v12382_v22  ;;  %v5997_v9 = vsub.f32 %v12239_v45, %v12382_v22  ;;  %v5998_v26 = vsub.f32 %v12234_v42, %v12382_v22 }
 0x9e5   : > { %v5999_v28 = vsub.f32 %v12230_v6, %v12382_v22  ;;  %v6000_v32 = vsub.f32 %v12227_v2, %v12382_v22 }
 0x9f5   : > { %v5962_v0 = vpop.f32.mrf.mxu1 }
 0x9f6   : > { %v5966_v56 = vsub.f32 %v5962_v0, %v5965_v40  ;;  %v5991_v40 = vsub.f32 %v12266_v8, %v12382_v22  ;;  %v5996_v8 = vsub.f32 %v12243_v53, %v12382_v22 }
 0x9f8   : > { %v5967_v63 = vmax.f32 %v5966_v56, 0.0 }
 0x9fa   : > { %v6001_v27 = vadd.f32 1e-05, %v5967_v63 }
 0x9fc   : > { %7663 = vrsqrt.f32 %v6001_v27  ;;  %vm6008_vm4 = vweird.f32 %v6001_v27 }
 0xa02   : > { %v7664_v37 = vpop.eup %7663 }
 0xa03   : > { %v6003_v60 = vmul.f32 %v7664_v37, %v6001_v27  ;;  %vm6009_vm13 = vweird.f32 %v7664_v37 }
 0xa04   : > { %vm12386_vm14 = vmor %vm6008_vm4, %vm6009_vm13 }
 0xa05   : > { %v6004_v5 = vmul.f32 %v7664_v37, %v6003_v60  ;;  %v12475_v60 = vld [vmem:[%s13961_s11] ss:$0 sm:$0xff] }
 0xa07   : > { %v6005_v34 = vmul.f32 0.5, %v6004_v5 }
 0xa09   : > { %v6006_v61 = vsub.f32 1.5, %v6005_v34 }
 0xa0b   : > { %v6007_v13 = vmul.f32 %v7664_v37, %v6006_v61 }
 0xa0d   : > { %v6011_v50 = vsel %vm12386_vm14, %v7664_v37, %v6007_v13 }
 0xa0e   : > { %v12420_v16 = vperm.slane %v6011_v50, 0 }
 0xa10   : > { %v6013_v58 = vmul.f32 %v12420_v16, %v5969_v12  ;;  %v6014_v0 = vmul.f32 %v12420_v16, %v5970_v21  ;;  %v6015_v56 = vmul.f32 %v12420_v16, %v5971_v18  ;;  %v6016_v53 = vmul.f32 %v12420_v16, %v5972_v46 }
 0xa11   : > { %v6017_v63 = vmul.f32 %v12420_v16, %v5973_v3  ;;  %v6018_v45 = vmul.f32 %v12420_v16, %v5974_v23  ;;  %v6019_v42 = vmul.f32 %v12420_v16, %v5975_v30  ;;  %v6020_v27 = vmul.f32 %v12420_v16, %v5976_v31 }
 0xa12   : > { %v6021_v37 = vmul.f32 %v12420_v16, %v5977_v17  ;;  %v6022_v6 = vmul.f32 %v12420_v16, %v5978_v25  ;;  %v6023_v2 = vmul.f32 %v12420_v16, %v5979_v49  ;;  %v6024_v5 = vmul.f32 %v12420_v16, %v5980_v14 }
 0xa13   : > { %v6025_v34 = vmul.f32 %v12420_v16, %v5981_v48  ;;  %v6026_v61 = vmul.f32 %v12420_v16, %v5982_v10  ;;  %v6048_v22 = vmul.f32 %v12449_v41, %v6013_v58  ;;  %v6027_v13 = vmul.f32 %v12420_v16, %v5983_v39 }
 0xa14   : > { %v6028_v12 = vmul.f32 %v12420_v16, %v5984_v55  ;;  %v6029_v52 = vmul.f32 %v12420_v16, %v5985_v11  ;;  %v6049_v21 = vmul.f32 %v12449_v41, %v6014_v0  ;;  %v6030_v18 = vmul.f32 %v12420_v16, %v5986_v47 }
 0xa15   : > { %v6031_v46 = vmul.f32 %v12420_v16, %v5987_v4  ;;  %v6032_v50 = vmul.f32 %v12420_v16, %v5988_v57  ;;  %v6050_v3 = vmul.f32 %v12449_v41, %v6015_v56  ;;  %v6033_v20 = vmul.f32 %v12420_v16, %v5989_v35 }
 0xa16   : > { %v6034_v23 = vmul.f32 %v12420_v16, %v5990_v44  ;;  %v12492_v38 = vmul.f32 %v12420_v16, %v5991_v40  ;;  %v6051_v30 = vmul.f32 %v12449_v41, %v6016_v53  ;;  %v12496_v43 = vmul.f32 %v12420_v16, %v5992_v1 }
 0xa17   : > { %v12499_v31 = vmul.f32 %v12420_v16, %v5993_v7  ;;  %v6052_v33 = vmul.f32 %v12449_v41, %v6017_v63  ;;  %v12503_v17 = vadd.f32 %v12475_v60, %v6048_v22  ;;  %v12506_v59 = vmul.f32 %v12420_v16, %v5994_v19 }
 0xa18   : > { %v12509_v25 = vmul.f32 %v12420_v16, %v5995_v24  ;;  %v6053_v51 = vmul.f32 %v12449_v41, %v6018_v45  ;;  %v12513_v49 = vadd.f32 %v12475_v60, %v6049_v21  ;;  %v12516_v62 = vmul.f32 %v12420_v16, %v5996_v8 }
 0xa19   : > { %14794 = vst [vmem:[#allocation14_spill] sm:$0xff] %v12503_v17  ;;  %v12519_v14 = vmul.f32 %v12420_v16, %v5997_v9  ;;  %v6054_v29 = vmul.f32 %v12449_v41, %v6019_v42  ;;  %v12523_v48 = vadd.f32 %v12475_v60, %v6050_v3  ;;  %v12526_v36 = vmul.f32 %v12420_v16, %v5998_v26 }
 0xa1a   : > { %14795 = vst [vmem:[#allocation62_spill] sm:$0xff] %v12513_v49  ;;  %v12529_v10 = vmul.f32 %v12420_v16, %v5999_v28  ;;  %v6055_v54 = vmul.f32 %v12449_v41, %v6020_v27  ;;  %v12533_v39 = vadd.f32 %v12475_v60, %v6051_v30  ;;  %v12536_v15 = vmul.f32 %v12420_v16, %v6000_v32 }
 0xa1b   : > { %14796 = vst [vmem:[#allocation41_spill] sm:$0xff] %v12523_v48  ;;  %v6056_v55 = vmul.f32 %v12449_v41, %v6021_v37  ;;  %v12540_v11 = vadd.f32 %v12475_v60, %v6052_v33  ;;  %v7425_v47 = vmul.f32 -1.442695, %v12503_v17  ;;  %v6057_v4 = vmul.f32 %v12449_v41, %v6022_v6 }
 0xa1c   : > { %14797 = vst [vmem:[#allocation24_spill] sm:$0xff] %v12533_v39  ;;  %v6058_v57 = vmul.f32 %v12449_v41, %v6023_v2  ;;  %v12546_v35 = vadd.f32 %v12475_v60, %v6053_v51  ;;  %v7426_v44 = vmul.f32 -1.442695, %v12513_v49  ;;  %v6059_v40 = vmul.f32 %v12449_v41, %v6024_v5 }
 0xa1d   : > { %14798 = vst [vmem:[#allocation44_spill] sm:$0xff] %v12540_v11  ;;  %v6060_v16 = vmul.f32 %v12449_v41, %v6025_v34  ;;  %v12552_v1 = vadd.f32 %v12475_v60, %v6054_v29  ;;  %v7427_v7 = vmul.f32 -1.442695, %v12523_v48  ;;  %v6061_v19 = vmul.f32 %v12449_v41, %v6026_v61 }
 0xa1e   : > { %14799 = vst [vmem:[#allocation60_spill] sm:$0xff] %v12546_v35  ;;  %v6062_v24 = vmul.f32 %v12449_v41, %v6027_v13  ;;  %v12558_v8 = vadd.f32 %v12475_v60, %v6055_v54  ;;  %v7428_v9 = vmul.f32 -1.442695, %v12533_v39  ;;  %v6063_v26 = vmul.f32 %v12449_v41, %v6028_v12 }
 0xa1f   : > { %14800 = vst [vmem:[#allocation13_spill] sm:$0xff] %v12552_v1  ;;  %v12563_v58 = vadd.f32 %v12475_v60, %v6056_v55  ;;  %7665 = vpow2.f32 %v7425_v47  ;;  %v7429_v28 = vmul.f32 -1.442695, %v12540_v11  ;;  %v6064_v32 = vmul.f32 %v12449_v41, %v6029_v52 }
 0xa20   : > { %14801 = vst [vmem:[#allocation22_spill] sm:$0xff] %v12558_v8  ;;  %v12568_v0 = vadd.f32 %v12475_v60, %v6057_v4  ;;  %7667 = vpow2.f32 %v7426_v44  ;;  %v7430_v56 = vmul.f32 -1.442695, %v12546_v35  ;;  %v6065_v53 = vmul.f32 %v12449_v41, %v6030_v18 }
 0xa21   : > { %14802 = vst [vmem:[#allocation25_spill] sm:$0xff] %v12563_v58  ;;  %v12573_v63 = vadd.f32 %v12475_v60, %v6058_v57  ;;  %7669 = vpow2.f32 %v7427_v7  ;;  %v7431_v45 = vmul.f32 -1.442695, %v12552_v1  ;;  %v6066_v42 = vmul.f32 %v12449_v41, %v6031_v46 }
 0xa22   : > { %14803 = vst [vmem:[#allocation51_spill] sm:$0xff] %v12568_v0  ;;  %v12578_v27 = vadd.f32 %v12475_v60, %v6059_v40  ;;  %7671 = vpow2.f32 %v7428_v9  ;;  %v7432_v37 = vmul.f32 -1.442695, %v12558_v8  ;;  %v6067_v6 = vmul.f32 %v12449_v41, %v6032_v50 }
 0xa23   : > { %14804 = vst [vmem:[#allocation59_spill] sm:$0xff] %v12573_v63  ;;  %v12583_v2 = vadd.f32 %v12475_v60, %v6060_v16  ;;  %7673 = vpow2.f32 %v7429_v28  ;;  %v7433_v5 = vmul.f32 -1.442695, %v12563_v58  ;;  %v6068_v34 = vmul.f32 %v12449_v41, %v6033_v20 }
 0xa24   : > { %14805 = vst [vmem:[#allocation20_spill] sm:$0xff] %v12578_v27  ;;  %v12588_v61 = vadd.f32 %v12475_v60, %v6061_v19  ;;  %7675 = vpow2.f32 %v7430_v56  ;;  %v7434_v22 = vmul.f32 -1.442695, %v12568_v0  ;;  %v6069_v12 = vmul.f32 %v12449_v41, %v6034_v23 }
 0xa25   : > { %14806 = vst [vmem:[#allocation39_spill] sm:$0xff] %v12583_v2  ;;  %v12591_v13 = vpop.eup %7665  ;;  %v12595_v52 = vadd.f32 %v12475_v60, %v6062_v24  ;;  %7677 = vpow2.f32 %v7431_v45  ;;  %v7435_v21 = vmul.f32 -1.442695, %v12573_v63  ;;  %v6070_v46 = vmul.f32 %v12449_v41, %v12492_v38 }
 0xa26   : > { %14807 = vst [vmem:[#allocation47_spill] sm:$0xff] %v12588_v61  ;;  %v12598_v18 = vpop.eup %7667  ;;  %v12603_v50 = vadd.f32 %v12475_v60, %v6063_v26  ;;  %7679 = vpow2.f32 %v7432_v37  ;;  %v7436_v3 = vmul.f32 -1.442695, %v12578_v27  ;;  %v6071_v23 = vmul.f32 %v12449_v41, %v12496_v43 }
 0xa27   : > { %14808 = vst [vmem:[#allocation18_spill] sm:$0xff] %v12595_v52  ;;  %v12606_v20 = vpop.eup %7669  ;;  %v12611_v30 = vadd.f32 %v12475_v60, %v6064_v32  ;;  %7681 = vpow2.f32 %v7433_v5  ;;  %v7437_v33 = vmul.f32 -1.442695, %v12583_v2  ;;  %v6072_v38 = vmul.f32 %v12449_v41, %v12499_v31 }
 0xa28   : > { %14809 = vst [vmem:[#allocation11_spill] sm:$0xff] %v12603_v50  ;;  %v12614_v51 = vpop.eup %7671  ;;  %v12619_v29 = vadd.f32 %v12475_v60, %v6065_v53  ;;  %7683 = vpow2.f32 %v7434_v22  ;;  %v7438_v54 = vmul.f32 -1.442695, %v12588_v61  ;;  %v6073_v43 = vmul.f32 %v12449_v41, %v12506_v59 }
 0xa29   : > { %14810 = vst [vmem:[#allocation74_spill] sm:$0xff] %v12611_v30  ;;  %v12622_v55 = vpop.eup %7673  ;;  %v12627_v47 = vadd.f32 %v12475_v60, %v6066_v42  ;;  %7685 = vpow2.f32 %v7435_v21  ;;  %v7439_v4 = vmul.f32 -1.442695, %v12595_v52  ;;  %v6074_v31 = vmul.f32 %v12449_v41, %v12509_v25 }
 0xa2a   : > { %14811 = vst [vmem:[#allocation94_spill] sm:$0xff] %v12619_v29  ;;  %v12630_v57 = vpop.eup %7675  ;;  %v12635_v44 = vadd.f32 %v12475_v60, %v6067_v6  ;;  %7687 = vpow2.f32 %v7436_v3  ;;  %v7440_v40 = vmul.f32 -1.442695, %v12603_v50  ;;  %v6075_v59 = vmul.f32 %v12449_v41, %v12516_v62 }
 0xa2b   : > { %14812 = vst [vmem:[#allocation42_spill] sm:$0xff] %v12627_v47  ;;  %v12638_v16 = vpop.eup %7677  ;;  %v12643_v7 = vadd.f32 %v12475_v60, %v6068_v34  ;;  %7689 = vpow2.f32 %v7437_v33  ;;  %v7441_v19 = vmul.f32 -1.442695, %v12611_v30  ;;  %v6076_v25 = vmul.f32 %v12449_v41, %v12519_v14 }
 0xa2c   : > { %14813 = vst [vmem:[#allocation48_spill] sm:$0xff] %v12635_v44  ;;  %v12646_v24 = vpop.eup %7679  ;;  %v12651_v9 = vadd.f32 %v12475_v60, %v6069_v12  ;;  %7691 = vpow2.f32 %v7438_v54  ;;  %v7442_v26 = vmul.f32 -1.442695, %v12619_v29  ;;  %v6077_v62 = vmul.f32 %v12449_v41, %v12526_v36 }
 0xa2d   : > { %14814 = vst [vmem:[#allocation15_spill] sm:$0xff] %v12643_v7  ;;  %v12654_v28 = vpop.eup %7681  ;;  %v12659_v32 = vadd.f32 %v12475_v60, %v6070_v46  ;;  %7693 = vpow2.f32 %v7439_v4  ;;  %v7443_v56 = vmul.f32 -1.442695, %v12627_v47  ;;  %v6078_v14 = vmul.f32 %v12449_v41, %v12529_v10 }
 0xa2e   : > { %14815 = vst [vmem:[#allocation93_spill] sm:$0xff] %v12651_v9  ;;  %v12662_v53 = vpop.eup %7683  ;;  %v12667_v45 = vadd.f32 %v12475_v60, %v6071_v23  ;;  %7695 = vpow2.f32 %v7440_v40  ;;  %v7444_v42 = vmul.f32 -1.442695, %v12635_v44  ;;  %v6079_v36 = vmul.f32 %v12449_v41, %v12536_v15 }
 0xa2f   : > { %14816 = vst [vmem:[#allocation52_spill] sm:$0xff] %v12659_v32  ;;  %v12670_v37 = vpop.eup %7685  ;;  %v12675_v6 = vadd.f32 %v12475_v60, %v6072_v38  ;;  %7697 = vpow2.f32 %v7441_v19  ;;  %v7445_v5 = vmul.f32 -1.442695, %v12643_v7  ;;  %v12681_v10 = vadd.f32 %v12475_v60, %v6073_v43 }
 0xa30   : > { %14817 = vst [vmem:[#allocation80_spill] sm:$0xff] %v12667_v45  ;;  %v12678_v34 = vpop.eup %7687  ;;  %v12684_v22 = vadd.f32 %v12475_v60, %v6074_v31  ;;  %7699 = vpow2.f32 %v7442_v26  ;;  %v7446_v12 = vmul.f32 -1.442695, %v12651_v9  ;;  %v12690_v41 = vadd.f32 %v12475_v60, %v6075_v59 }
 0xa31   : > { %14818 = vst [vmem:[#allocation37_spill] sm:$0xff] %v12675_v6  ;;  %v12687_v21 = vpop.eup %7689  ;;  %v12693_v15 = vadd.f32 %v12475_v60, %v6076_v25  ;;  %7701 = vpow2.f32 %v7443_v56  ;;  %v7447_v46 = vmul.f32 -1.442695, %v12659_v32  ;;  %v12699_v23 = vadd.f32 %v12475_v60, %v6077_v62 }
 0xa32   : > { %14819 = vst [vmem:[#allocation82_spill] sm:$0xff] %v12681_v10  ;;  %v12696_v3 = vpop.eup %7691  ;;  %7703 = vpow2.f32 %v7444_v42  ;;  %v7448_v33 = vmul.f32 -1.442695, %v12667_v45  ;;  %v12703_v38 = vadd.f32 1.0, %v12591_v13  ;;  %v12708_v43 = vadd.f32 %v12475_v60, %v6078_v14 }
 0xa33   : > { %14820 = vst [vmem:[#allocation73_spill] sm:$0xff] %v12684_v22  ;;  %v12705_v54 = vpop.eup %7693  ;;  %7705 = vpow2.f32 %v7445_v5  ;;  %v7449_v4 = vmul.f32 -1.442695, %v12675_v6  ;;  %v12712_v31 = vadd.f32 1.0, %v12598_v18  ;;  %v12715_v59 = vadd.f32 %v12475_v60, %v6079_v36 }
 0xa34   : > { %14821 = vst [vmem:[#allocation92_spill] sm:$0xff] %v12690_v41  ;;  %v7696_v40 = vpop.eup %7695  ;;  %7707 = vpow2.f32 %v7446_v12  ;;  %v7450_v19 = vmul.f32 -1.442695, %v12681_v10  ;;  %v7451_v25 = vmul.f32 -1.442695, %v12684_v22  ;;  %v12725_v14 = vadd.f32 1.0, %v12606_v20 }
 0xa35   : > { %14822 = vst [vmem:[#allocation65_spill] sm:$0xff] %v12693_v15  ;;  %v7698_v13 = vpop.eup %7697  ;;  %7709 = vpow2.f32 %v7447_v46  ;;  %v7452_v26 = vmul.f32 -1.442695, %v12690_v41  ;;  %v7453_v62 = vmul.f32 -1.442695, %v12693_v15  ;;  %v6254_v60 = vand.u32 2147483648, %v12703_v38 }
 0xa36   : > { %14823 = vst [vmem:[#allocation68_spill] sm:$0xff] %v12699_v23  ;;  %v7700_v56 = vpop.eup %7699  ;;  %7711 = vpow2.f32 %v7448_v33  ;;  %v12722_v18 = vmul.f32 -1.442695, %v12699_v23  ;;  %v12729_v36 = vmul.f32 -1.442695, %v12708_v43  ;;  %v12732_v5 = vadd.f32 1.0, %v12614_v51 }
 0xa37   : > { %14824 = vst [vmem:[#allocation71_spill] sm:$0xff] %v12708_v43  ;;  %v7702_v42 = vpop.eup %7701  ;;  %7713 = vpow2.f32 %v7449_v4  ;;  %v6269_v12 = vand.u32 2147483648, %v12712_v31  ;;  %v12736_v33 = vmul.f32 -1.442695, %v12715_v59  ;;  %v12739_v20 = vadd.f32 1.0, %v12622_v55 }
 0xa38   : > { %14825 = vst [vmem:[#allocation63_spill] sm:$0xff] %v12715_v59  ;;  %v7704_v46 = vpop.eup %7703  ;;  %7715 = vpow2.f32 %v7450_v19  ;;  %v12743_v4 = vadd.f32 1.0, %v12630_v57  ;;  %v12746_v51 = vadd.f32 1.0, %v12638_v16  ;;  %v12750_v19 = vadd.f32 1.0, %v12646_v24 }
 0xa39   : > { %v7706_v15 = vpop.eup %7705  ;;  %7717 = vpow2.f32 %v7451_v25  ;;  %v12752_v59 = vor.u32 1.1754944e-38, %v6254_v60  ;;  %v6284_v55 = vand.u32 2147483648, %v12725_v14  ;;  %v12756_v25 = vadd.f32 1.0, %v12654_v28 }
 0xa3a   : > { %v7708_v41 = vpop.eup %7707  ;;  %7719 = vpow2.f32 %v7452_v26  ;;  %v12759_v57 = vor.u32 1.1754944e-38, %v6269_v12  ;;  %v6299_v16 = vand.u32 2147483648, %v12732_v5  ;;  %v12763_v26 = vadd.f32 1.0, %v12662_v53 }
 0xa3b   : > { %v7710_v23 = vpop.eup %7709  ;;  %7721 = vrcp.f32 %v12703_v38  ;;  %v12766_v24 = vadd.f32 1.0, %v12670_v37  ;;  %v12771_v28 = vadd.f32 1.0, %v12678_v34  ;;  %v6314_v10 = vand.u32 2147483648, %v12739_v20 }
 0xa3c   : > { %v7712_v43 = vpop.eup %7711  ;;  %7723 = vrcp.f32 %v12712_v31  ;;  %v12777_v53 = vadd.f32 1.0, %v12687_v21  ;;  %v12779_v37 = vor.u32 1.1754944e-38, %v6284_v55  ;;  %v6329_v45 = vand.u32 2147483648, %v12743_v4 }
 0xa3d   : > { %v7714_v22 = vpop.eup %7713  ;;  %7725 = vrcp.f32 %v12725_v14  ;;  %v12783_v32 = vadd.f32 1.0, %v12696_v3  ;;  %v12786_v34 = vor.u32 1.1754944e-38, %v6299_v16  ;;  %v12792_v21 = vadd.f32 1.0, %v7696_v40 }
 0xa3e   : > { %v7716_v6 = vpop.eup %7715  ;;  %7727 = vpow2.f32 %v7453_v62  ;;  %v12790_v62 = vadd.f32 1.0, %v12705_v54  ;;  %v12798_v3 = vadd.f32 1.0, %v7698_v13  ;;  %v12800_v44 = vor.u32 1.1754944e-38, %v6314_v10 }
 0xa3f   : > { %v7718_v60 = vpop.eup %7717  ;;  %7729 = vrcp.f32 %v12732_v5  ;;  %v6344_v16 = vand.u32 2147483648, %v12746_v51  ;;  %v12806_v54 = vadd.f32 1.0, %v7700_v56  ;;  %v12808_v40 = vadd.f32 1.0, %v7702_v42 }
 0xa40   : > { %v7720_v9 = vpop.eup %7719  ;;  %7731 = vrcp.f32 %v12739_v20  ;;  %v12810_v47 = vor.u32 1.1754944e-38, %v6329_v45  ;;  %v12816_v10 = vadd.f32 1.0, %v7704_v46  ;;  %v6359_v29 = vand.u32 2147483648, %v12750_v19 }
 0xa41   : > { %v12796_v7 = vpop.eup %7721  ;;  %7733 = vrcp.f32 %v12743_v4  ;;  %v12821_v56 = vadd.f32 1.0, %v7706_v15  ;;  %v12823_v42 = vadd.f32 1.0, %v7708_v41  ;;  %v12833_v13 = vor.u32 1.1754944e-38, %v6344_v16 }
 0xa42   : > { %v12804_v12 = vpop.eup %7723  ;;  %7735 = vrcp.f32 %v12746_v51  ;;  %v12837_v15 = vadd.f32 1.0, %v7710_v23  ;;  %v12845_v45 = vadd.f32 1.0, %v7712_v43  ;;  %v12847_v61 = vor.u32 1.1754944e-38, %v6359_v29 }
 0xa43   : > { %v12813_v55 = vpop.eup %7725  ;;  %7737 = vpow2.f32 %v12722_v18  ;;  %14826 = vst [vmem:[#allocation64_spill] sm:$0xff] %v12823_v42  ;;  %v6244_v18 = vmul.f32 %v12796_v7, %v12703_v38  ;;  %v6259_v46 = vmul.f32 %v12804_v12, %v12712_v31  ;;  %v12853_v23 = vadd.f32 1.0, %v7714_v22 }
 0xa44   : > { %v7728_v30 = vpop.eup %7727  ;;  %7739 = vpow2.f32 %v12729_v36  ;;  %14827 = vst [vmem:[#allocation66_spill] sm:$0xff] %v12837_v15  ;;  %v6274_v41 = vmul.f32 %v12813_v55, %v12725_v14  ;;  %v6374_v36 = vand.u32 2147483648, %v12756_v25  ;;  %v12855_v27 = vadd.f32 1.0, %v7716_v6 }
 0xa45   : > { %v12826_v50 = vpop.eup %7729  ;;  %7741 = vpow2.f32 %v12736_v33  ;;  %14828 = vst [vmem:[#allocation61_spill] sm:$0xff] %v12845_v45  ;;  %v6389_v63 = vand.u32 2147483648, %v12763_v26  ;;  %v12859_v58 = vadd.f32 1.0, %v7718_v60  ;;  %v6245_v43 = vsub.f32 1.0, %v6244_v18 }
 0xa46   : > { %v12835_v52 = vpop.eup %7731  ;;  %7743 = vrcp.f32 %v12750_v19  ;;  %14829 = vst [vmem:[#allocation91_spill] sm:$0xff] %v12853_v23  ;;  %v6260_v29 = vsub.f32 1.0, %v6259_v46  ;;  %v6275_v35 = vsub.f32 1.0, %v6274_v41  ;;  %v6289_v16 = vmul.f32 %v12826_v50, %v12732_v5 }
 0xa47   : > { %v12843_v33 = vpop.eup %7733  ;;  %7745 = vrcp.f32 %v12756_v25  ;;  %14830 = vst [vmem:[#allocation67_spill] sm:$0xff] %v12855_v27  ;;  %v6304_v6 = vmul.f32 %v12835_v52, %v12739_v20  ;;  %v12866_v22 = vor.u32 1.1754944e-38, %v6374_v36  ;;  %v12870_v39 = vadd.f32 1.0, %v7720_v9 }
 0xa48   : > { %v12851_v2 = vpop.eup %7735  ;;  %7747 = vrcp.f32 %v12763_v26  ;;  %14831 = vst [vmem:[#allocation33_spill] sm:$0xff] %v12859_v58  ;;  %v12872_v60 = vadd.f32 1.0, %v7728_v30  ;;  %vm6248_vm7 = vweird.f32 %v12703_v38  ;;  %v6319_v18 = vmul.f32 %v12843_v33, %v12743_v4 }
 0xa49   : > { %v7738_v0 = vpop.eup %7737  ;;  %14832 = vst [vmem:[#allocation89_spill] sm:$0xff] %v12870_v39  ;;  %v6334_v46 = vmul.f32 %v12851_v2, %v12746_v51  ;;  %vm6263_vm8 = vweird.f32 %v12712_v31  ;;  %v12884_v36 = vor.u32 1.1754944e-38, %v6389_v63  ;;  %7749 = vrcp.f32 %v12766_v24 }
 0xa4a   : > { %v7740_v1 = vpop.eup %7739  ;;  %14833 = vst [vmem:[#allocation84_spill] sm:$0xff] %v12872_v60  ;;  %v12881_v8 = vadd.f32 1.0, %v7738_v0  ;;  %v6246_v49 = vmul.f32 %v12796_v7, %v6245_v43  ;;  %v6261_v17 = vmul.f32 %v12804_v12, %v6260_v29  ;;  %vm6278_vm11 = vweird.f32 %v12725_v14 }
 0xa4b   : > { %v12868_v11 = vpop.eup %7741  ;;  %v12890_v48 = vadd.f32 1.0, %v7740_v1  ;;  %v6276_v63 = vmul.f32 %v12813_v55, %v6275_v35  ;;  %v6290_v60 = vsub.f32 1.0, %v6289_v16  ;;  %vm6293_vm1 = vweird.f32 %v12732_v5 }
 0xa4c   : > { %v12879_v41 = vpop.eup %7743  ;;  %14834 = vst [vmem:[#allocation88_spill] sm:$0xff] %v12881_v8  ;;  %v6305_v30 = vsub.f32 1.0, %v6304_v6  ;;  %vm6308_vm6 = vweird.f32 %v12739_v20  ;;  %v6320_v1 = vsub.f32 1.0, %v6319_v18  ;;  %v6335_v43 = vsub.f32 1.0, %v6334_v46 }
 0xa4d   : > { %v12888_v9 = vpop.eup %7745  ;;  %14835 = vst [vmem:[#allocation29_spill] sm:$0xff] %v12890_v48  ;;  %v6349_v29 = vmul.f32 %v12879_v41, %v12750_v19  ;;  %v6419_v48 = vand.u32 2147483648, %v12771_v28  ;;  %vm6249_vm3 = vweird.f32 %v12796_v7  ;;  %v14836_v0 = vand.u32 2147483647, %v12703_v38 }
 0xa4e   : > { %v12896_v8 = vpop.eup %7747  ;;  %vm6264_vm15 = vweird.f32 %v12804_v12  ;;  %v14839_v16 = vand.u32 2147483647, %v12712_v31  ;;  %vm6279_vm9 = vweird.f32 %v12813_v55  ;;  %v6364_v18 = vmul.f32 %v12888_v9, %v12756_v25  ;;  %vm12948_vm4 = vmor %vm6248_vm7, %vm6249_vm3 }
 0xa4f   : > { %vm12908_vm10 = vcmp.eq.f32.partialorder %v14836_v0, 8.507059e+37  ;;  %v6247_v46 = vadd.f32 %v12796_v7, %v6246_v49  ;;  %v6262_v0 = vadd.f32 %v12804_v12, %v6261_v17  ;;  %v14842_v39 = vand.u32 2147483647, %v12725_v14  ;;  %v12935_v27 = vpop.eup %7749  ;;  %vm12962_vm12 = vmor %vm6263_vm8, %vm6264_vm15 }
 0xa50   : > { %vm12915_vm5 = vcmp.eq.f32.partialorder %v14839_v16, 8.507059e+37  ;;  %vm6294_vm2 = vweird.f32 %v12826_v50  ;;  %v6379_v16 = vmul.f32 %v12896_v8, %v12763_v26  ;;  %v6277_v23 = vadd.f32 %v12813_v55, %v6276_v63  ;;  %vm12989_vm8 = vmor %vm6278_vm11, %vm6279_vm9 }
 0xa51   : > { %vm12927_vm0 = vcmp.eq.f32.partialorder %v14842_v39, 8.507059e+37  ;;  %v6291_v49 = vmul.f32 %v12826_v50, %v6290_v60  ;;  %v6306_v17 = vmul.f32 %v12835_v52, %v6305_v30  ;;  %7751 = vrcp.f32 %v12771_v28  ;;  %vm13010_vm11 = vmor %vm6293_vm1, %vm6294_vm2 }
 0xa52   : > { %v6321_v39 = vmul.f32 %v12843_v33, %v6320_v1  ;;  %v6336_v45 = vmul.f32 %v12851_v2, %v6335_v43  ;;  %v6350_v15 = vsub.f32 1.0, %v6349_v29  ;;  %7753 = vrcp.f32 %v12777_v53 }
 0xa53   : > { %vm6309_vm14 = vweird.f32 %v12835_v52  ;;  %v6365_v60 = vsub.f32 1.0, %v6364_v18  ;;  %7755 = vrcp.f32 %v12783_v32  ;;  %v6251_v30 = vsel %vm12948_vm4, %v12796_v7, %v6247_v46 }
 0xa54   : > { %v14849_v63 = vand.u32 2147483647, %v12732_v5  ;;  %v14852_v43 = vand.u32 2147483647, %v12739_v20  ;;  %vm6339_vm4 = vweird.f32 %v12851_v2  ;;  %vm6353_vm13 = vweird.f32 %v12750_v19  ;;  %vm13033_vm1 = vmor %vm6308_vm6, %vm6309_vm14 }
 0xa55   : > { %v6380_v7 = vsub.f32 1.0, %v6379_v16  ;;  %v6394_v31 = vmul.f32 %v12935_v27, %v12766_v24  ;;  %v6266_v42 = vsel %vm12962_vm12, %v12804_v12, %v6262_v0  ;;  %v6292_v46 = vadd.f32 %v12826_v50, %v6291_v49 }
 0xa56   : > { %vm12968_vm7 = vcmp.eq.f32.partialorder %v14849_v63, 8.507059e+37  ;;  %vm12974_vm3 = vcmp.eq.f32.partialorder %v14852_v43, 8.507059e+37  ;;  %v6307_v63 = vadd.f32 %v12835_v52, %v6306_v17  ;;  %v14857_v16 = vand.u32 2147483647, %v12743_v4 }
 0xa57   : > { %vm6368_vm12 = vweird.f32 %v12756_v25  ;;  %7757 = vrcp.f32 %v12790_v62  ;;  %v6281_v14 = vsel %vm12989_vm8, %v12813_v55, %v6277_v23  ;;  %v6322_v0 = vadd.f32 %v12843_v33, %v6321_v39  ;;  %v13024_v23 = vpop.eup %7751 }
 0xa58   : > { %vm12997_vm15 = vcmp.eq.f32.partialorder %v14857_v16, 8.507059e+37  ;;  %v6337_v49 = vadd.f32 %v12851_v2, %v6336_v45  ;;  %v14862_v17 = vand.u32 2147483647, %v12746_v51  ;;  %v6351_v55 = vmul.f32 %v12879_v41, %v6350_v15 }
 0xa59   : > { %v13027_v5 = vadd.f32 1.0, %v12868_v11  ;;  %v6366_v39 = vmul.f32 %v12888_v9, %v6365_v60  ;;  %v14867_v18 = vand.u32 2147483648, %v12766_v24  ;;  %v13042_v16 = vor.u32 1.1754944e-38, %v6419_v48 }
 0xa5a   : > { %vm13018_vm9 = vcmp.eq.f32.partialorder %v14862_v17, 8.507059e+37  ;;  %v13044_v17 = vpop.eup %7753  ;;  %v13049_v11 = vsel %vm12908_vm10, %v12752_v59, %v6251_v30  ;;  %v13054_v20 = vsel %vm12915_vm5, %v12759_v57, %v6266_v42  ;;  %vm14868_vm6 = vweird.f32 %v12843_v33 }
 0xa5b   : > { %v13040_v15 = vor.u32 1.1754944e-38, %v14867_v18  ;;  %vm14869_vm2 = vweird.f32 %v12743_v4  ;;  %v14872_v48 = vand.u32 2147483647, %v12750_v19  ;;  %v6381_v59 = vmul.f32 %v12896_v8, %v6380_v7  ;;  %v13071_v6 = vpop.eup %7755 }
 0xa5c   : > { %vm13060_vm14 = vmor %vm14869_vm2, %vm14868_vm6  ;;  %v6395_v35 = vsub.f32 1.0, %v6394_v31  ;;  %v13076_v57 = vsel %vm12927_vm0, %v12779_v37, %v6281_v14  ;;  %v6296_v4 = vsel %vm13010_vm11, %v12826_v50, %v6292_v46  ;;  %v6311_v30 = vsel %vm13033_vm1, %v12835_v52, %v6307_v63 }
 0xa5d   : > { %vm13066_vm8 = vcmp.eq.f32.partialorder %v14872_v48, 8.507059e+37  ;;  %vm14875_vm10 = vweird.f32 %v12746_v51  ;;  %vm6354_vm6 = vweird.f32 %v12879_v41  ;;  %v6326_v58 = vsel %vm13060_vm14, %v12843_v33, %v6322_v0 }
 0xa5e   : > { %vm13088_vm5 = vmor %vm14875_vm10, %vm6339_vm4  ;;  %v6352_v52 = vadd.f32 %v12879_v41, %v6351_v55  ;;  %v14878_v37 = vand.u32 2147483647, %v12756_v25  ;;  %v14881_v31 = vand.u32 2147483647, %v12763_v26  ;;  %vm6398_vm11 = vweird.f32 %v12766_v24 }
 0xa5f   : > { %v6341_v50 = vsel %vm13088_vm5, %v12851_v2, %v6337_v49  ;;  %v6409_v33 = vmul.f32 %v13024_v23, %v12771_v28  ;;  %v13115_v2 = vpop.eup %7757  ;;  %v6367_v46 = vadd.f32 %v12888_v9, %v6366_v39  ;;  %vm6369_vm1 = vweird.f32 %v12888_v9  ;;  %vm13141_vm14 = vmor %vm6353_vm13, %vm6354_vm6 }
 0xa60   : > { %vm13102_vm0 = vcmp.eq.f32.partialorder %v14878_v37, 8.507059e+37  ;;  %vm13108_vm4 = vcmp.eq.f32.partialorder %v14881_v31, 8.507059e+37  ;;  %v6424_v63 = vmul.f32 %v13044_v17, %v12777_v53  ;;  %7759 = vrcp.f32 %v12792_v21 }
 0xa61   : > { %v6382_v14 = vadd.f32 %v12896_v8, %v6381_v59  ;;  %vm6384_vm2 = vweird.f32 %v12896_v8  ;;  %v6396_v12 = vmul.f32 %v12935_v27, %v6395_v35  ;;  %v6439_v0 = vmul.f32 %v13071_v6, %v12783_v32 }
 0xa62   : > { %v13130_v49 = vsel %vm12968_vm7, %v12786_v34, %v6296_v4  ;;  %v13135_v55 = vsel %vm12974_vm3, %v12800_v44, %v6311_v30  ;;  %v6434_v39 = vand.u32 2147483648, %v12777_v53  ;;  %7761 = vrcp.f32 %v12798_v3  ;;  %vm13157_vm7 = vmor %vm6368_vm12, %vm6369_vm1 }
 0xa63   : > { %v13150_v34 = vsel %vm12997_vm15, %v12810_v47, %v6326_v58  ;;  %v6356_v44 = vsel %vm13141_vm14, %v12879_v41, %v6352_v52  ;;  %v14888_v1 = vand.u32 2147483647, %v12766_v24  ;;  %v6410_v60 = vsub.f32 1.0, %v6409_v33 }
 0xa64   : > { %v6454_v47 = vmul.f32 %v13115_v2, %v12790_v62  ;;  %v13172_v41 = vsel %vm13018_vm9, %v12833_v13, %v6341_v50  ;;  %v6371_v25 = vsel %vm13157_vm7, %v12888_v9, %v6367_v46  ;;  %vm14891_vm3 = vweird.f32 %v12763_v26 }
 0xa65   : > { %vm13163_vm13 = vcmp.eq.f32.partialorder %v14888_v1, 8.507059e+37  ;;  %vm13181_vm15 = vmor %vm14891_vm3, %vm6384_vm2  ;;  %vm6399_vm12 = vweird.f32 %v12935_v27  ;;  %v6425_v48 = vsub.f32 1.0, %v6424_v63  ;;  %v6397_v38 = vadd.f32 %v12935_v27, %v6396_v12 }
 0xa66   : > { %v6386_v13 = vsel %vm13181_vm15, %v12896_v8, %v6382_v14  ;;  %vm6413_vm9 = vweird.f32 %v12771_v28  ;;  %v6440_v9 = vsub.f32 1.0, %v6439_v0  ;;  %7763 = vrcp.f32 %v12806_v54  ;;  %v13192_v59 = vpop.eup %7759 }
 0xa67   : > { %v13197_v26 = vsel %vm13066_vm8, %v12847_v61, %v6356_v44  ;;  %vm6428_vm10 = vweird.f32 %v12777_v53  ;;  %v6432_v35 = vand.u32 2147483647, %v12777_v53  ;;  %v13201_v4 = vor.u32 1.1754944e-38, %v6434_v39  ;;  %vm13223_vm8 = vmor %vm6398_vm11, %vm6399_vm12 }
 0xa68   : > { %v6411_v8 = vmul.f32 %v13024_v23, %v6410_v60  ;;  %vm6443_vm5 = vweird.f32 %v12783_v32  ;;  %v6447_v30 = vand.u32 2147483647, %v12783_v32  ;;  %v6449_v7 = vand.u32 2147483648, %v12783_v32  ;;  %v13207_v50 = vpop.eup %7761 }
 0xa69   : > { %v6455_v58 = vsub.f32 1.0, %v6454_v47  ;;  %v13212_v61 = vsel %vm13102_vm0, %v12866_v22, %v6371_v25  ;;  %v13217_v18 = vsel %vm13108_vm4, %v12884_v36, %v6386_v13  ;;  %v6426_v37 = vmul.f32 %v13044_v17, %v6425_v48 }
 0xa6a   : > { %7765 = vrcp.f32 %v12808_v40  ;;  %v6401_v22 = vsel %vm13223_vm8, %v12935_v27, %v6397_v38  ;;  %vm6414_vm6 = vweird.f32 %v13024_v23  ;;  %v14896_v36 = vand.u32 2147483647, %v12771_v28 }
 0xa6b   : > { %v6441_v24 = vmul.f32 %v13071_v6, %v6440_v9  ;;  %v6469_v31 = vmul.f32 %v13192_v59, %v12792_v21  ;;  %vm6429_vm4 = vweird.f32 %v13044_v17  ;;  %vm13243_vm11 = vcmp.eq.f32.partialorder %v6432_v35, 8.507059e+37  ;;  %vm13277_vm7 = vmor %vm6413_vm9, %vm6414_vm6 }
 0xa6c   : > { %vm13235_vm0 = vcmp.eq.f32.partialorder %v14896_v36, 8.507059e+37  ;;  %v6462_v27 = vand.u32 2147483647, %v12790_v62  ;;  %v6464_v33 = vand.u32 2147483648, %v12790_v62  ;;  %7767 = vrcp.f32 %v12816_v10  ;;  %v13250_v46 = vpop.eup %7763  ;;  %vm13295_vm3 = vmor %vm6428_vm10, %vm6429_vm4  ;;  %v14914_v36 = vld [vmem:[#allocation66_spill] sm:$0xff] }
 0xa6d   : > { %v6412_v63 = vadd.f32 %v13024_v23, %v6411_v8  ;;  %vm13253_vm1 = vcmp.eq.f32.partialorder %v6447_v30, 8.507059e+37  ;;  %v6450_v12 = vor.u32 1.1754944e-38, %v6449_v7  ;;  %v6456_v0 = vmul.f32 %v13115_v2, %v6455_v58 }
 0xa6e   : > { %v6484_v45 = vmul.f32 %v13207_v50, %v12798_v3  ;;  %v13263_v39 = vsel %vm13163_vm13, %v13040_v15, %v6401_v22  ;;  %v6427_v44 = vadd.f32 %v13044_v17, %v6426_v37  ;;  %vm6458_vm2 = vweird.f32 %v12790_v62  ;;  %v14911_v37 = vld [vmem:[#allocation64_spill] sm:$0xff] }
 0xa6f   : > { %v6479_v19 = vand.u32 2147483648, %v12792_v21  ;;  %v6442_v1 = vadd.f32 %v13071_v6, %v6441_v24  ;;  %vm6444_vm14 = vweird.f32 %v13071_v6  ;;  %v6470_v60 = vsub.f32 1.0, %v6469_v31 }
 0xa70   : > { %7769 = vrcp.f32 %v12821_v56  ;;  %v13271_v47 = vpop.eup %7765  ;;  %vm13281_vm13 = vcmp.eq.f32.partialorder %v6462_v27, 8.507059e+37  ;;  %v6465_v25 = vor.u32 1.1754944e-38, %v6464_v33  ;;  %v6477_v43 = vand.u32 2147483647, %v12792_v21  ;;  %vm13311_vm9 = vmor %vm6443_vm5, %vm6444_vm14 }
 0xa71   : > { %v6499_v48 = vmul.f32 %v13250_v46, %v12806_v54  ;;  %v6416_v13 = vsel %vm13277_vm7, %v13024_v23, %v6412_v63  ;;  %v6457_v38 = vadd.f32 %v13115_v2, %v6456_v0  ;;  %vm6459_vm15 = vweird.f32 %v13115_v2 }
 0xa72   : > { %vm6473_vm12 = vweird.f32 %v12792_v21  ;;  %v6485_v9 = vsub.f32 1.0, %v6484_v45  ;;  %v13302_v35 = vpop.eup %7767  ;;  %v6431_v23 = vsel %vm13295_vm3, %v13044_v17, %v6427_v44  ;;  %v6480_v8 = vor.u32 1.1754944e-38, %v6479_v19  ;;  %vm13331_vm10 = vmor %vm6458_vm2, %vm6459_vm15 }
 0xa73   : > { %v6492_v30 = vand.u32 2147483647, %v12798_v3  ;;  %v6494_v7 = vand.u32 2147483648, %v12798_v3  ;;  %v6446_v58 = vsel %vm13311_vm9, %v13071_v6, %v6442_v1  ;;  %v6471_v52 = vmul.f32 %v13192_v59, %v6470_v60 }
 0xa74   : > { %v6514_v17 = vmul.f32 %v13271_v47, %v12808_v40  ;;  %7771 = vrcp.f32 %v14911_v37  ;;  %v13327_v32 = vsel %vm13235_vm0, %v13042_v16, %v6416_v13  ;;  %vm6488_vm5 = vweird.f32 %v12798_v3 }
 0xa75   : > { %v6500_v6 = vsub.f32 1.0, %v6499_v48  ;;  %7773 = vrcp.f32 %v14914_v36  ;;  %v13342_v31 = vsel %vm13243_vm11, %v13201_v4, %v6431_v23  ;;  %v6461_v62 = vsel %vm13331_vm10, %v13115_v2, %v6457_v38  ;;  %v14923_v23 = vld [vmem:[#allocation61_spill] sm:$0xff] }
 0xa76   : > { %v13337_v24 = vpop.eup %7769  ;;  %vm13347_vm8 = vcmp.eq.f32.partialorder %v6477_v43, 8.507059e+37  ;;  %v6486_v51 = vmul.f32 %v13207_v50, %v6485_v9  ;;  %v6529_v27 = vmul.f32 %v13302_v35, %v12816_v10  ;;  %v13356_v33 = vsel %vm13253_vm1, %v6450_v12, %v6446_v58  ;;  %v14926_v58 = vld [vmem:[#allocation91_spill] sm:$0xff] }
 0xa77   : > { %vm6474_vm6 = vweird.f32 %v13192_v59  ;;  %v6507_v4 = vand.u32 2147483647, %v12806_v54  ;;  %v6509_v42 = vand.u32 2147483648, %v12806_v54  ;;  %v6472_v2 = vadd.f32 %v13192_v59, %v6471_v52 }
 0xa78   : > { %vm13362_vm0 = vcmp.eq.f32.partialorder %v6492_v30, 8.507059e+37  ;;  %v6495_v0 = vor.u32 1.1754944e-38, %v6494_v7  ;;  %vm6503_vm4 = vweird.f32 %v12806_v54  ;;  %v6515_v45 = vsub.f32 1.0, %v6514_v17  ;;  %vm13387_vm2 = vmor %vm6473_vm12, %vm6474_vm6 }
 0xa79   : > { %v13369_v14 = vsel %vm13281_vm13, %v6465_v25, %v6461_v62  ;;  %vm6489_vm11 = vweird.f32 %v13207_v50  ;;  %v6501_v12 = vmul.f32 %v13250_v46, %v6500_v6  ;;  %v6544_v44 = vmul.f32 %v13337_v24, %v12821_v56 }
 0xa7a   : > { %v13375_v19 = vpop.eup %7771  ;;  %v6487_v1 = vadd.f32 %v13207_v50, %v6486_v51  ;;  %vm6518_vm1 = vweird.f32 %v12808_v40  ;;  %v6522_v60 = vand.u32 2147483647, %v12808_v40  ;;  %v6524_v15 = vand.u32 2147483648, %v12808_v40  ;;  %vm13408_vm3 = vmor %vm6488_vm5, %vm6489_vm11 }
 0xa7b   : > { %v6530_v29 = vsub.f32 1.0, %v6529_v27  ;;  %v13381_v25 = vpop.eup %7773  ;;  %vm6504_vm14 = vweird.f32 %v13250_v46  ;;  %vm13392_vm7 = vcmp.eq.f32.partialorder %v6507_v4, 8.507059e+37  ;;  %v6510_v13 = vor.u32 1.1754944e-38, %v6509_v42 }
 0xa7c   : > { %v6537_v28 = vand.u32 2147483647, %v12816_v10  ;;  %v6476_v38 = vsel %vm13387_vm2, %v13192_v59, %v6472_v2  ;;  %v6516_v9 = vmul.f32 %v13271_v47, %v6515_v45  ;;  %vm6533_vm13 = vweird.f32 %v12816_v10  ;;  %vm13437_vm9 = vmor %vm6503_vm4, %vm6504_vm14 }
 0xa7d   : > { %v6539_v21 = vand.u32 2147483648, %v12816_v10  ;;  %7775 = vrcp.f32 %v14923_v23  ;;  %v6502_v30 = vadd.f32 %v13250_v46, %v6501_v12  ;;  %v6545_v7 = vsub.f32 1.0, %v6544_v44 }
 0xa7e   : > { %v6559_v59 = vmul.f32 %v13375_v19, %v14911_v37  ;;  %7777 = vrcp.f32 %v14926_v58  ;;  %v6491_v52 = vsel %vm13408_vm3, %v13207_v50, %v6487_v1  ;;  %vm13419_vm15 = vcmp.eq.f32.partialorder %v6522_v60, 8.507059e+37  ;;  %v14933_v60 = vld [vmem:[#allocation67_spill] sm:$0xff] }
 0xa7f   : > { %v6525_v3 = vor.u32 1.1754944e-38, %v6524_v15  ;;  %v6531_v22 = vmul.f32 %v13302_v35, %v6530_v29  ;;  %v6574_v6 = vmul.f32 %v13381_v25, %v14914_v36  ;;  %v13428_v62 = vsel %vm13347_vm8, %v6480_v8, %v6476_v38 }
 0xa80   : > { %vm6519_vm12 = vweird.f32 %v13271_v47  ;;  %v6552_v51 = vand.u32 2147483647, %v12821_v56  ;;  %v6554_v50 = vand.u32 2147483648, %v12821_v56  ;;  %v6517_v4 = vadd.f32 %v13271_v47, %v6516_v9 }
 0xa81   : > { %vm13442_vm10 = vcmp.eq.f32.partialorder %v6537_v28, 8.507059e+37  ;;  %v6540_v8 = vor.u32 1.1754944e-38, %v6539_v21  ;;  %vm6548_vm5 = vweird.f32 %v12821_v56  ;;  %v13449_v42 = vsel %vm13362_vm0, %v6495_v0, %v6491_v52  ;;  %vm13466_vm6 = vmor %vm6518_vm1, %vm6519_vm12 }
 0xa82   : > { %v6506_v54 = vsel %vm13437_vm9, %v13250_v46, %v6502_v30  ;;  %v6546_v2 = vmul.f32 %v13337_v24, %v6545_v7  ;;  %v6560_v45 = vsub.f32 1.0, %v6559_v59  ;;  %v6532_v44 = vadd.f32 %v13302_v35, %v6531_v22  ;;  %v14940_v7 = vld [vmem:[#allocation33_spill] sm:$0xff] }
 0xa83   : > { %v13455_v12 = vpop.eup %7775  ;;  %vm6534_vm8 = vweird.f32 %v13302_v35  ;;  %v6575_v1 = vsub.f32 1.0, %v6574_v6  ;;  %7779 = vrcp.f32 %v14933_v60  ;;  %vm13470_vm0 = vcmp.eq.f32.partialorder %v6552_v51, 8.507059e+37 }
 0xa84   : > { %v13460_v15 = vpop.eup %7777  ;;  %v6555_v0 = vor.u32 1.1754944e-38, %v6554_v50  ;;  %vm6563_vm4 = vweird.f32 %v14911_v37  ;;  %v6567_v29 = vand.u32 2147483647, %v14911_v37  ;;  %v6569_v43 = vand.u32 2147483648, %v14911_v37  ;;  %vm13488_vm11 = vmor %vm6533_vm13, %vm6534_vm8  ;;  %v14963_v37 = vld [vmem:[#allocation44_spill] sm:$0xff] }
 0xa85   : > { %v13479_v28 = vsel %vm13392_vm7, %v6510_v13, %v6506_v54  ;;  %v6521_v40 = vsel %vm13466_vm6, %v13271_v47, %v6517_v4  ;;  %v6582_v38 = vand.u32 2147483647, %v14914_v36  ;;  %v6584_v9 = vand.u32 2147483648, %v14914_v36 }
 0xa86   : > { %v6547_v53 = vadd.f32 %v13337_v24, %v6546_v2  ;;  %vm6549_vm1 = vweird.f32 %v13337_v24  ;;  %v6561_v48 = vmul.f32 %v13375_v19, %v6560_v45  ;;  %v6589_v13 = vmul.f32 %v13455_v12, %v14923_v23 }
 0xa87   : > { %v6536_v47 = vsel %vm13488_vm11, %v13302_v35, %v6532_v44  ;;  %v6576_v30 = vmul.f32 %v13381_v25, %v6575_v1  ;;  %v6604_v10 = vmul.f32 %v13460_v15, %v14926_v58  ;;  %7781 = vrcp.f32 %v14940_v7  ;;  %vm13517_vm7 = vmor %vm6548_vm5, %vm6549_vm1  ;;  %v14947_v44 = vld [vmem:[#allocation89_spill] sm:$0xff] }
 0xa88   : > { %v13506_v59 = vsel %vm13419_vm15, %v6525_v3, %v6521_v40  ;;  %vm13508_vm2 = vcmp.eq.f32.partialorder %v6567_v29, 8.507059e+37  ;;  %v6570_v22 = vor.u32 1.1754944e-38, %v6569_v43  ;;  %vm6578_vm14 = vweird.f32 %v14914_v36  ;;  %v14977_v36 = vld [vmem:[#allocation59_spill] sm:$0xff] }
 0xa89   : > { %v13513_v35 = vpop.eup %7779  ;;  %vm6564_vm13 = vweird.f32 %v13375_v19  ;;  %vm13522_vm3 = vcmp.eq.f32.partialorder %v6582_v38, 8.507059e+37  ;;  %v6585_v3 = vor.u32 1.1754944e-38, %v6584_v9  ;;  %v6599_v51 = vand.u32 2147483648, %v14923_v23  ;;  %v14950_v38 = vld [vmem:[#allocation84_spill] sm:$0xff] }
 0xa8a   : > { %v13529_v50 = vsel %vm13442_vm10, %v6540_v8, %v6536_v47  ;;  %v6551_v56 = vsel %vm13517_vm7, %v13337_v24, %v6547_v53  ;;  %v6562_v27 = vadd.f32 %v13375_v19, %v6561_v48  ;;  %v6590_v4 = vsub.f32 1.0, %v6589_v13  ;;  %vm13555_vm9 = vmor %vm6563_vm4, %vm6564_vm13  ;;  %v14953_v9 = vld [vmem:[#allocation88_spill] sm:$0xff]  ;;  %v14954_v48 = vld [vmem:[#allocation29_spill] sm:$0xff] }
 0xa8b   : > { %v6577_v54 = vadd.f32 %v13381_v25, %v6576_v30  ;;  %vm6579_vm15 = vweird.f32 %v13381_v25  ;;  %v6597_v2 = vand.u32 2147483647, %v14923_v23  ;;  %v6605_v45 = vsub.f32 1.0, %v6604_v10 }
 0xa8c   : > { %vm6593_vm12 = vweird.f32 %v14923_v23  ;;  %v6612_v16 = vand.u32 2147483647, %v14926_v58  ;;  %v6614_v8 = vand.u32 2147483648, %v14926_v58  ;;  %v6619_v24 = vmul.f32 %v13513_v35, %v14933_v60  ;;  %vm13575_vm5 = vmor %vm6578_vm14, %vm6579_vm15 }
 0xa8d   : > { %7783 = vrcp.f32 %v14947_v44  ;;  %v13545_v1 = vpop.eup %7781  ;;  %v13549_v46 = vsel %vm13470_vm0, %v6555_v0, %v6551_v56  ;;  %v13559_v43 = vor.u32 1.1754944e-38, %v6599_v51  ;;  %vm6608_vm10 = vweird.f32 %v14926_v58 }
 0xa8e   : > { %v6629_v40 = vand.u32 2147483648, %v14933_v60  ;;  %7785 = vrcp.f32 %v14950_v38  ;;  %v6566_v63 = vsel %vm13555_vm9, %v13375_v19, %v6562_v27  ;;  %v6591_v0 = vmul.f32 %v13455_v12, %v6590_v4 }
 0xa8f   : > { %vm6594_vm8 = vweird.f32 %v13455_v12  ;;  %7787 = vrcp.f32 %v14953_v9  ;;  %v6581_v21 = vsel %vm13575_vm5, %v13381_v25, %v6577_v54  ;;  %v6606_v19 = vmul.f32 %v13460_v15, %v6605_v45 }
 0xa90   : > { %v6627_v53 = vand.u32 2147483647, %v14933_v60  ;;  %7789 = vrcp.f32 %v14954_v48  ;;  %vm13588_vm6 = vcmp.eq.f32.partialorder %v6597_v2, 8.507059e+37  ;;  %v13592_v13 = vor.u32 1.1754944e-38, %v6614_v8 }
 0xa91   : > { %v6620_v47 = vsub.f32 1.0, %v6619_v24  ;;  %v6634_v30 = vmul.f32 %v13545_v1, %v14940_v7  ;;  %7791 = vrcp.f32 %v13027_v5  ;;  %v13599_v25 = vsel %vm13508_vm2, %v6570_v22, %v6566_v63  ;;  %v14959_v22 = vld [vmem:[#allocation14_spill] sm:$0xff]  ;;  %v14962_v63 = vld [vmem:[#allocation24_spill] sm:$0xff]  ;;  %vm13645_vm2 = vmor %vm6593_vm12, %vm6594_vm8 }
 0xa92   : > { %vm6609_vm0 = vweird.f32 %v13460_v15  ;;  %v13602_v10 = vor.u32 1.1754944e-38, %v6629_v40  ;;  %v6644_v6 = vand.u32 2147483648, %v14940_v7  ;;  %v13609_v56 = vsel %vm13522_vm3, %v6585_v3, %v6581_v21  ;;  %v14960_v3 = vld [vmem:[#allocation62_spill] sm:$0xff] }
 0xa93   : > { %v13605_v51 = vpop.eup %7783  ;;  %v6592_v27 = vadd.f32 %v13455_v12, %v6591_v0  ;;  %vm13612_vm4 = vcmp.eq.f32.partialorder %v6612_v16, 8.507059e+37  ;;  %vm6623_vm11 = vweird.f32 %v14933_v60  ;;  %v6642_v52 = vand.u32 2147483647, %v14940_v7  ;;  %v14961_v16 = vld [vmem:[#allocation41_spill] sm:$0xff]  ;;  %vm13666_vm14 = vmor %vm6608_vm10, %vm6609_vm0 }
 0xa94   : > { %v6723_v54 = vmul.f32 %v13049_v11, %v14959_v22  ;;  %v13620_v2 = vpop.eup %7785  ;;  %v6607_v17 = vadd.f32 %v13460_v15, %v6606_v19  ;;  %vm6624_vm1 = vweird.f32 %v13513_v35  ;;  %v6724_v45 = vmul.f32 %v13054_v20, %v14960_v3  ;;  %v14966_v19 = vld [vmem:[#allocation60_spill] sm:$0xff]  ;;  %v14972_v3 = vld [vmem:[#allocation22_spill] sm:$0xff]  ;;  %v14988_v22 = vld [vmem:[#allocation11_spill] sm:$0xff] }
 0xa95   : > { %v6725_v8 = vmul.f32 %v13076_v57, %v14961_v16  ;;  %v13628_v24 = vpop.eup %7787  ;;  %v6621_v29 = vmul.f32 %v13513_v35, %v6620_v47  ;;  %v6635_v40 = vsub.f32 1.0, %v6634_v30  ;;  %v6726_v11 = vmul.f32 %v13130_v49, %v14962_v63  ;;  %v14973_v63 = vld [vmem:[#allocation25_spill] sm:$0xff]  ;;  %vm13726_vm12 = vmor %vm6623_vm11, %vm6624_vm1 }
 0xa96   : > { %v6727_v0 = vmul.f32 %v13135_v55, %v14963_v37  ;;  %6755 = vst [vmem:[%s13636_s20] sm:$0xff] %v6723_v54  ;;  %v13639_v20 = vpop.eup %7789  ;;  %v13649_v49 = vor.u32 1.1754944e-38, %v6644_v6  ;;  %v6649_v55 = vmul.f32 %v13605_v51, %v14947_v44  ;;  %v6657_v21 = vand.u32 2147483647, %v14947_v44 }
 0xa97   : > { %v6728_v47 = vmul.f32 %v13150_v34, %v14966_v19  ;;  %6756 = vst [vmem:[%s13636_s20 + $0x8] sm:$0xff] %v6724_v45  ;;  %v13657_v30 = vpop.eup %7791  ;;  %v6596_v23 = vsel %vm13645_vm2, %v13455_v12, %v6592_v27  ;;  %vm13670_vm7 = vcmp.eq.f32.partialorder %v6627_v53, 8.507059e+37  ;;  %vm6638_vm13 = vweird.f32 %v14940_v7  ;;  %v14971_v27 = vld [vmem:[#allocation13_spill] sm:$0xff]  ;;  %v14980_v19 = vld [vmem:[#allocation20_spill] sm:$0xff] }
 0xa98   : > { %v6659_v34 = vand.u32 2147483648, %v14947_v44  ;;  %v6664_v12 = vmul.f32 %v13620_v2, %v14950_v38  ;;  %v6729_v54 = vmul.f32 %v13172_v41, %v14971_v27  ;;  %6757 = vst [vmem:[%s13636_s20 + $0x10] sm:$0xff] %v6725_v8  ;;  %v6611_v58 = vsel %vm13666_vm14, %v13460_v15, %v6607_v17 }
 0xa99   : > { %vm6639_vm3 = vweird.f32 %v13545_v1  ;;  %v6679_v53 = vmul.f32 %v13628_v24, %v14953_v9  ;;  %v6730_v45 = vmul.f32 %v13197_v26, %v14972_v3  ;;  %6758 = vst [vmem:[%s13636_s20 + $0x18] sm:$0xff] %v6726_v11  ;;  %v6622_v16 = vadd.f32 %v13513_v35, %v6621_v29  ;;  %v14974_v29 = vld [vmem:[#allocation51_spill] sm:$0xff] }
 0xa9a   : > { %v6636_v41 = vmul.f32 %v13545_v1, %v6635_v40  ;;  %v6694_v8 = vmul.f32 %v13639_v20, %v14954_v48  ;;  %v6731_v15 = vmul.f32 %v13212_v61, %v14973_v63  ;;  %6759 = vst [vmem:[%s13636_s20 + $0x20] sm:$0xff] %v6727_v0  ;;  %v13700_v17 = vsel %vm13588_vm6, %v13559_v43, %v6596_v23  ;;  %v14981_v23 = vld [vmem:[#allocation39_spill] sm:$0xff]  ;;  %vm13764_vm6 = vmor %vm6638_vm13, %vm6639_vm3 }
 0xa9b   : > { %v6650_v37 = vsub.f32 1.0, %v6649_v55  ;;  %v6709_v26 = vmul.f32 %v13657_v30, %v13027_v5  ;;  %v6732_v40 = vmul.f32 %v13217_v18, %v14974_v29  ;;  %6760 = vst [vmem:[%s13636_s20 + $0x28] sm:$0xff] %v6728_v47  ;;  %vm13707_vm15 = vcmp.eq.f32.partialorder %v6642_v52, 8.507059e+37 }
 0xa9c   : > { %v13711_v61 = vor.u32 1.1754944e-38, %v6659_v34  ;;  %v6665_v0 = vsub.f32 1.0, %v6664_v12  ;;  %v6674_v43 = vand.u32 2147483648, %v14950_v38  ;;  %v6733_v57 = vmul.f32 %v13263_v39, %v14977_v36  ;;  %6761 = vst [vmem:[%s13636_s20 + $0x30] sm:$0xff] %v6729_v54  ;;  %v14982_v12 = vld [vmem:[#allocation47_spill] sm:$0xff] }
 0xa9d   : > { %v13720_v55 = vsel %vm13612_vm4, %v13592_v13, %v6611_v58  ;;  %vm6653_vm9 = vweird.f32 %v14947_v44  ;;  %v6672_v52 = vand.u32 2147483647, %v14950_v38  ;;  %v6680_v39 = vsub.f32 1.0, %v6679_v53  ;;  %6762 = vst [vmem:[%s13636_s20 + $0x38] sm:$0xff] %v6730_v45  ;;  %v14983_v58 = vld [vmem:[#allocation18_spill] sm:$0xff] }
 0xa9e   : > { %v6734_v47 = vmul.f32 %v13327_v32, %v14980_v19  ;;  %v6626_v13 = vsel %vm13726_vm12, %v13513_v35, %v6622_v16  ;;  %v6637_v60 = vadd.f32 %v13545_v1, %v6636_v41  ;;  %vm6668_vm10 = vweird.f32 %v14950_v38  ;;  %6763 = vst [vmem:[%s13636_s20 + $0x40] sm:$0xff] %v6731_v15 }
 0xa9f   : > { %v6695_v4 = vsub.f32 1.0, %v6694_v8  ;;  %v6735_v6 = vmul.f32 %v13342_v31, %v14981_v23  ;;  %v6651_v34 = vmul.f32 %v13605_v51, %v6650_v37  ;;  %vm6654_vm5 = vweird.f32 %v13605_v51  ;;  %6764 = vst [vmem:[%s13636_s20 + $0x48] sm:$0xff] %v6732_v40  ;;  %v14991_v8 = vld [vmem:[#allocation74_spill] sm:$0xff] }
 0xaa0   : > { %v6710_v32 = vsub.f32 1.0, %v6709_v26  ;;  %v6736_v27 = vmul.f32 %v13356_v33, %v14982_v12  ;;  %v6666_v35 = vmul.f32 %v13620_v2, %v6665_v0  ;;  %v13749_v54 = vor.u32 1.1754944e-38, %v6674_v43  ;;  %6765 = vst [vmem:[%s13636_s20 + $0x50] sm:$0xff] %v6733_v57  ;;  %vm13813_vm14 = vmor %vm6653_vm9, %vm6654_vm5  ;;  %v14997_v57 = vld [vmem:[#allocation15_spill] sm:$0xff]  ;;  %v15015_v33 = vld [vmem:[#allocation65_spill] sm:$0xff] }
 0xaa1   : > { %vm6683_vm8 = vweird.f32 %v14953_v9  ;;  %v6737_v31 = vmul.f32 %v13369_v14, %v14983_v58  ;;  %v13758_v53 = vsel %vm13670_vm7, %v13602_v10, %v6626_v13  ;;  %vm13768_vm0 = vcmp.eq.f32.partialorder %v6657_v21, 8.507059e+37  ;;  %6766 = vst [vmem:[%s13636_s20 + $0x58] sm:$0xff] %v6734_v47  ;;  %v15005_v47 = vld [vmem:[#allocation52_spill] sm:$0xff] }
 0xaa2   : > { %v6681_v14 = vmul.f32 %v13628_v24, %v6680_v39  ;;  %v6687_v45 = vand.u32 2147483647, %v14953_v9  ;;  %v6738_v10 = vmul.f32 %v13428_v62, %v14988_v22  ;;  %v6641_v7 = vsel %vm13764_vm6, %v13545_v1, %v6637_v60  ;;  %6767 = vst [vmem:[%s13636_s20 + $0x60] sm:$0xff] %v6735_v6  ;;  %v14992_v1 = vld [vmem:[#allocation94_spill] sm:$0xff]  ;;  %v15014_v58 = vld [vmem:[#allocation92_spill] sm:$0xff]  ;;  %v15017_v22 = vld [vmem:[#allocation71_spill] sm:$0xff] }
 0xaa3   : > { %vm13780_vm4 = vcmp.eq.f32.partialorder %v6672_v52, 8.507059e+37  ;;  %v6689_v21 = vand.u32 2147483648, %v14953_v9  ;;  %v6696_v41 = vmul.f32 %v13639_v20, %v6695_v4  ;;  %v6739_v63 = vmul.f32 %v13449_v42, %v14991_v8  ;;  %6768 = vst [vmem:[%s13636_s20 + $0x68] sm:$0xff] %v6736_v27  ;;  %v14993_v42 = vld [vmem:[#allocation42_spill] sm:$0xff]  ;;  %v15008_v4 = vld [vmem:[#allocation80_spill] sm:$0xff] }
 0xaa4   : > { %v6652_v62 = vadd.f32 %v13605_v51, %v6651_v34  ;;  %vm6698_vm11 = vweird.f32 %v14954_v48  ;;  %v6711_v15 = vmul.f32 %v13657_v30, %v6710_v32  ;;  %v6740_v37 = vmul.f32 %v13479_v28, %v14992_v1  ;;  %6769 = vst [vmem:[%s13636_s20 + $0x70] sm:$0xff] %v6737_v31  ;;  %v14994_v28 = vld [vmem:[#allocation48_spill] sm:$0xff]  ;;  %v15012_v32 = vld [vmem:[#allocation82_spill] sm:$0xff] }
 0xaa5   : > { %v6667_v26 = vadd.f32 %v13620_v2, %v6666_v35  ;;  %vm6669_vm1 = vweird.f32 %v13620_v2  ;;  %v6702_v29 = vand.u32 2147483647, %v14954_v48  ;;  %v6741_v40 = vmul.f32 %v13506_v59, %v14993_v42  ;;  %6770 = vst [vmem:[%s13636_s20 + $0x78] sm:$0xff] %v6738_v10  ;;  %v15013_v35 = vld [vmem:[#allocation73_spill] sm:$0xff] }
 0xaa6   : > { %v6646_v0 = vsel %vm13707_vm15, %v13649_v49, %v6641_v7  ;;  %v6682_v43 = vadd.f32 %v13628_v24, %v6681_v14  ;;  %vm6684_vm2 = vweird.f32 %v13628_v24  ;;  %v6742_v36 = vmul.f32 %v13529_v50, %v14994_v28  ;;  %6771 = vst [vmem:[%s13636_s20 + $0x80] sm:$0xff] %v6739_v63  ;;  %vm13830_vm13 = vmor %vm6668_vm10, %vm6669_vm1  ;;  %v15016_v14 = vld [vmem:[#allocation68_spill] sm:$0xff]  ;;  %v15018_v7 = vld [vmem:[#allocation63_spill] sm:$0xff] }
 0xaa7   : > { %v6697_v11 = vadd.f32 %v13639_v20, %v6696_v41  ;;  %vm6699_vm7 = vweird.f32 %v13639_v20  ;;  %v6704_v49 = vand.u32 2147483648, %v14954_v48  ;;  %v6743_v18 = vmul.f32 %v13549_v46, %v14997_v57  ;;  %v15000_v46 = vld [vmem:[#allocation93_spill] sm:$0xff]  ;;  %6772 = vst [vmem:[%s13636_s20 + $0x88] sm:$0xff] %v6740_v37  ;;  %vm13846_vm15 = vmor %vm6683_vm8, %vm6684_vm2 }
 0xaa8   : > { %v6656_v50 = vsel %vm13813_vm14, %v13605_v51, %v6652_v62  ;;  %v6712_v52 = vadd.f32 %v13657_v30, %v6711_v15  ;;  %vm6714_vm3 = vweird.f32 %v13657_v30  ;;  %v6744_v39 = vmul.f32 %v13599_v25, %v15000_v46  ;;  %6773 = vst [vmem:[%s13636_s20 + $0x90] sm:$0xff] %v6741_v40  ;;  %vm13865_vm9 = vmor %vm6698_vm11, %vm6699_vm7 }
 0xaa9   : > { %v6671_v51 = vsel %vm13830_vm13, %v13620_v2, %v6667_v26  ;;  %vm13850_vm12 = vcmp.eq.f32.partialorder %v6687_v45, 8.507059e+37  ;;  %v6719_v25 = vand.u32 2147483648, %v13027_v5  ;;  %v6745_v13 = vmul.f32 %v13609_v56, %v15005_v47  ;;  %6774 = vst [vmem:[%s13636_s20 + $0x98] sm:$0xff] %v6742_v36 }
 0xaaa   : > { %v6686_v2 = vsel %vm13846_vm15, %v13628_v24, %v6682_v43  ;;  %vm6713_vm10 = vweird.f32 %v13027_v5  ;;  %v6717_v60 = vand.u32 2147483647, %v13027_v5  ;;  %v6746_v56 = vmul.f32 %v13700_v17, %v15008_v4  ;;  %v15011_v5 = vld [vmem:[#allocation37_spill] sm:$0xff]  ;;  %6775 = vst [vmem:[%s13636_s20 + $0xa0] sm:$0xff] %v6743_v18 }
 0xaab   : > { %v6661_v24 = vsel %vm13768_vm0, %v13711_v61, %v6656_v50  ;;  %v6690_v48 = vor.u32 1.1754944e-38, %v6689_v21  ;;  %v6701_v23 = vsel %vm13865_vm9, %v13639_v20, %v6697_v11  ;;  %vm13883_vm5 = vmor %vm6713_vm10, %vm6714_vm3  ;;  %v6747_v17 = vmul.f32 %v13720_v55, %v15011_v5  ;;  %6776 = vst [vmem:[%s13636_s20 + $0xa8] sm:$0xff] %v6744_v39 }
 0xaac   : > { %v6676_v61 = vsel %vm13780_vm4, %v13749_v54, %v6671_v51  ;;  %v6705_v34 = vor.u32 1.1754944e-38, %v6704_v49  ;;  %v6716_v20 = vsel %vm13883_vm5, %v13657_v30, %v6712_v52  ;;  %v6748_v12 = vmul.f32 %v13758_v53, %v15012_v32  ;;  %6777 = vst [vmem:[%s13636_s20 + $0xb0] sm:$0xff] %v6745_v13 }
 0xaad   : > { %v6691_v55 = vsel %vm13850_vm12, %v6690_v48, %v6686_v2  ;;  %vm6703_vm8 = vcmp.eq.f32.partialorder %v6702_v29, 8.507059e+37  ;;  %v6720_v27 = vor.u32 1.1754944e-38, %v6719_v25  ;;  %v6749_v54 = vmul.f32 %v6646_v0, %v15013_v35  ;;  %6778 = vst [vmem:[%s13636_s20 + $0xb8] sm:$0xff] %v6746_v56 }
 0xaae   : > { %v6706_v30 = vsel %vm6703_vm8, %v6705_v34, %v6701_v23  ;;  %vm6718_vm6 = vcmp.eq.f32.partialorder %v6717_v60, 8.507059e+37  ;;  %v6750_v31 = vmul.f32 %v6661_v24, %v15014_v58  ;;  %v6751_v3 = vmul.f32 %v6676_v61, %v15015_v33  ;;  %6779 = vst [vmem:[%s13636_s20 + $0xc0] sm:$0xff] %v6747_v17 }
 0xaaf   : > { %v6721_v53 = vsel %vm6718_vm6, %v6720_v27, %v6716_v20  ;;  %v6752_v45 = vmul.f32 %v6691_v55, %v15016_v14  ;;  %6780 = vst [vmem:[%s13636_s20 + $0xc8] sm:$0xff] %v6748_v12  ;;  %v6753_v10 = vmul.f32 %v6706_v30, %v15017_v22 }
 0xab0   : > { %6781 = vst [vmem:[%s13636_s20 + $0xd0] sm:$0xff] %v6749_v54  ;;  %v6754_v16 = vmul.f32 %v6721_v53, %v15018_v7 }
 0xab1   : > { %6782 = vst [vmem:[%s13636_s20 + $0xd8] sm:$0xff] %v6750_v31 }
 0xab2   : > { %6783 = vst [vmem:[%s13636_s20 + $0xe0] sm:$0xff] %v6751_v3 }
 0xab3   : > { %6784 = vst [vmem:[%s13636_s20 + $0xe8] sm:$0xff] %v6752_v45 }
 0xab4   : > { %6785 = vst [vmem:[%s13636_s20 + $0xf0] sm:$0xff] %v6753_v10 }
 0xab5   : > { %6786 = vst [vmem:[%s13636_s20 + $0xf8] sm:$0xff] %v6754_v16 }
 0xab6   : > { %7852 = shalt.err (!%p7849_p8)
}
 0xab7   : > { %s7898_s30 = smov 128   ;;  %s7899_s20 = smov 8  }
 0xab8   : > { %7471 = dma.vmem_to_hbm [thread:$0]  (%p8008_p5), %s6801_s3, 4096, %s6803_s21, %s6788_s8, %s7898_s30, %s7898_s30, %s7899_s20  }
 0xab9 PF: > { %p7483_p9 = scmp.ge.s32.totalorder %s7891_s28, 2  ;;  %s6817_s2 = sand.u32 1, %s7879_s25  }
 0xaba   : > { %s6818_s24 = scalar_lea.sflag [#allocation5], %s6817_s2 }
 0xabb   : > { %p7478_p10 = pnand %p7483_p9, %p8012_p6 }
 0xabd   : > { %p7479_p11 = pneg %p7478_p10 }
 0xabf   : > { %7874 = dma.done.wait (%p7479_p11), %s6818_s24, 4096  }
 0xac0   : > { %7876 = vsyncadd (%p7479_p11), %s6818_s24, 4294963200  ;;  %p24_p12 = scmp.ge.s32.totalorder %s7995_s14, 4   ;;  %s15019_s25 = smov %s7883_s26 }
 0xac1   : > { %s15020_s26 = smov %s7887_s27  ;;  %s15021_s27 = smov %s8006_s17 }
 0xac2   : > { %s15022_s28 = smov %s7995_s14  ;;  %26 = sbr.rel (!%p24_p12) target bundleno = 9 (0x9), region = 135 }
 0xac7   :  { %6824 = vsyncpa [#allocation4], 1 }
 0xac8   :  { %6826 = vsyncpa [#allocation4 + $0x1], 1 }
 0xac9   :  { %6827 = vsyncpa [#allocation5], 1 }
 0xaca   :  { %6829 = vsyncpa [#allocation5 + $0x1], 1 }

</bundles_post_ra>
